<compile_context>
chip_gen: v7x
topology: tpu7x:2x2x1
jax: 0.10.0
libtpu: 0.0.40
codegen_flags: <defaults>
</compile_context>

<pallas_src>
import functools
import math

import jax
import jax.numpy as jnp
from jax.experimental import pallas as pl
from jax.experimental.pallas import tpu as pltpu

NUM_PLANES_BLOCK = [[64, 64], [64, 64], [64, 128], [128, 128],
                    [128, 256], [256, 256], [256, 512], [512, 512]]
STRIDE_BLOCK = [1, 1, 2, 1, 2, 1, 2, 1]
BN_EPS = 1e-5


def _round_up(x, m):
    return ((x + m - 1) // m) * m


def _m_tiling(M):
    """Pad M (rows) and pick tm so that nm >= 2 whenever Mp >= 32 (v7x)."""
    Mp = _round_up(max(M, 16), 16)
    if Mp <= 16:
        return Mp, Mp
    cap = min(256, Mp // 2)
    tm = (cap // 8) * 8
    while Mp % tm:
        tm -= 8
    return Mp, tm


def _tk_for(Kp):
    """K tile: 256 feeds the 256-wide MXU; fall back to 128 when not aligned."""
    return 256 if Kp % 256 == 0 else 128


# --------------------------- Pallas kernels ---------------------------------

def _matmul_bn_kernel(a_ref, w_ref, scale_ref, bias_ref, o_ref, acc_ref, *,
                      relu):
    """out = maybe_relu((A @ W) * scale + bias); grid (M, K); bf16 out."""
    k = pl.program_id(1)

    @pl.when(k == 0)
    def _():
        acc_ref[...] = jnp.zeros_like(acc_ref)

    acc_ref[...] += jnp.dot(a_ref[...], w_ref[...],
                            preferred_element_type=jnp.float32)

    @pl.when(k == pl.num_programs(1) - 1)
    def _():
        out = acc_ref[...] * scale_ref[...] + bias_ref[...]
        if relu:
            out = jnp.maximum(out, 0.0)
        o_ref[...] = out.astype(o_ref.dtype)


@functools.lru_cache(maxsize=None)
def _build_matmul(Mp, tm, Kp, tk, Cp, relu):
    nm, nk = Mp // tm, Kp // tk
    kernel = functools.partial(_matmul_bn_kernel, relu=relu)
    return pl.pallas_call(
        kernel,
        out_shape=jax.ShapeDtypeStruct((Mp, Cp), jnp.bfloat16),
        grid_spec=pltpu.PrefetchScalarGridSpec(
            num_scalar_prefetch=0,
            grid=(nm, nk),
            in_specs=[
                pl.BlockSpec((tm, tk), lambda m, k: (m, k)),   # A (bf16)
                pl.BlockSpec((tk, Cp), lambda m, k: (k, 0)),   # W (bf16)
                pl.BlockSpec((1, Cp), lambda m, k: (0, 0)),    # folded BN scale
                pl.BlockSpec((1, Cp), lambda m, k: (0, 0)),    # folded BN bias
            ],
            out_specs=pl.BlockSpec((tm, Cp), lambda m, k: (m, 0)),
            scratch_shapes=[pltpu.VMEM((tm, Cp), jnp.float32)],
        ),
        compiler_params=pltpu.CompilerParams(
            dimension_semantics=("parallel", "arbitrary")),
    )


def fused_matmul(a_bf16, w_p, s_p, b_p, relu):
    """A:(M,Kp) bf16 (K already padded), W:(Kp,Cp) bf16 -> (Mp,Cp) bf16."""
    M, Kp = a_bf16.shape
    _, Cp = w_p.shape
    tk = _tk_for(Kp)
    Mp, tm = _m_tiling(M)
    if Mp != M:
        a_bf16 = jnp.pad(a_bf16, ((0, Mp - M), (0, 0)))
    return _build_matmul(Mp, tm, Kp, tk, Cp, bool(relu))(a_bf16, w_p, s_p, b_p)


def _moe_gemm_kernel(emap_ref, cnt_ref, a_ref, w_ref, g_ref, scale_ref,
                     bias_ref, res_ref, o_ref, acc_ref):
    """out = relu(bn2(sum_e gate_e * (A @ W_e)) + residual).

    Grid (M, K, E) with experts innermost; inactive experts (e >= cnt[m]) are
    skipped (their weight block index repeats the previous one -> DMA elided).
    """
    m = pl.program_id(0)
    k = pl.program_id(1)
    e = pl.program_id(2)
    nk = pl.num_programs(1)
    ne = pl.num_programs(2)

    @pl.when(jnp.logical_and(k == 0, e == 0))
    def _():
        acc_ref[...] = jnp.zeros_like(acc_ref)

    @pl.when(e < cnt_ref[m])
    def _():
        acc_ref[...] += g_ref[0] * jnp.dot(a_ref[...], w_ref[0],
                                           preferred_element_type=jnp.float32)

    @pl.when(jnp.logical_and(k == nk - 1, e == ne - 1))
    def _():
        out = (acc_ref[...] * scale_ref[...] + bias_ref[...]
               + res_ref[...].astype(jnp.float32))
        o_ref[...] = jnp.maximum(out, 0.0).astype(o_ref.dtype)


@functools.lru_cache(maxsize=None)
def _build_moe_gemm(E, Mp, tm, Kp, tk, Cp):
    nm, nk = Mp // tm, Kp // tk

    def a_map(m, k, e, emap, cnt):
        return (m, k)

    def w_map(m, k, e, emap, cnt):
        return (emap[m * E + e], k, 0)

    def g_map(m, k, e, emap, cnt):
        return (emap[m * E + e], m, 0)

    def bcast_map(m, k, e, emap, cnt):
        return (0, 0)

    def row_map(m, k, e, emap, cnt):
        return (m, 0)

    return pl.pallas_call(
        _moe_gemm_kernel,
        out_shape=jax.ShapeDtypeStruct((Mp, Cp), jnp.bfloat16),
        grid_spec=pltpu.PrefetchScalarGridSpec(
            num_scalar_prefetch=2,                 # emap (nm*E,), cnt (nm,)
            grid=(nm, nk, E),
            in_specs=[
                pl.BlockSpec((tm, tk), a_map),        # patches (bf16)
                pl.BlockSpec((1, tk, Cp), w_map),     # expert weight (bf16)
                pl.BlockSpec((1, tm, 1), g_map),      # per-row gate (f32)
                pl.BlockSpec((1, Cp), bcast_map),     # bn2 scale
                pl.BlockSpec((1, Cp), bcast_map),     # bn2 bias
                pl.BlockSpec((tm, Cp), row_map),      # residual (bf16)
            ],
            out_specs=pl.BlockSpec((tm, Cp), row_map),
            scratch_shapes=[pltpu.VMEM((tm, Cp), jnp.float32)],
        ),
        compiler_params=pltpu.CompilerParams(
            dimension_semantics=("parallel", "arbitrary", "arbitrary")),
    )


def moe_expert_gemm(patches, w_stack, expert_weights, scale_p, bias_p,
                    residual, ho_wo):
    """patches:(M,Kp) bf16, w_stack:(E,Kp,Cp) bf16, residual:(M,Cp) bf16."""
    M, Kp = patches.shape
    E, _, Cp = w_stack.shape
    tk = _tk_for(Kp)
    Mp, tm = _m_tiling(M)
    nm = Mp // tm
    if Mp != M:
        patches = jnp.pad(patches, ((0, Mp - M), (0, 0)))
        residual = jnp.pad(residual, ((0, Mp - M), (0, 0)))

    # Per-row gates (E, Mp, 1).
    g_rows = jnp.repeat(expert_weights, ho_wo, axis=0)          # (M, E)
    if Mp != M:
        g_rows = jnp.pad(g_rows, ((0, Mp - M), (0, 0)))
    gates = jnp.transpose(g_rows)[:, :, None].astype(jnp.float32)

    # Per-(m-tile, expert) schedule: active experts first, inactive slots
    # repeat the last active index (=> weight DMA elided) and are skipped.
    tile_max = g_rows.reshape(nm, tm, E).max(axis=1)            # (nm, E)
    active = tile_max > 0.0
    cnt = jnp.maximum(jnp.sum(active, axis=1), 1).astype(jnp.int32)
    order = jnp.argsort(jnp.logical_not(active).astype(jnp.int32),
                        axis=1).astype(jnp.int32)               # actives first
    last = jnp.take_along_axis(order, (cnt - 1)[:, None], axis=1)
    slot = jnp.arange(E, dtype=jnp.int32)[None, :]
    emap = jnp.where(slot < cnt[:, None], order, last)
    emap = emap.reshape(-1).astype(jnp.int32)                    # (nm*E,)

    return _build_moe_gemm(E, Mp, tm, Kp, tk, Cp)(
        emap, cnt, patches, w_stack, gates, scale_p, bias_p, residual)


# --------------------------- JAX glue ----------------------------------------

def _im2col(x, kh, kw, stride, padding):
    """x: (N,H,W,C) bf16 -> (N*Ho*Wo, KH*KW*C) bf16, column order (kh, kw, c).

    Activations are already channel-padded + bf16, so patches materialize
    exactly once in final layout (K = kh*kw*Cp is a multiple of 128).
    """
    # TODO(synk): replace with implicit-GEMM (shifted-window BlockSpec reads)
    # to avoid the 9x HBM expansion of 3x3 activations.
    n, h, w, c = x.shape
    if padding:
        x = jnp.pad(x, ((0, 0), (padding, padding), (padding, padding), (0, 0)))
    ho = (h + 2 * padding - kh) // stride + 1
    wo = (w + 2 * padding - kw) // stride + 1
    if kh == 1 and kw == 1:
        patches = x[:, ::stride, ::stride, :][:, :ho, :wo, :]
        return patches.reshape(n * ho * wo, c), (n, ho, wo)
    cols = []
    for i in range(kh):
        for j in range(kw):
            cols.append(x[:, i:i + stride * ho:stride,
                          j:j + stride * wo:stride, :])
    patches = jnp.concatenate(cols, axis=-1).reshape(n * ho * wo, kh * kw * c)
    return patches, (n, ho, wo)


def _fold_bn(bn):
    scale = bn['gamma'] / jnp.sqrt(bn['var'] + BN_EPS)
    bias = bn['beta'] - bn['mean'] * scale
    return scale, bias


def conv_bn_act(x, cp, kh, kw, stride, padding, relu):
    """x bf16 NHWC (channel-padded, or raw 3-channel stem input)."""
    patches, (n, ho, wo) = _im2col(x, kh, kw, stride, padding)
    M, K = patches.shape
    Kp = cp['w'].shape[0]
    if K != Kp:                                   # only the 3-channel stem
        patches = jnp.pad(patches, ((0, 0), (0, Kp - K)))
    out = fused_matmul(patches, cp['w'], cp['scale'], cp['bias'], relu)
    Cp = out.shape[-1]
    return out[:M].reshape(n, ho, wo, Cp)


def moe_block(bp, x, stride, num_experts, top_k):
    # Router: linear on globally averaged block input, softmax over top-k.
    gap = jnp.mean(x.astype(jnp.float32), axis=(1, 2))           # (N, Cp_in)
    logits = gap @ bp['gate_w'] + bp['gate_b']                   # (N, E)
    vals, idx = jax.lax.top_k(logits, top_k)
    sm = jax.nn.softmax(vals, axis=-1)
    expert_weights = jnp.sum(
        jax.nn.one_hot(idx, num_experts, dtype=jnp.float32) * sm[..., None],
        axis=1)                                                  # (N, E)

    # Residual branch (optional 1x1 conv + BN downsample); stays bf16/padded.
    if 'down' in bp:
        identity = conv_bn_act(x, bp['down'], 1, 1, stride, 0, relu=False)
    else:
        identity = x

    # conv1 -> bn1 -> relu (fused GEMM, bf16 padded output).
    hmid = conv_bn_act(x, bp['conv1'], 3, 3, stride, 1, relu=True)
    no, ho, wo, cp_out = hmid.shape
    M = no * ho * wo

    # Expert 3x3 convs + gated combine + bn2 + residual + relu, one kernel.
    patches, _ = _im2col(hmid, 3, 3, 1, 1)
    out = moe_expert_gemm(patches, bp['experts_w'], expert_weights,
                          bp['bn2_scale'], bp['bn2_bias'],
                          identity.reshape(M, cp_out), ho * wo)
    return out[:M].reshape(no, ho, wo, cp_out), expert_weights


def forward(prep, x_nchw, num_experts, top_k):
    x = jnp.transpose(x_nchw, (0, 2, 3, 1)).astype(jnp.bfloat16)  # NCHW->NHWC
    x = conv_bn_act(x, prep['stem'], 3, 3, 1, 1, relu=True)
    for bp, s in zip(prep['blocks'], STRIDE_BLOCK):
        x, _expert_w = moe_block(bp, x, s, num_experts, top_k)
    feature = jnp.mean(x.astype(jnp.float32), axis=(1, 2))  # avgpool + flatten
    return feature @ prep['fc_w'] + prep['fc_b']             # tiny FC: XLA dot


# --------------------------- Parameter init / prepare ------------------------

def _kaiming_conv(key, kh, kw, cin, cout):
    fan_out = cout * kh * kw
    std = math.sqrt(2.0 / fan_out)
    return std * jax.random.normal(key, (kh, kw, cin, cout), jnp.float32)


def _bn_params(c):
    return dict(gamma=jnp.ones((c,), jnp.float32),
                beta=jnp.zeros((c,), jnp.float32),
                mean=jnp.zeros((c,), jnp.float32),
                var=jnp.ones((c,), jnp.float32))


def _linear_params(key, cin, cout):
    kw_, kb_ = jax.random.split(key)
    bound = 1.0 / math.sqrt(cin)
    w = jax.random.uniform(kw_, (cin, cout), jnp.float32, -bound, bound)
    b = jax.random.uniform(kb_, (cout,), jnp.float32, -bound, bound)
    return w, b


def init_params(key, num_experts, n_classes=10):
    keys = iter(jax.random.split(key, 512))
    params = dict(conv1=_kaiming_conv(next(keys), 3, 3, 3, 64),
                  bn1=_bn_params(64))
    blocks = []
    for (pin, pout), s in zip(NUM_PLANES_BLOCK, STRIDE_BLOCK):
        blk = dict(
            conv1=_kaiming_conv(next(keys), 3, 3, pin, pout),
            bn1=_bn_params(pout),
            experts=[_kaiming_conv(next(keys), 3, 3, pout, pout)
                     for _ in range(num_experts)],
            bn2=_bn_params(pout),
        )
        blk['gate_w'], blk['gate_b'] = _linear_params(next(keys), pin,
                                                      num_experts)
        if s != 1 or pin != pout:
            blk['down_conv'] = _kaiming_conv(next(keys), 1, 1, pin, pout)
            blk['down_bn'] = _bn_params(pout)
        blocks.append(blk)
    params['blocks'] = blocks
    params['fc_w'], params['fc_b'] = _linear_params(next(keys), 512, n_classes)
    return params


def _prep_conv(w_hwio, bn, pad_cin_to=None):
    """Fold BN, lay out weight as (Kp,Cp) bf16 matching padded-channel patches.

    Padded output channels get scale=bias=0 so they stay exactly zero, keeping
    the padded-activation invariant through the whole network.
    """
    kh, kw, cin, cout = w_hwio.shape
    cp_out = _round_up(cout, 128)
    if pad_cin_to is None:                       # stem: K padded at the tail
        K = kh * kw * cin
        Kp = _round_up(K, 128)
        w_p = jnp.zeros((Kp, cp_out), jnp.float32).at[:K, :cout].set(
            w_hwio.reshape(K, cout))
    else:                                        # embed channels -> (kh,kw,Cp_in)
        cp_in = pad_cin_to
        w_emb = jnp.zeros((kh, kw, cp_in, cout), jnp.float32)
        w_emb = w_emb.at[:, :, :cin, :].set(w_hwio)
        Kp = kh * kw * cp_in
        w_p = jnp.zeros((Kp, cp_out), jnp.float32).at[:, :cout].set(
            w_emb.reshape(Kp, cout))
    if bn is None:
        scale = jnp.ones((cout,), jnp.float32)
        bias = jnp.zeros((cout,), jnp.float32)
    else:
        scale, bias = _fold_bn(bn)
    s_p = jnp.zeros((1, cp_out), jnp.float32).at[0, :cout].set(scale)
    b_p = jnp.zeros((1, cp_out), jnp.float32).at[0, :cout].set(bias)
    return dict(w=w_p.astype(jnp.bfloat16), scale=s_p, bias=b_p)


def prepare_params(params, num_experts):
    """One-time (outside jit) weight padding / BN folding / bf16 cast."""
    prep = dict(stem=_prep_conv(params['conv1'], params['bn1']), blocks=[])
    for blk, (pin, pout) in zip(params['blocks'], NUM_PLANES_BLOCK):
        cp_in = _round_up(pin, 128)
        cp_out = _round_up(pout, 128)
        pb = dict(conv1=_prep_conv(blk['conv1'], blk['bn1'], pad_cin_to=cp_in))
        pb['experts_w'] = jnp.stack(
            [_prep_conv(we, None, pad_cin_to=cp_out)['w']
             for we in blk['experts']], axis=0)                 # (E, Kp, Cp)
        s2, b2 = _fold_bn(blk['bn2'])
        pb['bn2_scale'] = jnp.zeros((1, cp_out), jnp.float32).at[0, :pout].set(s2)
        pb['bn2_bias'] = jnp.zeros((1, cp_out), jnp.float32).at[0, :pout].set(b2)
        pb['gate_w'] = jnp.zeros((cp_in, num_experts),
                                 jnp.float32).at[:pin, :].set(blk['gate_w'])
        pb['gate_b'] = blk['gate_b']
        if 'down_conv' in blk:
            pb['down'] = _prep_conv(blk['down_conv'], blk['down_bn'],
                                    pad_cin_to=cp_in)
        prep['blocks'].append(pb)
    prep['fc_w'] = params['fc_w']
    prep['fc_b'] = params['fc_b']
    return prep


# --------------------------- Main --------------------------------------------

if __name__ == "__main__":
    num_experts, top_k, n_classes = 4, 2, 10
    key = jax.random.PRNGKey(0)
    pkey, xkey = jax.random.split(key)
    params = init_params(pkey, num_experts, n_classes)
    prep = prepare_params(params, num_experts)
    x = jax.random.normal(xkey, (2, 3, 16, 16), jnp.float32)   # NCHW like torch

    fwd = jax.jit(functools.partial(forward, num_experts=num_experts,
                                    top_k=top_k))
    out = fwd(prep, x)
    out = jax.block_until_ready(out)

    assert out.shape == (2, n_classes), out.shape
    assert bool(jnp.all(jnp.isfinite(out)))
    print("KERNEL_OK")
</pallas_src>

<mosaic_0001>
module attributes {stable_mosaic.version = 11 : i64} {
  func.func @_matmul_bn_kernel(%arg0: i32, %arg1: i32, %arg2: memref<256x128xbf16, #tpu.memory_space<vmem>>, %arg3: memref<128x128xbf16, #tpu.memory_space<vmem>>, %arg4: memref<1x128xf32, #tpu.memory_space<vmem>>, %arg5: memref<1x128xf32, #tpu.memory_space<vmem>>, %arg6: memref<256x128xbf16, #tpu.memory_space<vmem>>, %arg7: memref<256x128xf32, #tpu.memory_space<vmem>>) attributes {dimension_semantics = [#tpu.dimension_semantics<parallel>, #tpu.dimension_semantics<arbitrary>], iteration_bounds = array<i64: 2, 1>, scalar_prefetch = 0 : i64, scratch_operands = 1 : i64, tpu.core_type = #tpu.core_type<tc>, window_params = [{transform_indices = @transform_0, window_bounds = array<i64: 256, 128>}, {transform_indices = @transform_1, window_bounds = array<i64: 128, 128>}, {pipeline_mode = #tpu.pipeline_mode<synchronous>, transform_indices = @transform_2, window_bounds = array<i64: 1, 128>}, {pipeline_mode = #tpu.pipeline_mode<synchronous>, transform_indices = @transform_3, window_bounds = array<i64: 1, 128>}, {transform_indices = @transform_4, window_bounds = array<i64: 256, 128>}]} {
    %c0_i32 = arith.constant 0 : i32
    %0 = arith.cmpi eq, %arg1, %c0_i32 : i32
    %1 = arith.extui %0 : i1 to i32
    %c0_i32_0 = arith.constant 0 : i32
    %2 = arith.cmpi ne, %1, %c0_i32_0 : i32
    scf.if %2 {
      %cst_10 = arith.constant 0.000000e+00 : f32
      %12 = vector.broadcast %cst_10 : f32 to vector<256x128xf32>
      %c0_11 = arith.constant 0 : index
      %c0_12 = arith.constant 0 : index
      %13 = vector.load %arg7[%c0_11, %c0_12] : memref<256x128xf32, #tpu.memory_space<vmem>>, vector<256x128xf32>
      tpu.vector_store %arg7[%c0_11, %c0_12], %12 {strides = array<i32>} : memref<256x128xf32, #tpu.memory_space<vmem>>, vector<256x128xf32>,
    } else {
    }
    %c0 = arith.constant 0 : index
    %c0_1 = arith.constant 0 : index
    %3 = vector.load %arg7[%c0, %c0_1] : memref<256x128xf32, #tpu.memory_space<vmem>>, vector<256x128xf32>
    %c0_2 = arith.constant 0 : index
    %c0_3 = arith.constant 0 : index
    %4 = vector.load %arg2[%c0_2, %c0_3] : memref<256x128xbf16, #tpu.memory_space<vmem>>, vector<256x128xbf16>
    %c0_4 = arith.constant 0 : index
    %c0_5 = arith.constant 0 : index
    %5 = vector.load %arg3[%c0_4, %c0_5] : memref<128x128xbf16, #tpu.memory_space<vmem>>, vector<128x128xbf16>
    %cst = arith.constant dense<0.000000e+00> : vector<256x128xf32>
    %6 = tpu.matmul %4, %5, %cst {dimension_numbers = #tpu.dot_dimension_numbers<[1], [0], [0], [1], [0, 0, 1, 1], [], []>} : vector<256x128xbf16>, vector<128x128xbf16>, vector<256x128xf32> -> vector<256x128xf32>
    %7 = arith.addf %3, %6 : vector<256x128xf32>
    %c0_6 = arith.constant 0 : index
    %c0_7 = arith.constant 0 : index
    %8 = vector.load %arg7[%c0_6, %c0_7] : memref<256x128xf32, #tpu.memory_space<vmem>>, vector<256x128xf32>
    tpu.vector_store %arg7[%c0_6, %c0_7], %7 {strides = array<i32>} : memref<256x128xf32, #tpu.memory_space<vmem>>, vector<256x128xf32>,
    %c0_i32_8 = arith.constant 0 : i32
    %9 = arith.cmpi eq, %arg1, %c0_i32_8 : i32
    %10 = arith.extui %9 : i1 to i32
    %c0_i32_9 = arith.constant 0 : i32
    %11 = arith.cmpi ne, %10, %c0_i32_9 : i32
    scf.if %11 {
      %c0_10 = arith.constant 0 : index
      %c0_11 = arith.constant 0 : index
      %12 = vector.load %arg7[%c0_10, %c0_11] : memref<256x128xf32, #tpu.memory_space<vmem>>, vector<256x128xf32>
      %c0_12 = arith.constant 0 : index
      %c0_13 = arith.constant 0 : index
      %13 = vector.load %arg4[%c0_12, %c0_13] : memref<1x128xf32, #tpu.memory_space<vmem>>, vector<1x128xf32>
      %14 = vector.broadcast %13 : vector<1x128xf32> to vector<256x128xf32>
      %15 = arith.mulf %12, %14 : vector<256x128xf32>
      %c0_14 = arith.constant 0 : index
      %c0_15 = arith.constant 0 : index
      %16 = vector.load %arg5[%c0_14, %c0_15] : memref<1x128xf32, #tpu.memory_space<vmem>>, vector<1x128xf32>
      %17 = vector.broadcast %16 : vector<1x128xf32> to vector<256x128xf32>
      %18 = arith.addf %15, %17 : vector<256x128xf32>
      %cst_16 = arith.constant 0.000000e+00 : f32
      %19 = vector.broadcast %cst_16 : f32 to vector<256x128xf32>
      %20 = arith.maximumf %18, %19 : vector<256x128xf32>
      %21 = arith.truncf %20 : vector<256x128xf32> to vector<256x128xbf16>
      %c0_17 = arith.constant 0 : index
      %c0_18 = arith.constant 0 : index
      %22 = vector.load %arg6[%c0_17, %c0_18] : memref<256x128xbf16, #tpu.memory_space<vmem>>, vector<256x128xbf16>
      tpu.vector_store %arg6[%c0_17, %c0_18], %21 {strides = array<i32>} : memref<256x128xbf16, #tpu.memory_space<vmem>>, vector<256x128xbf16>,
    } else {
    }
    return
  }
  func.func @transform_0(%arg0: i32, %arg1: i32) -> (i32, i32) {
    %c0_i32 = arith.constant 0 : i32
    return %arg0, %arg1 : i32, i32
  }
  func.func @transform_1(%arg0: i32, %arg1: i32) -> (i32, i32) {
    %c0_i32 = arith.constant 0 : i32
    %c0_i32_0 = arith.constant 0 : i32
    return %arg1, %c0_i32 : i32, i32
  }
  func.func @transform_2(%arg0: i32, %arg1: i32) -> (i32, i32) {
    %c0_i32 = arith.constant 0 : i32
    %c0_i32_0 = arith.constant 0 : i32
    %c0_i32_1 = arith.constant 0 : i32
    return %c0_i32, %c0_i32_0 : i32, i32
  }
  func.func @transform_3(%arg0: i32, %arg1: i32) -> (i32, i32) {
    %c0_i32 = arith.constant 0 : i32
    %c0_i32_0 = arith.constant 0 : i32
    %c0_i32_1 = arith.constant 0 : i32
    return %c0_i32, %c0_i32_0 : i32, i32
  }
  func.func @transform_4(%arg0: i32, %arg1: i32) -> (i32, i32) {
    %c0_i32 = arith.constant 0 : i32
    %c0_i32_0 = arith.constant 0 : i32
    return %arg0, %c0_i32 : i32, i32
  }
}

module attributes {stable_mosaic.version = 11 : i64} {
  func.func @_matmul_bn_kernel(%arg0: i32, %arg1: i32, %arg2: memref<256x128xbf16, #tpu.memory_space<vmem>>, %arg3: memref<128x128xbf16, #tpu.memory_space<vmem>>, %arg4: memref<1x128xf32, #tpu.memory_space<vmem>>, %arg5: memref<1x128xf32, #tpu.memory_space<vmem>>, %arg6: memref<256x128xbf16, #tpu.memory_space<vmem>>, %arg7: memref<256x128xf32, #tpu.memory_space<vmem>>) attributes {dimension_semantics = [#tpu.dimension_semantics<parallel>, #tpu.dimension_semantics<arbitrary>], iteration_bounds = array<i64: 2, 9>, scalar_prefetch = 0 : i64, scratch_operands = 1 : i64, tpu.core_type = #tpu.core_type<tc>, window_params = [{transform_indices = @transform_0, window_bounds = array<i64: 256, 128>}, {transform_indices = @transform_1, window_bounds = array<i64: 128, 128>}, {pipeline_mode = #tpu.pipeline_mode<synchronous>, transform_indices = @transform_2, window_bounds = array<i64: 1, 128>}, {pipeline_mode = #tpu.pipeline_mode<synchronous>, transform_indices = @transform_3, window_bounds = array<i64: 1, 128>}, {transform_indices = @transform_4, window_bounds = array<i64: 256, 128>}]} {
    %c0_i32 = arith.constant 0 : i32
    %0 = arith.cmpi eq, %arg1, %c0_i32 : i32
    %1 = arith.extui %0 : i1 to i32
    %c0_i32_0 = arith.constant 0 : i32
    %2 = arith.cmpi ne, %1, %c0_i32_0 : i32
    scf.if %2 {
      %cst_9 = arith.constant 0.000000e+00 : f32
      %12 = vector.broadcast %cst_9 : f32 to vector<256x128xf32>
      %c0_10 = arith.constant 0 : index
      %c0_11 = arith.constant 0 : index
      %13 = vector.load %arg7[%c0_10, %c0_11] : memref<256x128xf32, #tpu.memory_space<vmem>>, vector<256x128xf32>
      tpu.vector_store %arg7[%c0_10, %c0_11], %12 {strides = array<i32>} : memref<256x128xf32, #tpu.memory_space<vmem>>, vector<256x128xf32>,
    } else {
    }
    %c0 = arith.constant 0 : index
    %c0_1 = arith.constant 0 : index
    %3 = vector.load %arg7[%c0, %c0_1] : memref<256x128xf32, #tpu.memory_space<vmem>>, vector<256x128xf32>
    %c0_2 = arith.constant 0 : index
    %c0_3 = arith.constant 0 : index
    %4 = vector.load %arg2[%c0_2, %c0_3] : memref<256x128xbf16, #tpu.memory_space<vmem>>, vector<256x128xbf16>
    %c0_4 = arith.constant 0 : index
    %c0_5 = arith.constant 0 : index
    %5 = vector.load %arg3[%c0_4, %c0_5] : memref<128x128xbf16, #tpu.memory_space<vmem>>, vector<128x128xbf16>
    %cst = arith.constant dense<0.000000e+00> : vector<256x128xf32>
    %6 = tpu.matmul %4, %5, %cst {dimension_numbers = #tpu.dot_dimension_numbers<[1], [0], [0], [1], [0, 0, 1, 1], [], []>} : vector<256x128xbf16>, vector<128x128xbf16>, vector<256x128xf32> -> vector<256x128xf32>
    %7 = arith.addf %3, %6 : vector<256x128xf32>
    %c0_6 = arith.constant 0 : index
    %c0_7 = arith.constant 0 : index
    %8 = vector.load %arg7[%c0_6, %c0_7] : memref<256x128xf32, #tpu.memory_space<vmem>>, vector<256x128xf32>
    tpu.vector_store %arg7[%c0_6, %c0_7], %7 {strides = array<i32>} : memref<256x128xf32, #tpu.memory_space<vmem>>, vector<256x128xf32>,
    %c8_i32 = arith.constant 8 : i32
    %9 = arith.cmpi eq, %arg1, %c8_i32 : i32
    %10 = arith.extui %9 : i1 to i32
    %c0_i32_8 = arith.constant 0 : i32
    %11 = arith.cmpi ne, %10, %c0_i32_8 : i32
    scf.if %11 {
      %c0_9 = arith.constant 0 : index
      %c0_10 = arith.constant 0 : index
      %12 = vector.load %arg7[%c0_9, %c0_10] : memref<256x128xf32, #tpu.memory_space<vmem>>, vector<256x128xf32>
      %c0_11 = arith.constant 0 : index
      %c0_12 = arith.constant 0 : index
      %13 = vector.load %arg4[%c0_11, %c0_12] : memref<1x128xf32, #tpu.memory_space<vmem>>, vector<1x128xf32>
      %14 = vector.broadcast %13 : vector<1x128xf32> to vector<256x128xf32>
      %15 = arith.mulf %12, %14 : vector<256x128xf32>
      %c0_13 = arith.constant 0 : index
      %c0_14 = arith.constant 0 : index
      %16 = vector.load %arg5[%c0_13, %c0_14] : memref<1x128xf32, #tpu.memory_space<vmem>>, vector<1x128xf32>
      %17 = vector.broadcast %16 : vector<1x128xf32> to vector<256x128xf32>
      %18 = arith.addf %15, %17 : vector<256x128xf32>
      %cst_15 = arith.constant 0.000000e+00 : f32
      %19 = vector.broadcast %cst_15 : f32 to vector<256x128xf32>
      %20 = arith.maximumf %18, %19 : vector<256x128xf32>
      %21 = arith.truncf %20 : vector<256x128xf32> to vector<256x128xbf16>
      %c0_16 = arith.constant 0 : index
      %c0_17 = arith.constant 0 : index
      %22 = vector.load %arg6[%c0_16, %c0_17] : memref<256x128xbf16, #tpu.memory_space<vmem>>, vector<256x128xbf16>
      tpu.vector_store %arg6[%c0_16, %c0_17], %21 {strides = array<i32>} : memref<256x128xbf16, #tpu.memory_space<vmem>>, vector<256x128xbf16>,
    } else {
    }
    return
  }
  func.func @transform_0(%arg0: i32, %arg1: i32) -> (i32, i32) {
    %c0_i32 = arith.constant 0 : i32
    return %arg0, %arg1 : i32, i32
  }
  func.func @transform_1(%arg0: i32, %arg1: i32) -> (i32, i32) {
    %c0_i32 = arith.constant 0 : i32
    %c0_i32_0 = arith.constant 0 : i32
    return %arg1, %c0_i32 : i32, i32
  }
  func.func @transform_2(%arg0: i32, %arg1: i32) -> (i32, i32) {
    %c0_i32 = arith.constant 0 : i32
    %c0_i32_0 = arith.constant 0 : i32
    %c0_i32_1 = arith.constant 0 : i32
    return %c0_i32, %c0_i32_0 : i32, i32
  }
  func.func @transform_3(%arg0: i32, %arg1: i32) -> (i32, i32) {
    %c0_i32 = arith.constant 0 : i32
    %c0_i32_0 = arith.constant 0 : i32
    %c0_i32_1 = arith.constant 0 : i32
    return %c0_i32, %c0_i32_0 : i32, i32
  }
  func.func @transform_4(%arg0: i32, %arg1: i32) -> (i32, i32) {
    %c0_i32 = arith.constant 0 : i32
    %c0_i32_0 = arith.constant 0 : i32
    return %arg0, %c0_i32 : i32, i32
  }
}

module attributes {stable_mosaic.version = 11 : i64} {
  func.func @_moe_gemm_kernel(%arg0: i32, %arg1: i32, %arg2: i32, %arg3: memref<8xi32, #tpu.memory_space<smem>>, %arg4: memref<2xi32, #tpu.memory_space<smem>>, %arg5: memref<256x128xbf16, #tpu.memory_space<vmem>>, %arg6: memref<1x128x128xbf16, #tpu.memory_space<vmem>>, %arg7: memref<1x256x1xf32, #tpu.memory_space<vmem>>, %arg8: memref<1x128xf32, #tpu.memory_space<vmem>>, %arg9: memref<1x128xf32, #tpu.memory_space<vmem>>, %arg10: memref<256x128xbf16, #tpu.memory_space<vmem>>, %arg11: memref<256x128xbf16, #tpu.memory_space<vmem>>, %arg12: memref<256x128xf32, #tpu.memory_space<vmem>>) attributes {dimension_semantics = [#tpu.dimension_semantics<parallel>, #tpu.dimension_semantics<arbitrary>, #tpu.dimension_semantics<arbitrary>], iteration_bounds = array<i64: 2, 9, 4>, scalar_prefetch = 2 : i64, scratch_operands = 1 : i64, tpu.core_type = #tpu.core_type<tc>, window_params = [{transform_indices = @transform_0, window_bounds = array<i64: 256, 128>}, {transform_indices = @transform_1, window_bounds = array<i64: 1, 128, 128>}, {transform_indices = @transform_2, window_bounds = array<i64: 1, 256, 1>}, {pipeline_mode = #tpu.pipeline_mode<synchronous>, transform_indices = @transform_3, window_bounds = array<i64: 1, 128>}, {pipeline_mode = #tpu.pipeline_mode<synchronous>, transform_indices = @transform_4, window_bounds = array<i64: 1, 128>}, {transform_indices = @transform_5, window_bounds = array<i64: 256, 128>}, {transform_indices = @transform_6, window_bounds = array<i64: 256, 128>}]} {
    %c0_i32 = arith.constant 0 : i32
    %0 = arith.cmpi eq, %arg1, %c0_i32 : i32
    %c0_i32_0 = arith.constant 0 : i32
    %1 = arith.cmpi eq, %arg2, %c0_i32_0 : i32
    %2 = arith.andi %0, %1 : i1
    %3 = arith.extui %2 : i1 to i32
    %c0_i32_1 = arith.constant 0 : i32
    %4 = arith.cmpi ne, %3, %c0_i32_1 : i32
    scf.if %4 {
      %cst = arith.constant 0.000000e+00 : f32
      %15 = vector.broadcast %cst : f32 to vector<256x128xf32>
      %c0 = arith.constant 0 : index
      %c0_4 = arith.constant 0 : index
      %16 = vector.load %arg12[%c0, %c0_4] : memref<256x128xf32, #tpu.memory_space<vmem>>, vector<256x128xf32>
      tpu.vector_store %arg12[%c0, %c0_4], %15 {strides = array<i32>} : memref<256x128xf32, #tpu.memory_space<vmem>>, vector<256x128xf32>,
    } else {
    }
    %5 = arith.index_cast %arg0 : i32 to index
    %6 = memref.load %arg4[%5] : memref<2xi32, #tpu.memory_space<smem>>
    %7 = arith.cmpi slt, %arg2, %6 : i32
    %8 = arith.extui %7 : i1 to i32
    %c0_i32_2 = arith.constant 0 : i32
    %9 = arith.cmpi ne, %8, %c0_i32_2 : i32
    scf.if %9 {
      %c0 = arith.constant 0 : index
      %c0_4 = arith.constant 0 : index
      %15 = vector.load %arg12[%c0, %c0_4] : memref<256x128xf32, #tpu.memory_space<vmem>>, vector<256x128xf32>
      %c0_5 = arith.constant 0 : index
      %c0_6 = arith.constant 0 : index
      %c0_7 = arith.constant 0 : index
      %16 = vector.load %arg7[%c0_5, %c0_6, %c0_7] : memref<1x256x1xf32, #tpu.memory_space<vmem>>, vector<1x256x1xf32>
      %17 = vector.shape_cast %16 : vector<1x256x1xf32> to vector<256x1xf32>
      %c0_8 = arith.constant 0 : index
      %c0_9 = arith.constant 0 : index
      %18 = vector.load %arg5[%c0_8, %c0_9] : memref<256x128xbf16, #tpu.memory_space<vmem>>, vector<256x128xbf16>
      %c0_10 = arith.constant 0 : index
      %c0_11 = arith.constant 0 : index
      %c0_12 = arith.constant 0 : index
      %19 = vector.load %arg6[%c0_10, %c0_11, %c0_12] : memref<1x128x128xbf16, #tpu.memory_space<vmem>>, vector<1x128x128xbf16>
      %20 = vector.shape_cast %19 : vector<1x128x128xbf16> to vector<128x128xbf16>
      %cst = arith.constant dense<0.000000e+00> : vector<256x128xf32>
      %21 = tpu.matmul %18, %20, %cst {dimension_numbers = #tpu.dot_dimension_numbers<[1], [0], [0], [1], [0, 0, 1, 1], [], []>} : vector<256x128xbf16>, vector<128x128xbf16>, vector<256x128xf32> -> vector<256x128xf32>
      %22 = vector.broadcast %17 : vector<256x1xf32> to vector<256x128xf32>
      %23 = arith.mulf %22, %21 : vector<256x128xf32>
      %24 = arith.addf %15, %23 : vector<256x128xf32>
      %c0_13 = arith.constant 0 : index
      %c0_14 = arith.constant 0 : index
      %25 = vector.load %arg12[%c0_13, %c0_14] : memref<256x128xf32, #tpu.memory_space<vmem>>, vector<256x128xf32>
      tpu.vector_store %arg12[%c0_13, %c0_14], %24 {strides = array<i32>} : memref<256x128xf32, #tpu.memory_space<vmem>>, vector<256x128xf32>,
    } else {
    }
    %c8_i32 = arith.constant 8 : i32
    %10 = arith.cmpi eq, %arg1, %c8_i32 : i32
    %c3_i32 = arith.constant 3 : i32
    %11 = arith.cmpi eq, %arg2, %c3_i32 : i32
    %12 = arith.andi %10, %11 : i1
    %13 = arith.extui %12 : i1 to i32
    %c0_i32_3 = arith.constant 0 : i32
    %14 = arith.cmpi ne, %13, %c0_i32_3 : i32
    scf.if %14 {
      %c0 = arith.constant 0 : index
      %c0_4 = arith.constant 0 : index
      %15 = vector.load %arg12[%c0, %c0_4] : memref<256x128xf32, #tpu.memory_space<vmem>>, vector<256x128xf32>
      %c0_5 = arith.constant 0 : index
      %c0_6 = arith.constant 0 : index
      %16 = vector.load %arg8[%c0_5, %c0_6] : memref<1x128xf32, #tpu.memory_space<vmem>>, vector<1x128xf32>
      %17 = vector.broadcast %16 : vector<1x128xf32> to vector<256x128xf32>
      %18 = arith.mulf %15, %17 : vector<256x128xf32>
      %c0_7 = arith.constant 0 : index
      %c0_8 = arith.constant 0 : index
      %19 = vector.load %arg9[%c0_7, %c0_8] : memref<1x128xf32, #tpu.memory_space<vmem>>, vector<1x128xf32>
      %20 = vector.broadcast %19 : vector<1x128xf32> to vector<256x128xf32>
      %21 = arith.addf %18, %20 : vector<256x128xf32>
      %c0_9 = arith.constant 0 : index
      %c0_10 = arith.constant 0 : index
      %22 = vector.load %arg10[%c0_9, %c0_10] : memref<256x128xbf16, #tpu.memory_space<vmem>>, vector<256x128xbf16>
      %23 = arith.extf %22 : vector<256x128xbf16> to vector<256x128xf32>
      %24 = arith.addf %21, %23 : vector<256x128xf32>
      %cst = arith.constant 0.000000e+00 : f32
      %25 = vector.broadcast %cst : f32 to vector<256x128xf32>
      %26 = arith.maximumf %24, %25 : vector<256x128xf32>
      %27 = arith.truncf %26 : vector<256x128xf32> to vector<256x128xbf16>
      %c0_11 = arith.constant 0 : index
      %c0_12 = arith.constant 0 : index
      %28 = vector.load %arg11[%c0_11, %c0_12] : memref<256x128xbf16, #tpu.memory_space<vmem>>, vector<256x128xbf16>
      tpu.vector_store %arg11[%c0_11, %c0_12], %27 {strides = array<i32>} : memref<256x128xbf16, #tpu.memory_space<vmem>>, vector<256x128xbf16>,
    } else {
    }
    return
  }
  func.func @transform_0(%arg0: i32, %arg1: i32, %arg2: i32, %arg3: memref<8xi32, #tpu.memory_space<smem>>, %arg4: memref<2xi32, #tpu.memory_space<smem>>) -> (i32, i32) {
    %c0_i32 = arith.constant 0 : i32
    return %arg0, %arg1 : i32, i32
  }
  func.func @transform_1(%arg0: i32, %arg1: i32, %arg2: i32, %arg3: memref<8xi32, #tpu.memory_space<smem>>, %arg4: memref<2xi32, #tpu.memory_space<smem>>) -> (i32, i32, i32) {
    %c4_i32 = arith.constant 4 : i32
    %0 = arith.muli %arg0, %c4_i32 : i32
    %1 = arith.addi %0, %arg2 : i32
    %2 = arith.index_cast %1 : i32 to index
    %3 = memref.load %arg3[%2] : memref<8xi32, #tpu.memory_space<smem>>
    %c0_i32 = arith.constant 0 : i32
    %c0_i32_0 = arith.constant 0 : i32
    return %3, %arg1, %c0_i32 : i32, i32, i32
  }
  func.func @transform_2(%arg0: i32, %arg1: i32, %arg2: i32, %arg3: memref<8xi32, #tpu.memory_space<smem>>, %arg4: memref<2xi32, #tpu.memory_space<smem>>) -> (i32, i32, i32) {
    %c4_i32 = arith.constant 4 : i32
    %0 = arith.muli %arg0, %c4_i32 : i32
    %1 = arith.addi %0, %arg2 : i32
    %2 = arith.index_cast %1 : i32 to index
    %3 = memref.load %arg3[%2] : memref<8xi32, #tpu.memory_space<smem>>
    %c0_i32 = arith.constant 0 : i32
    %c0_i32_0 = arith.constant 0 : i32
    return %3, %arg0, %c0_i32 : i32, i32, i32
  }
  func.func @transform_3(%arg0: i32, %arg1: i32, %arg2: i32, %arg3: memref<8xi32, #tpu.memory_space<smem>>, %arg4: memref<2xi32, #tpu.memory_space<smem>>) -> (i32, i32) {
    %c0_i32 = arith.constant 0 : i32
    %c0_i32_0 = arith.constant 0 : i32
    %c0_i32_1 = arith.constant 0 : i32
    return %c0_i32, %c0_i32_0 : i32, i32
  }
  func.func @transform_4(%arg0: i32, %arg1: i32, %arg2: i32, %arg3: memref<8xi32, #tpu.memory_space<smem>>, %arg4: memref<2xi32, #tpu.memory_space<smem>>) -> (i32, i32) {
    %c0_i32 = arith.constant 0 : i32
    %c0_i32_0 = arith.constant 0 : i32
    %c0_i32_1 = arith.constant 0 : i32
    return %c0_i32, %c0_i32_0 : i32, i32
  }
  func.func @transform_5(%arg0: i32, %arg1: i32, %arg2: i32, %arg3: memref<8xi32, #tpu.memory_space<smem>>, %arg4: memref<2xi32, #tpu.memory_space<smem>>) -> (i32, i32) {
    %c0_i32 = arith.constant 0 : i32
    %c0_i32_0 = arith.constant 0 : i32
    return %arg0, %c0_i32 : i32, i32
  }
  func.func @transform_6(%arg0: i32, %arg1: i32, %arg2: i32, %arg3: memref<8xi32, #tpu.memory_space<smem>>, %arg4: memref<2xi32, #tpu.memory_space<smem>>) -> (i32, i32) {
    %c0_i32 = arith.constant 0 : i32
    %c0_i32_0 = arith.constant 0 : i32
    return %arg0, %c0_i32 : i32, i32
  }
}

module attributes {stable_mosaic.version = 11 : i64} {
  func.func @_matmul_bn_kernel(%arg0: i32, %arg1: i32, %arg2: memref<64x128xbf16, #tpu.memory_space<vmem>>, %arg3: memref<128x128xbf16, #tpu.memory_space<vmem>>, %arg4: memref<1x128xf32, #tpu.memory_space<vmem>>, %arg5: memref<1x128xf32, #tpu.memory_space<vmem>>, %arg6: memref<64x128xbf16, #tpu.memory_space<vmem>>, %arg7: memref<64x128xf32, #tpu.memory_space<vmem>>) attributes {dimension_semantics = [#tpu.dimension_semantics<parallel>, #tpu.dimension_semantics<arbitrary>], iteration_bounds = array<i64: 2, 9>, scalar_prefetch = 0 : i64, scratch_operands = 1 : i64, tpu.core_type = #tpu.core_type<tc>, window_params = [{transform_indices = @transform_0, window_bounds = array<i64: 64, 128>}, {transform_indices = @transform_1, window_bounds = array<i64: 128, 128>}, {pipeline_mode = #tpu.pipeline_mode<synchronous>, transform_indices = @transform_2, window_bounds = array<i64: 1, 128>}, {pipeline_mode = #tpu.pipeline_mode<synchronous>, transform_indices = @transform_3, window_bounds = array<i64: 1, 128>}, {transform_indices = @transform_4, window_bounds = array<i64: 64, 128>}]} {
    %c0_i32 = arith.constant 0 : i32
    %0 = arith.cmpi eq, %arg1, %c0_i32 : i32
    %1 = arith.extui %0 : i1 to i32
    %c0_i32_0 = arith.constant 0 : i32
    %2 = arith.cmpi ne, %1, %c0_i32_0 : i32
    scf.if %2 {
      %cst_9 = arith.constant 0.000000e+00 : f32
      %12 = vector.broadcast %cst_9 : f32 to vector<64x128xf32>
      %c0_10 = arith.constant 0 : index
      %c0_11 = arith.constant 0 : index
      %13 = vector.load %arg7[%c0_10, %c0_11] : memref<64x128xf32, #tpu.memory_space<vmem>>, vector<64x128xf32>
      tpu.vector_store %arg7[%c0_10, %c0_11], %12 {strides = array<i32>} : memref<64x128xf32, #tpu.memory_space<vmem>>, vector<64x128xf32>,
    } else {
    }
    %c0 = arith.constant 0 : index
    %c0_1 = arith.constant 0 : index
    %3 = vector.load %arg7[%c0, %c0_1] : memref<64x128xf32, #tpu.memory_space<vmem>>, vector<64x128xf32>
    %c0_2 = arith.constant 0 : index
    %c0_3 = arith.constant 0 : index
    %4 = vector.load %arg2[%c0_2, %c0_3] : memref<64x128xbf16, #tpu.memory_space<vmem>>, vector<64x128xbf16>
    %c0_4 = arith.constant 0 : index
    %c0_5 = arith.constant 0 : index
    %5 = vector.load %arg3[%c0_4, %c0_5] : memref<128x128xbf16, #tpu.memory_space<vmem>>, vector<128x128xbf16>
    %cst = arith.constant dense<0.000000e+00> : vector<64x128xf32>
    %6 = tpu.matmul %4, %5, %cst {dimension_numbers = #tpu.dot_dimension_numbers<[1], [0], [0], [1], [0, 0, 1, 1], [], []>} : vector<64x128xbf16>, vector<128x128xbf16>, vector<64x128xf32> -> vector<64x128xf32>
    %7 = arith.addf %3, %6 : vector<64x128xf32>
    %c0_6 = arith.constant 0 : index
    %c0_7 = arith.constant 0 : index
    %8 = vector.load %arg7[%c0_6, %c0_7] : memref<64x128xf32, #tpu.memory_space<vmem>>, vector<64x128xf32>
    tpu.vector_store %arg7[%c0_6, %c0_7], %7 {strides = array<i32>} : memref<64x128xf32, #tpu.memory_space<vmem>>, vector<64x128xf32>,
    %c8_i32 = arith.constant 8 : i32
    %9 = arith.cmpi eq, %arg1, %c8_i32 : i32
    %10 = arith.extui %9 : i1 to i32
    %c0_i32_8 = arith.constant 0 : i32
    %11 = arith.cmpi ne, %10, %c0_i32_8 : i32
    scf.if %11 {
      %c0_9 = arith.constant 0 : index
      %c0_10 = arith.constant 0 : index
      %12 = vector.load %arg7[%c0_9, %c0_10] : memref<64x128xf32, #tpu.memory_space<vmem>>, vector<64x128xf32>
      %c0_11 = arith.constant 0 : index
      %c0_12 = arith.constant 0 : index
      %13 = vector.load %arg4[%c0_11, %c0_12] : memref<1x128xf32, #tpu.memory_space<vmem>>, vector<1x128xf32>
      %14 = vector.broadcast %13 : vector<1x128xf32> to vector<64x128xf32>
      %15 = arith.mulf %12, %14 : vector<64x128xf32>
      %c0_13 = arith.constant 0 : index
      %c0_14 = arith.constant 0 : index
      %16 = vector.load %arg5[%c0_13, %c0_14] : memref<1x128xf32, #tpu.memory_space<vmem>>, vector<1x128xf32>
      %17 = vector.broadcast %16 : vector<1x128xf32> to vector<64x128xf32>
      %18 = arith.addf %15, %17 : vector<64x128xf32>
      %cst_15 = arith.constant 0.000000e+00 : f32
      %19 = vector.broadcast %cst_15 : f32 to vector<64x128xf32>
      %20 = arith.maximumf %18, %19 : vector<64x128xf32>
      %21 = arith.truncf %20 : vector<64x128xf32> to vector<64x128xbf16>
      %c0_16 = arith.constant 0 : index
      %c0_17 = arith.constant 0 : index
      %22 = vector.load %arg6[%c0_16, %c0_17] : memref<64x128xbf16, #tpu.memory_space<vmem>>, vector<64x128xbf16>
      tpu.vector_store %arg6[%c0_16, %c0_17], %21 {strides = array<i32>} : memref<64x128xbf16, #tpu.memory_space<vmem>>, vector<64x128xbf16>,
    } else {
    }
    return
  }
  func.func @transform_0(%arg0: i32, %arg1: i32) -> (i32, i32) {
    %c0_i32 = arith.constant 0 : i32
    return %arg0, %arg1 : i32, i32
  }
  func.func @transform_1(%arg0: i32, %arg1: i32) -> (i32, i32) {
    %c0_i32 = arith.constant 0 : i32
    %c0_i32_0 = arith.constant 0 : i32
    return %arg1, %c0_i32 : i32, i32
  }
  func.func @transform_2(%arg0: i32, %arg1: i32) -> (i32, i32) {
    %c0_i32 = arith.constant 0 : i32
    %c0_i32_0 = arith.constant 0 : i32
    %c0_i32_1 = arith.constant 0 : i32
    return %c0_i32, %c0_i32_0 : i32, i32
  }
  func.func @transform_3(%arg0: i32, %arg1: i32) -> (i32, i32) {
    %c0_i32 = arith.constant 0 : i32
    %c0_i32_0 = arith.constant 0 : i32
    %c0_i32_1 = arith.constant 0 : i32
    return %c0_i32, %c0_i32_0 : i32, i32
  }
  func.func @transform_4(%arg0: i32, %arg1: i32) -> (i32, i32) {
    %c0_i32 = arith.constant 0 : i32
    %c0_i32_0 = arith.constant 0 : i32
    return %arg0, %c0_i32 : i32, i32
  }
}

module attributes {stable_mosaic.version = 11 : i64} {
  func.func @_matmul_bn_kernel(%arg0: i32, %arg1: i32, %arg2: memref<64x128xbf16, #tpu.memory_space<vmem>>, %arg3: memref<128x128xbf16, #tpu.memory_space<vmem>>, %arg4: memref<1x128xf32, #tpu.memory_space<vmem>>, %arg5: memref<1x128xf32, #tpu.memory_space<vmem>>, %arg6: memref<64x128xbf16, #tpu.memory_space<vmem>>, %arg7: memref<64x128xf32, #tpu.memory_space<vmem>>) attributes {dimension_semantics = [#tpu.dimension_semantics<parallel>, #tpu.dimension_semantics<arbitrary>], iteration_bounds = array<i64: 2, 1>, scalar_prefetch = 0 : i64, scratch_operands = 1 : i64, tpu.core_type = #tpu.core_type<tc>, window_params = [{transform_indices = @transform_0, window_bounds = array<i64: 64, 128>}, {transform_indices = @transform_1, window_bounds = array<i64: 128, 128>}, {pipeline_mode = #tpu.pipeline_mode<synchronous>, transform_indices = @transform_2, window_bounds = array<i64: 1, 128>}, {pipeline_mode = #tpu.pipeline_mode<synchronous>, transform_indices = @transform_3, window_bounds = array<i64: 1, 128>}, {transform_indices = @transform_4, window_bounds = array<i64: 64, 128>}]} {
    %c0_i32 = arith.constant 0 : i32
    %0 = arith.cmpi eq, %arg1, %c0_i32 : i32
    %1 = arith.extui %0 : i1 to i32
    %c0_i32_0 = arith.constant 0 : i32
    %2 = arith.cmpi ne, %1, %c0_i32_0 : i32
    scf.if %2 {
      %cst_10 = arith.constant 0.000000e+00 : f32
      %12 = vector.broadcast %cst_10 : f32 to vector<64x128xf32>
      %c0_11 = arith.constant 0 : index
      %c0_12 = arith.constant 0 : index
      %13 = vector.load %arg7[%c0_11, %c0_12] : memref<64x128xf32, #tpu.memory_space<vmem>>, vector<64x128xf32>
      tpu.vector_store %arg7[%c0_11, %c0_12], %12 {strides = array<i32>} : memref<64x128xf32, #tpu.memory_space<vmem>>, vector<64x128xf32>,
    } else {
    }
    %c0 = arith.constant 0 : index
    %c0_1 = arith.constant 0 : index
    %3 = vector.load %arg7[%c0, %c0_1] : memref<64x128xf32, #tpu.memory_space<vmem>>, vector<64x128xf32>
    %c0_2 = arith.constant 0 : index
    %c0_3 = arith.constant 0 : index
    %4 = vector.load %arg2[%c0_2, %c0_3] : memref<64x128xbf16, #tpu.memory_space<vmem>>, vector<64x128xbf16>
    %c0_4 = arith.constant 0 : index
    %c0_5 = arith.constant 0 : index
    %5 = vector.load %arg3[%c0_4, %c0_5] : memref<128x128xbf16, #tpu.memory_space<vmem>>, vector<128x128xbf16>
    %cst = arith.constant dense<0.000000e+00> : vector<64x128xf32>
    %6 = tpu.matmul %4, %5, %cst {dimension_numbers = #tpu.dot_dimension_numbers<[1], [0], [0], [1], [0, 0, 1, 1], [], []>} : vector<64x128xbf16>, vector<128x128xbf16>, vector<64x128xf32> -> vector<64x128xf32>
    %7 = arith.addf %3, %6 : vector<64x128xf32>
    %c0_6 = arith.constant 0 : index
    %c0_7 = arith.constant 0 : index
    %8 = vector.load %arg7[%c0_6, %c0_7] : memref<64x128xf32, #tpu.memory_space<vmem>>, vector<64x128xf32>
    tpu.vector_store %arg7[%c0_6, %c0_7], %7 {strides = array<i32>} : memref<64x128xf32, #tpu.memory_space<vmem>>, vector<64x128xf32>,
    %c0_i32_8 = arith.constant 0 : i32
    %9 = arith.cmpi eq, %arg1, %c0_i32_8 : i32
    %10 = arith.extui %9 : i1 to i32
    %c0_i32_9 = arith.constant 0 : i32
    %11 = arith.cmpi ne, %10, %c0_i32_9 : i32
    scf.if %11 {
      %c0_10 = arith.constant 0 : index
      %c0_11 = arith.constant 0 : index
      %12 = vector.load %arg7[%c0_10, %c0_11] : memref<64x128xf32, #tpu.memory_space<vmem>>, vector<64x128xf32>
      %c0_12 = arith.constant 0 : index
      %c0_13 = arith.constant 0 : index
      %13 = vector.load %arg4[%c0_12, %c0_13] : memref<1x128xf32, #tpu.memory_space<vmem>>, vector<1x128xf32>
      %14 = vector.broadcast %13 : vector<1x128xf32> to vector<64x128xf32>
      %15 = arith.mulf %12, %14 : vector<64x128xf32>
      %c0_14 = arith.constant 0 : index
      %c0_15 = arith.constant 0 : index
      %16 = vector.load %arg5[%c0_14, %c0_15] : memref<1x128xf32, #tpu.memory_space<vmem>>, vector<1x128xf32>
      %17 = vector.broadcast %16 : vector<1x128xf32> to vector<64x128xf32>
      %18 = arith.addf %15, %17 : vector<64x128xf32>
      %19 = arith.truncf %18 : vector<64x128xf32> to vector<64x128xbf16>
      %c0_16 = arith.constant 0 : index
      %c0_17 = arith.constant 0 : index
      %20 = vector.load %arg6[%c0_16, %c0_17] : memref<64x128xbf16, #tpu.memory_space<vmem>>, vector<64x128xbf16>
      tpu.vector_store %arg6[%c0_16, %c0_17], %19 {strides = array<i32>} : memref<64x128xbf16, #tpu.memory_space<vmem>>, vector<64x128xbf16>,
    } else {
    }
    return
  }
  func.func @transform_0(%arg0: i32, %arg1: i32) -> (i32, i32) {
    %c0_i32 = arith.constant 0 : i32
    return %arg0, %arg1 : i32, i32
  }
  func.func @transform_1(%arg0: i32, %arg1: i32) -> (i32, i32) {
    %c0_i32 = arith.constant 0 : i32
    %c0_i32_0 = arith.constant 0 : i32
    return %arg1, %c0_i32 : i32, i32
  }
  func.func @transform_2(%arg0: i32, %arg1: i32) -> (i32, i32) {
    %c0_i32 = arith.constant 0 : i32
    %c0_i32_0 = arith.constant 0 : i32
    %c0_i32_1 = arith.constant 0 : i32
    return %c0_i32, %c0_i32_0 : i32, i32
  }
  func.func @transform_3(%arg0: i32, %arg1: i32) -> (i32, i32) {
    %c0_i32 = arith.constant 0 : i32
    %c0_i32_0 = arith.constant 0 : i32
    %c0_i32_1 = arith.constant 0 : i32
    return %c0_i32, %c0_i32_0 : i32, i32
  }
  func.func @transform_4(%arg0: i32, %arg1: i32) -> (i32, i32) {
    %c0_i32 = arith.constant 0 : i32
    %c0_i32_0 = arith.constant 0 : i32
    return %arg0, %c0_i32 : i32, i32
  }
}

module attributes {stable_mosaic.version = 11 : i64} {
  func.func @_moe_gemm_kernel(%arg0: i32, %arg1: i32, %arg2: i32, %arg3: memref<8xi32, #tpu.memory_space<smem>>, %arg4: memref<2xi32, #tpu.memory_space<smem>>, %arg5: memref<64x128xbf16, #tpu.memory_space<vmem>>, %arg6: memref<1x128x128xbf16, #tpu.memory_space<vmem>>, %arg7: memref<1x64x1xf32, #tpu.memory_space<vmem>>, %arg8: memref<1x128xf32, #tpu.memory_space<vmem>>, %arg9: memref<1x128xf32, #tpu.memory_space<vmem>>, %arg10: memref<64x128xbf16, #tpu.memory_space<vmem>>, %arg11: memref<64x128xbf16, #tpu.memory_space<vmem>>, %arg12: memref<64x128xf32, #tpu.memory_space<vmem>>) attributes {dimension_semantics = [#tpu.dimension_semantics<parallel>, #tpu.dimension_semantics<arbitrary>, #tpu.dimension_semantics<arbitrary>], iteration_bounds = array<i64: 2, 9, 4>, scalar_prefetch = 2 : i64, scratch_operands = 1 : i64, tpu.core_type = #tpu.core_type<tc>, window_params = [{transform_indices = @transform_0, window_bounds = array<i64: 64, 128>}, {transform_indices = @transform_1, window_bounds = array<i64: 1, 128, 128>}, {transform_indices = @transform_2, window_bounds = array<i64: 1, 64, 1>}, {pipeline_mode = #tpu.pipeline_mode<synchronous>, transform_indices = @transform_3, window_bounds = array<i64: 1, 128>}, {pipeline_mode = #tpu.pipeline_mode<synchronous>, transform_indices = @transform_4, window_bounds = array<i64: 1, 128>}, {transform_indices = @transform_5, window_bounds = array<i64: 64, 128>}, {transform_indices = @transform_6, window_bounds = array<i64: 64, 128>}]} {
    %c0_i32 = arith.constant 0 : i32
    %0 = arith.cmpi eq, %arg1, %c0_i32 : i32
    %c0_i32_0 = arith.constant 0 : i32
    %1 = arith.cmpi eq, %arg2, %c0_i32_0 : i32
    %2 = arith.andi %0, %1 : i1
    %3 = arith.extui %2 : i1 to i32
    %c0_i32_1 = arith.constant 0 : i32
    %4 = arith.cmpi ne, %3, %c0_i32_1 : i32
    scf.if %4 {
      %cst = arith.constant 0.000000e+00 : f32
      %15 = vector.broadcast %cst : f32 to vector<64x128xf32>
      %c0 = arith.constant 0 : index
      %c0_4 = arith.constant 0 : index
      %16 = vector.load %arg12[%c0, %c0_4] : memref<64x128xf32, #tpu.memory_space<vmem>>, vector<64x128xf32>
      tpu.vector_store %arg12[%c0, %c0_4], %15 {strides = array<i32>} : memref<64x128xf32, #tpu.memory_space<vmem>>, vector<64x128xf32>,
    } else {
    }
    %5 = arith.index_cast %arg0 : i32 to index
    %6 = memref.load %arg4[%5] : memref<2xi32, #tpu.memory_space<smem>>
    %7 = arith.cmpi slt, %arg2, %6 : i32
    %8 = arith.extui %7 : i1 to i32
    %c0_i32_2 = arith.constant 0 : i32
    %9 = arith.cmpi ne, %8, %c0_i32_2 : i32
    scf.if %9 {
      %c0 = arith.constant 0 : index
      %c0_4 = arith.constant 0 : index
      %15 = vector.load %arg12[%c0, %c0_4] : memref<64x128xf32, #tpu.memory_space<vmem>>, vector<64x128xf32>
      %c0_5 = arith.constant 0 : index
      %c0_6 = arith.constant 0 : index
      %c0_7 = arith.constant 0 : index
      %16 = vector.load %arg7[%c0_5, %c0_6, %c0_7] : memref<1x64x1xf32, #tpu.memory_space<vmem>>, vector<1x64x1xf32>
      %17 = vector.shape_cast %16 : vector<1x64x1xf32> to vector<64x1xf32>
      %c0_8 = arith.constant 0 : index
      %c0_9 = arith.constant 0 : index
      %18 = vector.load %arg5[%c0_8, %c0_9] : memref<64x128xbf16, #tpu.memory_space<vmem>>, vector<64x128xbf16>
      %c0_10 = arith.constant 0 : index
      %c0_11 = arith.constant 0 : index
      %c0_12 = arith.constant 0 : index
      %19 = vector.load %arg6[%c0_10, %c0_11, %c0_12] : memref<1x128x128xbf16, #tpu.memory_space<vmem>>, vector<1x128x128xbf16>
      %20 = vector.shape_cast %19 : vector<1x128x128xbf16> to vector<128x128xbf16>
      %cst = arith.constant dense<0.000000e+00> : vector<64x128xf32>
      %21 = tpu.matmul %18, %20, %cst {dimension_numbers = #tpu.dot_dimension_numbers<[1], [0], [0], [1], [0, 0, 1, 1], [], []>} : vector<64x128xbf16>, vector<128x128xbf16>, vector<64x128xf32> -> vector<64x128xf32>
      %22 = vector.broadcast %17 : vector<64x1xf32> to vector<64x128xf32>
      %23 = arith.mulf %22, %21 : vector<64x128xf32>
      %24 = arith.addf %15, %23 : vector<64x128xf32>
      %c0_13 = arith.constant 0 : index
      %c0_14 = arith.constant 0 : index
      %25 = vector.load %arg12[%c0_13, %c0_14] : memref<64x128xf32, #tpu.memory_space<vmem>>, vector<64x128xf32>
      tpu.vector_store %arg12[%c0_13, %c0_14], %24 {strides = array<i32>} : memref<64x128xf32, #tpu.memory_space<vmem>>, vector<64x128xf32>,
    } else {
    }
    %c8_i32 = arith.constant 8 : i32
    %10 = arith.cmpi eq, %arg1, %c8_i32 : i32
    %c3_i32 = arith.constant 3 : i32
    %11 = arith.cmpi eq, %arg2, %c3_i32 : i32
    %12 = arith.andi %10, %11 : i1
    %13 = arith.extui %12 : i1 to i32
    %c0_i32_3 = arith.constant 0 : i32
    %14 = arith.cmpi ne, %13, %c0_i32_3 : i32
    scf.if %14 {
      %c0 = arith.constant 0 : index
      %c0_4 = arith.constant 0 : index
      %15 = vector.load %arg12[%c0, %c0_4] : memref<64x128xf32, #tpu.memory_space<vmem>>, vector<64x128xf32>
      %c0_5 = arith.constant 0 : index
      %c0_6 = arith.constant 0 : index
      %16 = vector.load %arg8[%c0_5, %c0_6] : memref<1x128xf32, #tpu.memory_space<vmem>>, vector<1x128xf32>
      %17 = vector.broadcast %16 : vector<1x128xf32> to vector<64x128xf32>
      %18 = arith.mulf %15, %17 : vector<64x128xf32>
      %c0_7 = arith.constant 0 : index
      %c0_8 = arith.constant 0 : index
      %19 = vector.load %arg9[%c0_7, %c0_8] : memref<1x128xf32, #tpu.memory_space<vmem>>, vector<1x128xf32>
      %20 = vector.broadcast %19 : vector<1x128xf32> to vector<64x128xf32>
      %21 = arith.addf %18, %20 : vector<64x128xf32>
      %c0_9 = arith.constant 0 : index
      %c0_10 = arith.constant 0 : index
      %22 = vector.load %arg10[%c0_9, %c0_10] : memref<64x128xbf16, #tpu.memory_space<vmem>>, vector<64x128xbf16>
      %23 = arith.extf %22 : vector<64x128xbf16> to vector<64x128xf32>
      %24 = arith.addf %21, %23 : vector<64x128xf32>
      %cst = arith.constant 0.000000e+00 : f32
      %25 = vector.broadcast %cst : f32 to vector<64x128xf32>
      %26 = arith.maximumf %24, %25 : vector<64x128xf32>
      %27 = arith.truncf %26 : vector<64x128xf32> to vector<64x128xbf16>
      %c0_11 = arith.constant 0 : index
      %c0_12 = arith.constant 0 : index
      %28 = vector.load %arg11[%c0_11, %c0_12] : memref<64x128xbf16, #tpu.memory_space<vmem>>, vector<64x128xbf16>
      tpu.vector_store %arg11[%c0_11, %c0_12], %27 {strides = array<i32>} : memref<64x128xbf16, #tpu.memory_space<vmem>>, vector<64x128xbf16>,
    } else {
    }
    return
  }
  func.func @transform_0(%arg0: i32, %arg1: i32, %arg2: i32, %arg3: memref<8xi32, #tpu.memory_space<smem>>, %arg4: memref<2xi32, #tpu.memory_space<smem>>) -> (i32, i32) {
    %c0_i32 = arith.constant 0 : i32
    return %arg0, %arg1 : i32, i32
  }
  func.func @transform_1(%arg0: i32, %arg1: i32, %arg2: i32, %arg3: memref<8xi32, #tpu.memory_space<smem>>, %arg4: memref<2xi32, #tpu.memory_space<smem>>) -> (i32, i32, i32) {
    %c4_i32 = arith.constant 4 : i32
    %0 = arith.muli %arg0, %c4_i32 : i32
    %1 = arith.addi %0, %arg2 : i32
    %2 = arith.index_cast %1 : i32 to index
    %3 = memref.load %arg3[%2] : memref<8xi32, #tpu.memory_space<smem>>
    %c0_i32 = arith.constant 0 : i32
    %c0_i32_0 = arith.constant 0 : i32
    return %3, %arg1, %c0_i32 : i32, i32, i32
  }
  func.func @transform_2(%arg0: i32, %arg1: i32, %arg2: i32, %arg3: memref<8xi32, #tpu.memory_space<smem>>, %arg4: memref<2xi32, #tpu.memory_space<smem>>) -> (i32, i32, i32) {
    %c4_i32 = arith.constant 4 : i32
    %0 = arith.muli %arg0, %c4_i32 : i32
    %1 = arith.addi %0, %arg2 : i32
    %2 = arith.index_cast %1 : i32 to index
    %3 = memref.load %arg3[%2] : memref<8xi32, #tpu.memory_space<smem>>
    %c0_i32 = arith.constant 0 : i32
    %c0_i32_0 = arith.constant 0 : i32
    return %3, %arg0, %c0_i32 : i32, i32, i32
  }
  func.func @transform_3(%arg0: i32, %arg1: i32, %arg2: i32, %arg3: memref<8xi32, #tpu.memory_space<smem>>, %arg4: memref<2xi32, #tpu.memory_space<smem>>) -> (i32, i32) {
    %c0_i32 = arith.constant 0 : i32
    %c0_i32_0 = arith.constant 0 : i32
    %c0_i32_1 = arith.constant 0 : i32
    return %c0_i32, %c0_i32_0 : i32, i32
  }
  func.func @transform_4(%arg0: i32, %arg1: i32, %arg2: i32, %arg3: memref<8xi32, #tpu.memory_space<smem>>, %arg4: memref<2xi32, #tpu.memory_space<smem>>) -> (i32, i32) {
    %c0_i32 = arith.constant 0 : i32
    %c0_i32_0 = arith.constant 0 : i32
    %c0_i32_1 = arith.constant 0 : i32
    return %c0_i32, %c0_i32_0 : i32, i32
  }
  func.func @transform_5(%arg0: i32, %arg1: i32, %arg2: i32, %arg3: memref<8xi32, #tpu.memory_space<smem>>, %arg4: memref<2xi32, #tpu.memory_space<smem>>) -> (i32, i32) {
    %c0_i32 = arith.constant 0 : i32
    %c0_i32_0 = arith.constant 0 : i32
    return %arg0, %c0_i32 : i32, i32
  }
  func.func @transform_6(%arg0: i32, %arg1: i32, %arg2: i32, %arg3: memref<8xi32, #tpu.memory_space<smem>>, %arg4: memref<2xi32, #tpu.memory_space<smem>>) -> (i32, i32) {
    %c0_i32 = arith.constant 0 : i32
    %c0_i32_0 = arith.constant 0 : i32
    return %arg0, %c0_i32 : i32, i32
  }
}

module attributes {stable_mosaic.version = 11 : i64} {
  func.func @_matmul_bn_kernel(%arg0: i32, %arg1: i32, %arg2: memref<16x128xbf16, #tpu.memory_space<vmem>>, %arg3: memref<128x256xbf16, #tpu.memory_space<vmem>>, %arg4: memref<1x256xf32, #tpu.memory_space<vmem>>, %arg5: memref<1x256xf32, #tpu.memory_space<vmem>>, %arg6: memref<16x256xbf16, #tpu.memory_space<vmem>>, %arg7: memref<16x256xf32, #tpu.memory_space<vmem>>) attributes {dimension_semantics = [#tpu.dimension_semantics<parallel>, #tpu.dimension_semantics<arbitrary>], iteration_bounds = array<i64: 2, 9>, scalar_prefetch = 0 : i64, scratch_operands = 1 : i64, tpu.core_type = #tpu.core_type<tc>, window_params = [{transform_indices = @transform_0, window_bounds = array<i64: 16, 128>}, {transform_indices = @transform_1, window_bounds = array<i64: 128, 256>}, {pipeline_mode = #tpu.pipeline_mode<synchronous>, transform_indices = @transform_2, window_bounds = array<i64: 1, 256>}, {pipeline_mode = #tpu.pipeline_mode<synchronous>, transform_indices = @transform_3, window_bounds = array<i64: 1, 256>}, {transform_indices = @transform_4, window_bounds = array<i64: 16, 256>}]} {
    %c0_i32 = arith.constant 0 : i32
    %0 = arith.cmpi eq, %arg1, %c0_i32 : i32
    %1 = arith.extui %0 : i1 to i32
    %c0_i32_0 = arith.constant 0 : i32
    %2 = arith.cmpi ne, %1, %c0_i32_0 : i32
    scf.if %2 {
      %cst_9 = arith.constant 0.000000e+00 : f32
      %12 = vector.broadcast %cst_9 : f32 to vector<16x256xf32>
      %c0_10 = arith.constant 0 : index
      %c0_11 = arith.constant 0 : index
      %13 = vector.load %arg7[%c0_10, %c0_11] : memref<16x256xf32, #tpu.memory_space<vmem>>, vector<16x256xf32>
      tpu.vector_store %arg7[%c0_10, %c0_11], %12 {strides = array<i32>} : memref<16x256xf32, #tpu.memory_space<vmem>>, vector<16x256xf32>,
    } else {
    }
    %c0 = arith.constant 0 : index
    %c0_1 = arith.constant 0 : index
    %3 = vector.load %arg7[%c0, %c0_1] : memref<16x256xf32, #tpu.memory_space<vmem>>, vector<16x256xf32>
    %c0_2 = arith.constant 0 : index
    %c0_3 = arith.constant 0 : index
    %4 = vector.load %arg2[%c0_2, %c0_3] : memref<16x128xbf16, #tpu.memory_space<vmem>>, vector<16x128xbf16>
    %c0_4 = arith.constant 0 : index
    %c0_5 = arith.constant 0 : index
    %5 = vector.load %arg3[%c0_4, %c0_5] : memref<128x256xbf16, #tpu.memory_space<vmem>>, vector<128x256xbf16>
    %cst = arith.constant dense<0.000000e+00> : vector<16x256xf32>
    %6 = tpu.matmul %4, %5, %cst {dimension_numbers = #tpu.dot_dimension_numbers<[1], [0], [0], [1], [0, 0, 1, 1], [], []>} : vector<16x128xbf16>, vector<128x256xbf16>, vector<16x256xf32> -> vector<16x256xf32>
    %7 = arith.addf %3, %6 : vector<16x256xf32>
    %c0_6 = arith.constant 0 : index
    %c0_7 = arith.constant 0 : index
    %8 = vector.load %arg7[%c0_6, %c0_7] : memref<16x256xf32, #tpu.memory_space<vmem>>, vector<16x256xf32>
    tpu.vector_store %arg7[%c0_6, %c0_7], %7 {strides = array<i32>} : memref<16x256xf32, #tpu.memory_space<vmem>>, vector<16x256xf32>,
    %c8_i32 = arith.constant 8 : i32
    %9 = arith.cmpi eq, %arg1, %c8_i32 : i32
    %10 = arith.extui %9 : i1 to i32
    %c0_i32_8 = arith.constant 0 : i32
    %11 = arith.cmpi ne, %10, %c0_i32_8 : i32
    scf.if %11 {
      %c0_9 = arith.constant 0 : index
      %c0_10 = arith.constant 0 : index
      %12 = vector.load %arg7[%c0_9, %c0_10] : memref<16x256xf32, #tpu.memory_space<vmem>>, vector<16x256xf32>
      %c0_11 = arith.constant 0 : index
      %c0_12 = arith.constant 0 : index
      %13 = vector.load %arg4[%c0_11, %c0_12] : memref<1x256xf32, #tpu.memory_space<vmem>>, vector<1x256xf32>
      %14 = vector.broadcast %13 : vector<1x256xf32> to vector<16x256xf32>
      %15 = arith.mulf %12, %14 : vector<16x256xf32>
      %c0_13 = arith.constant 0 : index
      %c0_14 = arith.constant 0 : index
      %16 = vector.load %arg5[%c0_13, %c0_14] : memref<1x256xf32, #tpu.memory_space<vmem>>, vector<1x256xf32>
      %17 = vector.broadcast %16 : vector<1x256xf32> to vector<16x256xf32>
      %18 = arith.addf %15, %17 : vector<16x256xf32>
      %cst_15 = arith.constant 0.000000e+00 : f32
      %19 = vector.broadcast %cst_15 : f32 to vector<16x256xf32>
      %20 = arith.maximumf %18, %19 : vector<16x256xf32>
      %21 = arith.truncf %20 : vector<16x256xf32> to vector<16x256xbf16>
      %c0_16 = arith.constant 0 : index
      %c0_17 = arith.constant 0 : index
      %22 = vector.load %arg6[%c0_16, %c0_17] : memref<16x256xbf16, #tpu.memory_space<vmem>>, vector<16x256xbf16>
      tpu.vector_store %arg6[%c0_16, %c0_17], %21 {strides = array<i32>} : memref<16x256xbf16, #tpu.memory_space<vmem>>, vector<16x256xbf16>,
    } else {
    }
    return
  }
  func.func @transform_0(%arg0: i32, %arg1: i32) -> (i32, i32) {
    %c0_i32 = arith.constant 0 : i32
    return %arg0, %arg1 : i32, i32
  }
  func.func @transform_1(%arg0: i32, %arg1: i32) -> (i32, i32) {
    %c0_i32 = arith.constant 0 : i32
    %c0_i32_0 = arith.constant 0 : i32
    return %arg1, %c0_i32 : i32, i32
  }
  func.func @transform_2(%arg0: i32, %arg1: i32) -> (i32, i32) {
    %c0_i32 = arith.constant 0 : i32
    %c0_i32_0 = arith.constant 0 : i32
    %c0_i32_1 = arith.constant 0 : i32
    return %c0_i32, %c0_i32_0 : i32, i32
  }
  func.func @transform_3(%arg0: i32, %arg1: i32) -> (i32, i32) {
    %c0_i32 = arith.constant 0 : i32
    %c0_i32_0 = arith.constant 0 : i32
    %c0_i32_1 = arith.constant 0 : i32
    return %c0_i32, %c0_i32_0 : i32, i32
  }
  func.func @transform_4(%arg0: i32, %arg1: i32) -> (i32, i32) {
    %c0_i32 = arith.constant 0 : i32
    %c0_i32_0 = arith.constant 0 : i32
    return %arg0, %c0_i32 : i32, i32
  }
}

module attributes {stable_mosaic.version = 11 : i64} {
  func.func @_moe_gemm_kernel(%arg0: i32, %arg1: i32, %arg2: i32, %arg3: memref<8xi32, #tpu.memory_space<smem>>, %arg4: memref<2xi32, #tpu.memory_space<smem>>, %arg5: memref<16x256xbf16, #tpu.memory_space<vmem>>, %arg6: memref<1x256x256xbf16, #tpu.memory_space<vmem>>, %arg7: memref<1x16x1xf32, #tpu.memory_space<vmem>>, %arg8: memref<1x256xf32, #tpu.memory_space<vmem>>, %arg9: memref<1x256xf32, #tpu.memory_space<vmem>>, %arg10: memref<16x256xbf16, #tpu.memory_space<vmem>>, %arg11: memref<16x256xbf16, #tpu.memory_space<vmem>>, %arg12: memref<16x256xf32, #tpu.memory_space<vmem>>) attributes {dimension_semantics = [#tpu.dimension_semantics<parallel>, #tpu.dimension_semantics<arbitrary>, #tpu.dimension_semantics<arbitrary>], iteration_bounds = array<i64: 2, 9, 4>, scalar_prefetch = 2 : i64, scratch_operands = 1 : i64, tpu.core_type = #tpu.core_type<tc>, window_params = [{transform_indices = @transform_0, window_bounds = array<i64: 16, 256>}, {transform_indices = @transform_1, window_bounds = array<i64: 1, 256, 256>}, {transform_indices = @transform_2, window_bounds = array<i64: 1, 16, 1>}, {pipeline_mode = #tpu.pipeline_mode<synchronous>, transform_indices = @transform_3, window_bounds = array<i64: 1, 256>}, {pipeline_mode = #tpu.pipeline_mode<synchronous>, transform_indices = @transform_4, window_bounds = array<i64: 1, 256>}, {transform_indices = @transform_5, window_bounds = array<i64: 16, 256>}, {transform_indices = @transform_6, window_bounds = array<i64: 16, 256>}]} {
    %c0_i32 = arith.constant 0 : i32
    %0 = arith.cmpi eq, %arg1, %c0_i32 : i32
    %c0_i32_0 = arith.constant 0 : i32
    %1 = arith.cmpi eq, %arg2, %c0_i32_0 : i32
    %2 = arith.andi %0, %1 : i1
    %3 = arith.extui %2 : i1 to i32
    %c0_i32_1 = arith.constant 0 : i32
    %4 = arith.cmpi ne, %3, %c0_i32_1 : i32
    scf.if %4 {
      %cst = arith.constant 0.000000e+00 : f32
      %15 = vector.broadcast %cst : f32 to vector<16x256xf32>
      %c0 = arith.constant 0 : index
      %c0_4 = arith.constant 0 : index
      %16 = vector.load %arg12[%c0, %c0_4] : memref<16x256xf32, #tpu.memory_space<vmem>>, vector<16x256xf32>
      tpu.vector_store %arg12[%c0, %c0_4], %15 {strides = array<i32>} : memref<16x256xf32, #tpu.memory_space<vmem>>, vector<16x256xf32>,
    } else {
    }
    %5 = arith.index_cast %arg0 : i32 to index
    %6 = memref.load %arg4[%5] : memref<2xi32, #tpu.memory_space<smem>>
    %7 = arith.cmpi slt, %arg2, %6 : i32
    %8 = arith.extui %7 : i1 to i32
    %c0_i32_2 = arith.constant 0 : i32
    %9 = arith.cmpi ne, %8, %c0_i32_2 : i32
    scf.if %9 {
      %c0 = arith.constant 0 : index
      %c0_4 = arith.constant 0 : index
      %15 = vector.load %arg12[%c0, %c0_4] : memref<16x256xf32, #tpu.memory_space<vmem>>, vector<16x256xf32>
      %c0_5 = arith.constant 0 : index
      %c0_6 = arith.constant 0 : index
      %c0_7 = arith.constant 0 : index
      %16 = vector.load %arg7[%c0_5, %c0_6, %c0_7] : memref<1x16x1xf32, #tpu.memory_space<vmem>>, vector<1x16x1xf32>
      %17 = vector.shape_cast %16 : vector<1x16x1xf32> to vector<16x1xf32>
      %c0_8 = arith.constant 0 : index
      %c0_9 = arith.constant 0 : index
      %18 = vector.load %arg5[%c0_8, %c0_9] : memref<16x256xbf16, #tpu.memory_space<vmem>>, vector<16x256xbf16>
      %c0_10 = arith.constant 0 : index
      %c0_11 = arith.constant 0 : index
      %c0_12 = arith.constant 0 : index
      %19 = vector.load %arg6[%c0_10, %c0_11, %c0_12] : memref<1x256x256xbf16, #tpu.memory_space<vmem>>, vector<1x256x256xbf16>
      %20 = vector.shape_cast %19 : vector<1x256x256xbf16> to vector<256x256xbf16>
      %cst = arith.constant dense<0.000000e+00> : vector<16x256xf32>
      %21 = tpu.matmul %18, %20, %cst {dimension_numbers = #tpu.dot_dimension_numbers<[1], [0], [0], [1], [0, 0, 1, 1], [], []>} : vector<16x256xbf16>, vector<256x256xbf16>, vector<16x256xf32> -> vector<16x256xf32>
      %22 = vector.broadcast %17 : vector<16x1xf32> to vector<16x256xf32>
      %23 = arith.mulf %22, %21 : vector<16x256xf32>
      %24 = arith.addf %15, %23 : vector<16x256xf32>
      %c0_13 = arith.constant 0 : index
      %c0_14 = arith.constant 0 : index
      %25 = vector.load %arg12[%c0_13, %c0_14] : memref<16x256xf32, #tpu.memory_space<vmem>>, vector<16x256xf32>
      tpu.vector_store %arg12[%c0_13, %c0_14], %24 {strides = array<i32>} : memref<16x256xf32, #tpu.memory_space<vmem>>, vector<16x256xf32>,
    } else {
    }
    %c8_i32 = arith.constant 8 : i32
    %10 = arith.cmpi eq, %arg1, %c8_i32 : i32
    %c3_i32 = arith.constant 3 : i32
    %11 = arith.cmpi eq, %arg2, %c3_i32 : i32
    %12 = arith.andi %10, %11 : i1
    %13 = arith.extui %12 : i1 to i32
    %c0_i32_3 = arith.constant 0 : i32
    %14 = arith.cmpi ne, %13, %c0_i32_3 : i32
    scf.if %14 {
      %c0 = arith.constant 0 : index
      %c0_4 = arith.constant 0 : index
      %15 = vector.load %arg12[%c0, %c0_4] : memref<16x256xf32, #tpu.memory_space<vmem>>, vector<16x256xf32>
      %c0_5 = arith.constant 0 : index
      %c0_6 = arith.constant 0 : index
      %16 = vector.load %arg8[%c0_5, %c0_6] : memref<1x256xf32, #tpu.memory_space<vmem>>, vector<1x256xf32>
      %17 = vector.broadcast %16 : vector<1x256xf32> to vector<16x256xf32>
      %18 = arith.mulf %15, %17 : vector<16x256xf32>
      %c0_7 = arith.constant 0 : index
      %c0_8 = arith.constant 0 : index
      %19 = vector.load %arg9[%c0_7, %c0_8] : memref<1x256xf32, #tpu.memory_space<vmem>>, vector<1x256xf32>
      %20 = vector.broadcast %19 : vector<1x256xf32> to vector<16x256xf32>
      %21 = arith.addf %18, %20 : vector<16x256xf32>
      %c0_9 = arith.constant 0 : index
      %c0_10 = arith.constant 0 : index
      %22 = vector.load %arg10[%c0_9, %c0_10] : memref<16x256xbf16, #tpu.memory_space<vmem>>, vector<16x256xbf16>
      %23 = arith.extf %22 : vector<16x256xbf16> to vector<16x256xf32>
      %24 = arith.addf %21, %23 : vector<16x256xf32>
      %cst = arith.constant 0.000000e+00 : f32
      %25 = vector.broadcast %cst : f32 to vector<16x256xf32>
      %26 = arith.maximumf %24, %25 : vector<16x256xf32>
      %27 = arith.truncf %26 : vector<16x256xf32> to vector<16x256xbf16>
      %c0_11 = arith.constant 0 : index
      %c0_12 = arith.constant 0 : index
      %28 = vector.load %arg11[%c0_11, %c0_12] : memref<16x256xbf16, #tpu.memory_space<vmem>>, vector<16x256xbf16>
      tpu.vector_store %arg11[%c0_11, %c0_12], %27 {strides = array<i32>} : memref<16x256xbf16, #tpu.memory_space<vmem>>, vector<16x256xbf16>,
    } else {
    }
    return
  }
  func.func @transform_0(%arg0: i32, %arg1: i32, %arg2: i32, %arg3: memref<8xi32, #tpu.memory_space<smem>>, %arg4: memref<2xi32, #tpu.memory_space<smem>>) -> (i32, i32) {
    %c0_i32 = arith.constant 0 : i32
    return %arg0, %arg1 : i32, i32
  }
  func.func @transform_1(%arg0: i32, %arg1: i32, %arg2: i32, %arg3: memref<8xi32, #tpu.memory_space<smem>>, %arg4: memref<2xi32, #tpu.memory_space<smem>>) -> (i32, i32, i32) {
    %c4_i32 = arith.constant 4 : i32
    %0 = arith.muli %arg0, %c4_i32 : i32
    %1 = arith.addi %0, %arg2 : i32
    %2 = arith.index_cast %1 : i32 to index
    %3 = memref.load %arg3[%2] : memref<8xi32, #tpu.memory_space<smem>>
    %c0_i32 = arith.constant 0 : i32
    %c0_i32_0 = arith.constant 0 : i32
    return %3, %arg1, %c0_i32 : i32, i32, i32
  }
  func.func @transform_2(%arg0: i32, %arg1: i32, %arg2: i32, %arg3: memref<8xi32, #tpu.memory_space<smem>>, %arg4: memref<2xi32, #tpu.memory_space<smem>>) -> (i32, i32, i32) {
    %c4_i32 = arith.constant 4 : i32
    %0 = arith.muli %arg0, %c4_i32 : i32
    %1 = arith.addi %0, %arg2 : i32
    %2 = arith.index_cast %1 : i32 to index
    %3 = memref.load %arg3[%2] : memref<8xi32, #tpu.memory_space<smem>>
    %c0_i32 = arith.constant 0 : i32
    %c0_i32_0 = arith.constant 0 : i32
    return %3, %arg0, %c0_i32 : i32, i32, i32
  }
  func.func @transform_3(%arg0: i32, %arg1: i32, %arg2: i32, %arg3: memref<8xi32, #tpu.memory_space<smem>>, %arg4: memref<2xi32, #tpu.memory_space<smem>>) -> (i32, i32) {
    %c0_i32 = arith.constant 0 : i32
    %c0_i32_0 = arith.constant 0 : i32
    %c0_i32_1 = arith.constant 0 : i32
    return %c0_i32, %c0_i32_0 : i32, i32
  }
  func.func @transform_4(%arg0: i32, %arg1: i32, %arg2: i32, %arg3: memref<8xi32, #tpu.memory_space<smem>>, %arg4: memref<2xi32, #tpu.memory_space<smem>>) -> (i32, i32) {
    %c0_i32 = arith.constant 0 : i32
    %c0_i32_0 = arith.constant 0 : i32
    %c0_i32_1 = arith.constant 0 : i32
    return %c0_i32, %c0_i32_0 : i32, i32
  }
  func.func @transform_5(%arg0: i32, %arg1: i32, %arg2: i32, %arg3: memref<8xi32, #tpu.memory_space<smem>>, %arg4: memref<2xi32, #tpu.memory_space<smem>>) -> (i32, i32) {
    %c0_i32 = arith.constant 0 : i32
    %c0_i32_0 = arith.constant 0 : i32
    return %arg0, %c0_i32 : i32, i32
  }
  func.func @transform_6(%arg0: i32, %arg1: i32, %arg2: i32, %arg3: memref<8xi32, #tpu.memory_space<smem>>, %arg4: memref<2xi32, #tpu.memory_space<smem>>) -> (i32, i32) {
    %c0_i32 = arith.constant 0 : i32
    %c0_i32_0 = arith.constant 0 : i32
    return %arg0, %c0_i32 : i32, i32
  }
}

module attributes {stable_mosaic.version = 11 : i64} {
  func.func @_matmul_bn_kernel(%arg0: i32, %arg1: i32, %arg2: memref<16x128xbf16, #tpu.memory_space<vmem>>, %arg3: memref<128x256xbf16, #tpu.memory_space<vmem>>, %arg4: memref<1x256xf32, #tpu.memory_space<vmem>>, %arg5: memref<1x256xf32, #tpu.memory_space<vmem>>, %arg6: memref<16x256xbf16, #tpu.memory_space<vmem>>, %arg7: memref<16x256xf32, #tpu.memory_space<vmem>>) attributes {dimension_semantics = [#tpu.dimension_semantics<parallel>, #tpu.dimension_semantics<arbitrary>], iteration_bounds = array<i64: 2, 1>, scalar_prefetch = 0 : i64, scratch_operands = 1 : i64, tpu.core_type = #tpu.core_type<tc>, window_params = [{transform_indices = @transform_0, window_bounds = array<i64: 16, 128>}, {transform_indices = @transform_1, window_bounds = array<i64: 128, 256>}, {pipeline_mode = #tpu.pipeline_mode<synchronous>, transform_indices = @transform_2, window_bounds = array<i64: 1, 256>}, {pipeline_mode = #tpu.pipeline_mode<synchronous>, transform_indices = @transform_3, window_bounds = array<i64: 1, 256>}, {transform_indices = @transform_4, window_bounds = array<i64: 16, 256>}]} {
    %c0_i32 = arith.constant 0 : i32
    %0 = arith.cmpi eq, %arg1, %c0_i32 : i32
    %1 = arith.extui %0 : i1 to i32
    %c0_i32_0 = arith.constant 0 : i32
    %2 = arith.cmpi ne, %1, %c0_i32_0 : i32
    scf.if %2 {
      %cst_10 = arith.constant 0.000000e+00 : f32
      %12 = vector.broadcast %cst_10 : f32 to vector<16x256xf32>
      %c0_11 = arith.constant 0 : index
      %c0_12 = arith.constant 0 : index
      %13 = vector.load %arg7[%c0_11, %c0_12] : memref<16x256xf32, #tpu.memory_space<vmem>>, vector<16x256xf32>
      tpu.vector_store %arg7[%c0_11, %c0_12], %12 {strides = array<i32>} : memref<16x256xf32, #tpu.memory_space<vmem>>, vector<16x256xf32>,
    } else {
    }
    %c0 = arith.constant 0 : index
    %c0_1 = arith.constant 0 : index
    %3 = vector.load %arg7[%c0, %c0_1] : memref<16x256xf32, #tpu.memory_space<vmem>>, vector<16x256xf32>
    %c0_2 = arith.constant 0 : index
    %c0_3 = arith.constant 0 : index
    %4 = vector.load %arg2[%c0_2, %c0_3] : memref<16x128xbf16, #tpu.memory_space<vmem>>, vector<16x128xbf16>
    %c0_4 = arith.constant 0 : index
    %c0_5 = arith.constant 0 : index
    %5 = vector.load %arg3[%c0_4, %c0_5] : memref<128x256xbf16, #tpu.memory_space<vmem>>, vector<128x256xbf16>
    %cst = arith.constant dense<0.000000e+00> : vector<16x256xf32>
    %6 = tpu.matmul %4, %5, %cst {dimension_numbers = #tpu.dot_dimension_numbers<[1], [0], [0], [1], [0, 0, 1, 1], [], []>} : vector<16x128xbf16>, vector<128x256xbf16>, vector<16x256xf32> -> vector<16x256xf32>
    %7 = arith.addf %3, %6 : vector<16x256xf32>
    %c0_6 = arith.constant 0 : index
    %c0_7 = arith.constant 0 : index
    %8 = vector.load %arg7[%c0_6, %c0_7] : memref<16x256xf32, #tpu.memory_space<vmem>>, vector<16x256xf32>
    tpu.vector_store %arg7[%c0_6, %c0_7], %7 {strides = array<i32>} : memref<16x256xf32, #tpu.memory_space<vmem>>, vector<16x256xf32>,
    %c0_i32_8 = arith.constant 0 : i32
    %9 = arith.cmpi eq, %arg1, %c0_i32_8 : i32
    %10 = arith.extui %9 : i1 to i32
    %c0_i32_9 = arith.constant 0 : i32
    %11 = arith.cmpi ne, %10, %c0_i32_9 : i32
    scf.if %11 {
      %c0_10 = arith.constant 0 : index
      %c0_11 = arith.constant 0 : index
      %12 = vector.load %arg7[%c0_10, %c0_11] : memref<16x256xf32, #tpu.memory_space<vmem>>, vector<16x256xf32>
      %c0_12 = arith.constant 0 : index
      %c0_13 = arith.constant 0 : index
      %13 = vector.load %arg4[%c0_12, %c0_13] : memref<1x256xf32, #tpu.memory_space<vmem>>, vector<1x256xf32>
      %14 = vector.broadcast %13 : vector<1x256xf32> to vector<16x256xf32>
      %15 = arith.mulf %12, %14 : vector<16x256xf32>
      %c0_14 = arith.constant 0 : index
      %c0_15 = arith.constant 0 : index
      %16 = vector.load %arg5[%c0_14, %c0_15] : memref<1x256xf32, #tpu.memory_space<vmem>>, vector<1x256xf32>
      %17 = vector.broadcast %16 : vector<1x256xf32> to vector<16x256xf32>
      %18 = arith.addf %15, %17 : vector<16x256xf32>
      %19 = arith.truncf %18 : vector<16x256xf32> to vector<16x256xbf16>
      %c0_16 = arith.constant 0 : index
      %c0_17 = arith.constant 0 : index
      %20 = vector.load %arg6[%c0_16, %c0_17] : memref<16x256xbf16, #tpu.memory_space<vmem>>, vector<16x256xbf16>
      tpu.vector_store %arg6[%c0_16, %c0_17], %19 {strides = array<i32>} : memref<16x256xbf16, #tpu.memory_space<vmem>>, vector<16x256xbf16>,
    } else {
    }
    return
  }
  func.func @transform_0(%arg0: i32, %arg1: i32) -> (i32, i32) {
    %c0_i32 = arith.constant 0 : i32
    return %arg0, %arg1 : i32, i32
  }
  func.func @transform_1(%arg0: i32, %arg1: i32) -> (i32, i32) {
    %c0_i32 = arith.constant 0 : i32
    %c0_i32_0 = arith.constant 0 : i32
    return %arg1, %c0_i32 : i32, i32
  }
  func.func @transform_2(%arg0: i32, %arg1: i32) -> (i32, i32) {
    %c0_i32 = arith.constant 0 : i32
    %c0_i32_0 = arith.constant 0 : i32
    %c0_i32_1 = arith.constant 0 : i32
    return %c0_i32, %c0_i32_0 : i32, i32
  }
  func.func @transform_3(%arg0: i32, %arg1: i32) -> (i32, i32) {
    %c0_i32 = arith.constant 0 : i32
    %c0_i32_0 = arith.constant 0 : i32
    %c0_i32_1 = arith.constant 0 : i32
    return %c0_i32, %c0_i32_0 : i32, i32
  }
  func.func @transform_4(%arg0: i32, %arg1: i32) -> (i32, i32) {
    %c0_i32 = arith.constant 0 : i32
    %c0_i32_0 = arith.constant 0 : i32
    return %arg0, %c0_i32 : i32, i32
  }
}

module attributes {stable_mosaic.version = 11 : i64} {
  func.func @_matmul_bn_kernel(%arg0: i32, %arg1: i32, %arg2: memref<16x256xbf16, #tpu.memory_space<vmem>>, %arg3: memref<256x256xbf16, #tpu.memory_space<vmem>>, %arg4: memref<1x256xf32, #tpu.memory_space<vmem>>, %arg5: memref<1x256xf32, #tpu.memory_space<vmem>>, %arg6: memref<16x256xbf16, #tpu.memory_space<vmem>>, %arg7: memref<16x256xf32, #tpu.memory_space<vmem>>) attributes {dimension_semantics = [#tpu.dimension_semantics<parallel>, #tpu.dimension_semantics<arbitrary>], iteration_bounds = array<i64: 2, 9>, scalar_prefetch = 0 : i64, scratch_operands = 1 : i64, tpu.core_type = #tpu.core_type<tc>, window_params = [{transform_indices = @transform_0, window_bounds = array<i64: 16, 256>}, {transform_indices = @transform_1, window_bounds = array<i64: 256, 256>}, {pipeline_mode = #tpu.pipeline_mode<synchronous>, transform_indices = @transform_2, window_bounds = array<i64: 1, 256>}, {pipeline_mode = #tpu.pipeline_mode<synchronous>, transform_indices = @transform_3, window_bounds = array<i64: 1, 256>}, {transform_indices = @transform_4, window_bounds = array<i64: 16, 256>}]} {
    %c0_i32 = arith.constant 0 : i32
    %0 = arith.cmpi eq, %arg1, %c0_i32 : i32
    %1 = arith.extui %0 : i1 to i32
    %c0_i32_0 = arith.constant 0 : i32
    %2 = arith.cmpi ne, %1, %c0_i32_0 : i32
    scf.if %2 {
      %cst_9 = arith.constant 0.000000e+00 : f32
      %12 = vector.broadcast %cst_9 : f32 to vector<16x256xf32>
      %c0_10 = arith.constant 0 : index
      %c0_11 = arith.constant 0 : index
      %13 = vector.load %arg7[%c0_10, %c0_11] : memref<16x256xf32, #tpu.memory_space<vmem>>, vector<16x256xf32>
      tpu.vector_store %arg7[%c0_10, %c0_11], %12 {strides = array<i32>} : memref<16x256xf32, #tpu.memory_space<vmem>>, vector<16x256xf32>,
    } else {
    }
    %c0 = arith.constant 0 : index
    %c0_1 = arith.constant 0 : index
    %3 = vector.load %arg7[%c0, %c0_1] : memref<16x256xf32, #tpu.memory_space<vmem>>, vector<16x256xf32>
    %c0_2 = arith.constant 0 : index
    %c0_3 = arith.constant 0 : index
    %4 = vector.load %arg2[%c0_2, %c0_3] : memref<16x256xbf16, #tpu.memory_space<vmem>>, vector<16x256xbf16>
    %c0_4 = arith.constant 0 : index
    %c0_5 = arith.constant 0 : index
    %5 = vector.load %arg3[%c0_4, %c0_5] : memref<256x256xbf16, #tpu.memory_space<vmem>>, vector<256x256xbf16>
    %cst = arith.constant dense<0.000000e+00> : vector<16x256xf32>
    %6 = tpu.matmul %4, %5, %cst {dimension_numbers = #tpu.dot_dimension_numbers<[1], [0], [0], [1], [0, 0, 1, 1], [], []>} : vector<16x256xbf16>, vector<256x256xbf16>, vector<16x256xf32> -> vector<16x256xf32>
    %7 = arith.addf %3, %6 : vector<16x256xf32>
    %c0_6 = arith.constant 0 : index
    %c0_7 = arith.constant 0 : index
    %8 = vector.load %arg7[%c0_6, %c0_7] : memref<16x256xf32, #tpu.memory_space<vmem>>, vector<16x256xf32>
    tpu.vector_store %arg7[%c0_6, %c0_7], %7 {strides = array<i32>} : memref<16x256xf32, #tpu.memory_space<vmem>>, vector<16x256xf32>,
    %c8_i32 = arith.constant 8 : i32
    %9 = arith.cmpi eq, %arg1, %c8_i32 : i32
    %10 = arith.extui %9 : i1 to i32
    %c0_i32_8 = arith.constant 0 : i32
    %11 = arith.cmpi ne, %10, %c0_i32_8 : i32
    scf.if %11 {
      %c0_9 = arith.constant 0 : index
      %c0_10 = arith.constant 0 : index
      %12 = vector.load %arg7[%c0_9, %c0_10] : memref<16x256xf32, #tpu.memory_space<vmem>>, vector<16x256xf32>
      %c0_11 = arith.constant 0 : index
      %c0_12 = arith.constant 0 : index
      %13 = vector.load %arg4[%c0_11, %c0_12] : memref<1x256xf32, #tpu.memory_space<vmem>>, vector<1x256xf32>
      %14 = vector.broadcast %13 : vector<1x256xf32> to vector<16x256xf32>
      %15 = arith.mulf %12, %14 : vector<16x256xf32>
      %c0_13 = arith.constant 0 : index
      %c0_14 = arith.constant 0 : index
      %16 = vector.load %arg5[%c0_13, %c0_14] : memref<1x256xf32, #tpu.memory_space<vmem>>, vector<1x256xf32>
      %17 = vector.broadcast %16 : vector<1x256xf32> to vector<16x256xf32>
      %18 = arith.addf %15, %17 : vector<16x256xf32>
      %cst_15 = arith.constant 0.000000e+00 : f32
      %19 = vector.broadcast %cst_15 : f32 to vector<16x256xf32>
      %20 = arith.maximumf %18, %19 : vector<16x256xf32>
      %21 = arith.truncf %20 : vector<16x256xf32> to vector<16x256xbf16>
      %c0_16 = arith.constant 0 : index
      %c0_17 = arith.constant 0 : index
      %22 = vector.load %arg6[%c0_16, %c0_17] : memref<16x256xbf16, #tpu.memory_space<vmem>>, vector<16x256xbf16>
      tpu.vector_store %arg6[%c0_16, %c0_17], %21 {strides = array<i32>} : memref<16x256xbf16, #tpu.memory_space<vmem>>, vector<16x256xbf16>,
    } else {
    }
    return
  }
  func.func @transform_0(%arg0: i32, %arg1: i32) -> (i32, i32) {
    %c0_i32 = arith.constant 0 : i32
    return %arg0, %arg1 : i32, i32
  }
  func.func @transform_1(%arg0: i32, %arg1: i32) -> (i32, i32) {
    %c0_i32 = arith.constant 0 : i32
    %c0_i32_0 = arith.constant 0 : i32
    return %arg1, %c0_i32 : i32, i32
  }
  func.func @transform_2(%arg0: i32, %arg1: i32) -> (i32, i32) {
    %c0_i32 = arith.constant 0 : i32
    %c0_i32_0 = arith.constant 0 : i32
    %c0_i32_1 = arith.constant 0 : i32
    return %c0_i32, %c0_i32_0 : i32, i32
  }
  func.func @transform_3(%arg0: i32, %arg1: i32) -> (i32, i32) {
    %c0_i32 = arith.constant 0 : i32
    %c0_i32_0 = arith.constant 0 : i32
    %c0_i32_1 = arith.constant 0 : i32
    return %c0_i32, %c0_i32_0 : i32, i32
  }
  func.func @transform_4(%arg0: i32, %arg1: i32) -> (i32, i32) {
    %c0_i32 = arith.constant 0 : i32
    %c0_i32_0 = arith.constant 0 : i32
    return %arg0, %c0_i32 : i32, i32
  }
}

module attributes {stable_mosaic.version = 11 : i64} {
  func.func @_matmul_bn_kernel(%arg0: i32, %arg1: i32, %arg2: memref<16x256xbf16, #tpu.memory_space<vmem>>, %arg3: memref<256x512xbf16, #tpu.memory_space<vmem>>, %arg4: memref<1x512xf32, #tpu.memory_space<vmem>>, %arg5: memref<1x512xf32, #tpu.memory_space<vmem>>, %arg6: memref<16x512xbf16, #tpu.memory_space<vmem>>, %arg7: memref<16x512xf32, #tpu.memory_space<vmem>>) attributes {dimension_semantics = [#tpu.dimension_semantics<parallel>, #tpu.dimension_semantics<arbitrary>], iteration_bounds = array<i64: 1, 9>, scalar_prefetch = 0 : i64, scratch_operands = 1 : i64, tpu.core_type = #tpu.core_type<tc>, window_params = [{transform_indices = @transform_0, window_bounds = array<i64: 16, 256>}, {transform_indices = @transform_1, window_bounds = array<i64: 256, 512>}, {pipeline_mode = #tpu.pipeline_mode<synchronous>, transform_indices = @transform_2, window_bounds = array<i64: 1, 512>}, {pipeline_mode = #tpu.pipeline_mode<synchronous>, transform_indices = @transform_3, window_bounds = array<i64: 1, 512>}, {transform_indices = @transform_4, window_bounds = array<i64: 16, 512>}]} {
    %c0_i32 = arith.constant 0 : i32
    %0 = arith.cmpi eq, %arg1, %c0_i32 : i32
    %1 = arith.extui %0 : i1 to i32
    %c0_i32_0 = arith.constant 0 : i32
    %2 = arith.cmpi ne, %1, %c0_i32_0 : i32
    scf.if %2 {
      %cst_9 = arith.constant 0.000000e+00 : f32
      %12 = vector.broadcast %cst_9 : f32 to vector<16x512xf32>
      %c0_10 = arith.constant 0 : index
      %c0_11 = arith.constant 0 : index
      %13 = vector.load %arg7[%c0_10, %c0_11] : memref<16x512xf32, #tpu.memory_space<vmem>>, vector<16x512xf32>
      tpu.vector_store %arg7[%c0_10, %c0_11], %12 {strides = array<i32>} : memref<16x512xf32, #tpu.memory_space<vmem>>, vector<16x512xf32>,
    } else {
    }
    %c0 = arith.constant 0 : index
    %c0_1 = arith.constant 0 : index
    %3 = vector.load %arg7[%c0, %c0_1] : memref<16x512xf32, #tpu.memory_space<vmem>>, vector<16x512xf32>
    %c0_2 = arith.constant 0 : index
    %c0_3 = arith.constant 0 : index
    %4 = vector.load %arg2[%c0_2, %c0_3] : memref<16x256xbf16, #tpu.memory_space<vmem>>, vector<16x256xbf16>
    %c0_4 = arith.constant 0 : index
    %c0_5 = arith.constant 0 : index
    %5 = vector.load %arg3[%c0_4, %c0_5] : memref<256x512xbf16, #tpu.memory_space<vmem>>, vector<256x512xbf16>
    %cst = arith.constant dense<0.000000e+00> : vector<16x512xf32>
    %6 = tpu.matmul %4, %5, %cst {dimension_numbers = #tpu.dot_dimension_numbers<[1], [0], [0], [1], [0, 0, 1, 1], [], []>} : vector<16x256xbf16>, vector<256x512xbf16>, vector<16x512xf32> -> vector<16x512xf32>
    %7 = arith.addf %3, %6 : vector<16x512xf32>
    %c0_6 = arith.constant 0 : index
    %c0_7 = arith.constant 0 : index
    %8 = vector.load %arg7[%c0_6, %c0_7] : memref<16x512xf32, #tpu.memory_space<vmem>>, vector<16x512xf32>
    tpu.vector_store %arg7[%c0_6, %c0_7], %7 {strides = array<i32>} : memref<16x512xf32, #tpu.memory_space<vmem>>, vector<16x512xf32>,
    %c8_i32 = arith.constant 8 : i32
    %9 = arith.cmpi eq, %arg1, %c8_i32 : i32
    %10 = arith.extui %9 : i1 to i32
    %c0_i32_8 = arith.constant 0 : i32
    %11 = arith.cmpi ne, %10, %c0_i32_8 : i32
    scf.if %11 {
      %c0_9 = arith.constant 0 : index
      %c0_10 = arith.constant 0 : index
      %12 = vector.load %arg7[%c0_9, %c0_10] : memref<16x512xf32, #tpu.memory_space<vmem>>, vector<16x512xf32>
      %c0_11 = arith.constant 0 : index
      %c0_12 = arith.constant 0 : index
      %13 = vector.load %arg4[%c0_11, %c0_12] : memref<1x512xf32, #tpu.memory_space<vmem>>, vector<1x512xf32>
      %14 = vector.broadcast %13 : vector<1x512xf32> to vector<16x512xf32>
      %15 = arith.mulf %12, %14 : vector<16x512xf32>
      %c0_13 = arith.constant 0 : index
      %c0_14 = arith.constant 0 : index
      %16 = vector.load %arg5[%c0_13, %c0_14] : memref<1x512xf32, #tpu.memory_space<vmem>>, vector<1x512xf32>
      %17 = vector.broadcast %16 : vector<1x512xf32> to vector<16x512xf32>
      %18 = arith.addf %15, %17 : vector<16x512xf32>
      %cst_15 = arith.constant 0.000000e+00 : f32
      %19 = vector.broadcast %cst_15 : f32 to vector<16x512xf32>
      %20 = arith.maximumf %18, %19 : vector<16x512xf32>
      %21 = arith.truncf %20 : vector<16x512xf32> to vector<16x512xbf16>
      %c0_16 = arith.constant 0 : index
      %c0_17 = arith.constant 0 : index
      %22 = vector.load %arg6[%c0_16, %c0_17] : memref<16x512xbf16, #tpu.memory_space<vmem>>, vector<16x512xbf16>
      tpu.vector_store %arg6[%c0_16, %c0_17], %21 {strides = array<i32>} : memref<16x512xbf16, #tpu.memory_space<vmem>>, vector<16x512xbf16>,
    } else {
    }
    return
  }
  func.func @transform_0(%arg0: i32, %arg1: i32) -> (i32, i32) {
    %c0_i32 = arith.constant 0 : i32
    return %arg0, %arg1 : i32, i32
  }
  func.func @transform_1(%arg0: i32, %arg1: i32) -> (i32, i32) {
    %c0_i32 = arith.constant 0 : i32
    %c0_i32_0 = arith.constant 0 : i32
    return %arg1, %c0_i32 : i32, i32
  }
  func.func @transform_2(%arg0: i32, %arg1: i32) -> (i32, i32) {
    %c0_i32 = arith.constant 0 : i32
    %c0_i32_0 = arith.constant 0 : i32
    %c0_i32_1 = arith.constant 0 : i32
    return %c0_i32, %c0_i32_0 : i32, i32
  }
  func.func @transform_3(%arg0: i32, %arg1: i32) -> (i32, i32) {
    %c0_i32 = arith.constant 0 : i32
    %c0_i32_0 = arith.constant 0 : i32
    %c0_i32_1 = arith.constant 0 : i32
    return %c0_i32, %c0_i32_0 : i32, i32
  }
  func.func @transform_4(%arg0: i32, %arg1: i32) -> (i32, i32) {
    %c0_i32 = arith.constant 0 : i32
    %c0_i32_0 = arith.constant 0 : i32
    return %arg0, %c0_i32 : i32, i32
  }
}

module attributes {stable_mosaic.version = 11 : i64} {
  func.func @_matmul_bn_kernel(%arg0: i32, %arg1: i32, %arg2: memref<16x256xbf16, #tpu.memory_space<vmem>>, %arg3: memref<256x512xbf16, #tpu.memory_space<vmem>>, %arg4: memref<1x512xf32, #tpu.memory_space<vmem>>, %arg5: memref<1x512xf32, #tpu.memory_space<vmem>>, %arg6: memref<16x512xbf16, #tpu.memory_space<vmem>>, %arg7: memref<16x512xf32, #tpu.memory_space<vmem>>) attributes {dimension_semantics = [#tpu.dimension_semantics<parallel>, #tpu.dimension_semantics<arbitrary>], iteration_bounds = array<i64: 1, 1>, scalar_prefetch = 0 : i64, scratch_operands = 1 : i64, tpu.core_type = #tpu.core_type<tc>, window_params = [{transform_indices = @transform_0, window_bounds = array<i64: 16, 256>}, {transform_indices = @transform_1, window_bounds = array<i64: 256, 512>}, {pipeline_mode = #tpu.pipeline_mode<synchronous>, transform_indices = @transform_2, window_bounds = array<i64: 1, 512>}, {pipeline_mode = #tpu.pipeline_mode<synchronous>, transform_indices = @transform_3, window_bounds = array<i64: 1, 512>}, {transform_indices = @transform_4, window_bounds = array<i64: 16, 512>}]} {
    %c0_i32 = arith.constant 0 : i32
    %0 = arith.cmpi eq, %arg1, %c0_i32 : i32
    %1 = arith.extui %0 : i1 to i32
    %c0_i32_0 = arith.constant 0 : i32
    %2 = arith.cmpi ne, %1, %c0_i32_0 : i32
    scf.if %2 {
      %cst_10 = arith.constant 0.000000e+00 : f32
      %12 = vector.broadcast %cst_10 : f32 to vector<16x512xf32>
      %c0_11 = arith.constant 0 : index
      %c0_12 = arith.constant 0 : index
      %13 = vector.load %arg7[%c0_11, %c0_12] : memref<16x512xf32, #tpu.memory_space<vmem>>, vector<16x512xf32>
      tpu.vector_store %arg7[%c0_11, %c0_12], %12 {strides = array<i32>} : memref<16x512xf32, #tpu.memory_space<vmem>>, vector<16x512xf32>,
    } else {
    }
    %c0 = arith.constant 0 : index
    %c0_1 = arith.constant 0 : index
    %3 = vector.load %arg7[%c0, %c0_1] : memref<16x512xf32, #tpu.memory_space<vmem>>, vector<16x512xf32>
    %c0_2 = arith.constant 0 : index
    %c0_3 = arith.constant 0 : index
    %4 = vector.load %arg2[%c0_2, %c0_3] : memref<16x256xbf16, #tpu.memory_space<vmem>>, vector<16x256xbf16>
    %c0_4 = arith.constant 0 : index
    %c0_5 = arith.constant 0 : index
    %5 = vector.load %arg3[%c0_4, %c0_5] : memref<256x512xbf16, #tpu.memory_space<vmem>>, vector<256x512xbf16>
    %cst = arith.constant dense<0.000000e+00> : vector<16x512xf32>
    %6 = tpu.matmul %4, %5, %cst {dimension_numbers = #tpu.dot_dimension_numbers<[1], [0], [0], [1], [0, 0, 1, 1], [], []>} : vector<16x256xbf16>, vector<256x512xbf16>, vector<16x512xf32> -> vector<16x512xf32>
    %7 = arith.addf %3, %6 : vector<16x512xf32>
    %c0_6 = arith.constant 0 : index
    %c0_7 = arith.constant 0 : index
    %8 = vector.load %arg7[%c0_6, %c0_7] : memref<16x512xf32, #tpu.memory_space<vmem>>, vector<16x512xf32>
    tpu.vector_store %arg7[%c0_6, %c0_7], %7 {strides = array<i32>} : memref<16x512xf32, #tpu.memory_space<vmem>>, vector<16x512xf32>,
    %c0_i32_8 = arith.constant 0 : i32
    %9 = arith.cmpi eq, %arg1, %c0_i32_8 : i32
    %10 = arith.extui %9 : i1 to i32
    %c0_i32_9 = arith.constant 0 : i32
    %11 = arith.cmpi ne, %10, %c0_i32_9 : i32
    scf.if %11 {
      %c0_10 = arith.constant 0 : index
      %c0_11 = arith.constant 0 : index
      %12 = vector.load %arg7[%c0_10, %c0_11] : memref<16x512xf32, #tpu.memory_space<vmem>>, vector<16x512xf32>
      %c0_12 = arith.constant 0 : index
      %c0_13 = arith.constant 0 : index
      %13 = vector.load %arg4[%c0_12, %c0_13] : memref<1x512xf32, #tpu.memory_space<vmem>>, vector<1x512xf32>
      %14 = vector.broadcast %13 : vector<1x512xf32> to vector<16x512xf32>
      %15 = arith.mulf %12, %14 : vector<16x512xf32>
      %c0_14 = arith.constant 0 : index
      %c0_15 = arith.constant 0 : index
      %16 = vector.load %arg5[%c0_14, %c0_15] : memref<1x512xf32, #tpu.memory_space<vmem>>, vector<1x512xf32>
      %17 = vector.broadcast %16 : vector<1x512xf32> to vector<16x512xf32>
      %18 = arith.addf %15, %17 : vector<16x512xf32>
      %19 = arith.truncf %18 : vector<16x512xf32> to vector<16x512xbf16>
      %c0_16 = arith.constant 0 : index
      %c0_17 = arith.constant 0 : index
      %20 = vector.load %arg6[%c0_16, %c0_17] : memref<16x512xbf16, #tpu.memory_space<vmem>>, vector<16x512xbf16>
      tpu.vector_store %arg6[%c0_16, %c0_17], %19 {strides = array<i32>} : memref<16x512xbf16, #tpu.memory_space<vmem>>, vector<16x512xbf16>,
    } else {
    }
    return
  }
  func.func @transform_0(%arg0: i32, %arg1: i32) -> (i32, i32) {
    %c0_i32 = arith.constant 0 : i32
    return %arg0, %arg1 : i32, i32
  }
  func.func @transform_1(%arg0: i32, %arg1: i32) -> (i32, i32) {
    %c0_i32 = arith.constant 0 : i32
    %c0_i32_0 = arith.constant 0 : i32
    return %arg1, %c0_i32 : i32, i32
  }
  func.func @transform_2(%arg0: i32, %arg1: i32) -> (i32, i32) {
    %c0_i32 = arith.constant 0 : i32
    %c0_i32_0 = arith.constant 0 : i32
    %c0_i32_1 = arith.constant 0 : i32
    return %c0_i32, %c0_i32_0 : i32, i32
  }
  func.func @transform_3(%arg0: i32, %arg1: i32) -> (i32, i32) {
    %c0_i32 = arith.constant 0 : i32
    %c0_i32_0 = arith.constant 0 : i32
    %c0_i32_1 = arith.constant 0 : i32
    return %c0_i32, %c0_i32_0 : i32, i32
  }
  func.func @transform_4(%arg0: i32, %arg1: i32) -> (i32, i32) {
    %c0_i32 = arith.constant 0 : i32
    %c0_i32_0 = arith.constant 0 : i32
    return %arg0, %c0_i32 : i32, i32
  }
}

module attributes {stable_mosaic.version = 11 : i64} {
  func.func @_moe_gemm_kernel(%arg0: i32, %arg1: i32, %arg2: i32, %arg3: memref<4xi32, #tpu.memory_space<smem>>, %arg4: memref<1xi32, #tpu.memory_space<smem>>, %arg5: memref<16x256xbf16, #tpu.memory_space<vmem>>, %arg6: memref<1x256x512xbf16, #tpu.memory_space<vmem>>, %arg7: memref<1x16x1xf32, #tpu.memory_space<vmem>>, %arg8: memref<1x512xf32, #tpu.memory_space<vmem>>, %arg9: memref<1x512xf32, #tpu.memory_space<vmem>>, %arg10: memref<16x512xbf16, #tpu.memory_space<vmem>>, %arg11: memref<16x512xbf16, #tpu.memory_space<vmem>>, %arg12: memref<16x512xf32, #tpu.memory_space<vmem>>) attributes {dimension_semantics = [#tpu.dimension_semantics<parallel>, #tpu.dimension_semantics<arbitrary>, #tpu.dimension_semantics<arbitrary>], iteration_bounds = array<i64: 1, 18, 4>, scalar_prefetch = 2 : i64, scratch_operands = 1 : i64, tpu.core_type = #tpu.core_type<tc>, window_params = [{transform_indices = @transform_0, window_bounds = array<i64: 16, 256>}, {transform_indices = @transform_1, window_bounds = array<i64: 1, 256, 512>}, {transform_indices = @transform_2, window_bounds = array<i64: 1, 16, 1>}, {pipeline_mode = #tpu.pipeline_mode<synchronous>, transform_indices = @transform_3, window_bounds = array<i64: 1, 512>}, {pipeline_mode = #tpu.pipeline_mode<synchronous>, transform_indices = @transform_4, window_bounds = array<i64: 1, 512>}, {transform_indices = @transform_5, window_bounds = array<i64: 16, 512>}, {transform_indices = @transform_6, window_bounds = array<i64: 16, 512>}]} {
    %c0_i32 = arith.constant 0 : i32
    %0 = arith.cmpi eq, %arg1, %c0_i32 : i32
    %c0_i32_0 = arith.constant 0 : i32
    %1 = arith.cmpi eq, %arg2, %c0_i32_0 : i32
    %2 = arith.andi %0, %1 : i1
    %3 = arith.extui %2 : i1 to i32
    %c0_i32_1 = arith.constant 0 : i32
    %4 = arith.cmpi ne, %3, %c0_i32_1 : i32
    scf.if %4 {
      %cst = arith.constant 0.000000e+00 : f32
      %15 = vector.broadcast %cst : f32 to vector<16x512xf32>
      %c0 = arith.constant 0 : index
      %c0_4 = arith.constant 0 : index
      %16 = vector.load %arg12[%c0, %c0_4] : memref<16x512xf32, #tpu.memory_space<vmem>>, vector<16x512xf32>
      tpu.vector_store %arg12[%c0, %c0_4], %15 {strides = array<i32>} : memref<16x512xf32, #tpu.memory_space<vmem>>, vector<16x512xf32>,
    } else {
    }
    %5 = arith.index_cast %arg0 : i32 to index
    %6 = memref.load %arg4[%5] : memref<1xi32, #tpu.memory_space<smem>>
    %7 = arith.cmpi slt, %arg2, %6 : i32
    %8 = arith.extui %7 : i1 to i32
    %c0_i32_2 = arith.constant 0 : i32
    %9 = arith.cmpi ne, %8, %c0_i32_2 : i32
    scf.if %9 {
      %c0 = arith.constant 0 : index
      %c0_4 = arith.constant 0 : index
      %15 = vector.load %arg12[%c0, %c0_4] : memref<16x512xf32, #tpu.memory_space<vmem>>, vector<16x512xf32>
      %c0_5 = arith.constant 0 : index
      %c0_6 = arith.constant 0 : index
      %c0_7 = arith.constant 0 : index
      %16 = vector.load %arg7[%c0_5, %c0_6, %c0_7] : memref<1x16x1xf32, #tpu.memory_space<vmem>>, vector<1x16x1xf32>
      %17 = vector.shape_cast %16 : vector<1x16x1xf32> to vector<16x1xf32>
      %c0_8 = arith.constant 0 : index
      %c0_9 = arith.constant 0 : index
      %18 = vector.load %arg5[%c0_8, %c0_9] : memref<16x256xbf16, #tpu.memory_space<vmem>>, vector<16x256xbf16>
      %c0_10 = arith.constant 0 : index
      %c0_11 = arith.constant 0 : index
      %c0_12 = arith.constant 0 : index
      %19 = vector.load %arg6[%c0_10, %c0_11, %c0_12] : memref<1x256x512xbf16, #tpu.memory_space<vmem>>, vector<1x256x512xbf16>
      %20 = vector.shape_cast %19 : vector<1x256x512xbf16> to vector<256x512xbf16>
      %cst = arith.constant dense<0.000000e+00> : vector<16x512xf32>
      %21 = tpu.matmul %18, %20, %cst {dimension_numbers = #tpu.dot_dimension_numbers<[1], [0], [0], [1], [0, 0, 1, 1], [], []>} : vector<16x256xbf16>, vector<256x512xbf16>, vector<16x512xf32> -> vector<16x512xf32>
      %22 = vector.broadcast %17 : vector<16x1xf32> to vector<16x512xf32>
      %23 = arith.mulf %22, %21 : vector<16x512xf32>
      %24 = arith.addf %15, %23 : vector<16x512xf32>
      %c0_13 = arith.constant 0 : index
      %c0_14 = arith.constant 0 : index
      %25 = vector.load %arg12[%c0_13, %c0_14] : memref<16x512xf32, #tpu.memory_space<vmem>>, vector<16x512xf32>
      tpu.vector_store %arg12[%c0_13, %c0_14], %24 {strides = array<i32>} : memref<16x512xf32, #tpu.memory_space<vmem>>, vector<16x512xf32>,
    } else {
    }
    %c17_i32 = arith.constant 17 : i32
    %10 = arith.cmpi eq, %arg1, %c17_i32 : i32
    %c3_i32 = arith.constant 3 : i32
    %11 = arith.cmpi eq, %arg2, %c3_i32 : i32
    %12 = arith.andi %10, %11 : i1
    %13 = arith.extui %12 : i1 to i32
    %c0_i32_3 = arith.constant 0 : i32
    %14 = arith.cmpi ne, %13, %c0_i32_3 : i32
    scf.if %14 {
      %c0 = arith.constant 0 : index
      %c0_4 = arith.constant 0 : index
      %15 = vector.load %arg12[%c0, %c0_4] : memref<16x512xf32, #tpu.memory_space<vmem>>, vector<16x512xf32>
      %c0_5 = arith.constant 0 : index
      %c0_6 = arith.constant 0 : index
      %16 = vector.load %arg8[%c0_5, %c0_6] : memref<1x512xf32, #tpu.memory_space<vmem>>, vector<1x512xf32>
      %17 = vector.broadcast %16 : vector<1x512xf32> to vector<16x512xf32>
      %18 = arith.mulf %15, %17 : vector<16x512xf32>
      %c0_7 = arith.constant 0 : index
      %c0_8 = arith.constant 0 : index
      %19 = vector.load %arg9[%c0_7, %c0_8] : memref<1x512xf32, #tpu.memory_space<vmem>>, vector<1x512xf32>
      %20 = vector.broadcast %19 : vector<1x512xf32> to vector<16x512xf32>
      %21 = arith.addf %18, %20 : vector<16x512xf32>
      %c0_9 = arith.constant 0 : index
      %c0_10 = arith.constant 0 : index
      %22 = vector.load %arg10[%c0_9, %c0_10] : memref<16x512xbf16, #tpu.memory_space<vmem>>, vector<16x512xbf16>
      %23 = arith.extf %22 : vector<16x512xbf16> to vector<16x512xf32>
      %24 = arith.addf %21, %23 : vector<16x512xf32>
      %cst = arith.constant 0.000000e+00 : f32
      %25 = vector.broadcast %cst : f32 to vector<16x512xf32>
      %26 = arith.maximumf %24, %25 : vector<16x512xf32>
      %27 = arith.truncf %26 : vector<16x512xf32> to vector<16x512xbf16>
      %c0_11 = arith.constant 0 : index
      %c0_12 = arith.constant 0 : index
      %28 = vector.load %arg11[%c0_11, %c0_12] : memref<16x512xbf16, #tpu.memory_space<vmem>>, vector<16x512xbf16>
      tpu.vector_store %arg11[%c0_11, %c0_12], %27 {strides = array<i32>} : memref<16x512xbf16, #tpu.memory_space<vmem>>, vector<16x512xbf16>,
    } else {
    }
    return
  }
  func.func @transform_0(%arg0: i32, %arg1: i32, %arg2: i32, %arg3: memref<4xi32, #tpu.memory_space<smem>>, %arg4: memref<1xi32, #tpu.memory_space<smem>>) -> (i32, i32) {
    %c0_i32 = arith.constant 0 : i32
    return %arg0, %arg1 : i32, i32
  }
  func.func @transform_1(%arg0: i32, %arg1: i32, %arg2: i32, %arg3: memref<4xi32, #tpu.memory_space<smem>>, %arg4: memref<1xi32, #tpu.memory_space<smem>>) -> (i32, i32, i32) {
    %c4_i32 = arith.constant 4 : i32
    %0 = arith.muli %arg0, %c4_i32 : i32
    %1 = arith.addi %0, %arg2 : i32
    %2 = arith.index_cast %1 : i32 to index
    %3 = memref.load %arg3[%2] : memref<4xi32, #tpu.memory_space<smem>>
    %c0_i32 = arith.constant 0 : i32
    %c0_i32_0 = arith.constant 0 : i32
    return %3, %arg1, %c0_i32 : i32, i32, i32
  }
  func.func @transform_2(%arg0: i32, %arg1: i32, %arg2: i32, %arg3: memref<4xi32, #tpu.memory_space<smem>>, %arg4: memref<1xi32, #tpu.memory_space<smem>>) -> (i32, i32, i32) {
    %c4_i32 = arith.constant 4 : i32
    %0 = arith.muli %arg0, %c4_i32 : i32
    %1 = arith.addi %0, %arg2 : i32
    %2 = arith.index_cast %1 : i32 to index
    %3 = memref.load %arg3[%2] : memref<4xi32, #tpu.memory_space<smem>>
    %c0_i32 = arith.constant 0 : i32
    %c0_i32_0 = arith.constant 0 : i32
    return %3, %arg0, %c0_i32 : i32, i32, i32
  }
  func.func @transform_3(%arg0: i32, %arg1: i32, %arg2: i32, %arg3: memref<4xi32, #tpu.memory_space<smem>>, %arg4: memref<1xi32, #tpu.memory_space<smem>>) -> (i32, i32) {
    %c0_i32 = arith.constant 0 : i32
    %c0_i32_0 = arith.constant 0 : i32
    %c0_i32_1 = arith.constant 0 : i32
    return %c0_i32, %c0_i32_0 : i32, i32
  }
  func.func @transform_4(%arg0: i32, %arg1: i32, %arg2: i32, %arg3: memref<4xi32, #tpu.memory_space<smem>>, %arg4: memref<1xi32, #tpu.memory_space<smem>>) -> (i32, i32) {
    %c0_i32 = arith.constant 0 : i32
    %c0_i32_0 = arith.constant 0 : i32
    %c0_i32_1 = arith.constant 0 : i32
    return %c0_i32, %c0_i32_0 : i32, i32
  }
  func.func @transform_5(%arg0: i32, %arg1: i32, %arg2: i32, %arg3: memref<4xi32, #tpu.memory_space<smem>>, %arg4: memref<1xi32, #tpu.memory_space<smem>>) -> (i32, i32) {
    %c0_i32 = arith.constant 0 : i32
    %c0_i32_0 = arith.constant 0 : i32
    return %arg0, %c0_i32 : i32, i32
  }
  func.func @transform_6(%arg0: i32, %arg1: i32, %arg2: i32, %arg3: memref<4xi32, #tpu.memory_space<smem>>, %arg4: memref<1xi32, #tpu.memory_space<smem>>) -> (i32, i32) {
    %c0_i32 = arith.constant 0 : i32
    %c0_i32_0 = arith.constant 0 : i32
    return %arg0, %c0_i32 : i32, i32
  }
}

module attributes {stable_mosaic.version = 11 : i64} {
  func.func @_matmul_bn_kernel(%arg0: i32, %arg1: i32, %arg2: memref<16x256xbf16, #tpu.memory_space<vmem>>, %arg3: memref<256x512xbf16, #tpu.memory_space<vmem>>, %arg4: memref<1x512xf32, #tpu.memory_space<vmem>>, %arg5: memref<1x512xf32, #tpu.memory_space<vmem>>, %arg6: memref<16x512xbf16, #tpu.memory_space<vmem>>, %arg7: memref<16x512xf32, #tpu.memory_space<vmem>>) attributes {dimension_semantics = [#tpu.dimension_semantics<parallel>, #tpu.dimension_semantics<arbitrary>], iteration_bounds = array<i64: 1, 18>, scalar_prefetch = 0 : i64, scratch_operands = 1 : i64, tpu.core_type = #tpu.core_type<tc>, window_params = [{transform_indices = @transform_0, window_bounds = array<i64: 16, 256>}, {transform_indices = @transform_1, window_bounds = array<i64: 256, 512>}, {pipeline_mode = #tpu.pipeline_mode<synchronous>, transform_indices = @transform_2, window_bounds = array<i64: 1, 512>}, {pipeline_mode = #tpu.pipeline_mode<synchronous>, transform_indices = @transform_3, window_bounds = array<i64: 1, 512>}, {transform_indices = @transform_4, window_bounds = array<i64: 16, 512>}]} {
    %c0_i32 = arith.constant 0 : i32
    %0 = arith.cmpi eq, %arg1, %c0_i32 : i32
    %1 = arith.extui %0 : i1 to i32
    %c0_i32_0 = arith.constant 0 : i32
    %2 = arith.cmpi ne, %1, %c0_i32_0 : i32
    scf.if %2 {
      %cst_9 = arith.constant 0.000000e+00 : f32
      %12 = vector.broadcast %cst_9 : f32 to vector<16x512xf32>
      %c0_10 = arith.constant 0 : index
      %c0_11 = arith.constant 0 : index
      %13 = vector.load %arg7[%c0_10, %c0_11] : memref<16x512xf32, #tpu.memory_space<vmem>>, vector<16x512xf32>
      tpu.vector_store %arg7[%c0_10, %c0_11], %12 {strides = array<i32>} : memref<16x512xf32, #tpu.memory_space<vmem>>, vector<16x512xf32>,
    } else {
    }
    %c0 = arith.constant 0 : index
    %c0_1 = arith.constant 0 : index
    %3 = vector.load %arg7[%c0, %c0_1] : memref<16x512xf32, #tpu.memory_space<vmem>>, vector<16x512xf32>
    %c0_2 = arith.constant 0 : index
    %c0_3 = arith.constant 0 : index
    %4 = vector.load %arg2[%c0_2, %c0_3] : memref<16x256xbf16, #tpu.memory_space<vmem>>, vector<16x256xbf16>
    %c0_4 = arith.constant 0 : index
    %c0_5 = arith.constant 0 : index
    %5 = vector.load %arg3[%c0_4, %c0_5] : memref<256x512xbf16, #tpu.memory_space<vmem>>, vector<256x512xbf16>
    %cst = arith.constant dense<0.000000e+00> : vector<16x512xf32>
    %6 = tpu.matmul %4, %5, %cst {dimension_numbers = #tpu.dot_dimension_numbers<[1], [0], [0], [1], [0, 0, 1, 1], [], []>} : vector<16x256xbf16>, vector<256x512xbf16>, vector<16x512xf32> -> vector<16x512xf32>
    %7 = arith.addf %3, %6 : vector<16x512xf32>
    %c0_6 = arith.constant 0 : index
    %c0_7 = arith.constant 0 : index
    %8 = vector.load %arg7[%c0_6, %c0_7] : memref<16x512xf32, #tpu.memory_space<vmem>>, vector<16x512xf32>
    tpu.vector_store %arg7[%c0_6, %c0_7], %7 {strides = array<i32>} : memref<16x512xf32, #tpu.memory_space<vmem>>, vector<16x512xf32>,
    %c17_i32 = arith.constant 17 : i32
    %9 = arith.cmpi eq, %arg1, %c17_i32 : i32
    %10 = arith.extui %9 : i1 to i32
    %c0_i32_8 = arith.constant 0 : i32
    %11 = arith.cmpi ne, %10, %c0_i32_8 : i32
    scf.if %11 {
      %c0_9 = arith.constant 0 : index
      %c0_10 = arith.constant 0 : index
      %12 = vector.load %arg7[%c0_9, %c0_10] : memref<16x512xf32, #tpu.memory_space<vmem>>, vector<16x512xf32>
      %c0_11 = arith.constant 0 : index
      %c0_12 = arith.constant 0 : index
      %13 = vector.load %arg4[%c0_11, %c0_12] : memref<1x512xf32, #tpu.memory_space<vmem>>, vector<1x512xf32>
      %14 = vector.broadcast %13 : vector<1x512xf32> to vector<16x512xf32>
      %15 = arith.mulf %12, %14 : vector<16x512xf32>
      %c0_13 = arith.constant 0 : index
      %c0_14 = arith.constant 0 : index
      %16 = vector.load %arg5[%c0_13, %c0_14] : memref<1x512xf32, #tpu.memory_space<vmem>>, vector<1x512xf32>
      %17 = vector.broadcast %16 : vector<1x512xf32> to vector<16x512xf32>
      %18 = arith.addf %15, %17 : vector<16x512xf32>
      %cst_15 = arith.constant 0.000000e+00 : f32
      %19 = vector.broadcast %cst_15 : f32 to vector<16x512xf32>
      %20 = arith.maximumf %18, %19 : vector<16x512xf32>
      %21 = arith.truncf %20 : vector<16x512xf32> to vector<16x512xbf16>
      %c0_16 = arith.constant 0 : index
      %c0_17 = arith.constant 0 : index
      %22 = vector.load %arg6[%c0_16, %c0_17] : memref<16x512xbf16, #tpu.memory_space<vmem>>, vector<16x512xbf16>
      tpu.vector_store %arg6[%c0_16, %c0_17], %21 {strides = array<i32>} : memref<16x512xbf16, #tpu.memory_space<vmem>>, vector<16x512xbf16>,
    } else {
    }
    return
  }
  func.func @transform_0(%arg0: i32, %arg1: i32) -> (i32, i32) {
    %c0_i32 = arith.constant 0 : i32
    return %arg0, %arg1 : i32, i32
  }
  func.func @transform_1(%arg0: i32, %arg1: i32) -> (i32, i32) {
    %c0_i32 = arith.constant 0 : i32
    %c0_i32_0 = arith.constant 0 : i32
    return %arg1, %c0_i32 : i32, i32
  }
  func.func @transform_2(%arg0: i32, %arg1: i32) -> (i32, i32) {
    %c0_i32 = arith.constant 0 : i32
    %c0_i32_0 = arith.constant 0 : i32
    %c0_i32_1 = arith.constant 0 : i32
    return %c0_i32, %c0_i32_0 : i32, i32
  }
  func.func @transform_3(%arg0: i32, %arg1: i32) -> (i32, i32) {
    %c0_i32 = arith.constant 0 : i32
    %c0_i32_0 = arith.constant 0 : i32
    %c0_i32_1 = arith.constant 0 : i32
    return %c0_i32, %c0_i32_0 : i32, i32
  }
  func.func @transform_4(%arg0: i32, %arg1: i32) -> (i32, i32) {
    %c0_i32 = arith.constant 0 : i32
    %c0_i32_0 = arith.constant 0 : i32
    return %arg0, %c0_i32 : i32, i32
  }
}

module attributes {stable_mosaic.version = 11 : i64} {
  func.func @_moe_gemm_kernel(%arg0: i32, %arg1: i32, %arg2: i32, %arg3: memref<4xi32, #tpu.memory_space<smem>>, %arg4: memref<1xi32, #tpu.memory_space<smem>>, %arg5: memref<16x256xbf16, #tpu.memory_space<vmem>>, %arg6: memref<1x256x512xbf16, #tpu.memory_space<vmem>>, %arg7: memref<1x16x1xf32, #tpu.memory_space<vmem>>, %arg8: memref<1x512xf32, #tpu.memory_space<vmem>>, %arg9: memref<1x512xf32, #tpu.memory_space<vmem>>, %arg10: memref<16x512xbf16, #tpu.memory_space<vmem>>, %arg11: memref<16x512xbf16, #tpu.memory_space<vmem>>, %arg12: memref<16x512xf32, #tpu.memory_space<vmem>>) attributes {dimension_semantics = [#tpu.dimension_semantics<parallel>, #tpu.dimension_semantics<arbitrary>, #tpu.dimension_semantics<arbitrary>], iteration_bounds = array<i64: 1, 18, 4>, scalar_prefetch = 2 : i64, scratch_operands = 1 : i64, tpu.core_type = #tpu.core_type<tc>, window_params = [{transform_indices = @transform_0, window_bounds = array<i64: 16, 256>}, {transform_indices = @transform_1, window_bounds = array<i64: 1, 256, 512>}, {transform_indices = @transform_2, window_bounds = array<i64: 1, 16, 1>}, {pipeline_mode = #tpu.pipeline_mode<synchronous>, transform_indices = @transform_3, window_bounds = array<i64: 1, 512>}, {pipeline_mode = #tpu.pipeline_mode<synchronous>, transform_indices = @transform_4, window_bounds = array<i64: 1, 512>}, {transform_indices = @transform_5, window_bounds = array<i64: 16, 512>}, {transform_indices = @transform_6, window_bounds = array<i64: 16, 512>}]} {
    %c0_i32 = arith.constant 0 : i32
    %0 = arith.cmpi eq, %arg1, %c0_i32 : i32
    %c0_i32_0 = arith.constant 0 : i32
    %1 = arith.cmpi eq, %arg2, %c0_i32_0 : i32
    %2 = arith.andi %0, %1 : i1
    %3 = arith.extui %2 : i1 to i32
    %c0_i32_1 = arith.constant 0 : i32
    %4 = arith.cmpi ne, %3, %c0_i32_1 : i32
    scf.if %4 {
      %cst = arith.constant 0.000000e+00 : f32
      %15 = vector.broadcast %cst : f32 to vector<16x512xf32>
      %c0 = arith.constant 0 : index
      %c0_4 = arith.constant 0 : index
      %16 = vector.load %arg12[%c0, %c0_4] : memref<16x512xf32, #tpu.memory_space<vmem>>, vector<16x512xf32>
      tpu.vector_store %arg12[%c0, %c0_4], %15 {strides = array<i32>} : memref<16x512xf32, #tpu.memory_space<vmem>>, vector<16x512xf32>,
    } else {
    }
    %5 = arith.index_cast %arg0 : i32 to index
    %6 = memref.load %arg4[%5] : memref<1xi32, #tpu.memory_space<smem>>
    %7 = arith.cmpi slt, %arg2, %6 : i32
    %8 = arith.extui %7 : i1 to i32
    %c0_i32_2 = arith.constant 0 : i32
    %9 = arith.cmpi ne, %8, %c0_i32_2 : i32
    scf.if %9 {
      %c0 = arith.constant 0 : index
      %c0_4 = arith.constant 0 : index
      %15 = vector.load %arg12[%c0, %c0_4] : memref<16x512xf32, #tpu.memory_space<vmem>>, vector<16x512xf32>
      %c0_5 = arith.constant 0 : index
      %c0_6 = arith.constant 0 : index
      %c0_7 = arith.constant 0 : index
      %16 = vector.load %arg7[%c0_5, %c0_6, %c0_7] : memref<1x16x1xf32, #tpu.memory_space<vmem>>, vector<1x16x1xf32>
      %17 = vector.shape_cast %16 : vector<1x16x1xf32> to vector<16x1xf32>
      %c0_8 = arith.constant 0 : index
      %c0_9 = arith.constant 0 : index
      %18 = vector.load %arg5[%c0_8, %c0_9] : memref<16x256xbf16, #tpu.memory_space<vmem>>, vector<16x256xbf16>
      %c0_10 = arith.constant 0 : index
      %c0_11 = arith.constant 0 : index
      %c0_12 = arith.constant 0 : index
      %19 = vector.load %arg6[%c0_10, %c0_11, %c0_12] : memref<1x256x512xbf16, #tpu.memory_space<vmem>>, vector<1x256x512xbf16>
      %20 = vector.shape_cast %19 : vector<1x256x512xbf16> to vector<256x512xbf16>
      %cst = arith.constant dense<0.000000e+00> : vector<16x512xf32>
      %21 = tpu.matmul %18, %20, %cst {dimension_numbers = #tpu.dot_dimension_numbers<[1], [0], [0], [1], [0, 0, 1, 1], [], []>} : vector<16x256xbf16>, vector<256x512xbf16>, vector<16x512xf32> -> vector<16x512xf32>
      %22 = vector.broadcast %17 : vector<16x1xf32> to vector<16x512xf32>
      %23 = arith.mulf %22, %21 : vector<16x512xf32>
      %24 = arith.addf %15, %23 : vector<16x512xf32>
      %c0_13 = arith.constant 0 : index
      %c0_14 = arith.constant 0 : index
      %25 = vector.load %arg12[%c0_13, %c0_14] : memref<16x512xf32, #tpu.memory_space<vmem>>, vector<16x512xf32>
      tpu.vector_store %arg12[%c0_13, %c0_14], %24 {strides = array<i32>} : memref<16x512xf32, #tpu.memory_space<vmem>>, vector<16x512xf32>,
    } else {
    }
    %c17_i32 = arith.constant 17 : i32
    %10 = arith.cmpi eq, %arg1, %c17_i32 : i32
    %c3_i32 = arith.constant 3 : i32
    %11 = arith.cmpi eq, %arg2, %c3_i32 : i32
    %12 = arith.andi %10, %11 : i1
    %13 = arith.extui %12 : i1 to i32
    %c0_i32_3 = arith.constant 0 : i32
    %14 = arith.cmpi ne, %13, %c0_i32_3 : i32
    scf.if %14 {
      %c0 = arith.constant 0 : index
      %c0_4 = arith.constant 0 : index
      %15 = vector.load %arg12[%c0, %c0_4] : memref<16x512xf32, #tpu.memory_space<vmem>>, vector<16x512xf32>
      %c0_5 = arith.constant 0 : index
      %c0_6 = arith.constant 0 : index
      %16 = vector.load %arg8[%c0_5, %c0_6] : memref<1x512xf32, #tpu.memory_space<vmem>>, vector<1x512xf32>
      %17 = vector.broadcast %16 : vector<1x512xf32> to vector<16x512xf32>
      %18 = arith.mulf %15, %17 : vector<16x512xf32>
      %c0_7 = arith.constant 0 : index
      %c0_8 = arith.constant 0 : index
      %19 = vector.load %arg9[%c0_7, %c0_8] : memref<1x512xf32, #tpu.memory_space<vmem>>, vector<1x512xf32>
      %20 = vector.broadcast %19 : vector<1x512xf32> to vector<16x512xf32>
      %21 = arith.addf %18, %20 : vector<16x512xf32>
      %c0_9 = arith.constant 0 : index
      %c0_10 = arith.constant 0 : index
      %22 = vector.load %arg10[%c0_9, %c0_10] : memref<16x512xbf16, #tpu.memory_space<vmem>>, vector<16x512xbf16>
      %23 = arith.extf %22 : vector<16x512xbf16> to vector<16x512xf32>
      %24 = arith.addf %21, %23 : vector<16x512xf32>
      %cst = arith.constant 0.000000e+00 : f32
      %25 = vector.broadcast %cst : f32 to vector<16x512xf32>
      %26 = arith.maximumf %24, %25 : vector<16x512xf32>
      %27 = arith.truncf %26 : vector<16x512xf32> to vector<16x512xbf16>
      %c0_11 = arith.constant 0 : index
      %c0_12 = arith.constant 0 : index
      %28 = vector.load %arg11[%c0_11, %c0_12] : memref<16x512xbf16, #tpu.memory_space<vmem>>, vector<16x512xbf16>
      tpu.vector_store %arg11[%c0_11, %c0_12], %27 {strides = array<i32>} : memref<16x512xbf16, #tpu.memory_space<vmem>>, vector<16x512xbf16>,
    } else {
    }
    return
  }
  func.func @transform_0(%arg0: i32, %arg1: i32, %arg2: i32, %arg3: memref<4xi32, #tpu.memory_space<smem>>, %arg4: memref<1xi32, #tpu.memory_space<smem>>) -> (i32, i32) {
    %c0_i32 = arith.constant 0 : i32
    return %arg0, %arg1 : i32, i32
  }
  func.func @transform_1(%arg0: i32, %arg1: i32, %arg2: i32, %arg3: memref<4xi32, #tpu.memory_space<smem>>, %arg4: memref<1xi32, #tpu.memory_space<smem>>) -> (i32, i32, i32) {
    %c4_i32 = arith.constant 4 : i32
    %0 = arith.muli %arg0, %c4_i32 : i32
    %1 = arith.addi %0, %arg2 : i32
    %2 = arith.index_cast %1 : i32 to index
    %3 = memref.load %arg3[%2] : memref<4xi32, #tpu.memory_space<smem>>
    %c0_i32 = arith.constant 0 : i32
    %c0_i32_0 = arith.constant 0 : i32
    return %3, %arg1, %c0_i32 : i32, i32, i32
  }
  func.func @transform_2(%arg0: i32, %arg1: i32, %arg2: i32, %arg3: memref<4xi32, #tpu.memory_space<smem>>, %arg4: memref<1xi32, #tpu.memory_space<smem>>) -> (i32, i32, i32) {
    %c4_i32 = arith.constant 4 : i32
    %0 = arith.muli %arg0, %c4_i32 : i32
    %1 = arith.addi %0, %arg2 : i32
    %2 = arith.index_cast %1 : i32 to index
    %3 = memref.load %arg3[%2] : memref<4xi32, #tpu.memory_space<smem>>
    %c0_i32 = arith.constant 0 : i32
    %c0_i32_0 = arith.constant 0 : i32
    return %3, %arg0, %c0_i32 : i32, i32, i32
  }
  func.func @transform_3(%arg0: i32, %arg1: i32, %arg2: i32, %arg3: memref<4xi32, #tpu.memory_space<smem>>, %arg4: memref<1xi32, #tpu.memory_space<smem>>) -> (i32, i32) {
    %c0_i32 = arith.constant 0 : i32
    %c0_i32_0 = arith.constant 0 : i32
    %c0_i32_1 = arith.constant 0 : i32
    return %c0_i32, %c0_i32_0 : i32, i32
  }
  func.func @transform_4(%arg0: i32, %arg1: i32, %arg2: i32, %arg3: memref<4xi32, #tpu.memory_space<smem>>, %arg4: memref<1xi32, #tpu.memory_space<smem>>) -> (i32, i32) {
    %c0_i32 = arith.constant 0 : i32
    %c0_i32_0 = arith.constant 0 : i32
    %c0_i32_1 = arith.constant 0 : i32
    return %c0_i32, %c0_i32_0 : i32, i32
  }
  func.func @transform_5(%arg0: i32, %arg1: i32, %arg2: i32, %arg3: memref<4xi32, #tpu.memory_space<smem>>, %arg4: memref<1xi32, #tpu.memory_space<smem>>) -> (i32, i32) {
    %c0_i32 = arith.constant 0 : i32
    %c0_i32_0 = arith.constant 0 : i32
    return %arg0, %c0_i32 : i32, i32
  }
  func.func @transform_6(%arg0: i32, %arg1: i32, %arg2: i32, %arg3: memref<4xi32, #tpu.memory_space<smem>>, %arg4: memref<1xi32, #tpu.memory_space<smem>>) -> (i32, i32) {
    %c0_i32 = arith.constant 0 : i32
    %c0_i32_0 = arith.constant 0 : i32
    return %arg0, %c0_i32 : i32, i32
  }
}

</mosaic_0001>

<bundles_post_ra>
// kernel: forward.20
= control target key start
LH: loop header
LB: loop body
LE: loop exit
PB: predicated region body
PF: predicated region fallthrough
CT: control target
= control target key end

     0   :  { %s1502_s15 = smov 0   ;;  %s1504_s16 = smov 0   ;;  %s1676_s0 = inlined_call_operand.vmem [shape: bf16[512,128], index: 0, kind: input, shape index: {}]   ;;  %s1677_s1 = inlined_call_operand.vmem [shape: bf16[128,128], index: 1, kind: input, shape index: {}]   ;;  %s1678_s2 = inlined_call_operand.vmem [shape: f32[1,128], index: 2, kind: input, shape index: {}]   ;;  %s1679_s3 = inlined_call_operand.vmem [shape: f32[1,128], index: 3, kind: input, shape index: {}]   ;;  %s1680_s4 = inlined_call_operand.vmem [shape: bf16[512,128], index: 4, kind: output, shape index: {}]  }
   0x1   :  { %s1506_s17 = smov 0  }
   0x2 LB: > { %s26_s18 = sadd.s32 1, %s1471_s16  ;;  %p1125_p0 = scmp.ge.s32.totalorder %s1475_s17, 1  ;;  %s1475_s17 = sphi %s1506_s17, %s14_s17   ;;  %s1471_s16 = sphi %s1504_s16, %s1682_s16   ;;  %s1467_s15 = sphi %s1502_s15, %s1681_s15  }
   0x3   : > { %p28_p1 = scmp.ge.s32.totalorder %s26_s18, 2  ;;  %p191_p2 = scmp.lt.s32.totalorder %s1475_s17, 3 }
   0x5   : > { %s1684_s18 = smov (%p28_p1, %s26_s18), 0  ;;  %p192_p3 = pnand %p1125_p0, %p191_p2 }
   0x6   : > { %v1429_v0 = vld [vmem:[%s1677_s1] sm:$0xff] (!%p192_p3)   ;;  %s1126_s21 = sshll.u32 (!%p192_p3), %s1467_s15, 5  ;;  %v1430_v1 = vld [vmem:[%s1677_s1 + $0x8] sm:$0xff] (!%p192_p3)   ;;  %v1431_v2 = vld [vmem:[%s1677_s1 + $0x10] sm:$0xff] (!%p192_p3)  }
   0x7   : > { %195 = sbr.rel (%p192_p3) target bundleno = 288 (0x120), region = 36  ;;  %p226_p4 = scmp.lt.s32.totalorder (!%p192_p3), %s1126_s21, 63  ;;  %1341 = vmatprep.subr.bf16.mxu0 (!%p192_p3), %v1429_v0  ;;  %1389 = vmatprep.subr.bf16.mxu1 (!%p192_p3), %v1429_v0  ;;  %v1432_v3 = vld [vmem:[%s1677_s1 + $0x18] sm:$0xff] (!%p192_p3)   ;;  %v1433_v6 = vld [vmem:[%s1677_s1 + $0x20] sm:$0xff] (!%p192_p3)   ;;  %v1434_v7 = vld [vmem:[%s1677_s1 + $0x28] sm:$0xff] (!%p192_p3)  }
   0x8   : > { %1342 = vmatpush3.bf16.msra.mxu0 (!%p192_p3), %v1429_v0  ;;  %1397 = vmatpush3.bf16.msra.mxu1 (!%p192_p3), %v1429_v0  ;;  %v1435_v8 = vld [vmem:[%s1677_s1 + $0x30] sm:$0xff] (!%p192_p3)   ;;  %v1436_v9 = vld [vmem:[%s1677_s1 + $0x38] sm:$0xff] (!%p192_p3)   ;;  %v1573_v24 = vld [vmem:[%s1678_s2] ss:$0 sm:$0xff] (!%p192_p3) }
   0x9   : > { %1343 = vmatprep.subr.bf16.mxu0 (!%p192_p3), %v1430_v1  ;;  %1390 = vmatprep.subr.bf16.mxu1 (!%p192_p3), %v1430_v1  ;;  %v1578_v26 = vld [vmem:[%s1679_s3] ss:$0 sm:$0xff] (!%p192_p3) }
   0xc   : > { %1344 = vmatpush3.bf16.msra.mxu0 (!%p192_p3), %v1430_v1  ;;  %1398 = vmatpush3.bf16.msra.mxu1 (!%p192_p3), %v1430_v1 }
   0xd   : > { %1345 = vmatprep.subr.bf16.mxu0 (!%p192_p3), %v1431_v2  ;;  %1391 = vmatprep.subr.bf16.mxu1 (!%p192_p3), %v1431_v2 }
   0xe   : > { %s1686_s21 = smov (!%p226_p4, %s1126_s21), 63 }
   0xf   : > { %s1127_s26 = sshll.u32 %s1686_s21, 2 }
  0x10   : > { %s1537_s29 = scalar_lea.vmem %s1676_s0, %s1127_s26  ;;  %1346 = vmatpush3.bf16.msra.mxu0 %v1431_v2  ;;  %1399 = vmatpush3.bf16.msra.mxu1 %v1431_v2  ;;  %s1601_s24 = scalar_lea.vmem %s1680_s4, %s1127_s26 }
  0x11   : > { %v1437_v4 = vld [vmem:[%s1537_s29] sm:$0xff]   ;;  %1347 = vmatprep.subr.bf16.mxu0 %v1432_v3  ;;  %1392 = vmatprep.subr.bf16.mxu1 %v1432_v3  ;;  %v1439_v10 = vld [vmem:[%s1537_s29 + $0x8] sm:$0xff]   ;;  %v1441_v12 = vld [vmem:[%s1537_s29 + $0x10] sm:$0xff]  }
  0x12   : > { %v1438_v5 = vld [vmem:[%s1537_s29 + $0x40] sm:$0xff]   ;;  %1357 = vmatprep.mubr.bf16.mxu0 %v1437_v4  ;;  %v1440_v11 = vld [vmem:[%s1537_s29 + $0x48] sm:$0xff]   ;;  %v1442_v13 = vld [vmem:[%s1537_s29 + $0x50] sm:$0xff]  }
  0x13   : > { %1373 = vmatprep.mubr.bf16.mxu1 %v1438_v5  ;;  %v1443_v14 = vld [vmem:[%s1537_s29 + $0x18] sm:$0xff]   ;;  %v1445_v16 = vld [vmem:[%s1537_s29 + $0x20] sm:$0xff]   ;;  %v1447_v18 = vld [vmem:[%s1537_s29 + $0x28] sm:$0xff]  }
  0x14   : > { %1348 = vmatpush3.bf16.msra.mxu0 %v1432_v3  ;;  %1400 = vmatpush3.bf16.msra.mxu1 %v1432_v3  ;;  %v1444_v15 = vld [vmem:[%s1537_s29 + $0x58] sm:$0xff]   ;;  %v1446_v17 = vld [vmem:[%s1537_s29 + $0x60] sm:$0xff]   ;;  %v1448_v19 = vld [vmem:[%s1537_s29 + $0x68] sm:$0xff]  }
  0x15   : > { %1349 = vmatprep.subr.bf16.mxu0 %v1433_v6  ;;  %1393 = vmatprep.subr.bf16.mxu1 %v1433_v6  ;;  %v1449_v20 = vld [vmem:[%s1537_s29 + $0x30] sm:$0xff]   ;;  %v1451_v22 = vld [vmem:[%s1537_s29 + $0x38] sm:$0xff]  }
  0x16   : > { %v1450_v21 = vld [vmem:[%s1537_s29 + $0x70] sm:$0xff]   ;;  %v1452_v23 = vld [vmem:[%s1537_s29 + $0x78] sm:$0xff]  }
  0x18   : > { %1350 = vmatpush3.bf16.msra.mxu0 %v1433_v6  ;;  %1401 = vmatpush3.bf16.msra.mxu1 %v1433_v6 }
  0x19   : > { %1351 = vmatprep.subr.bf16.mxu0 %v1434_v7  ;;  %1394 = vmatprep.subr.bf16.mxu1 %v1434_v7 }
  0x1c   : > { %1352 = vmatpush3.bf16.msra.mxu0 %v1434_v7  ;;  %1402 = vmatpush3.bf16.msra.mxu1 %v1434_v7 }
  0x1d   : > { %1353 = vmatprep.subr.bf16.mxu0 %v1435_v8  ;;  %1395 = vmatprep.subr.bf16.mxu1 %v1435_v8 }
  0x20   : > { %1354 = vmatpush3.bf16.msra.mxu0 %v1435_v8  ;;  %1403 = vmatpush3.bf16.msra.mxu1 %v1435_v8 }
  0x21   : > { %1355 = vmatprep.subr.bf16.mxu0 %v1436_v9  ;;  %1396 = vmatprep.subr.bf16.mxu1 %v1436_v9 }
  0x24   : > { %1356 = vmatpush3.bf16.msra.mxu0 %v1436_v9  ;;  %1404 = vmatpush3.bf16.msra.mxu1 %v1436_v9 }
  0x27   : > { %1358 = vmatmul.mubr.bf16.vlgmr.msra.gmra.mrb[0].mxu0 %v1439_v10  ;;  %1374 = vmatmul.mubr.bf16.vlgmr.msra.gmra.mrb[0].mxu1 %v1440_v11 }
  0x28   : > { %1361 = vmatprep.mubr.bf16.mxu0 %v1441_v12  ;;  %1377 = vmatprep.mubr.bf16.mxu1 %v1442_v13 }
  0x2f   : > { %1362 = vmatmul.mubr.bf16.gmra.mrb[4].mxu0 %v1443_v14  ;;  %1378 = vmatmul.mubr.bf16.gmra.mrb[4].mxu1 %v1444_v15 }
  0x30   : > { %1365 = vmatprep.mubr.bf16.mxu0 %v1445_v16  ;;  %1381 = vmatprep.mubr.bf16.mxu1 %v1446_v17 }
  0x37   : > { %1366 = vmatmul.mubr.bf16.gmra.mrb[8].mxu0 %v1447_v18  ;;  %1382 = vmatmul.mubr.bf16.gmra.mrb[8].mxu1 %v1448_v19 }
  0x38   : > { %1369 = vmatprep.mubr.bf16.mxu0 %v1449_v20  ;;  %1385 = vmatprep.mubr.bf16.mxu1 %v1450_v21 }
  0x3f   : > { %1370 = vmatmul.mubr.bf16.gmra.mrb[12].mxu0 %v1451_v22  ;;  %1386 = vmatmul.mubr.bf16.gmra.mrb[12].mxu1 %v1452_v23 }
  0xfa   : > { %v1359_v25 = vpop.f32.mrb[0].mxu0  ;;  %v1375_v27 = vpop.f32.mrb[0].mxu1 }
  0xfb   : > { %v776_v28 = vmul.f32 %v1359_v25, %v1573_v24  ;;  %v792_v29 = vmul.f32 %v1375_v27, %v1573_v24  ;;  %v541_v30 = vpop.f32.mrb[1].mxu0  ;;  %v605_v31 = vpop.f32.mrb[1].mxu1 }
  0xfc   : > { %v774_v32 = vmul.f32 %v1573_v24, %v541_v30  ;;  %v790_v33 = vmul.f32 %v1573_v24, %v605_v31  ;;  %v1360_v34 = vpop.f32.mrb[2].mxu0  ;;  %v1376_v35 = vpop.f32.mrb[2].mxu1 }
  0xfd   : > { %v815_v36 = vadd.f32 %v1578_v26, %v776_v28  ;;  %v831_v37 = vadd.f32 %v1578_v26, %v792_v29  ;;  %v777_v38 = vmul.f32 %v1360_v34, %v1573_v24  ;;  %v793_v39 = vmul.f32 %v1376_v35, %v1573_v24  ;;  %v544_v40 = vpop.f32.mrb[3].mxu0  ;;  %v608_v41 = vpop.f32.mrb[3].mxu1 }
  0xfe   : > { %v813_v42 = vadd.f32 %v1578_v26, %v774_v32  ;;  %v829_v43 = vadd.f32 %v1578_v26, %v790_v33  ;;  %v775_v44 = vmul.f32 %v1573_v24, %v544_v40  ;;  %v791_v45 = vmul.f32 %v1573_v24, %v608_v41 }
  0xff   : > { %v816_v46 = vadd.f32 %v1578_v26, %v777_v38  ;;  %v832_v47 = vadd.f32 %v1578_v26, %v793_v39  ;;  %v847_v50 = vmax.f32 %v815_v36, 0.0  ;;  %v863_v51 = vmax.f32 %v831_v37, 0.0 }
 0x100   : > { %v814_v48 = vadd.f32 %v1578_v26, %v775_v44  ;;  %v830_v49 = vadd.f32 %v1578_v26, %v791_v45  ;;  %v845_v54 = vmax.f32 %v813_v42, 0.0  ;;  %v861_v55 = vmax.f32 %v829_v43, 0.0 }
 0x101   : > { %v848_v52 = vmax.f32 %v816_v46, 0.0  ;;  %v864_v53 = vmax.f32 %v832_v47, 0.0 }
 0x102   : > { %v846_v56 = vmax.f32 %v814_v48, 0.0  ;;  %v862_v57 = vmax.f32 %v830_v49, 0.0  ;;  %v1363_v58 = vpop.f32.mrb[4].mxu0  ;;  %v1379_v59 = vpop.f32.mrb[4].mxu1 }
 0x103   : > { %v1230_v60 = vpack.c.bf16 %v848_v52, %v847_v50  ;;  %v1270_v61 = vpack.c.bf16 %v864_v53, %v863_v51  ;;  %v780_v62 = vmul.f32 %v1363_v58, %v1573_v24  ;;  %v796_v63 = vmul.f32 %v1379_v59, %v1573_v24  ;;  %v557_v0 = vpop.f32.mrb[5].mxu0  ;;  %v621_v1 = vpop.f32.mrb[5].mxu1 }
 0x104   : > { %v1225_v2 = vpack.c.bf16 %v846_v56, %v845_v54  ;;  %v1265_v3 = vpack.c.bf16 %v862_v57, %v861_v55  ;;  %v778_v4 = vmul.f32 %v1573_v24, %v557_v0  ;;  %v794_v5 = vmul.f32 %v1573_v24, %v621_v1  ;;  %v1364_v6 = vpop.f32.mrb[6].mxu0  ;;  %v1380_v7 = vpop.f32.mrb[6].mxu1 }
 0x105   : > { %1302 = vst [vmem:[%s1601_s24 + $0x8] sm:$0xff] %v1230_v60   ;;  %1310 = vst [vmem:[%s1601_s24 + $0x48] sm:$0xff] %v1270_v61   ;;  %v819_v8 = vadd.f32 %v1578_v26, %v780_v62  ;;  %v835_v9 = vadd.f32 %v1578_v26, %v796_v63  ;;  %v781_v10 = vmul.f32 %v1364_v6, %v1573_v24  ;;  %v560_v12 = vpop.f32.mrb[7].mxu0  ;;  %v624_v13 = vpop.f32.mrb[7].mxu1 }
 0x106   : > { %v797_v11 = vmul.f32 %v1380_v7, %v1573_v24  ;;  %1226 = vst [vmem:[%s1601_s24] sm:$0xff] %v1225_v2   ;;  %1309 = vst [vmem:[%s1601_s24 + $0x40] sm:$0xff] %v1265_v3   ;;  %v817_v14 = vadd.f32 %v1578_v26, %v778_v4  ;;  %v833_v15 = vadd.f32 %v1578_v26, %v794_v5 }
 0x107   : > { %v779_v16 = vmul.f32 %v1573_v24, %v560_v12  ;;  %v795_v17 = vmul.f32 %v1573_v24, %v624_v13  ;;  %v820_v18 = vadd.f32 %v1578_v26, %v781_v10  ;;  %v851_v22 = vmax.f32 %v819_v8, 0.0 }
 0x108   : > { %v836_v19 = vadd.f32 %v1578_v26, %v797_v11  ;;  %v867_v23 = vmax.f32 %v835_v9, 0.0  ;;  %v849_v28 = vmax.f32 %v817_v14, 0.0  ;;  %v865_v29 = vmax.f32 %v833_v15, 0.0 }
 0x109   : > { %v818_v20 = vadd.f32 %v1578_v26, %v779_v16  ;;  %v834_v21 = vadd.f32 %v1578_v26, %v795_v17  ;;  %v852_v25 = vmax.f32 %v820_v18, 0.0 }
 0x10a   : > { %v868_v27 = vmax.f32 %v836_v19, 0.0  ;;  %v1367_v32 = vpop.f32.mrb[8].mxu0  ;;  %v1383_v33 = vpop.f32.mrb[8].mxu1 }
 0x10b   : > { %v850_v30 = vmax.f32 %v818_v20, 0.0  ;;  %v866_v31 = vmax.f32 %v834_v21, 0.0  ;;  %v1240_v34 = vpack.c.bf16 %v852_v25, %v851_v22  ;;  %v784_v36 = vmul.f32 %v1367_v32, %v1573_v24  ;;  %v573_v38 = vpop.f32.mrb[9].mxu0  ;;  %v637_v39 = vpop.f32.mrb[9].mxu1 }
 0x10c   : > { %v1280_v35 = vpack.c.bf16 %v868_v27, %v867_v23  ;;  %v800_v37 = vmul.f32 %v1383_v33, %v1573_v24  ;;  %v782_v42 = vmul.f32 %v1573_v24, %v573_v38  ;;  %v798_v43 = vmul.f32 %v1573_v24, %v637_v39  ;;  %v1368_v44 = vpop.f32.mrb[10].mxu0  ;;  %v1384_v45 = vpop.f32.mrb[10].mxu1 }
 0x10d   : > { %v1235_v40 = vpack.c.bf16 %v850_v30, %v849_v28  ;;  %v1275_v41 = vpack.c.bf16 %v866_v31, %v865_v29  ;;  %1304 = vst [vmem:[%s1601_s24 + $0x18] sm:$0xff] %v1240_v34   ;;  %v823_v46 = vadd.f32 %v1578_v26, %v784_v36  ;;  %v785_v48 = vmul.f32 %v1368_v44, %v1573_v24  ;;  %v576_v50 = vpop.f32.mrb[11].mxu0  ;;  %v640_v51 = vpop.f32.mrb[11].mxu1 }
 0x10e   : > { %1312 = vst [vmem:[%s1601_s24 + $0x58] sm:$0xff] %v1280_v35   ;;  %v839_v47 = vadd.f32 %v1578_v26, %v800_v37  ;;  %v801_v49 = vmul.f32 %v1384_v45, %v1573_v24  ;;  %v821_v52 = vadd.f32 %v1578_v26, %v782_v42  ;;  %v837_v53 = vadd.f32 %v1578_v26, %v798_v43 }
 0x10f   : > { %1303 = vst [vmem:[%s1601_s24 + $0x10] sm:$0xff] %v1235_v40   ;;  %1311 = vst [vmem:[%s1601_s24 + $0x50] sm:$0xff] %v1275_v41   ;;  %v783_v54 = vmul.f32 %v1573_v24, %v576_v50  ;;  %v799_v55 = vmul.f32 %v1573_v24, %v640_v51  ;;  %v824_v56 = vadd.f32 %v1578_v26, %v785_v48  ;;  %v855_v60 = vmax.f32 %v823_v46, 0.0 }
 0x110   : > { %v840_v57 = vadd.f32 %v1578_v26, %v801_v49  ;;  %v871_v61 = vmax.f32 %v839_v47, 0.0  ;;  %v853_v0 = vmax.f32 %v821_v52, 0.0  ;;  %v869_v1 = vmax.f32 %v837_v53, 0.0 }
 0x111   : > { %v822_v58 = vadd.f32 %v1578_v26, %v783_v54  ;;  %v838_v59 = vadd.f32 %v1578_v26, %v799_v55  ;;  %v856_v62 = vmax.f32 %v824_v56, 0.0 }
 0x112   : > { %v872_v63 = vmax.f32 %v840_v57, 0.0  ;;  %v1371_v4 = vpop.f32.mrb[12].mxu0  ;;  %v1387_v5 = vpop.f32.mrb[12].mxu1 }
 0x113   : > { %v854_v2 = vmax.f32 %v822_v58, 0.0  ;;  %v870_v3 = vmax.f32 %v838_v59, 0.0  ;;  %v1250_v6 = vpack.c.bf16 %v856_v62, %v855_v60  ;;  %v788_v8 = vmul.f32 %v1371_v4, %v1573_v24  ;;  %v589_v10 = vpop.f32.mrb[13].mxu0  ;;  %v653_v11 = vpop.f32.mrb[13].mxu1 }
 0x114   : > { %v1290_v7 = vpack.c.bf16 %v872_v63, %v871_v61  ;;  %v804_v9 = vmul.f32 %v1387_v5, %v1573_v24  ;;  %v786_v14 = vmul.f32 %v1573_v24, %v589_v10  ;;  %v802_v15 = vmul.f32 %v1573_v24, %v653_v11  ;;  %v1372_v16 = vpop.f32.mrb[14].mxu0  ;;  %v1388_v17 = vpop.f32.mrb[14].mxu1 }
 0x115   : > { %v1245_v12 = vpack.c.bf16 %v854_v2, %v853_v0  ;;  %v1285_v13 = vpack.c.bf16 %v870_v3, %v869_v1  ;;  %1306 = vst [vmem:[%s1601_s24 + $0x28] sm:$0xff] %v1250_v6   ;;  %v827_v18 = vadd.f32 %v1578_v26, %v788_v8  ;;  %v789_v20 = vmul.f32 %v1372_v16, %v1573_v24  ;;  %v592_v22 = vpop.f32.mrb[15].mxu0  ;;  %v656_v23 = vpop.f32.mrb[15].mxu1 }
 0x116   : > { %1314 = vst [vmem:[%s1601_s24 + $0x68] sm:$0xff] %v1290_v7   ;;  %v843_v19 = vadd.f32 %v1578_v26, %v804_v9  ;;  %v805_v21 = vmul.f32 %v1388_v17, %v1573_v24  ;;  %v825_v25 = vadd.f32 %v1578_v26, %v786_v14  ;;  %v841_v27 = vadd.f32 %v1578_v26, %v802_v15 }
 0x117   : > { %1305 = vst [vmem:[%s1601_s24 + $0x20] sm:$0xff] %v1245_v12   ;;  %1313 = vst [vmem:[%s1601_s24 + $0x60] sm:$0xff] %v1285_v13   ;;  %v787_v28 = vmul.f32 %v1573_v24, %v592_v22  ;;  %v803_v29 = vmul.f32 %v1573_v24, %v656_v23  ;;  %v828_v30 = vadd.f32 %v1578_v26, %v789_v20  ;;  %v859_v34 = vmax.f32 %v827_v18, 0.0 }
 0x118   : > { %v844_v31 = vadd.f32 %v1578_v26, %v805_v21  ;;  %v875_v35 = vmax.f32 %v843_v19, 0.0  ;;  %v857_v38 = vmax.f32 %v825_v25, 0.0  ;;  %v873_v39 = vmax.f32 %v841_v27, 0.0 }
 0x119   : > { %v826_v32 = vadd.f32 %v1578_v26, %v787_v28  ;;  %v842_v33 = vadd.f32 %v1578_v26, %v803_v29  ;;  %v860_v36 = vmax.f32 %v828_v30, 0.0 }
 0x11a   : > { %v876_v37 = vmax.f32 %v844_v31, 0.0 }
 0x11b   : > { %v858_v40 = vmax.f32 %v826_v32, 0.0  ;;  %v874_v24 = vmax.f32 %v842_v33, 0.0  ;;  %v1260_v41 = vpack.c.bf16 %v860_v36, %v859_v34 }
 0x11c   : > { %v1300_v42 = vpack.c.bf16 %v876_v37, %v875_v35 }
 0x11d   : > { %v1255_v43 = vpack.c.bf16 %v858_v40, %v857_v38  ;;  %v1295_v44 = vpack.c.bf16 %v874_v24, %v873_v39  ;;  %1308 = vst [vmem:[%s1601_s24 + $0x38] sm:$0xff] %v1260_v41  }
 0x11e   : > { %1316 = vst [vmem:[%s1601_s24 + $0x78] sm:$0xff] %v1300_v42  }
 0x11f   : > { %1307 = vst [vmem:[%s1601_s24 + $0x30] sm:$0xff] %v1255_v43   ;;  %1315 = vst [vmem:[%s1601_s24 + $0x70] sm:$0xff] %v1295_v44  }
 0x120 PF: > { %s14_s17 = sadd.s32 1, %s1475_s17   ;;  %s1681_s15 = smov %s1471_s16 }
 0x121   : > { %p11_p5 = scmp.ge.s32.totalorder %s14_s17, 4   ;;  %s1682_s16 = smov %s1684_s18 }
 0x123   :  { %13 = sbr.rel (!%p11_p5) target bundleno = 2 (0x2), region = 77 }

// kernel: forward.21
= control target key start
LH: loop header
LB: loop body
LE: loop exit
PB: predicated region body
PF: predicated region fallthrough
CT: control target
= control target key end

     0   :  { %s1739_s15 = smov 0   ;;  %s1741_s16 = smov 0   ;;  %s2021_s0 = inlined_call_operand.vmem [shape: bf16[512,1152], index: 0, kind: input, shape index: {}]   ;;  %s2022_s1 = inlined_call_operand.vmem [shape: bf16[1152,128], index: 1, kind: input, shape index: {}]   ;;  %s2023_s2 = inlined_call_operand.vmem [shape: f32[1,128], index: 2, kind: input, shape index: {}]   ;;  %s2024_s3 = inlined_call_operand.vmem [shape: f32[1,128], index: 3, kind: input, shape index: {}]   ;;  %s2025_s4 = inlined_call_operand.vmem [shape: bf16[512,128], index: 4, kind: output, shape index: {}]  }
   0x1   :  { %s1743_s17 = smov 0   ;;  %s1745_s18 = smov 0  }
   0x2   :  { %s1747_s19 = smov 0   ;;  %s1749_s20 = smov 0  }
   0x3   :  { %s1751_s21 = smov 0  }
   0x4 LB: > { %s23_s22 = sadd.s32 1, %s1703_s19  ;;  %s26_s23 = sadd.s32 1, %s1707_s20  ;;  %s1711_s21 = sphi %s1751_s21, %s14_s21   ;;  %s1707_s20 = sphi %s1749_s20, %s2031_s20   ;;  %s1703_s19 = sphi %s1747_s19, %s2030_s19   ;;  %s1699_s18 = sphi %s1745_s18, %s2029_s18   ;;  %s1695_s17 = sphi %s1743_s17, %s2028_s17   ;;  %s1691_s16 = sphi %s1741_s16, %s2027_s16   ;;  %s1687_s15 = sphi %s1739_s15, %s2026_s15  }
   0x5   : > { %p24_p0 = scmp.ge.s32.totalorder %s23_s22, 9  ;;  %p42_p1 = scmp.ne.s32.totalorder %s1691_s16, %s1687_s15 }
   0x6   : > { %p43_p2 = scmp.eq.s32.totalorder %s1711_s21, 0  ;;  %s35_s27 = sadd.s32 1, %s1691_s16 }
   0x7   : > { %s2033_s22 = smov (%p24_p0, %s23_s22), 0  ;;  %s2035_s23 = smov (!%p24_p0, %s26_s23), %s1707_s20 }
   0x8   : > { %p44_p3 = por %p43_p2, %p42_p1  ;;  %p28_p4 = scmp.ge.s32.totalorder %s2035_s23, 2 }
   0x9   : > { %s31_s24 = ssub.s32 %s1703_s19, %s2033_s22  ;;  %p1287_p6 = scmp.ge.s32.totalorder %s1711_s21, 18 }
   0xa   : > { %s2037_s23 = smov (%p28_p4, %s2035_s23), 0 }
   0xb   : > { %s30_s25 = ssub.s32 %s1707_s20, %s2037_s23  ;;  %168 = sbr.rel (%p1287_p6) target bundleno = 46 (0x2e), region = 24 }
   0xc   : > { %s32_s26 = sor.u32 %s31_s24, %s30_s25 }
   0xd   : > { %p33_p5 = scmp.eq.s32.totalorder %s32_s26, 0 }
   0xf   : > { %s1790_s28 = scalar_select %p33_p5, %s1691_s16, %s35_s27  }
  0x12   : > { %171 = sbr.rel (!%p44_p3) target bundleno = 46 (0x2e), region = 28  ;;  %s173_s29 = sand.u32 (%p44_p3), 1, %s1691_s16  }
  0x13   : > { %s1575_s30 = smul.u32 (%p44_p3), 288, %s1707_s20  ;;  %s1288_s5 = sshll.u32 (%p44_p3), %s173_s29, 7 }
  0x14   : > { %s1804_s11 = scalar_lea.vmem (%p44_p3), [#allocation3], %s1288_s5 }
  0x15   : > { %s178_s6 = sadd.s32 (%p44_p3), %s1703_s19, %s1575_s30 }
  0x16   : > { %s1291_s7 = sshll.u32 (%p44_p3), %s178_s6, 2 }
  0x17   : > { %s1799_s10 = scalar_lea.vmem (%p44_p3), %s2021_s0, %s1291_s7 }
  0x18   : > { %v196_v0 = vld [vmem:[%s1799_s10] sm:$0xf] (%p44_p3)  ;;  %v198_v1 = vld [vmem:[%s1799_s10 + $0x24] sm:$0xf] (%p44_p3)  ;;  %v200_v2 = vld [vmem:[%s1799_s10 + $0x48] sm:$0xf] (%p44_p3) }
  0x19   : > { %197 = vst [vmem:[%s1804_s11] sm:$0xf] %v196_v0  ;;  %199 = vst [vmem:[%s1804_s11 + $0x4] sm:$0xf] %v198_v1  ;;  %v202_v3 = vld [vmem:[%s1799_s10 + $0x6c] sm:$0xf] }
  0x1a   : > { %201 = vst [vmem:[%s1804_s11 + $0x8] sm:$0xf] %v200_v2  ;;  %v204_v4 = vld [vmem:[%s1799_s10 + $0x90] sm:$0xf]  ;;  %v206_v5 = vld [vmem:[%s1799_s10 + $0xb4] sm:$0xf] }
  0x1b   : > { %203 = vst [vmem:[%s1804_s11 + $0xc] sm:$0xf] %v202_v3  ;;  %205 = vst [vmem:[%s1804_s11 + $0x10] sm:$0xf] %v204_v4  ;;  %v208_v6 = vld [vmem:[%s1799_s10 + $0xd8] sm:$0xf] }
  0x1c   : > { %207 = vst [vmem:[%s1804_s11 + $0x14] sm:$0xf] %v206_v5  ;;  %v210_v7 = vld [vmem:[%s1799_s10 + $0xfc] sm:$0xf]  ;;  %v212_v8 = vld [vmem:[%s1799_s10 + $0x120] sm:$0xf] }
  0x1d   : > { %209 = vst [vmem:[%s1804_s11 + $0x18] sm:$0xf] %v208_v6  ;;  %211 = vst [vmem:[%s1804_s11 + $0x1c] sm:$0xf] %v210_v7  ;;  %v214_v9 = vld [vmem:[%s1799_s10 + $0x144] sm:$0xf] }
  0x1e   : > { %213 = vst [vmem:[%s1804_s11 + $0x20] sm:$0xf] %v212_v8  ;;  %v216_v10 = vld [vmem:[%s1799_s10 + $0x168] sm:$0xf]  ;;  %v218_v11 = vld [vmem:[%s1799_s10 + $0x18c] sm:$0xf] }
  0x1f   : > { %215 = vst [vmem:[%s1804_s11 + $0x24] sm:$0xf] %v214_v9  ;;  %217 = vst [vmem:[%s1804_s11 + $0x28] sm:$0xf] %v216_v10  ;;  %v220_v12 = vld [vmem:[%s1799_s10 + $0x1b0] sm:$0xf] }
  0x20   : > { %219 = vst [vmem:[%s1804_s11 + $0x2c] sm:$0xf] %v218_v11  ;;  %v222_v13 = vld [vmem:[%s1799_s10 + $0x1d4] sm:$0xf]  ;;  %v224_v14 = vld [vmem:[%s1799_s10 + $0x1f8] sm:$0xf] }
  0x21   : > { %221 = vst [vmem:[%s1804_s11 + $0x30] sm:$0xf] %v220_v12  ;;  %223 = vst [vmem:[%s1804_s11 + $0x34] sm:$0xf] %v222_v13  ;;  %v226_v15 = vld [vmem:[%s1799_s10 + $0x21c] sm:$0xf] }
  0x22   : > { %225 = vst [vmem:[%s1804_s11 + $0x38] sm:$0xf] %v224_v14  ;;  %v228_v16 = vld [vmem:[%s1799_s10 + $0x240] sm:$0xf]  ;;  %v230_v17 = vld [vmem:[%s1799_s10 + $0x264] sm:$0xf] }
  0x23   : > { %227 = vst [vmem:[%s1804_s11 + $0x3c] sm:$0xf] %v226_v15  ;;  %229 = vst [vmem:[%s1804_s11 + $0x40] sm:$0xf] %v228_v16  ;;  %v232_v18 = vld [vmem:[%s1799_s10 + $0x288] sm:$0xf] }
  0x24   : > { %231 = vst [vmem:[%s1804_s11 + $0x44] sm:$0xf] %v230_v17  ;;  %v234_v19 = vld [vmem:[%s1799_s10 + $0x2ac] sm:$0xf]  ;;  %v236_v20 = vld [vmem:[%s1799_s10 + $0x2d0] sm:$0xf] }
  0x25   : > { %233 = vst [vmem:[%s1804_s11 + $0x48] sm:$0xf] %v232_v18  ;;  %235 = vst [vmem:[%s1804_s11 + $0x4c] sm:$0xf] %v234_v19  ;;  %v238_v21 = vld [vmem:[%s1799_s10 + $0x2f4] sm:$0xf] }
  0x26   : > { %237 = vst [vmem:[%s1804_s11 + $0x50] sm:$0xf] %v236_v20  ;;  %v240_v22 = vld [vmem:[%s1799_s10 + $0x318] sm:$0xf]  ;;  %v242_v23 = vld [vmem:[%s1799_s10 + $0x33c] sm:$0xf] }
  0x27   : > { %239 = vst [vmem:[%s1804_s11 + $0x54] sm:$0xf] %v238_v21  ;;  %241 = vst [vmem:[%s1804_s11 + $0x58] sm:$0xf] %v240_v22  ;;  %v244_v24 = vld [vmem:[%s1799_s10 + $0x360] sm:$0xf] }
  0x28   : > { %243 = vst [vmem:[%s1804_s11 + $0x5c] sm:$0xf] %v242_v23  ;;  %v246_v25 = vld [vmem:[%s1799_s10 + $0x384] sm:$0xf]  ;;  %v248_v26 = vld [vmem:[%s1799_s10 + $0x3a8] sm:$0xf] }
  0x29   : > { %245 = vst [vmem:[%s1804_s11 + $0x60] sm:$0xf] %v244_v24  ;;  %247 = vst [vmem:[%s1804_s11 + $0x64] sm:$0xf] %v246_v25  ;;  %v250_v27 = vld [vmem:[%s1799_s10 + $0x3cc] sm:$0xf] }
  0x2a   : > { %249 = vst [vmem:[%s1804_s11 + $0x68] sm:$0xf] %v248_v26  ;;  %v252_v28 = vld [vmem:[%s1799_s10 + $0x3f0] sm:$0xf]  ;;  %v254_v29 = vld [vmem:[%s1799_s10 + $0x414] sm:$0xf] }
  0x2b   : > { %251 = vst [vmem:[%s1804_s11 + $0x6c] sm:$0xf] %v250_v27  ;;  %253 = vst [vmem:[%s1804_s11 + $0x70] sm:$0xf] %v252_v28  ;;  %v256_v30 = vld [vmem:[%s1799_s10 + $0x438] sm:$0xf] }
  0x2c   : > { %255 = vst [vmem:[%s1804_s11 + $0x74] sm:$0xf] %v254_v29  ;;  %v258_v31 = vld [vmem:[%s1799_s10 + $0x45c] sm:$0xf]  ;;  %257 = vst [vmem:[%s1804_s11 + $0x78] sm:$0xf] %v256_v30 }
  0x2d   : > { %259 = vst [vmem:[%s1804_s11 + $0x7c] sm:$0xf] %v258_v31 }
  0x2e PF: > { %p1292_p7 = scmp.ge.s32.totalorder %s1711_s21, 1  ;;  %p354_p8 = scmp.lt.s32.totalorder %s1711_s21, 19 }
  0x30   : > { %p355_p9 = pnand %p1292_p7, %p354_p8 }
  0x31   : > { %s361_s12 = sand.u32 (!%p355_p9), 1, %s1687_s15   ;;  %s1294_s13 = sshll.u32 (!%p355_p9), %s1695_s17, 4 }
  0x32   : > { %358 = sbr.rel (%p355_p9) target bundleno = 375 (0x177), region = 73  ;;  %s1293_s14 = sshll.u32 (!%p355_p9), %s361_s12, 7 }
  0x33   : > { %p393_p10 = scmp.lt.s32.totalorder (!%p355_p9), %s1294_s13, 143  ;;  %s1296_s24 = sshll.u32 (!%p355_p9), %s1699_s18, 5 }
  0x34   : > { %p399_p11 = scmp.lt.s32.totalorder (!%p355_p9), %s1296_s24, 63  ;;  %s1882_s15 = scalar_lea.vmem (!%p355_p9), [#allocation3], %s1293_s14 }
  0x35   : > { %p1298_p12 = scmp.ne.s32.totalorder (!%p355_p9), %s1695_s17, 0 }
  0x39   : > { %s2039_s13 = smov (!%p393_p10, %s1294_s13), 143  ;;  %s2041_s24 = smov (!%p399_p11, %s1296_s24), 63 }
  0x3a   : > { %s1295_s25 = sshll.u32 %s2039_s13, 2  ;;  %s1297_s30 = sshll.u32 %s2041_s24, 2  ;;  %v1713_v32 = vmov (!%p1298_p12), 0.0  }
  0x3b   : > { %s1875_s29 = scalar_lea.vmem %s2022_s1, %s1295_s25  ;;  %s1880_s7 = scalar_lea.vmem %s2025_s4, %s1297_s30  ;;  %409 = vst [vmem:[#allocation2] sm:$0xff] (!%p1298_p12), %v1713_v32  ;;  %410 = vst [vmem:[#allocation2 + $0x8] sm:$0xff] (!%p1298_p12), %v1713_v32 }
  0x3c   : > { %408 = sbr.rel (%p1298_p12) target bundleno = 75 (0x4b), region = 81  ;;  %411 = vst [vmem:[#allocation2 + $0x10] sm:$0xff] (!%p1298_p12), %v1713_v32  ;;  %412 = vst [vmem:[#allocation2 + $0x18] sm:$0xff] (!%p1298_p12), %v1713_v32 }
  0x3d   : > { %413 = vst [vmem:[#allocation2 + $0x20] sm:$0xff] (!%p1298_p12), %v1713_v32  ;;  %414 = vst [vmem:[#allocation2 + $0x28] sm:$0xff] (!%p1298_p12), %v1713_v32 }
  0x3e   : > { %415 = vst [vmem:[#allocation2 + $0x30] sm:$0xff] (!%p1298_p12), %v1713_v32  ;;  %416 = vst [vmem:[#allocation2 + $0x38] sm:$0xff] (!%p1298_p12), %v1713_v32 }
  0x3f   : > { %417 = vst [vmem:[#allocation2 + $0x40] sm:$0xff] (!%p1298_p12), %v1713_v32  ;;  %418 = vst [vmem:[#allocation2 + $0x48] sm:$0xff] (!%p1298_p12), %v1713_v32 }
  0x40   : > { %419 = vst [vmem:[#allocation2 + $0x50] sm:$0xff] (!%p1298_p12), %v1713_v32  ;;  %420 = vst [vmem:[#allocation2 + $0x58] sm:$0xff] (!%p1298_p12), %v1713_v32 }
  0x41   : > { %421 = vst [vmem:[#allocation2 + $0x60] sm:$0xff] (!%p1298_p12), %v1713_v32  ;;  %422 = vst [vmem:[#allocation2 + $0x68] sm:$0xff] (!%p1298_p12), %v1713_v32 }
  0x42   : > { %423 = vst [vmem:[#allocation2 + $0x70] sm:$0xff] (!%p1298_p12), %v1713_v32  ;;  %424 = vst [vmem:[#allocation2 + $0x78] sm:$0xff] (!%p1298_p12), %v1713_v32 }
  0x43   : > { %425 = vst [vmem:[#allocation2 + $0x80] sm:$0xff] %v1713_v32  ;;  %426 = vst [vmem:[#allocation2 + $0x88] sm:$0xff] %v1713_v32 }
  0x44   : > { %427 = vst [vmem:[#allocation2 + $0x90] sm:$0xff] %v1713_v32  ;;  %428 = vst [vmem:[#allocation2 + $0x98] sm:$0xff] %v1713_v32 }
  0x45   : > { %429 = vst [vmem:[#allocation2 + $0xa0] sm:$0xff] %v1713_v32  ;;  %430 = vst [vmem:[#allocation2 + $0xa8] sm:$0xff] %v1713_v32 }
  0x46   : > { %431 = vst [vmem:[#allocation2 + $0xb0] sm:$0xff] %v1713_v32  ;;  %432 = vst [vmem:[#allocation2 + $0xb8] sm:$0xff] %v1713_v32 }
  0x47   : > { %433 = vst [vmem:[#allocation2 + $0xc0] sm:$0xff] %v1713_v32  ;;  %434 = vst [vmem:[#allocation2 + $0xc8] sm:$0xff] %v1713_v32 }
  0x48   : > { %435 = vst [vmem:[#allocation2 + $0xd0] sm:$0xff] %v1713_v32  ;;  %436 = vst [vmem:[#allocation2 + $0xd8] sm:$0xff] %v1713_v32 }
  0x49   : > { %437 = vst [vmem:[#allocation2 + $0xe0] sm:$0xff] %v1713_v32  ;;  %438 = vst [vmem:[#allocation2 + $0xe8] sm:$0xff] %v1713_v32 }
  0x4a   : > { %439 = vst [vmem:[#allocation2 + $0xf0] sm:$0xff] %v1713_v32  ;;  %440 = vst [vmem:[#allocation2 + $0xf8] sm:$0xff] %v1713_v32 }
  0x4b PF: > { %v1633_v33 = vld [vmem:[%s1875_s29] sm:$0xff]   ;;  %v1634_v34 = vld [vmem:[%s1875_s29 + $0x8] sm:$0xff]   ;;  %v1635_v35 = vld [vmem:[%s1875_s29 + $0x10] sm:$0xff]   ;;  %p1323_p13 = scmp.ne.s32.totalorder %s1695_s17, 8 }
  0x4c   : > { %1511 = vmatprep.subr.bf16.mxu0 %v1633_v33  ;;  %1559 = vmatprep.subr.bf16.mxu1 %v1633_v33  ;;  %v1636_v36 = vld [vmem:[%s1875_s29 + $0x18] sm:$0xff]   ;;  %v1641_v37 = vld [vmem:[%s1882_s15] sm:$0xff]   ;;  %v1638_v40 = vld [vmem:[%s1875_s29 + $0x28] sm:$0xff]  }
  0x4d   : > { %1512 = vmatpush3.bf16.msra.mxu0 %v1633_v33  ;;  %1567 = vmatpush3.bf16.msra.mxu1 %v1633_v33  ;;  %v1642_v38 = vld [vmem:[%s1882_s15 + $0x40] sm:$0xff]   ;;  %v1639_v41 = vld [vmem:[%s1875_s29 + $0x30] sm:$0xff]   ;;  %v1640_v42 = vld [vmem:[%s1875_s29 + $0x38] sm:$0xff]  }
  0x4e   : > { %1513 = vmatprep.subr.bf16.mxu0 %v1634_v34  ;;  %1560 = vmatprep.subr.bf16.mxu1 %v1634_v34  ;;  %v1637_v39 = vld [vmem:[%s1875_s29 + $0x20] sm:$0xff]   ;;  %v1643_v43 = vld [vmem:[%s1882_s15 + $0x8] sm:$0xff]   ;;  %v1645_v45 = vld [vmem:[%s1882_s15 + $0x10] sm:$0xff]  }
  0x4f   : > { %1527 = vmatprep.mubr.bf16.mxu0 %v1641_v37  ;;  %1543 = vmatprep.mubr.bf16.mxu1 %v1642_v38  ;;  %v1644_v44 = vld [vmem:[%s1882_s15 + $0x48] sm:$0xff]   ;;  %v1646_v46 = vld [vmem:[%s1882_s15 + $0x50] sm:$0xff]   ;;  %v1647_v47 = vld [vmem:[%s1882_s15 + $0x18] sm:$0xff]  }
  0x50   : > { %v1648_v48 = vld [vmem:[%s1882_s15 + $0x58] sm:$0xff]   ;;  %v1649_v49 = vld [vmem:[%s1882_s15 + $0x20] sm:$0xff]   ;;  %v1651_v51 = vld [vmem:[%s1882_s15 + $0x28] sm:$0xff]  }
  0x51   : > { %1514 = vmatpush3.bf16.msra.mxu0 %v1634_v34  ;;  %1568 = vmatpush3.bf16.msra.mxu1 %v1634_v34  ;;  %v1650_v50 = vld [vmem:[%s1882_s15 + $0x60] sm:$0xff]   ;;  %v1652_v52 = vld [vmem:[%s1882_s15 + $0x68] sm:$0xff]   ;;  %v1653_v53 = vld [vmem:[%s1882_s15 + $0x30] sm:$0xff]  }
  0x52   : > { %1515 = vmatprep.subr.bf16.mxu0 %v1635_v35  ;;  %1561 = vmatprep.subr.bf16.mxu1 %v1635_v35  ;;  %v1654_v54 = vld [vmem:[%s1882_s15 + $0x70] sm:$0xff]   ;;  %v1655_v55 = vld [vmem:[%s1882_s15 + $0x38] sm:$0xff]   ;;  %v441_v59 = vld [vmem:[#allocation2] sm:$0xff] }
  0x53   : > { %v1656_v56 = vld [vmem:[%s1882_s15 + $0x78] sm:$0xff]   ;;  %v443_v57 = vld [vmem:[#allocation2 + $0x10] sm:$0xff]  ;;  %v457_v60 = vld [vmem:[#allocation2 + $0x80] sm:$0xff] }
  0x54   : > { %v459_v58 = vld [vmem:[#allocation2 + $0x90] sm:$0xff]  ;;  %v444_v63 = vld [vmem:[#allocation2 + $0x18] sm:$0xff]  ;;  %v442_v5 = vld [vmem:[#allocation2 + $0x8] sm:$0xff] }
  0x55   : > { %1516 = vmatpush3.bf16.msra.mxu0 %v1635_v35  ;;  %1569 = vmatpush3.bf16.msra.mxu1 %v1635_v35  ;;  %v460_v0 = vld [vmem:[#allocation2 + $0x98] sm:$0xff]  ;;  %v458_v6 = vld [vmem:[#allocation2 + $0x88] sm:$0xff]  ;;  %v447_v17 = vld [vmem:[#allocation2 + $0x30] sm:$0xff] }
  0x56   : > { %1517 = vmatprep.subr.bf16.mxu0 %v1636_v36  ;;  %1562 = vmatprep.subr.bf16.mxu1 %v1636_v36  ;;  %v463_v18 = vld [vmem:[#allocation2 + $0xb0] sm:$0xff]  ;;  %v445_v19 = vld [vmem:[#allocation2 + $0x20] sm:$0xff]  ;;  %v448_v23 = vld [vmem:[#allocation2 + $0x38] sm:$0xff] }
  0x57   : > { %v461_v20 = vld [vmem:[#allocation2 + $0xa0] sm:$0xff]  ;;  %v464_v24 = vld [vmem:[#allocation2 + $0xb8] sm:$0xff]  ;;  %v446_v29 = vld [vmem:[#allocation2 + $0x28] sm:$0xff] }
  0x58   : > { %v462_v30 = vld [vmem:[#allocation2 + $0xa8] sm:$0xff] }
  0x59   : > { %1518 = vmatpush3.bf16.msra.mxu0 %v1636_v36  ;;  %1570 = vmatpush3.bf16.msra.mxu1 %v1636_v36 }
  0x5a   : > { %1519 = vmatprep.subr.bf16.mxu0 %v1637_v39  ;;  %1563 = vmatprep.subr.bf16.mxu1 %v1637_v39 }
  0x5d   : > { %1520 = vmatpush3.bf16.msra.mxu0 %v1637_v39  ;;  %1571 = vmatpush3.bf16.msra.mxu1 %v1637_v39 }
  0x5e   : > { %1521 = vmatprep.subr.bf16.mxu0 %v1638_v40  ;;  %1564 = vmatprep.subr.bf16.mxu1 %v1638_v40 }
  0x61   : > { %1522 = vmatpush3.bf16.msra.mxu0 %v1638_v40  ;;  %1572 = vmatpush3.bf16.msra.mxu1 %v1638_v40 }
  0x62   : > { %1523 = vmatprep.subr.bf16.mxu0 %v1639_v41  ;;  %1565 = vmatprep.subr.bf16.mxu1 %v1639_v41 }
  0x65   : > { %1524 = vmatpush3.bf16.msra.mxu0 %v1639_v41  ;;  %1573 = vmatpush3.bf16.msra.mxu1 %v1639_v41  ;;  %v451_v41 = vld [vmem:[#allocation2 + $0x50] sm:$0xff] }
  0x66   : > { %1525 = vmatprep.subr.bf16.mxu0 %v1640_v42  ;;  %1566 = vmatprep.subr.bf16.mxu1 %v1640_v42 }
  0x69   : > { %1526 = vmatpush3.bf16.msra.mxu0 %v1640_v42  ;;  %1574 = vmatpush3.bf16.msra.mxu1 %v1640_v42  ;;  %v467_v42 = vld [vmem:[#allocation2 + $0xd0] sm:$0xff] }
  0x6c   : > { %1528 = vmatmul.mubr.bf16.vlgmr.msra.gmra.mrb[0].mxu0 %v1643_v43  ;;  %1544 = vmatmul.mubr.bf16.vlgmr.msra.gmra.mrb[0].mxu1 %v1644_v44  ;;  %v449_v43 = vld [vmem:[#allocation2 + $0x40] sm:$0xff] }
  0x6d   : > { %1531 = vmatprep.mubr.bf16.mxu0 %v1645_v45  ;;  %1547 = vmatprep.mubr.bf16.mxu1 %v1646_v46  ;;  %v465_v44 = vld [vmem:[#allocation2 + $0xc0] sm:$0xff] }
  0x74   : > { %1532 = vmatmul.mubr.bf16.gmra.mrb[4].mxu0 %v1647_v47  ;;  %1548 = vmatmul.mubr.bf16.gmra.mrb[4].mxu1 %v1648_v48  ;;  %v452_v47 = vld [vmem:[#allocation2 + $0x58] sm:$0xff] }
  0x75   : > { %1535 = vmatprep.mubr.bf16.mxu0 %v1649_v49  ;;  %1551 = vmatprep.mubr.bf16.mxu1 %v1650_v50  ;;  %v468_v48 = vld [vmem:[#allocation2 + $0xd8] sm:$0xff] }
  0x7c   : > { %1536 = vmatmul.mubr.bf16.gmra.mrb[8].mxu0 %v1651_v51  ;;  %1552 = vmatmul.mubr.bf16.gmra.mrb[8].mxu1 %v1652_v52 }
  0x7d   : > { %1539 = vmatprep.mubr.bf16.mxu0 %v1653_v53  ;;  %1555 = vmatprep.mubr.bf16.mxu1 %v1654_v54  ;;  %v450_v53 = vld [vmem:[#allocation2 + $0x48] sm:$0xff] }
  0x7e   : > { %v466_v54 = vld [vmem:[#allocation2 + $0xc8] sm:$0xff] }
  0x84   : > { %1540 = vmatmul.mubr.bf16.gmra.mrb[12].mxu0 %v1655_v55  ;;  %1556 = vmatmul.mubr.bf16.gmra.mrb[12].mxu1 %v1656_v56 }
 0x13f   : > { %v1529_v61 = vpop.f32.mrb[0].mxu0  ;;  %v1545_v62 = vpop.f32.mrb[0].mxu1 }
 0x140   : > { %v828_v1 = vadd.f32 %v1529_v61, %v443_v57  ;;  %v844_v2 = vadd.f32 %v1545_v62, %v459_v58  ;;  %v699_v3 = vpop.f32.mrb[1].mxu0  ;;  %v763_v4 = vpop.f32.mrb[1].mxu1 }
 0x141   : > { %v826_v7 = vadd.f32 %v699_v3, %v441_v59  ;;  %v842_v8 = vadd.f32 %v763_v4, %v457_v60  ;;  %v1530_v9 = vpop.f32.mrb[2].mxu0  ;;  %v1546_v10 = vpop.f32.mrb[2].mxu1  ;;  %v453_v3 = vld [vmem:[#allocation2 + $0x60] sm:$0xff] }
 0x142   : > { %860 = vst [vmem:[#allocation2 + $0x10] sm:$0xff] %v828_v1  ;;  %876 = vst [vmem:[#allocation2 + $0x90] sm:$0xff] %v844_v2  ;;  %v829_v11 = vadd.f32 %v1530_v9, %v444_v63  ;;  %v845_v12 = vadd.f32 %v1546_v10, %v460_v0  ;;  %v702_v13 = vpop.f32.mrb[3].mxu0  ;;  %v766_v14 = vpop.f32.mrb[3].mxu1  ;;  %v455_v1 = vld [vmem:[#allocation2 + $0x70] sm:$0xff]  ;;  %v469_v4 = vld [vmem:[#allocation2 + $0xe0] sm:$0xff] }
 0x143   : > { %858 = vst [vmem:[#allocation2] sm:$0xff] %v826_v7  ;;  %874 = vst [vmem:[#allocation2 + $0x80] sm:$0xff] %v842_v8  ;;  %v827_v15 = vadd.f32 %v702_v13, %v442_v5  ;;  %v843_v16 = vadd.f32 %v766_v14, %v458_v6  ;;  %v471_v2 = vld [vmem:[#allocation2 + $0xf0] sm:$0xff]  ;;  %v456_v7 = vld [vmem:[#allocation2 + $0x78] sm:$0xff] }
 0x144   : > { %861 = vst [vmem:[#allocation2 + $0x18] sm:$0xff] %v829_v11  ;;  %877 = vst [vmem:[#allocation2 + $0x98] sm:$0xff] %v845_v12  ;;  %v472_v8 = vld [vmem:[#allocation2 + $0xf8] sm:$0xff]  ;;  %v454_v13 = vld [vmem:[#allocation2 + $0x68] sm:$0xff] }
 0x145   : > { %859 = vst [vmem:[#allocation2 + $0x8] sm:$0xff] %v827_v15  ;;  %875 = vst [vmem:[#allocation2 + $0x88] sm:$0xff] %v843_v16  ;;  %v470_v14 = vld [vmem:[#allocation2 + $0xe8] sm:$0xff] }
 0x147   : > { %v1533_v21 = vpop.f32.mrb[4].mxu0  ;;  %v1549_v22 = vpop.f32.mrb[4].mxu1 }
 0x148   : > { %v832_v25 = vadd.f32 %v1533_v21, %v447_v17  ;;  %v848_v26 = vadd.f32 %v1549_v22, %v463_v18  ;;  %v715_v27 = vpop.f32.mrb[5].mxu0  ;;  %v779_v28 = vpop.f32.mrb[5].mxu1 }
 0x149   : > { %v830_v31 = vadd.f32 %v715_v27, %v445_v19  ;;  %v846_v32 = vadd.f32 %v779_v28, %v461_v20  ;;  %v1534_v33 = vpop.f32.mrb[6].mxu0  ;;  %v1550_v34 = vpop.f32.mrb[6].mxu1  ;;  %v1913_v27 = vld [vmem:[%s2023_s2] ss:$0 sm:$0xff] (!%p1323_p13) }
 0x14a   : > { %864 = vst [vmem:[#allocation2 + $0x30] sm:$0xff] %v832_v25  ;;  %880 = vst [vmem:[#allocation2 + $0xb0] sm:$0xff] %v848_v26  ;;  %v833_v35 = vadd.f32 %v1534_v33, %v448_v23  ;;  %v849_v36 = vadd.f32 %v1550_v34, %v464_v24  ;;  %v718_v37 = vpop.f32.mrb[7].mxu0  ;;  %v782_v38 = vpop.f32.mrb[7].mxu1  ;;  %v894_v25 = vld [vmem:[#allocation2] sm:$0xff] (!%p1323_p13) }
 0x14b   : > { %862 = vst [vmem:[#allocation2 + $0x20] sm:$0xff] %v830_v31  ;;  %878 = vst [vmem:[#allocation2 + $0xa0] sm:$0xff] %v846_v32  ;;  %v831_v39 = vadd.f32 %v718_v37, %v446_v29  ;;  %v847_v40 = vadd.f32 %v782_v38, %v462_v30  ;;  %v933_v28 = vmul.f32 (!%p1323_p13), %v1913_v27, %v894_v25  ;;  %v1920_v30 = vld [vmem:[%s2024_s3] ss:$0 sm:$0xff] (!%p1323_p13)  ;;  %v896_v31 = vld [vmem:[#allocation2 + $0x10] sm:$0xff] (!%p1323_p13) }
 0x14c   : > { %865 = vst [vmem:[#allocation2 + $0x38] sm:$0xff] %v833_v35  ;;  %881 = vst [vmem:[#allocation2 + $0xb8] sm:$0xff] %v849_v36  ;;  %v895_v26 = vld [vmem:[#allocation2 + $0x8] sm:$0xff] (!%p1323_p13)  ;;  %v897_v32 = vld [vmem:[#allocation2 + $0x18] sm:$0xff] (!%p1323_p13)  ;;  %v935_v33 = vmul.f32 (!%p1323_p13), %v1913_v27, %v896_v31 }
 0x14d   : > { %863 = vst [vmem:[#allocation2 + $0x28] sm:$0xff] %v831_v39  ;;  %879 = vst [vmem:[#allocation2 + $0xa8] sm:$0xff] %v847_v40  ;;  %v934_v29 = vmul.f32 (!%p1323_p13), %v1913_v27, %v895_v26  ;;  %v936_v34 = vmul.f32 (!%p1323_p13), %v1913_v27, %v897_v32  ;;  %v972_v38 = vadd.f32 (!%p1323_p13), %v1920_v30, %v933_v28  ;;  %v912_v31 = vld [vmem:[#allocation2 + $0x90] sm:$0xff] (!%p1323_p13)  ;;  %v913_v32 = vld [vmem:[#allocation2 + $0x98] sm:$0xff] (!%p1323_p13) }
 0x14f   : > { %v1537_v45 = vpop.f32.mrb[8].mxu0  ;;  %v1553_v46 = vpop.f32.mrb[8].mxu1  ;;  %v973_v39 = vadd.f32 (!%p1323_p13), %v1920_v30, %v934_v29 }
 0x150   : > { %v836_v49 = vadd.f32 %v1537_v45, %v451_v41  ;;  %v852_v50 = vadd.f32 %v1553_v46, %v467_v42  ;;  %v731_v51 = vpop.f32.mrb[9].mxu0  ;;  %v795_v52 = vpop.f32.mrb[9].mxu1 }
 0x151   : > { %v834_v55 = vadd.f32 %v731_v51, %v449_v43  ;;  %v850_v56 = vadd.f32 %v795_v52, %v465_v44  ;;  %v1538_v57 = vpop.f32.mrb[10].mxu0  ;;  %v1554_v58 = vpop.f32.mrb[10].mxu1  ;;  %v900_v37 = vld [vmem:[#allocation2 + $0x30] sm:$0xff] (!%p1323_p13)  ;;  %v974_v43 = vadd.f32 (!%p1323_p13), %v1920_v30, %v935_v33  ;;  %v975_v44 = vadd.f32 (!%p1323_p13), %v1920_v30, %v936_v34 }
 0x152   : > { %868 = vst [vmem:[#allocation2 + $0x50] sm:$0xff] %v836_v49  ;;  %884 = vst [vmem:[#allocation2 + $0xd0] sm:$0xff] %v852_v50  ;;  %v837_v59 = vadd.f32 %v1538_v57, %v452_v47  ;;  %v853_v60 = vadd.f32 %v1554_v58, %v468_v48  ;;  %v734_v61 = vpop.f32.mrb[11].mxu0  ;;  %v798_v62 = vpop.f32.mrb[11].mxu1  ;;  %v898_v35 = vld [vmem:[#allocation2 + $0x20] sm:$0xff] (!%p1323_p13)  ;;  %v939_v45 = vmul.f32 (!%p1323_p13), %v1913_v27, %v900_v37  ;;  %v1004_v48 = vmax.f32 (!%p1323_p13), %v972_v38, 0.0 }
 0x153   : > { %866 = vst [vmem:[#allocation2 + $0x40] sm:$0xff] %v834_v55  ;;  %882 = vst [vmem:[#allocation2 + $0xc0] sm:$0xff] %v850_v56  ;;  %v835_v63 = vadd.f32 %v734_v61, %v450_v53  ;;  %v851_v0 = vadd.f32 %v798_v62, %v466_v54  ;;  %v937_v40 = vmul.f32 (!%p1323_p13), %v1913_v27, %v898_v35  ;;  %v901_v42 = vld [vmem:[#allocation2 + $0x38] sm:$0xff] (!%p1323_p13)  ;;  %v1005_v49 = vmax.f32 (!%p1323_p13), %v973_v39, 0.0  ;;  %v914_v37 = vld [vmem:[#allocation2 + $0xa0] sm:$0xff] (!%p1323_p13) }
 0x154   : > { %869 = vst [vmem:[#allocation2 + $0x58] sm:$0xff] %v837_v59  ;;  %885 = vst [vmem:[#allocation2 + $0xd8] sm:$0xff] %v853_v60  ;;  %v899_v36 = vld [vmem:[#allocation2 + $0x28] sm:$0xff] (!%p1323_p13)  ;;  %v940_v46 = vmul.f32 (!%p1323_p13), %v1913_v27, %v901_v42  ;;  %v1006_v53 = vmax.f32 (!%p1323_p13), %v974_v43, 0.0  ;;  %v1007_v54 = vmax.f32 (!%p1323_p13), %v975_v44, 0.0  ;;  %v978_v55 = vadd.f32 (!%p1323_p13), %v1920_v30, %v939_v45  ;;  %v916_v43 = vld [vmem:[#allocation2 + $0xb0] sm:$0xff] (!%p1323_p13) }
 0x155   : > { %867 = vst [vmem:[#allocation2 + $0x48] sm:$0xff] %v835_v63  ;;  %883 = vst [vmem:[#allocation2 + $0xc8] sm:$0xff] %v851_v0  ;;  %v938_v41 = vmul.f32 (!%p1323_p13), %v1913_v27, %v899_v36  ;;  %v976_v50 = vadd.f32 (!%p1323_p13), %v1920_v30, %v937_v40  ;;  %v1395_v59 = vpack.c.bf16 (!%p1323_p13), %v1005_v49, %v1004_v48  ;;  %v915_v38 = vld [vmem:[#allocation2 + $0xa8] sm:$0xff] (!%p1323_p13)  ;;  %v917_v48 = vld [vmem:[#allocation2 + $0xb8] sm:$0xff] (!%p1323_p13) }
 0x156   : > { %v979_v56 = vadd.f32 (!%p1323_p13), %v1920_v30, %v940_v46  ;;  %v951_v46 = vmul.f32 (!%p1323_p13), %v1913_v27, %v912_v31 }
 0x157   : > { %v1541_v5 = vpop.f32.mrb[12].mxu0  ;;  %v1557_v6 = vpop.f32.mrb[12].mxu1  ;;  %893 = sbr.rel (%p1323_p13) target bundleno = 375 (0x177), region = 85  ;;  %v977_v51 = vadd.f32 (!%p1323_p13), %v1920_v30, %v938_v41  ;;  %v1008_v60 = vmax.f32 (!%p1323_p13), %v976_v50, 0.0  ;;  %1396 = vst [vmem:[%s1880_s7] sm:$0xff] (!%p1323_p13), %v1395_v59  }
 0x158   : > { %v840_v9 = vadd.f32 %v1541_v5, %v455_v1  ;;  %v856_v10 = vadd.f32 %v1557_v6, %v471_v2  ;;  %v747_v11 = vpop.f32.mrb[13].mxu0  ;;  %v811_v12 = vpop.f32.mrb[13].mxu1  ;;  %v1400_v1 = vpack.c.bf16 (!%p1323_p13), %v1007_v54, %v1006_v53  ;;  %v1010_v2 = vmax.f32 (!%p1323_p13), %v978_v55, 0.0 }
 0x159   : > { %v838_v15 = vadd.f32 %v747_v11, %v453_v3  ;;  %v854_v16 = vadd.f32 %v811_v12, %v469_v4  ;;  %v1542_v17 = vpop.f32.mrb[14].mxu0  ;;  %v1558_v18 = vpop.f32.mrb[14].mxu1  ;;  %v904_v57 = vld [vmem:[#allocation2 + $0x50] sm:$0xff] (!%p1323_p13)  ;;  %v1009_v61 = vmax.f32 (!%p1323_p13), %v977_v51, 0.0  ;;  %v1011_v3 = vmax.f32 (!%p1323_p13), %v979_v56, 0.0 }
 0x15a   : > { %872 = vst [vmem:[#allocation2 + $0x70] sm:$0xff] %v840_v9  ;;  %888 = vst [vmem:[#allocation2 + $0xf0] sm:$0xff] %v856_v10  ;;  %v841_v19 = vadd.f32 %v1542_v17, %v456_v7  ;;  %v857_v20 = vadd.f32 %v1558_v18, %v472_v8  ;;  %v750_v21 = vpop.f32.mrb[15].mxu0  ;;  %v814_v22 = vpop.f32.mrb[15].mxu1  ;;  %v902_v47 = vld [vmem:[#allocation2 + $0x40] sm:$0xff] (!%p1323_p13)  ;;  %v943_v8 = vmul.f32 (!%p1323_p13), %v1913_v27, %v904_v57 }
 0x15b   : > { %870 = vst [vmem:[#allocation2 + $0x60] sm:$0xff] %v838_v15  ;;  %886 = vst [vmem:[#allocation2 + $0xe0] sm:$0xff] %v854_v16  ;;  %v839_v23 = vadd.f32 %v750_v21, %v454_v13  ;;  %v855_v24 = vadd.f32 %v814_v22, %v470_v14  ;;  %v905_v58 = vld [vmem:[#allocation2 + $0x58] sm:$0xff] (!%p1323_p13)  ;;  %v941_v62 = vmul.f32 (!%p1323_p13), %v1913_v27, %v902_v47  ;;  %v910_v15 = vld [vmem:[#allocation2 + $0x80] sm:$0xff] (!%p1323_p13) }
 0x15c   : > { %873 = vst [vmem:[#allocation2 + $0x78] sm:$0xff] %v841_v19  ;;  %889 = vst [vmem:[#allocation2 + $0xf8] sm:$0xff] %v857_v20  ;;  %v903_v52 = vld [vmem:[#allocation2 + $0x48] sm:$0xff] (!%p1323_p13)  ;;  %v1405_v6 = vpack.c.bf16 (!%p1323_p13), %v1009_v61, %v1008_v60  ;;  %v944_v9 = vmul.f32 (!%p1323_p13), %v1913_v27, %v905_v58  ;;  %v1410_v11 = vpack.c.bf16 (!%p1323_p13), %v1011_v3, %v1010_v2  ;;  %v918_v53 = vld [vmem:[#allocation2 + $0xc0] sm:$0xff] (!%p1323_p13) }
 0x15d   : > { %871 = vst [vmem:[#allocation2 + $0x68] sm:$0xff] %v839_v23  ;;  %887 = vst [vmem:[#allocation2 + $0xe8] sm:$0xff] %v855_v24  ;;  %v942_v4 = vmul.f32 (!%p1323_p13), %v1913_v27, %v903_v52  ;;  %v980_v7 = vadd.f32 (!%p1323_p13), %v1920_v30, %v941_v62  ;;  %v982_v17 = vadd.f32 (!%p1323_p13), %v1920_v30, %v943_v8  ;;  %v911_v24 = vld [vmem:[#allocation2 + $0x88] sm:$0xff] (!%p1323_p13)  ;;  %v920_v3 = vld [vmem:[#allocation2 + $0xd0] sm:$0xff] (!%p1323_p13) }
 0x15e   : > { %1472 = vst [vmem:[%s1880_s7 + $0x8] sm:$0xff] %v1400_v1   ;;  %1473 = vst [vmem:[%s1880_s7 + $0x10] sm:$0xff] %v1405_v6   ;;  %v983_v18 = vadd.f32 %v1920_v30, %v944_v9  ;;  %v949_v29 = vmul.f32 %v1913_v27, %v910_v15  ;;  %v950_v41 = vmul.f32 %v1913_v27, %v911_v24  ;;  %v919_v62 = vld [vmem:[#allocation2 + $0xc8] sm:$0xff] }
 0x15f   : > { %v981_v12 = vadd.f32 %v1920_v30, %v942_v4  ;;  %v1012_v16 = vmax.f32 %v980_v7, 0.0  ;;  %1474 = vst [vmem:[%s1880_s7 + $0x18] sm:$0xff] %v1410_v11   ;;  %v1014_v25 = vmax.f32 %v982_v17, 0.0  ;;  %v952_v47 = vmul.f32 %v1913_v27, %v913_v32  ;;  %v921_v4 = vld [vmem:[#allocation2 + $0xd8] sm:$0xff] }
 0x160   : > { %v1015_v26 = vmax.f32 %v983_v18, 0.0  ;;  %v988_v42 = vadd.f32 %v1920_v30, %v949_v29  ;;  %v989_v49 = vadd.f32 %v1920_v30, %v950_v41  ;;  %v953_v51 = vmul.f32 %v1913_v27, %v914_v37 }
 0x161   : > { %v908_v5 = vld [vmem:[#allocation2 + $0x70] sm:$0xff]  ;;  %v1013_v20 = vmax.f32 %v981_v12, 0.0  ;;  %v954_v52 = vmul.f32 %v1913_v27, %v915_v38  ;;  %v990_v55 = vadd.f32 %v1920_v30, %v951_v46  ;;  %v991_v56 = vadd.f32 %v1920_v30, %v952_v47 }
 0x162   : > { %v906_v63 = vld [vmem:[#allocation2 + $0x60] sm:$0xff]  ;;  %v947_v19 = vmul.f32 %v1913_v27, %v908_v5  ;;  %v1420_v39 = vpack.c.bf16 %v1015_v26, %v1014_v25  ;;  %v1020_v50 = vmax.f32 %v988_v42, 0.0  ;;  %v955_v57 = vmul.f32 %v1913_v27, %v916_v43  ;;  %v924_v15 = vld [vmem:[#allocation2 + $0xf0] sm:$0xff] }
 0x163   : > { %v909_v10 = vld [vmem:[#allocation2 + $0x78] sm:$0xff]  ;;  %v945_v13 = vmul.f32 %v1913_v27, %v906_v63  ;;  %v1415_v33 = vpack.c.bf16 %v1013_v20, %v1012_v16  ;;  %v1021_v58 = vmax.f32 %v989_v49, 0.0  ;;  %v992_v59 = vadd.f32 %v1920_v30, %v953_v51  ;;  %v922_v9 = vld [vmem:[#allocation2 + $0xe0] sm:$0xff] }
 0x164   : > { %v907_v0 = vld [vmem:[#allocation2 + $0x68] sm:$0xff]  ;;  %v948_v23 = vmul.f32 %v1913_v27, %v909_v10  ;;  %v986_v28 = vadd.f32 %v1920_v30, %v947_v19  ;;  %1476 = vst [vmem:[%s1880_s7 + $0x28] sm:$0xff] %v1420_v39   ;;  %v993_v60 = vadd.f32 %v1920_v30, %v954_v52  ;;  %v956_v61 = vmul.f32 %v1913_v27, %v917_v48  ;;  %v925_v20 = vld [vmem:[#allocation2 + $0xf8] sm:$0xff] }
 0x165   : > { %v946_v14 = vmul.f32 %v1913_v27, %v907_v0  ;;  %v984_v21 = vadd.f32 %v1920_v30, %v945_v13  ;;  %1475 = vst [vmem:[%s1880_s7 + $0x20] sm:$0xff] %v1415_v33   ;;  %v1022_v63 = vmax.f32 %v990_v55, 0.0  ;;  %v1023_v0 = vmax.f32 %v991_v56, 0.0  ;;  %v923_v10 = vld [vmem:[#allocation2 + $0xe8] sm:$0xff] }
 0x166   : > { %v987_v36 = vadd.f32 %v1920_v30, %v948_v23  ;;  %v1018_v40 = vmax.f32 %v986_v28, 0.0  ;;  %v994_v1 = vadd.f32 %v1920_v30, %v955_v57  ;;  %v957_v2 = vmul.f32 %v1913_v27, %v918_v53 }
 0x167   : > { %v985_v22 = vadd.f32 %v1920_v30, %v946_v14  ;;  %v1016_v34 = vmax.f32 %v984_v21, 0.0  ;;  %v1435_v5 = vpack.c.bf16 %v1021_v58, %v1020_v50  ;;  %v1024_v6 = vmax.f32 %v992_v59, 0.0 }
 0x168   : > { %v1019_v45 = vmax.f32 %v987_v36, 0.0  ;;  %v1025_v7 = vmax.f32 %v993_v60, 0.0  ;;  %v995_v8 = vadd.f32 %v1920_v30, %v956_v61  ;;  %v1440_v11 = vpack.c.bf16 %v1023_v0, %v1022_v63 }
 0x169   : > { %v1017_v35 = vmax.f32 %v985_v22, 0.0  ;;  %v1026_v12 = vmax.f32 %v994_v1, 0.0  ;;  %v958_v13 = vmul.f32 %v1913_v27, %v919_v62  ;;  %v996_v14 = vadd.f32 %v1920_v30, %v957_v2  ;;  %1479 = vst [vmem:[%s1880_s7 + $0x40] sm:$0xff] %v1435_v5  }
 0x16a   : > { %v1430_v54 = vpack.c.bf16 %v1019_v45, %v1018_v40  ;;  %v1445_v16 = vpack.c.bf16 %v1025_v7, %v1024_v6  ;;  %v1027_v17 = vmax.f32 %v995_v8, 0.0  ;;  %v959_v18 = vmul.f32 %v1913_v27, %v920_v3  ;;  %1480 = vst [vmem:[%s1880_s7 + $0x48] sm:$0xff] %v1440_v11  }
 0x16b   : > { %v1425_v44 = vpack.c.bf16 %v1017_v35, %v1016_v34  ;;  %v960_v19 = vmul.f32 %v1913_v27, %v921_v4  ;;  %v997_v21 = vadd.f32 %v1920_v30, %v958_v13  ;;  %v1028_v22 = vmax.f32 %v996_v14, 0.0 }
 0x16c   : > { %1478 = vst [vmem:[%s1880_s7 + $0x38] sm:$0xff] %v1430_v54   ;;  %v961_v23 = vmul.f32 %v1913_v27, %v922_v9  ;;  %v962_v24 = vmul.f32 %v1913_v27, %v923_v10  ;;  %1481 = vst [vmem:[%s1880_s7 + $0x50] sm:$0xff] %v1445_v16   ;;  %v1450_v25 = vpack.c.bf16 %v1027_v17, %v1026_v12 }
 0x16d   : > { %1477 = vst [vmem:[%s1880_s7 + $0x30] sm:$0xff] %v1425_v44   ;;  %v998_v26 = vadd.f32 %v1920_v30, %v959_v18  ;;  %v999_v28 = vadd.f32 %v1920_v30, %v960_v19  ;;  %v963_v29 = vmul.f32 %v1913_v27, %v924_v15  ;;  %v1029_v31 = vmax.f32 %v997_v21, 0.0 }
 0x16e   : > { %v1000_v32 = vadd.f32 %v1920_v30, %v961_v23  ;;  %v1001_v33 = vadd.f32 %v1920_v30, %v962_v24  ;;  %v964_v34 = vmul.f32 %v1913_v27, %v925_v20  ;;  %1482 = vst [vmem:[%s1880_s7 + $0x58] sm:$0xff] %v1450_v25  }
 0x16f   : > { %v1030_v35 = vmax.f32 %v998_v26, 0.0  ;;  %v1031_v36 = vmax.f32 %v999_v28, 0.0  ;;  %v1002_v37 = vadd.f32 %v1920_v30, %v963_v29  ;;  %v1455_v38 = vpack.c.bf16 %v1029_v31, %v1028_v22 }
 0x170   : > { %v1032_v39 = vmax.f32 %v1000_v32, 0.0  ;;  %v1033_v40 = vmax.f32 %v1001_v33, 0.0  ;;  %v1003_v41 = vadd.f32 %v1920_v30, %v964_v34 }
 0x171   : > { %v1460_v42 = vpack.c.bf16 %v1031_v36, %v1030_v35  ;;  %v1034_v43 = vmax.f32 %v1002_v37, 0.0  ;;  %1483 = vst [vmem:[%s1880_s7 + $0x60] sm:$0xff] %v1455_v38  }
 0x172   : > { %v1465_v44 = vpack.c.bf16 %v1033_v40, %v1032_v39  ;;  %v1035_v45 = vmax.f32 %v1003_v41, 0.0 }
 0x173   : > { %1484 = vst [vmem:[%s1880_s7 + $0x68] sm:$0xff] %v1460_v42  }
 0x174   : > { %1485 = vst [vmem:[%s1880_s7 + $0x70] sm:$0xff] %v1465_v44   ;;  %v1470_v46 = vpack.c.bf16 %v1035_v45, %v1034_v43 }
 0x176   : > { %1486 = vst [vmem:[%s1880_s7 + $0x78] sm:$0xff] %v1470_v46  }
 0x177 PF: > { %s14_s21 = sadd.s32 1, %s1711_s21   ;;  %s2026_s15 = smov %s1691_s16 }
 0x178   : > { %p11_p0 = scmp.ge.s32.totalorder %s14_s21, 20   ;;  %s2027_s16 = smov %s1790_s28 }
 0x179   : > { %s2028_s17 = smov %s1703_s19  ;;  %s2029_s18 = smov %s1707_s20 }
 0x17a   : > { %s2030_s19 = smov %s2033_s22  ;;  %s2031_s20 = smov %s2037_s23 }
 0x17b   :  { %13 = sbr.rel (!%p11_p0) target bundleno = 4 (0x4), region = 123 }

// kernel: forward.22
= control target key start
LH: loop header
LB: loop body
LE: loop exit
PB: predicated region body
PF: predicated region fallthrough
CT: control target
= control target key end

     0   :  { %s2903_s0 = inlined_call_operand.vmem [shape: s32[8], index: 0, kind: input, shape index: {}]   ;;  %s2904_s2 = inlined_call_operand.vmem [shape: bf16[512,1152], index: 2, kind: input, shape index: {}]   ;;  %s2905_s3 = inlined_call_operand.vmem [shape: bf16[4,1152,128], index: 3, kind: input, shape index: {}]   ;;  %s2906_s4 = inlined_call_operand.vmem [shape: f32[4,512,1], index: 4, kind: input, shape index: {}]   ;;  %s2907_s5 = inlined_call_operand.vmem [shape: f32[1,128], index: 5, kind: input, shape index: {}]   ;;  %s2908_s6 = inlined_call_operand.vmem [shape: f32[1,128], index: 6, kind: input, shape index: {}]   ;;  %s2909_s7 = inlined_call_operand.vmem [shape: bf16[512,128], index: 7, kind: input, shape index: {}]   ;;  %s2910_s8 = inlined_call_operand.vmem [shape: bf16[512,128], index: 8, kind: output, shape index: {}]   ;;  %s2911_s1 = inlined_call_operand.vmem [shape: s32[2], index: 1, kind: input, shape index: {}]  }
   0x1   :  { %2919 = sst [smem:[#allocation17_spill]] %s2904_s2  ;;  %s13_s29 = sshll.u32 %s2903_s0, 4  ;;  %s14_s29 = int_to_ptr.vmem [resolvable:$true] %s13_s29 }
   0x2   :  { %s17_s10 = sshll.u32 %s2911_s1, 4  ;;  %s2326_s11 = scalar_lea.vmem %s14_s29, 16  ;;  %s18_s10 = int_to_ptr.vmem [resolvable:$true] %s17_s10 }
   0x3   :  { %p2327_p0 = scmp.ne.s32.totalorder %s14_s29, %s2326_s11  ;;  %p2331_p1 = scmp.lt.s32.totalorder %s14_s29, %s14_s29 }
   0x4   :  { %p2332_p2 = scmp.lt.s32.totalorder %s2326_s11, %s2326_s11 }
   0x6   :  { %p2333_p3 = por %p2332_p2, %p2331_p1 }
   0x8   :  { %p2334_p4 = pnand %p2333_p3, %p2327_p0 }
   0xa   :  { %2337 = shalt.err (!%p2334_p4)  }
   0xb   :  { %s2424_s12 = smov [#allocation4]   ;;  %s2338_s13 = scalar_lea.vmem %s18_s10, 16 }
   0xc   :  { %16 = dma.vmem_to_smem %s14_s29, 16, %s2424_s12, [#allocation3] }
   0xd   :  { %p2339_p5 = scmp.ne.s32.totalorder %s18_s10, %s2338_s13  ;;  %p2343_p6 = scmp.lt.s32.totalorder %s18_s10, %s18_s10 }
   0xe   :  { %p2344_p7 = scmp.lt.s32.totalorder %s2338_s13, %s2338_s13 }
  0x10   :  { %p2345_p8 = por %p2344_p7, %p2343_p6 }
  0x12   :  { %p2346_p9 = pnand %p2345_p8, %p2339_p5 }
  0x14   :  { %2349 = shalt.err (!%p2346_p9)  }
  0x15   :  { %s2425_s0 = smov [#allocation5]  }
  0x16   :  { %20 = dma.vmem_to_smem %s18_s10, 16, %s2425_s0, [#allocation3] }
  0x17   :  { %2386 = dma.done.wait [#allocation3], 32 }
  0x18   :  { %2387 = vsyncadd [#allocation3], 4294967264 }
  0x19   :  { %22 = sfence }
  0x1a   :  { %s2479_s1 = smov 0   ;;  %s2481_s14 = smov 0  }
  0x1b   :  { %s2483_s15 = smov 0   ;;  %s2485_s16 = smov 0  }
  0x1c   :  { %s2487_s17 = smov 0   ;;  %s2489_s18 = smov 0  }
  0x1d   :  { %s2491_s19 = smov 0   ;;  %s2493_s20 = smov 0  }
  0x1e   :  { %s2495_s21 = smov 0  }
  0x1f LB: > { %2920 = sst [smem:[#allocation8_spill]] %s2394_s14  ;;  %s40_s22 = sadd.s32 1, %s2410_s18  ;;  %s2422_s21 = sphi %s2495_s21, %s28_s21   ;;  %s2418_s20 = sphi %s2493_s20, %s2938_s20   ;;  %s2414_s19 = sphi %s2491_s19, %s2937_s19   ;;  %s2410_s18 = sphi %s2489_s18, %s2936_s18   ;;  %s2406_s17 = sphi %s2487_s17, %s2935_s17   ;;  %s2402_s16 = sphi %s2485_s16, %s2934_s16   ;;  %s2398_s15 = sphi %s2483_s15, %s2933_s15   ;;  %s2394_s14 = sphi %s2481_s14, %s2932_s14   ;;  %s2390_s1 = sphi %s2479_s1, %s2931_s1  }
  0x20   : > { %2921 = sst [smem:[#allocation9_spill]] %s2410_s18  ;;  %p41_p10 = scmp.ge.s32.totalorder %s40_s22, 4 }
  0x21   : > { %2922 = sst [smem:[#allocation10_spill]] %s2414_s19  ;;  %s43_s23 = sadd.s32 1, %s2414_s19 }
  0x22   : > { %2923 = sst [smem:[#allocation11_spill]] %s2418_s20  ;;  %p63_p11 = scmp.ne.s32.totalorder %s2394_s14, %s2390_s1 }
  0x23   : > { %2924 = sst [smem:[#allocation12_spill]] %s2422_s21  ;;  %s2940_s22 = smov (%p41_p10, %s40_s22), 0 }
  0x24   : > { %2925 = sst [smem:[#allocation13_spill]] %s2940_s22  ;;  %s2942_s23 = smov (!%p41_p10, %s43_s23), %s2414_s19 }
  0x25   : > { %p64_p12 = scmp.eq.s32.totalorder %s2422_s21, 0  ;;  %p45_p13 = scmp.ge.s32.totalorder %s2942_s23, 9 }
  0x26   : > { %s47_s24 = sadd.s32 1, %s2418_s20  ;;  %s56_s28 = sadd.s32 1, %s2394_s14 }
  0x27   : > { %p65_p0 = por %p64_p12, %p63_p11  ;;  %s2944_s23 = smov (%p45_p13, %s2942_s23), 0 }
  0x28   : > { %2926 = sst [smem:[#allocation14_spill]] %s2944_s23  ;;  %s2946_s24 = smov (!%p45_p13, %s47_s24), %s2418_s20 }
  0x29   : > { %p49_p1 = scmp.ge.s32.totalorder %s2946_s24, 2  ;;  %s52_s25 = ssub.s32 %s2414_s19, %s2944_s23 }
  0x2a   : > { %p1849_p3 = scmp.ge.s32.totalorder %s2422_s21, 72 }
  0x2b   : > { %s2948_s24 = smov (%p49_p1, %s2946_s24), 0 }
  0x2c   : > { %2927 = sst [smem:[#allocation15_spill]] %s2948_s24  ;;  %s51_s26 = ssub.s32 %s2418_s20, %s2948_s24 }
  0x2d   : > { %s53_s27 = sor.u32 %s52_s25, %s51_s26  ;;  %257 = sbr.rel (%p1849_p3) target bundleno = 83 (0x53), region = 24 }
  0x2e   : > { %p54_p2 = scmp.eq.s32.totalorder %s53_s27, 0 }
  0x30   : > { %s2544_s29 = scalar_select %p54_p2, %s2394_s14, %s56_s28  }
  0x32   : > { %2928 = sst [smem:[#allocation16_spill]] %s2544_s29 }
  0x34   : > { %260 = sbr.rel (!%p65_p0) target bundleno = 83 (0x53), region = 28  ;;  %s262_s30 = sand.u32 (%p65_p0), 1, %s2394_s14  }
  0x35   : > { %s2222_s9 = smul.u32 (%p65_p0), 288, %s2418_s20  ;;  %s1850_s10 = sshll.u32 (%p65_p0), %s262_s30, 7 }
  0x36   : > { %s2929_s2 = sld [smem:[#allocation17_spill]] (%p65_p0)  ;;  %s2558_s26 = scalar_lea.vmem (%p65_p0), [#allocation6], %s1850_s10 }
  0x37   : > { %s267_s11 = sadd.s32 (%p65_p0), %s2414_s19, %s2222_s9 }
  0x38   : > { %s1853_s12 = sshll.u32 (%p65_p0), %s267_s11, 2 }
  0x3c   : > { %s2553_s25 = scalar_lea.vmem %s2929_s2, %s1853_s12 }
  0x3d   : > { %v285_v0 = vld [vmem:[%s2553_s25] sm:$0xf]  ;;  %v287_v1 = vld [vmem:[%s2553_s25 + $0x24] sm:$0xf]  ;;  %v289_v2 = vld [vmem:[%s2553_s25 + $0x48] sm:$0xf] }
  0x3e   : > { %286 = vst [vmem:[%s2558_s26] sm:$0xf] %v285_v0  ;;  %288 = vst [vmem:[%s2558_s26 + $0x4] sm:$0xf] %v287_v1  ;;  %v291_v3 = vld [vmem:[%s2553_s25 + $0x6c] sm:$0xf] }
  0x3f   : > { %290 = vst [vmem:[%s2558_s26 + $0x8] sm:$0xf] %v289_v2  ;;  %v293_v4 = vld [vmem:[%s2553_s25 + $0x90] sm:$0xf]  ;;  %v295_v5 = vld [vmem:[%s2553_s25 + $0xb4] sm:$0xf] }
  0x40   : > { %292 = vst [vmem:[%s2558_s26 + $0xc] sm:$0xf] %v291_v3  ;;  %294 = vst [vmem:[%s2558_s26 + $0x10] sm:$0xf] %v293_v4  ;;  %v297_v6 = vld [vmem:[%s2553_s25 + $0xd8] sm:$0xf] }
  0x41   : > { %296 = vst [vmem:[%s2558_s26 + $0x14] sm:$0xf] %v295_v5  ;;  %v299_v7 = vld [vmem:[%s2553_s25 + $0xfc] sm:$0xf]  ;;  %v301_v8 = vld [vmem:[%s2553_s25 + $0x120] sm:$0xf] }
  0x42   : > { %298 = vst [vmem:[%s2558_s26 + $0x18] sm:$0xf] %v297_v6  ;;  %300 = vst [vmem:[%s2558_s26 + $0x1c] sm:$0xf] %v299_v7  ;;  %v303_v9 = vld [vmem:[%s2553_s25 + $0x144] sm:$0xf] }
  0x43   : > { %302 = vst [vmem:[%s2558_s26 + $0x20] sm:$0xf] %v301_v8  ;;  %v305_v10 = vld [vmem:[%s2553_s25 + $0x168] sm:$0xf]  ;;  %v307_v11 = vld [vmem:[%s2553_s25 + $0x18c] sm:$0xf] }
  0x44   : > { %304 = vst [vmem:[%s2558_s26 + $0x24] sm:$0xf] %v303_v9  ;;  %306 = vst [vmem:[%s2558_s26 + $0x28] sm:$0xf] %v305_v10  ;;  %v309_v12 = vld [vmem:[%s2553_s25 + $0x1b0] sm:$0xf] }
  0x45   : > { %308 = vst [vmem:[%s2558_s26 + $0x2c] sm:$0xf] %v307_v11  ;;  %v311_v13 = vld [vmem:[%s2553_s25 + $0x1d4] sm:$0xf]  ;;  %v313_v14 = vld [vmem:[%s2553_s25 + $0x1f8] sm:$0xf] }
  0x46   : > { %310 = vst [vmem:[%s2558_s26 + $0x30] sm:$0xf] %v309_v12  ;;  %312 = vst [vmem:[%s2558_s26 + $0x34] sm:$0xf] %v311_v13  ;;  %v315_v15 = vld [vmem:[%s2553_s25 + $0x21c] sm:$0xf] }
  0x47   : > { %314 = vst [vmem:[%s2558_s26 + $0x38] sm:$0xf] %v313_v14  ;;  %v317_v16 = vld [vmem:[%s2553_s25 + $0x240] sm:$0xf]  ;;  %v319_v17 = vld [vmem:[%s2553_s25 + $0x264] sm:$0xf] }
  0x48   : > { %316 = vst [vmem:[%s2558_s26 + $0x3c] sm:$0xf] %v315_v15  ;;  %318 = vst [vmem:[%s2558_s26 + $0x40] sm:$0xf] %v317_v16  ;;  %v321_v18 = vld [vmem:[%s2553_s25 + $0x288] sm:$0xf] }
  0x49   : > { %320 = vst [vmem:[%s2558_s26 + $0x44] sm:$0xf] %v319_v17  ;;  %v323_v19 = vld [vmem:[%s2553_s25 + $0x2ac] sm:$0xf]  ;;  %v325_v20 = vld [vmem:[%s2553_s25 + $0x2d0] sm:$0xf] }
  0x4a   : > { %322 = vst [vmem:[%s2558_s26 + $0x48] sm:$0xf] %v321_v18  ;;  %324 = vst [vmem:[%s2558_s26 + $0x4c] sm:$0xf] %v323_v19  ;;  %v327_v21 = vld [vmem:[%s2553_s25 + $0x2f4] sm:$0xf] }
  0x4b   : > { %326 = vst [vmem:[%s2558_s26 + $0x50] sm:$0xf] %v325_v20  ;;  %v329_v22 = vld [vmem:[%s2553_s25 + $0x318] sm:$0xf]  ;;  %v331_v23 = vld [vmem:[%s2553_s25 + $0x33c] sm:$0xf] }
  0x4c   : > { %328 = vst [vmem:[%s2558_s26 + $0x54] sm:$0xf] %v327_v21  ;;  %330 = vst [vmem:[%s2558_s26 + $0x58] sm:$0xf] %v329_v22  ;;  %v333_v24 = vld [vmem:[%s2553_s25 + $0x360] sm:$0xf] }
  0x4d   : > { %332 = vst [vmem:[%s2558_s26 + $0x5c] sm:$0xf] %v331_v23  ;;  %v335_v25 = vld [vmem:[%s2553_s25 + $0x384] sm:$0xf]  ;;  %v337_v26 = vld [vmem:[%s2553_s25 + $0x3a8] sm:$0xf] }
  0x4e   : > { %334 = vst [vmem:[%s2558_s26 + $0x60] sm:$0xf] %v333_v24  ;;  %336 = vst [vmem:[%s2558_s26 + $0x64] sm:$0xf] %v335_v25  ;;  %v339_v27 = vld [vmem:[%s2553_s25 + $0x3cc] sm:$0xf] }
  0x4f   : > { %338 = vst [vmem:[%s2558_s26 + $0x68] sm:$0xf] %v337_v26  ;;  %v341_v28 = vld [vmem:[%s2553_s25 + $0x3f0] sm:$0xf]  ;;  %v343_v29 = vld [vmem:[%s2553_s25 + $0x414] sm:$0xf] }
  0x50   : > { %340 = vst [vmem:[%s2558_s26 + $0x6c] sm:$0xf] %v339_v27  ;;  %342 = vst [vmem:[%s2558_s26 + $0x70] sm:$0xf] %v341_v28  ;;  %v345_v30 = vld [vmem:[%s2553_s25 + $0x438] sm:$0xf] }
  0x51   : > { %344 = vst [vmem:[%s2558_s26 + $0x74] sm:$0xf] %v343_v29  ;;  %v347_v31 = vld [vmem:[%s2553_s25 + $0x45c] sm:$0xf]  ;;  %346 = vst [vmem:[%s2558_s26 + $0x78] sm:$0xf] %v345_v30 }
  0x52   : > { %348 = vst [vmem:[%s2558_s26 + $0x7c] sm:$0xf] %v347_v31 }
  0x53 PF: > { %p1854_p4 = scmp.ge.s32.totalorder %s2422_s21, 1  ;;  %p481_p5 = scmp.lt.s32.totalorder %s2422_s21, 73 }
  0x55   : > { %p482_p6 = pnand %p1854_p4, %p481_p5 }
  0x56   : > { %s488_s27 = sand.u32 (!%p482_p6), 1, %s2390_s1   ;;  %s1856_s28 = sshll.u32 (!%p482_p6), %s2406_s17, 2 }
  0x57   : > { %485 = sbr.rel (%p482_p6) target bundleno = 457 (0x1c9), region = 81  ;;  %s1855_s30 = sshll.u32 (!%p482_p6), %s488_s27, 7 }
  0x58   : > { %s548_s9 = sadd.s32 (!%p482_p6), %s2398_s15, %s1856_s28  ;;  %s1857_s11 = sshll.u32 (!%p482_p6), %s2402_s16, 4 }
  0x59   : > { %s549_s10 = sld [smem:[#allocation4 + %s548_s9]] (!%p482_p6)  ;;  %p553_p7 = scmp.lt.s32.totalorder (!%p482_p6), %s1857_s11, 143 }
  0x5a   : > { %s565_s12 = sld [smem:[#allocation4 + %s548_s9]] (!%p482_p6)  ;;  %s1860_s13 = sshll.u32 (!%p482_p6), %s2406_s17, 5 }
  0x5b   : > { %p569_p8 = scmp.lt.s32.totalorder (!%p482_p6), %s1860_s13, 63  ;;  %p592_p9 = scmp.eq.s32.totalorder (!%p482_p6), %s2402_s16, 0 }
  0x5c   : > { %p593_p11 = scmp.eq.s32.totalorder (!%p482_p6), %s2398_s15, 0  ;;  %s2654_s2 = scalar_lea.vmem (!%p482_p6), [#allocation6], %s1855_s30 }
  0x5e   : > { %s2950_s11 = smov (!%p553_p7, %s1857_s11), 143  ;;  %s2952_s13 = smov (!%p569_p8, %s1860_s13), 63 }
  0x5f   : > { %p551_p10 = scmp.lt.s32.totalorder %s549_s10, 3  ;;  %s1864_s0 = sshll.u32 %s2952_s13, 2 }
  0x60   : > { %p567_p12 = scmp.lt.s32.totalorder %s565_s12, 3  ;;  %s2633_s27 = scalar_lea.vmem %s2909_s7, %s1864_s0 }
  0x61   : > { %s2954_s10 = smov (!%p551_p10, %s549_s10), 3  ;;  %s2638_s24 = scalar_lea.vmem %s2910_s8, %s1864_s0 }
  0x62   : > { %s2956_s12 = smov (!%p567_p12, %s565_s12), 3  ;;  %s2223_s1 = smul.u32 144, %s2954_s10 }
  0x63   : > { %s1861_s28 = sshll.u32 %s2956_s12, 6  ;;  %p594_p13 = pnand %p593_p11, %p592_p9 }
  0x64   : > { %s556_s23 = sadd.s32 %s2223_s1, %s2950_s11  ;;  %s572_s22 = sadd.s32 %s1861_s28, %s2952_s13  ;;  %v2426_v32 = vmov (!%p594_p13), 0.0  }
  0x65   : > { %s1858_s20 = sshll.u32 %s556_s23, 2  ;;  %s1862_s19 = sshll.u32 %s572_s22, 3  ;;  %598 = vst [vmem:[#allocation2] sm:$0xff] (!%p594_p13), %v2426_v32  ;;  %599 = vst [vmem:[#allocation2 + $0x8] sm:$0xff] (!%p594_p13), %v2426_v32 }
  0x66   : > { %s2643_s14 = scalar_lea.vmem %s2905_s3, %s1858_s20  ;;  %s2648_s25 = scalar_lea.vmem %s2906_s4, %s1862_s19  ;;  %600 = vst [vmem:[#allocation2 + $0x10] sm:$0xff] (!%p594_p13), %v2426_v32  ;;  %601 = vst [vmem:[#allocation2 + $0x18] sm:$0xff] (!%p594_p13), %v2426_v32 }
  0x67   : > { %597 = sbr.rel (%p594_p13) target bundleno = 117 (0x75), region = 89  ;;  %602 = vst [vmem:[#allocation2 + $0x20] sm:$0xff] (!%p594_p13), %v2426_v32  ;;  %603 = vst [vmem:[#allocation2 + $0x28] sm:$0xff] (!%p594_p13), %v2426_v32 }
  0x68   : > { %604 = vst [vmem:[#allocation2 + $0x30] sm:$0xff] (!%p594_p13), %v2426_v32  ;;  %605 = vst [vmem:[#allocation2 + $0x38] sm:$0xff] (!%p594_p13), %v2426_v32 }
  0x69   : > { %606 = vst [vmem:[#allocation2 + $0x40] sm:$0xff] (!%p594_p13), %v2426_v32  ;;  %607 = vst [vmem:[#allocation2 + $0x48] sm:$0xff] (!%p594_p13), %v2426_v32 }
  0x6a   : > { %608 = vst [vmem:[#allocation2 + $0x50] sm:$0xff] (!%p594_p13), %v2426_v32  ;;  %609 = vst [vmem:[#allocation2 + $0x58] sm:$0xff] (!%p594_p13), %v2426_v32 }
  0x6b   : > { %610 = vst [vmem:[#allocation2 + $0x60] sm:$0xff] (!%p594_p13), %v2426_v32  ;;  %611 = vst [vmem:[#allocation2 + $0x68] sm:$0xff] (!%p594_p13), %v2426_v32 }
  0x6c   : > { %612 = vst [vmem:[#allocation2 + $0x70] sm:$0xff] (!%p594_p13), %v2426_v32  ;;  %613 = vst [vmem:[#allocation2 + $0x78] sm:$0xff] (!%p594_p13), %v2426_v32 }
  0x6d   : > { %614 = vst [vmem:[#allocation2 + $0x80] sm:$0xff] (!%p594_p13), %v2426_v32  ;;  %615 = vst [vmem:[#allocation2 + $0x88] sm:$0xff] (!%p594_p13), %v2426_v32 }
  0x6e   : > { %616 = vst [vmem:[#allocation2 + $0x90] sm:$0xff] %v2426_v32  ;;  %617 = vst [vmem:[#allocation2 + $0x98] sm:$0xff] %v2426_v32 }
  0x6f   : > { %618 = vst [vmem:[#allocation2 + $0xa0] sm:$0xff] %v2426_v32  ;;  %619 = vst [vmem:[#allocation2 + $0xa8] sm:$0xff] %v2426_v32 }
  0x70   : > { %620 = vst [vmem:[#allocation2 + $0xb0] sm:$0xff] %v2426_v32  ;;  %621 = vst [vmem:[#allocation2 + $0xb8] sm:$0xff] %v2426_v32 }
  0x71   : > { %622 = vst [vmem:[#allocation2 + $0xc0] sm:$0xff] %v2426_v32  ;;  %623 = vst [vmem:[#allocation2 + $0xc8] sm:$0xff] %v2426_v32 }
  0x72   : > { %624 = vst [vmem:[#allocation2 + $0xd0] sm:$0xff] %v2426_v32  ;;  %625 = vst [vmem:[#allocation2 + $0xd8] sm:$0xff] %v2426_v32 }
  0x73   : > { %626 = vst [vmem:[#allocation2 + $0xe0] sm:$0xff] %v2426_v32  ;;  %627 = vst [vmem:[#allocation2 + $0xe8] sm:$0xff] %v2426_v32 }
  0x74   : > { %628 = vst [vmem:[#allocation2 + $0xf0] sm:$0xff] %v2426_v32  ;;  %629 = vst [vmem:[#allocation2 + $0xf8] sm:$0xff] %v2426_v32 }
  0x75 PF: > { %s630_s18 = sld [smem:[#allocation5 + %s2406_s17]] }
  0x7b   : > { %p1867_p0 = scmp.ge.s32.totalorder %s2398_s15, %s630_s18 }
  0x7c   : > { %v2302_v33 = vld [vmem:[%s2643_s14] sm:$0xff] (!%p1867_p0)   ;;  %v2303_v34 = vld [vmem:[%s2643_s14 + $0x8] sm:$0xff] (!%p1867_p0)   ;;  %v2427_v35 = vmov (!%p1867_p0), 0   ;;  %v2304_v36 = vld [vmem:[%s2643_s14 + $0x10] sm:$0xff] (!%p1867_p0)  }
  0x7d   : > { %634 = sbr.rel (%p1867_p0) target bundleno = 402 (0x192), region = 93  ;;  %2301 = vset.pattern.permute.xlu1 (!%p1867_p0), %v2427_v35  ;;  %2300 = vset.pattern.permute.xlu0 (!%p1867_p0), %v2427_v35  ;;  %v669_v37 = vld [vmem:[%s2648_s25 + $0x10] sm:$0xff] (!%p1867_p0)  ;;  %v667_v38 = vld [vmem:[%s2648_s25] sm:$0xff] (!%p1867_p0)  ;;  %v2305_v39 = vld [vmem:[%s2643_s14 + $0x18] sm:$0xff] (!%p1867_p0)  }
  0x7e   : > { %2158 = vmatprep.subr.bf16.mxu0 (!%p1867_p0), %v2302_v33  ;;  %2206 = vmatprep.subr.bf16.mxu1 (!%p1867_p0), %v2302_v33  ;;  %v670_v40 = vld [vmem:[%s2648_s25 + $0x18] sm:$0xff] (!%p1867_p0)  ;;  %v668_v41 = vld [vmem:[%s2648_s25 + $0x8] sm:$0xff] (!%p1867_p0)  ;;  %v2310_v42 = vld [vmem:[%s2654_s2] sm:$0xff] (!%p1867_p0)  }
  0x7f   : > { %2159 = vmatpush3.bf16.msra.mxu0 (!%p1867_p0), %v2302_v33  ;;  %2214 = vmatpush3.bf16.msra.mxu1 (!%p1867_p0), %v2302_v33  ;;  %v2311_v43 = vld [vmem:[%s2654_s2 + $0x40] sm:$0xff] (!%p1867_p0)   ;;  %v672_v45 = vld [vmem:[%s2648_s25 + $0x28] sm:$0xff] (!%p1867_p0)  ;;  %v674_v48 = vld [vmem:[%s2648_s25 + $0x38] sm:$0xff] (!%p1867_p0) }
  0x80   : > { %2160 = vmatprep.subr.bf16.mxu0 (!%p1867_p0), %v2303_v34  ;;  %2207 = vmatprep.subr.bf16.mxu1 (!%p1867_p0), %v2303_v34  ;;  %v2306_v44 = vld [vmem:[%s2643_s14 + $0x20] sm:$0xff] (!%p1867_p0)   ;;  %v2307_v47 = vld [vmem:[%s2643_s14 + $0x28] sm:$0xff] (!%p1867_p0)   ;;  %v673_v49 = vld [vmem:[%s2648_s25 + $0x30] sm:$0xff] (!%p1867_p0) }
  0x81   : > { %1064 = vperm.xlu1 (!%p1867_p0), %2301, %v669_v37   ;;  %1054 = vperm.xlu0 (!%p1867_p0), %2300, %v667_v38   ;;  %v671_v46 = vld [vmem:[%s2648_s25 + $0x20] sm:$0xff] (!%p1867_p0)  ;;  %v2308_v50 = vld [vmem:[%s2643_s14 + $0x30] sm:$0xff] (!%p1867_p0)   ;;  %v676_v51 = vld [vmem:[%s2648_s25 + $0x48] sm:$0xff] (!%p1867_p0) }
  0x82   : > { %2174 = vmatprep.mubr.bf16.mxu0 (!%p1867_p0), %v2310_v42  ;;  %2190 = vmatprep.mubr.bf16.mxu1 (!%p1867_p0), %v2311_v43  ;;  %v675_v52 = vld [vmem:[%s2648_s25 + $0x40] sm:$0xff] (!%p1867_p0)  ;;  %v2309_v53 = vld [vmem:[%s2643_s14 + $0x38] sm:$0xff] (!%p1867_p0)   ;;  %v677_v55 = vld [vmem:[%s2648_s25 + $0x50] sm:$0xff] (!%p1867_p0) }
  0x83   : > { %2161 = vmatpush3.bf16.msra.mxu0 (!%p1867_p0), %v2303_v34  ;;  %2215 = vmatpush3.bf16.msra.mxu1 (!%p1867_p0), %v2303_v34  ;;  %v678_v54 = vld [vmem:[%s2648_s25 + $0x58] sm:$0xff] (!%p1867_p0)  ;;  %v2312_v56 = vld [vmem:[%s2654_s2 + $0x8] sm:$0xff] (!%p1867_p0)   ;;  %v679_v59 = vld [vmem:[%s2648_s25 + $0x60] sm:$0xff] (!%p1867_p0) }
  0x84   : > { %2162 = vmatprep.subr.bf16.mxu0 %v2304_v36  ;;  %2208 = vmatprep.subr.bf16.mxu1 %v2304_v36  ;;  %v2313_v57 = vld [vmem:[%s2654_s2 + $0x48] sm:$0xff]   ;;  %v2314_v60 = vld [vmem:[%s2654_s2 + $0x10] sm:$0xff]   ;;  %v682_v62 = vld [vmem:[%s2648_s25 + $0x78] sm:$0xff] }
  0x85   : > { %1069 = vperm.xlu1 %2301, %v670_v40   ;;  %1059 = vperm.xlu0 %2300, %v668_v41   ;;  %v680_v58 = vld [vmem:[%s2648_s25 + $0x68] sm:$0xff]  ;;  %v2315_v61 = vld [vmem:[%s2654_s2 + $0x50] sm:$0xff]   ;;  %v2316_v0 = vld [vmem:[%s2654_s2 + $0x18] sm:$0xff]  }
  0x86   : > { %v681_v63 = vld [vmem:[%s2648_s25 + $0x70] sm:$0xff]  ;;  %v2317_v1 = vld [vmem:[%s2654_s2 + $0x58] sm:$0xff]   ;;  %v684_v2 = vld [vmem:[%s2648_s25 + $0x88] sm:$0xff] }
  0x87   : > { %2163 = vmatpush3.bf16.msra.mxu0 %v2304_v36  ;;  %2216 = vmatpush3.bf16.msra.mxu1 %v2304_v36  ;;  %v683_v3 = vld [vmem:[%s2648_s25 + $0x80] sm:$0xff]  ;;  %v686_v6 = vld [vmem:[%s2648_s25 + $0x98] sm:$0xff]  ;;  %v685_v7 = vld [vmem:[%s2648_s25 + $0x90] sm:$0xff] }
  0x88   : > { %2164 = vmatprep.subr.bf16.mxu0 %v2305_v39  ;;  %2209 = vmatprep.subr.bf16.mxu1 %v2305_v39  ;;  %v2318_v4 = vld [vmem:[%s2654_s2 + $0x20] sm:$0xff]   ;;  %v2320_v8 = vld [vmem:[%s2654_s2 + $0x28] sm:$0xff]   ;;  %v2322_v12 = vld [vmem:[%s2654_s2 + $0x30] sm:$0xff]  }
  0x89   : > { %1079 = vperm.xlu1 %2301, %v672_v45   ;;  %1074 = vperm.xlu0 %2300, %v671_v46   ;;  %v2319_v5 = vld [vmem:[%s2654_s2 + $0x60] sm:$0xff]   ;;  %v2321_v9 = vld [vmem:[%s2654_s2 + $0x68] sm:$0xff]   ;;  %v2323_v13 = vld [vmem:[%s2654_s2 + $0x70] sm:$0xff]  }
  0x8a   : > { %v688_v10 = vld [vmem:[%s2648_s25 + $0xa8] sm:$0xff]  ;;  %v687_v11 = vld [vmem:[%s2648_s25 + $0xa0] sm:$0xff]  ;;  %v690_v14 = vld [vmem:[%s2648_s25 + $0xb8] sm:$0xff] }
  0x8b   : > { %2165 = vmatpush3.bf16.msra.mxu0 %v2305_v39  ;;  %2217 = vmatpush3.bf16.msra.mxu1 %v2305_v39  ;;  %v689_v15 = vld [vmem:[%s2648_s25 + $0xb0] sm:$0xff]  ;;  %v2324_v16 = vld [vmem:[%s2654_s2 + $0x38] sm:$0xff]   ;;  %v692_v18 = vld [vmem:[%s2648_s25 + $0xc8] sm:$0xff] }
  0x8c   : > { %2166 = vmatprep.subr.bf16.mxu0 %v2306_v44  ;;  %2210 = vmatprep.subr.bf16.mxu1 %v2306_v44  ;;  %v2325_v17 = vld [vmem:[%s2654_s2 + $0x78] sm:$0xff]   ;;  %v691_v19 = vld [vmem:[%s2648_s25 + $0xc0] sm:$0xff]  ;;  %v693_v21 = vld [vmem:[%s2648_s25 + $0xd0] sm:$0xff] }
  0x8d   : > { %1089 = vperm.xlu1 %2301, %v674_v48   ;;  %1084 = vperm.xlu0 %2300, %v673_v49   ;;  %v694_v20 = vld [vmem:[%s2648_s25 + $0xd8] sm:$0xff]  ;;  %v696_v22 = vld [vmem:[%s2648_s25 + $0xe8] sm:$0xff]  ;;  %v695_v23 = vld [vmem:[%s2648_s25 + $0xe0] sm:$0xff] }
  0x8e   : > { %v698_v24 = vld [vmem:[%s2648_s25 + $0xf8] sm:$0xff]  ;;  %v697_v25 = vld [vmem:[%s2648_s25 + $0xf0] sm:$0xff] }
  0x8f   : > { %2167 = vmatpush3.bf16.msra.mxu0 %v2306_v44  ;;  %2218 = vmatpush3.bf16.msra.mxu1 %v2306_v44 }
  0x90   : > { %2168 = vmatprep.subr.bf16.mxu0 %v2307_v47  ;;  %2211 = vmatprep.subr.bf16.mxu1 %v2307_v47 }
  0x91   : > { %1099 = vperm.xlu1 %2301, %v676_v51   ;;  %1094 = vperm.xlu0 %2300, %v675_v52   ;;  %v637_v52 = vld [vmem:[#allocation2 + $0x10] sm:$0xff] }
  0x93   : > { %2169 = vmatpush3.bf16.msra.mxu0 %v2307_v47  ;;  %2219 = vmatpush3.bf16.msra.mxu1 %v2307_v47 }
  0x94   : > { %2170 = vmatprep.subr.bf16.mxu0 %v2308_v50  ;;  %2212 = vmatprep.subr.bf16.mxu1 %v2308_v50 }
  0x95   : > { %1109 = vperm.xlu1 %2301, %v678_v54   ;;  %1104 = vperm.xlu0 %2300, %v677_v55   ;;  %v653_v54 = vld [vmem:[#allocation2 + $0x90] sm:$0xff] }
  0x97   : > { %2171 = vmatpush3.bf16.msra.mxu0 %v2308_v50  ;;  %2220 = vmatpush3.bf16.msra.mxu1 %v2308_v50 }
  0x98   : > { %2172 = vmatprep.subr.bf16.mxu0 %v2309_v53  ;;  %2213 = vmatprep.subr.bf16.mxu1 %v2309_v53 }
  0x99   : > { %1119 = vperm.xlu1 %2301, %v680_v58   ;;  %1114 = vperm.xlu0 %2300, %v679_v59   ;;  %v635_v58 = vld [vmem:[#allocation2] sm:$0xff] }
  0x9b   : > { %2173 = vmatpush3.bf16.msra.mxu0 %v2309_v53  ;;  %2221 = vmatpush3.bf16.msra.mxu1 %v2309_v53 }
  0x9d   : > { %1129 = vperm.xlu1 %2301, %v682_v62   ;;  %1124 = vperm.xlu0 %2300, %v681_v63  }
  0x9e   : > { %2175 = vmatmul.mubr.bf16.vlgmr.msra.gmra.mrb[0].mxu0 %v2312_v56  ;;  %2191 = vmatmul.mubr.bf16.vlgmr.msra.gmra.mrb[0].mxu1 %v2313_v57 }
  0x9f   : > { %2178 = vmatprep.mubr.bf16.mxu0 %v2314_v60  ;;  %2194 = vmatprep.mubr.bf16.mxu1 %v2315_v61  ;;  %v651_v60 = vld [vmem:[#allocation2 + $0x80] sm:$0xff] }
  0xa1   : > { %1139 = vperm.xlu1 %2301, %v684_v2   ;;  %1134 = vperm.xlu0 %2300, %v683_v3   ;;  %v654_v2 = vld [vmem:[#allocation2 + $0x98] sm:$0xff] }
  0xa5   : > { %1149 = vperm.xlu1 %2301, %v686_v6   ;;  %1144 = vperm.xlu0 %2300, %v685_v7  }
  0xa6   : > { %2179 = vmatmul.mubr.bf16.gmra.mrb[4].mxu0 %v2316_v0  ;;  %2195 = vmatmul.mubr.bf16.gmra.mrb[4].mxu1 %v2317_v1  ;;  %v638_v0 = vld [vmem:[#allocation2 + $0x18] sm:$0xff] }
  0xa7   : > { %2182 = vmatprep.mubr.bf16.mxu0 %v2318_v4  ;;  %2198 = vmatprep.mubr.bf16.mxu1 %v2319_v5 }
  0xa9   : > { %1159 = vperm.xlu1 %2301, %v688_v10   ;;  %1154 = vperm.xlu0 %2300, %v687_v11   ;;  %v652_v10 = vld [vmem:[#allocation2 + $0x88] sm:$0xff] }
  0xad   : > { %1169 = vperm.xlu1 %2301, %v690_v14   ;;  %1164 = vperm.xlu0 %2300, %v689_v15  }
  0xae   : > { %2183 = vmatmul.mubr.bf16.gmra.mrb[8].mxu0 %v2320_v8  ;;  %2199 = vmatmul.mubr.bf16.gmra.mrb[8].mxu1 %v2321_v9  ;;  %v636_v8 = vld [vmem:[#allocation2 + $0x8] sm:$0xff] }
  0xaf   : > { %2186 = vmatprep.mubr.bf16.mxu0 %v2322_v12  ;;  %2202 = vmatprep.mubr.bf16.mxu1 %v2323_v13 }
  0xb1   : > { %1179 = vperm.xlu1 %2301, %v692_v18   ;;  %1174 = vperm.xlu0 %2300, %v691_v19  }
  0xb5   : > { %1189 = vperm.xlu1 %2301, %v694_v20   ;;  %1184 = vperm.xlu0 %2300, %v693_v21  }
  0xb6   : > { %2187 = vmatmul.mubr.bf16.gmra.mrb[12].mxu0 %v2324_v16  ;;  %2203 = vmatmul.mubr.bf16.gmra.mrb[12].mxu1 %v2325_v17 }
  0xb9   : > { %1199 = vperm.xlu1 %2301, %v696_v22   ;;  %1194 = vperm.xlu0 %2300, %v695_v23   ;;  %v641_v22 = vld [vmem:[#allocation2 + $0x30] sm:$0xff] }
  0xbd   : > { %1209 = vperm.xlu1 %2301, %v698_v24   ;;  %1204 = vperm.xlu0 %2300, %v697_v25   ;;  %v657_v24 = vld [vmem:[#allocation2 + $0xb0] sm:$0xff] }
 0x100   : > { %v1065_v26 = vpop.permute.xlu1 %1064  ;;  %v1055_v27 = vpop.permute.xlu0 %1054 }
 0x104   : > { %v1070_v28 = vpop.permute.xlu1 %1069  ;;  %v1060_v29 = vpop.permute.xlu0 %1059 }
 0x108   : > { %v2714_v30 = vpop.permute.xlu1 %1079  ;;  %v2716_v31 = vpop.permute.xlu0 %1074 }
 0x10c   : > { %v2718_v32 = vpop.permute.xlu1 %1089  ;;  %v2720_v33 = vpop.permute.xlu0 %1084 }
 0x110   : > { %v2722_v34 = vpop.permute.xlu1 %1099  ;;  %v2724_v35 = vpop.permute.xlu0 %1094 }
 0x114   : > { %v2726_v36 = vpop.permute.xlu1 %1109  ;;  %v2728_v37 = vpop.permute.xlu0 %1104 }
 0x118   : > { %v2730_v38 = vpop.permute.xlu1 %1119  ;;  %v2732_v39 = vpop.permute.xlu0 %1114 }
 0x11c   : > { %v2734_v40 = vpop.permute.xlu1 %1129  ;;  %v2736_v41 = vpop.permute.xlu0 %1124 }
 0x120   : > { %v1140_v42 = vpop.permute.xlu1 %1139  ;;  %v1135_v43 = vpop.permute.xlu0 %1134 }
 0x124   : > { %v1150_v44 = vpop.permute.xlu1 %1149  ;;  %v1145_v45 = vpop.permute.xlu0 %1144 }
 0x128   : > { %v2738_v46 = vpop.permute.xlu1 %1159  ;;  %v1155_v47 = vpop.permute.xlu0 %1154 }
 0x12c   : > { %v2740_v48 = vpop.permute.xlu1 %1169  ;;  %v1165_v49 = vpop.permute.xlu0 %1164 }
 0x130   : > { %v2742_v50 = vpop.permute.xlu1 %1179  ;;  %v2744_v51 = vpop.permute.xlu0 %1174 }
 0x134   : > { %v2746_v20 = vpop.permute.xlu1 %1189  ;;  %v1185_v21 = vpop.permute.xlu0 %1184 }
 0x171   : > { %v2176_v53 = vpop.f32.mrb[0].mxu0  ;;  %v2192_v55 = vpop.f32.mrb[0].mxu1 }
 0x172   : > { %v1214_v56 = vmul.f32 %v2176_v53, %v1065_v26  ;;  %v1230_v57 = vmul.f32 %v2192_v55, %v1145_v45  ;;  %v925_v59 = vpop.f32.mrb[1].mxu0  ;;  %v989_v61 = vpop.f32.mrb[1].mxu1 }
 0x173   : > { %v1212_v62 = vmul.f32 %v1055_v27, %v925_v59  ;;  %v1228_v63 = vmul.f32 %v1135_v43, %v989_v61  ;;  %v2177_v1 = vpop.f32.mrb[2].mxu0  ;;  %v2193_v3 = vpop.f32.mrb[2].mxu1 }
 0x174   : > { %v1246_v4 = vadd.f32 %v1214_v56, %v637_v52  ;;  %v1262_v5 = vadd.f32 %v1230_v57, %v653_v54  ;;  %v1215_v6 = vmul.f32 %v2177_v1, %v1070_v28  ;;  %v1231_v7 = vmul.f32 %v2193_v3, %v1150_v44  ;;  %v928_v9 = vpop.f32.mrb[3].mxu0  ;;  %v992_v11 = vpop.f32.mrb[3].mxu1  ;;  %v639_v28 = vld [vmem:[#allocation2 + $0x20] sm:$0xff]  ;;  %v642_v52 = vld [vmem:[#allocation2 + $0x38] sm:$0xff] }
 0x175   : > { %v1244_v12 = vadd.f32 %v1212_v62, %v635_v58  ;;  %v1260_v13 = vadd.f32 %v1228_v63, %v651_v60  ;;  %v1213_v14 = vmul.f32 %v1060_v29, %v928_v9  ;;  %v1229_v15 = vmul.f32 %v1140_v42, %v992_v11  ;;  %v655_v42 = vld [vmem:[#allocation2 + $0xa0] sm:$0xff]  ;;  %v658_v54 = vld [vmem:[#allocation2 + $0xb8] sm:$0xff]  ;;  %v640_v60 = vld [vmem:[#allocation2 + $0x28] sm:$0xff]  ;;  %v2754_v3 = vpop.permute.xlu1 %1199 }
 0x176   : > { %1278 = vst [vmem:[#allocation2 + $0x10] sm:$0xff] %v1246_v4  ;;  %1294 = vst [vmem:[#allocation2 + $0x90] sm:$0xff] %v1262_v5  ;;  %v1247_v16 = vadd.f32 %v1215_v6, %v638_v0  ;;  %v1263_v17 = vadd.f32 %v1231_v7, %v654_v2  ;;  %v645_v4 = vld [vmem:[#allocation2 + $0x50] sm:$0xff] }
 0x177   : > { %1276 = vst [vmem:[#allocation2] sm:$0xff] %v1244_v12  ;;  %1292 = vst [vmem:[#allocation2 + $0x80] sm:$0xff] %v1260_v13  ;;  %v1245_v18 = vadd.f32 %v1213_v14, %v636_v8  ;;  %v1261_v19 = vadd.f32 %v1229_v15, %v652_v10  ;;  %v643_v8 = vld [vmem:[#allocation2 + $0x40] sm:$0xff]  ;;  %v646_v14 = vld [vmem:[#allocation2 + $0x58] sm:$0xff] }
 0x178   : > { %1279 = vst [vmem:[#allocation2 + $0x18] sm:$0xff] %v1247_v16  ;;  %1295 = vst [vmem:[#allocation2 + $0x98] sm:$0xff] %v1263_v17  ;;  %v659_v10 = vld [vmem:[#allocation2 + $0xc0] sm:$0xff]  ;;  %v662_v16 = vld [vmem:[#allocation2 + $0xd8] sm:$0xff] }
 0x179   : > { %1277 = vst [vmem:[#allocation2 + $0x8] sm:$0xff] %v1245_v18  ;;  %1293 = vst [vmem:[#allocation2 + $0x88] sm:$0xff] %v1261_v19  ;;  %v2180_v23 = vpop.f32.mrb[4].mxu0  ;;  %v2196_v25 = vpop.f32.mrb[4].mxu1 }
 0x17a   : > { %v1218_v26 = vmul.f32 %v2180_v23, %v2720_v33  ;;  %v1234_v27 = vmul.f32 %v2196_v25, %v1165_v49  ;;  %v941_v29 = vpop.f32.mrb[5].mxu0  ;;  %v1005_v43 = vpop.f32.mrb[5].mxu1  ;;  %v656_v49 = vld [vmem:[#allocation2 + $0xa8] sm:$0xff] }
 0x17b   : > { %v1216_v44 = vmul.f32 %v2716_v31, %v941_v29  ;;  %v1232_v45 = vmul.f32 %v1155_v47, %v1005_v43  ;;  %v2181_v53 = vpop.f32.mrb[6].mxu0  ;;  %v2197_v55 = vpop.f32.mrb[6].mxu1 }
 0x17c   : > { %v1250_v56 = vadd.f32 %v1218_v26, %v641_v22  ;;  %v1266_v57 = vadd.f32 %v1234_v27, %v657_v24  ;;  %v1219_v58 = vmul.f32 %v2181_v53, %v2718_v32  ;;  %v1235_v59 = vmul.f32 %v2197_v55, %v2740_v48  ;;  %v944_v33 = vpop.f32.mrb[7].mxu0  ;;  %v1008_v61 = vpop.f32.mrb[7].mxu1  ;;  %v660_v24 = vld [vmem:[#allocation2 + $0xc8] sm:$0xff] }
 0x17d   : > { %v1248_v62 = vadd.f32 %v1216_v44, %v639_v28  ;;  %v1264_v63 = vadd.f32 %v1232_v45, %v655_v42  ;;  %v1217_v0 = vmul.f32 %v2714_v30, %v944_v33  ;;  %v1233_v31 = vmul.f32 %v2738_v46, %v1008_v61  ;;  %v1195_v48 = vpop.permute.xlu0 %1194  ;;  %v661_v30 = vld [vmem:[#allocation2 + $0xd0] sm:$0xff]  ;;  %v1210_v43 = vpop.permute.xlu1 %1209 }
 0x17e   : > { %1282 = vst [vmem:[#allocation2 + $0x30] sm:$0xff] %v1250_v56  ;;  %1298 = vst [vmem:[#allocation2 + $0xb0] sm:$0xff] %v1266_v57  ;;  %v1251_v47 = vadd.f32 %v1219_v58, %v642_v52  ;;  %v1267_v1 = vadd.f32 %v1235_v59, %v658_v54  ;;  %v649_v44 = vld [vmem:[#allocation2 + $0x70] sm:$0xff]  ;;  %v647_v54 = vld [vmem:[#allocation2 + $0x60] sm:$0xff] }
 0x17f   : > { %1280 = vst [vmem:[#allocation2 + $0x20] sm:$0xff] %v1248_v62  ;;  %1296 = vst [vmem:[#allocation2 + $0xa0] sm:$0xff] %v1264_v63  ;;  %v1249_v2 = vadd.f32 %v1217_v0, %v640_v60  ;;  %v1265_v32 = vadd.f32 %v1233_v31, %v656_v49  ;;  %v665_v52 = vld [vmem:[#allocation2 + $0xf0] sm:$0xff]  ;;  %v663_v56 = vld [vmem:[#allocation2 + $0xe0] sm:$0xff] }
 0x180   : > { %1283 = vst [vmem:[#allocation2 + $0x38] sm:$0xff] %v1251_v47  ;;  %1299 = vst [vmem:[#allocation2 + $0xb8] sm:$0xff] %v1267_v1  ;;  %v650_v60 = vld [vmem:[#allocation2 + $0x78] sm:$0xff]  ;;  %v648_v47 = vld [vmem:[#allocation2 + $0x68] sm:$0xff] }
 0x181   : > { %1281 = vst [vmem:[#allocation2 + $0x28] sm:$0xff] %v1249_v2  ;;  %1297 = vst [vmem:[#allocation2 + $0xa8] sm:$0xff] %v1265_v32  ;;  %v2184_v5 = vpop.f32.mrb[8].mxu0  ;;  %v2200_v6 = vpop.f32.mrb[8].mxu1  ;;  %v666_v49 = vld [vmem:[#allocation2 + $0xf8] sm:$0xff] }
 0x182   : > { %v1222_v46 = vmul.f32 %v2184_v5, %v2728_v37  ;;  %v1238_v7 = vmul.f32 %v2200_v6, %v1185_v21  ;;  %v957_v9 = vpop.f32.mrb[9].mxu0  ;;  %v1021_v11 = vpop.f32.mrb[9].mxu1  ;;  %v644_v37 = vld [vmem:[#allocation2 + $0x48] sm:$0xff] }
 0x183   : > { %v1220_v12 = vmul.f32 %v2724_v35, %v957_v9  ;;  %v1236_v13 = vmul.f32 %v2744_v51, %v1021_v11  ;;  %v2185_v15 = vpop.f32.mrb[10].mxu0  ;;  %v2201_v17 = vpop.f32.mrb[10].mxu1 }
 0x184   : > { %v1254_v18 = vadd.f32 %v1222_v46, %v645_v4  ;;  %v1270_v19 = vadd.f32 %v1238_v7, %v661_v30  ;;  %v1223_v22 = vmul.f32 %v2185_v15, %v2726_v36  ;;  %v1239_v23 = vmul.f32 %v2201_v17, %v2746_v20  ;;  %v960_v21 = vpop.f32.mrb[11].mxu0  ;;  %v1024_v25 = vpop.f32.mrb[11].mxu1 }
 0x185   : > { %v1252_v26 = vadd.f32 %v1220_v12, %v643_v8  ;;  %v1268_v27 = vadd.f32 %v1236_v13, %v659_v10  ;;  %v1221_v35 = vmul.f32 %v2722_v34, %v960_v21  ;;  %v1237_v51 = vmul.f32 %v2742_v50, %v1024_v25  ;;  %v1205_v20 = vpop.permute.xlu0 %1204 }
 0x186   : > { %1286 = vst [vmem:[#allocation2 + $0x50] sm:$0xff] %v1254_v18  ;;  %1302 = vst [vmem:[#allocation2 + $0xd0] sm:$0xff] %v1270_v19  ;;  %v1255_v28 = vadd.f32 %v1223_v22, %v646_v14  ;;  %v1271_v29 = vadd.f32 %v1239_v23, %v662_v16 }
 0x187   : > { %1284 = vst [vmem:[#allocation2 + $0x40] sm:$0xff] %v1252_v26  ;;  %1300 = vst [vmem:[#allocation2 + $0xc0] sm:$0xff] %v1268_v27  ;;  %v1253_v42 = vadd.f32 %v1221_v35, %v644_v37  ;;  %v1269_v36 = vadd.f32 %v1237_v51, %v660_v24 }
 0x188   : > { %1287 = vst [vmem:[#allocation2 + $0x58] sm:$0xff] %v1255_v28  ;;  %1303 = vst [vmem:[#allocation2 + $0xd8] sm:$0xff] %v1271_v29 }
 0x189   : > { %1285 = vst [vmem:[#allocation2 + $0x48] sm:$0xff] %v1253_v42  ;;  %1301 = vst [vmem:[#allocation2 + $0xc8] sm:$0xff] %v1269_v36  ;;  %v2188_v45 = vpop.f32.mrb[12].mxu0  ;;  %v2204_v34 = vpop.f32.mrb[12].mxu1 }
 0x18a   : > { %v1226_v50 = vmul.f32 %v2188_v45, %v2736_v41  ;;  %v1242_v53 = vmul.f32 %v2204_v34, %v1205_v20  ;;  %v973_v55 = vpop.f32.mrb[13].mxu0  ;;  %v1037_v57 = vpop.f32.mrb[13].mxu1  ;;  %v664_v41 = vld [vmem:[#allocation2 + $0xe8] sm:$0xff] }
 0x18b   : > { %v1224_v58 = vmul.f32 %v2732_v39, %v973_v55  ;;  %v1240_v59 = vmul.f32 %v1195_v48, %v1037_v57  ;;  %v2189_v33 = vpop.f32.mrb[14].mxu0  ;;  %v2205_v61 = vpop.f32.mrb[14].mxu1 }
 0x18c   : > { %v1258_v62 = vadd.f32 %v1226_v50, %v649_v44  ;;  %v1274_v63 = vadd.f32 %v1242_v53, %v665_v52  ;;  %v1227_v0 = vmul.f32 %v2189_v33, %v2734_v40  ;;  %v1243_v31 = vmul.f32 %v2205_v61, %v1210_v43  ;;  %v976_v1 = vpop.f32.mrb[15].mxu0  ;;  %v1040_v2 = vpop.f32.mrb[15].mxu1 }
 0x18d   : > { %v1256_v32 = vadd.f32 %v1224_v58, %v647_v54  ;;  %v1272_v4 = vadd.f32 %v1240_v59, %v663_v56  ;;  %v1225_v5 = vmul.f32 %v2730_v38, %v976_v1  ;;  %v1241_v39 = vmul.f32 %v2754_v3, %v1040_v2 }
 0x18e   : > { %1290 = vst [vmem:[#allocation2 + $0x70] sm:$0xff] %v1258_v62  ;;  %1306 = vst [vmem:[#allocation2 + $0xf0] sm:$0xff] %v1274_v63  ;;  %v1259_v48 = vadd.f32 %v1227_v0, %v650_v60  ;;  %v1275_v30 = vadd.f32 %v1243_v31, %v666_v49 }
 0x18f   : > { %1288 = vst [vmem:[#allocation2 + $0x60] sm:$0xff] %v1256_v32  ;;  %1304 = vst [vmem:[#allocation2 + $0xe0] sm:$0xff] %v1272_v4  ;;  %v1257_v6 = vadd.f32 %v1225_v5, %v648_v47  ;;  %v1273_v46 = vadd.f32 %v1241_v39, %v664_v41 }
 0x190   : > { %1291 = vst [vmem:[#allocation2 + $0x78] sm:$0xff] %v1259_v48  ;;  %1307 = vst [vmem:[#allocation2 + $0xf8] sm:$0xff] %v1275_v30 }
 0x191   : > { %1289 = vst [vmem:[#allocation2 + $0x68] sm:$0xff] %v1257_v6  ;;  %1305 = vst [vmem:[#allocation2 + $0xe8] sm:$0xff] %v1273_v46 }
 0x192 PF: > { %p1308_p1 = scmp.eq.s32.totalorder %s2402_s16, 8  ;;  %p1309_p2 = scmp.eq.s32.totalorder %s2398_s15, 3 }
 0x194   : > { %p1310_p3 = pnand %p1309_p2, %p1308_p1 }
 0x195   : > { %v1314_v38 = vld [vmem:[#allocation2] sm:$0xff] (!%p1310_p3)  ;;  %v1315_v40 = vld [vmem:[#allocation2 + $0x8] sm:$0xff] (!%p1310_p3)  ;;  %v1316_v11 = vld [vmem:[#allocation2 + $0x10] sm:$0xff] (!%p1310_p3) }
 0x196   : > { %1313 = sbr.rel (%p1310_p3) target bundleno = 457 (0x1c9), region = 97  ;;  %v2773_v3 = vld [vmem:[%s2907_s5] ss:$0 sm:$0xff] (!%p1310_p3)  ;;  %v1317_v14 = vld [vmem:[#allocation2 + $0x18] sm:$0xff] (!%p1310_p3)  ;;  %v2104_v16 = vld [vmem:[%s2633_s27 + $0x8] sm:$0xff] (!%p1310_p3)  }
 0x197   : > { %v1353_v7 = vmul.f32 (!%p1310_p3), %v2773_v3, %v1314_v38  ;;  %v1354_v8 = vmul.f32 (!%p1310_p3), %v2773_v3, %v1315_v40  ;;  %v2780_v9 = vld [vmem:[%s2908_s6] ss:$0 sm:$0xff] (!%p1310_p3)  ;;  %v1355_v15 = vmul.f32 (!%p1310_p3), %v2773_v3, %v1316_v11  ;;  %v1356_v22 = vmul.f32 (!%p1310_p3), %v2773_v3, %v1317_v14  ;;  %v1319_v37 = vld [vmem:[#allocation2 + $0x28] sm:$0xff] (!%p1310_p3)  ;;  %v2105_v21 = vld [vmem:[%s2633_s27 + $0x10] sm:$0xff] (!%p1310_p3)  }
 0x198   : > { %v1961_v10 = vld [vmem:[%s2633_s27] sm:$0xff] (!%p1310_p3)   ;;  %v1966_v23 = vunpack.c.l.bf16 (!%p1310_p3), %v2104_v16  ;;  %v1967_v25 = vunpack.c.h.bf16 (!%p1310_p3), %v2104_v16  ;;  %v1358_v27 = vmul.f32 (!%p1310_p3), %v2773_v3, %v1319_v37  ;;  %v1320_v35 = vld [vmem:[#allocation2 + $0x30] sm:$0xff] (!%p1310_p3)  ;;  %v1970_v42 = vunpack.c.l.bf16 (!%p1310_p3), %v2105_v21  ;;  %v1321_v36 = vld [vmem:[#allocation2 + $0x38] sm:$0xff] (!%p1310_p3) }
 0x199   : > { %v1962_v12 = vunpack.c.l.bf16 (!%p1310_p3), %v1961_v10  ;;  %v1963_v13 = vunpack.c.h.bf16 (!%p1310_p3), %v1961_v10  ;;  %v1318_v17 = vld [vmem:[#allocation2 + $0x20] sm:$0xff] (!%p1310_p3)  ;;  %v1392_v18 = vadd.f32 (!%p1310_p3), %v2780_v9, %v1353_v7  ;;  %v1393_v19 = vadd.f32 (!%p1310_p3), %v2780_v9, %v1354_v8  ;;  %v2106_v52 = vld [vmem:[%s2633_s27 + $0x18] sm:$0xff] (!%p1310_p3)   ;;  %v1323_v60 = vld [vmem:[#allocation2 + $0x48] sm:$0xff] (!%p1310_p3) }
 0x19a   : > { %v1394_v24 = vadd.f32 (!%p1310_p3), %v2780_v9, %v1355_v15  ;;  %v1357_v26 = vmul.f32 (!%p1310_p3), %v2773_v3, %v1318_v17  ;;  %v1395_v29 = vadd.f32 (!%p1310_p3), %v2780_v9, %v1356_v22  ;;  %v1397_v44 = vadd.f32 (!%p1310_p3), %v2780_v9, %v1358_v27  ;;  %v1322_v59 = vld [vmem:[#allocation2 + $0x40] sm:$0xff] (!%p1310_p3)  ;;  %v1324_v41 = vld [vmem:[#allocation2 + $0x50] sm:$0xff] (!%p1310_p3)  ;;  %v1325_v39 = vld [vmem:[#allocation2 + $0x58] sm:$0xff] (!%p1310_p3) }
 0x19b   : > { %v1488_v51 = vadd.f32 (!%p1310_p3), %v1962_v12, %v1392_v18  ;;  %v1489_v28 = vadd.f32 (!%p1310_p3), %v1963_v13, %v1393_v19  ;;  %v1971_v45 = vunpack.c.h.bf16 (!%p1310_p3), %v2105_v21  ;;  %v1359_v54 = vmul.f32 (!%p1310_p3), %v2773_v3, %v1320_v35  ;;  %v2107_v63 = vld [vmem:[%s2633_s27 + $0x20] sm:$0xff] (!%p1310_p3)   ;;  %v2108_v48 = vld [vmem:[%s2633_s27 + $0x28] sm:$0xff] (!%p1310_p3)   ;;  %v2109_v13 = vld [vmem:[%s2633_s27 + $0x30] sm:$0xff] (!%p1310_p3)  }
 0x19c   : > { %v1490_v43 = vadd.f32 (!%p1310_p3), %v1966_v23, %v1394_v24  ;;  %v1396_v20 = vadd.f32 (!%p1310_p3), %v2780_v9, %v1357_v26  ;;  %v1491_v53 = vadd.f32 (!%p1310_p3), %v1967_v25, %v1395_v29  ;;  %v1360_v58 = vmul.f32 (!%p1310_p3), %v2773_v3, %v1321_v36  ;;  %v1326_v40 = vld [vmem:[#allocation2 + $0x60] sm:$0xff] (!%p1310_p3)  ;;  %v1327_v12 = vld [vmem:[#allocation2 + $0x68] sm:$0xff] (!%p1310_p3)  ;;  %v1328_v37 = vld [vmem:[#allocation2 + $0x70] sm:$0xff] (!%p1310_p3) }
 0x19d   : > { %v1520_v34 = vmax.f32 %v1488_v51, 0.0  ;;  %v1521_v50 = vmax.f32 %v1489_v28, 0.0  ;;  %v1493_v57 = vadd.f32 %v1971_v45, %v1397_v44  ;;  %v1398_v61 = vadd.f32 %v2780_v9, %v1359_v54  ;;  %v1329_v27 = vld [vmem:[#allocation2 + $0x78] sm:$0xff]  ;;  %v1330_v45 = vld [vmem:[#allocation2 + $0x80] sm:$0xff]  ;;  %v1331_v54 = vld [vmem:[#allocation2 + $0x88] sm:$0xff] }
 0x19e   : > { %v1522_v55 = vmax.f32 %v1490_v43, 0.0  ;;  %v1492_v56 = vadd.f32 %v1970_v42, %v1396_v20  ;;  %v1523_v49 = vmax.f32 %v1491_v53, 0.0  ;;  %v1974_v62 = vunpack.c.l.bf16 %v2106_v52  ;;  %v2110_v42 = vld [vmem:[%s2633_s27 + $0x38] sm:$0xff]  }
 0x19f   : > { %v2027_v33 = vpack.c.bf16 %v1521_v50, %v1520_v34  ;;  %v1525_v31 = vmax.f32 %v1493_v57, 0.0  ;;  %v1399_v47 = vadd.f32 %v2780_v9, %v1360_v58  ;;  %v1975_v1 = vunpack.c.h.bf16 %v2106_v52 }
 0x1a0   : > { %v1524_v0 = vmax.f32 %v1492_v56, 0.0  ;;  %v2032_v2 = vpack.c.bf16 %v1523_v49, %v1522_v55  ;;  %v1494_v32 = vadd.f32 %v1974_v62, %v1398_v61  ;;  %v1361_v4 = vmul.f32 %v2773_v3, %v1322_v59  ;;  %v2111_v59 = vld [vmem:[%s2633_s27 + $0x40] sm:$0xff]   ;;  %v1332_v62 = vld [vmem:[#allocation2 + $0x90] sm:$0xff] }
 0x1a1   : > { %2028 = vst [vmem:[%s2638_s24] sm:$0xff] %v2027_v33   ;;  %v1362_v5 = vmul.f32 %v2773_v3, %v1323_v60  ;;  %v1495_v6 = vadd.f32 %v1975_v1, %v1399_v47  ;;  %v1978_v46 = vunpack.c.l.bf16 %v2107_v63  ;;  %v1979_v38 = vunpack.c.h.bf16 %v2107_v63  ;;  %v1333_v1 = vld [vmem:[#allocation2 + $0x98] sm:$0xff] }
 0x1a2   : > { %v2037_v30 = vpack.c.bf16 %v1525_v31, %v1524_v0  ;;  %2119 = vst [vmem:[%s2638_s24 + $0x8] sm:$0xff] %v2032_v2   ;;  %v1526_v7 = vmax.f32 %v1494_v32, 0.0  ;;  %v1400_v8 = vadd.f32 %v2780_v9, %v1361_v4  ;;  %v1363_v11 = vmul.f32 %v2773_v3, %v1324_v41  ;;  %v2112_v41 = vld [vmem:[%s2633_s27 + $0x48] sm:$0xff]  }
 0x1a3   : > { %v1401_v10 = vadd.f32 %v2780_v9, %v1362_v5  ;;  %v1527_v14 = vmax.f32 %v1495_v6, 0.0  ;;  %v1364_v15 = vmul.f32 %v2773_v3, %v1325_v39  ;;  %v1982_v16 = vunpack.c.l.bf16 %v2108_v48  ;;  %v1334_v39 = vld [vmem:[#allocation2 + $0xa0] sm:$0xff] }
 0x1a4   : > { %2120 = vst [vmem:[%s2638_s24 + $0x10] sm:$0xff] %v2037_v30   ;;  %v1983_v17 = vunpack.c.h.bf16 %v2108_v48  ;;  %v1496_v18 = vadd.f32 %v1978_v46, %v1400_v8  ;;  %v1402_v22 = vadd.f32 %v2780_v9, %v1363_v11  ;;  %v1365_v23 = vmul.f32 %v2773_v3, %v1326_v40  ;;  %v2113_v11 = vld [vmem:[%s2633_s27 + $0x50] sm:$0xff]  }
 0x1a5   : > { %v1497_v19 = vadd.f32 %v1979_v38, %v1401_v10  ;;  %v2042_v21 = vpack.c.bf16 %v1527_v14, %v1526_v7  ;;  %v1403_v24 = vadd.f32 %v2780_v9, %v1364_v15  ;;  %v1366_v25 = vmul.f32 %v2773_v3, %v1327_v12  ;;  %v1335_v38 = vld [vmem:[#allocation2 + $0xa8] sm:$0xff] }
 0x1a6   : > { %v1986_v26 = vunpack.c.l.bf16 %v2109_v13  ;;  %v1528_v35 = vmax.f32 %v1496_v18, 0.0  ;;  %v1498_v28 = vadd.f32 %v1982_v16, %v1402_v22  ;;  %v1404_v29 = vadd.f32 %v2780_v9, %v1365_v23  ;;  %v1336_v16 = vld [vmem:[#allocation2 + $0xb0] sm:$0xff]  ;;  %v1337_v23 = vld [vmem:[#allocation2 + $0xb8] sm:$0xff] }
 0x1a7   : > { %v1529_v51 = vmax.f32 %v1497_v19, 0.0  ;;  %2121 = vst [vmem:[%s2638_s24 + $0x18] sm:$0xff] %v2042_v21   ;;  %v1499_v36 = vadd.f32 %v1983_v17, %v1403_v24  ;;  %v1405_v43 = vadd.f32 %v2780_v9, %v1366_v25  ;;  %v1987_v20 = vunpack.c.h.bf16 %v2109_v13 }
 0x1a8   : > { %v1367_v44 = vmul.f32 %v2773_v3, %v1328_v37  ;;  %v1530_v34 = vmax.f32 %v1498_v28, 0.0  ;;  %v1500_v50 = vadd.f32 %v1986_v26, %v1404_v29  ;;  %v1368_v53 = vmul.f32 %v2773_v3, %v1329_v27  ;;  %v2114_v26 = vld [vmem:[%s2633_s27 + $0x58] sm:$0xff]   ;;  %v1338_v29 = vld [vmem:[#allocation2 + $0xc0] sm:$0xff] }
 0x1a9   : > { %v2047_v52 = vpack.c.bf16 %v1529_v51, %v1528_v35  ;;  %v1531_v55 = vmax.f32 %v1499_v36, 0.0  ;;  %v1501_v56 = vadd.f32 %v1987_v20, %v1405_v43  ;;  %v1990_v58 = vunpack.c.l.bf16 %v2110_v42 }
 0x1aa   : > { %v1406_v57 = vadd.f32 %v2780_v9, %v1367_v44  ;;  %v1532_v60 = vmax.f32 %v1500_v50, 0.0  ;;  %v1407_v33 = vadd.f32 %v2780_v9, %v1368_v53  ;;  %v1991_v49 = vunpack.c.h.bf16 %v2110_v42  ;;  %v1339_v44 = vld [vmem:[#allocation2 + $0xc8] sm:$0xff]  ;;  %v2115_v53 = vld [vmem:[%s2633_s27 + $0x60] sm:$0xff]  }
 0x1ab   : > { %2122 = vst [vmem:[%s2638_s24 + $0x20] sm:$0xff] %v2047_v52   ;;  %v1369_v61 = vmul.f32 %v2773_v3, %v1330_v45  ;;  %v2052_v63 = vpack.c.bf16 %v1531_v55, %v1530_v34  ;;  %v1533_v0 = vmax.f32 %v1501_v56, 0.0  ;;  %v1370_v47 = vmul.f32 %v2773_v3, %v1331_v54 }
 0x1ac   : > { %v1502_v31 = vadd.f32 %v1990_v58, %v1406_v57  ;;  %v1503_v2 = vadd.f32 %v1991_v49, %v1407_v33  ;;  %v1994_v4 = vunpack.c.l.bf16 %v2111_v59  ;;  %v1995_v5 = vunpack.c.h.bf16 %v2111_v59  ;;  %v1340_v58 = vld [vmem:[#allocation2 + $0xd0] sm:$0xff] }
 0x1ad   : > { %v1408_v32 = vadd.f32 %v2780_v9, %v1369_v61  ;;  %2123 = vst [vmem:[%s2638_s24 + $0x28] sm:$0xff] %v2052_v63   ;;  %v2057_v48 = vpack.c.bf16 %v1533_v0, %v1532_v60  ;;  %v1409_v6 = vadd.f32 %v2780_v9, %v1370_v47  ;;  %v1371_v46 = vmul.f32 %v2773_v3, %v1332_v62  ;;  %v1341_v61 = vld [vmem:[#allocation2 + $0xd8] sm:$0xff]  ;;  %v2116_v62 = vld [vmem:[%s2633_s27 + $0x68] sm:$0xff]  }
 0x1ae   : > { %v1534_v30 = vmax.f32 %v1502_v31, 0.0  ;;  %v1535_v40 = vmax.f32 %v1503_v2, 0.0  ;;  %v1372_v8 = vmul.f32 %v2773_v3, %v1333_v1  ;;  %v1998_v10 = vunpack.c.l.bf16 %v2112_v41  ;;  %v1342_v1 = vld [vmem:[#allocation2 + $0xe0] sm:$0xff] }
 0x1af   : > { %v1504_v7 = vadd.f32 %v1994_v4, %v1408_v32  ;;  %2124 = vst [vmem:[%s2638_s24 + $0x30] sm:$0xff] %v2057_v48   ;;  %v1505_v12 = vadd.f32 %v1995_v5, %v1409_v6  ;;  %v1410_v13 = vadd.f32 %v2780_v9, %v1371_v46  ;;  %v1999_v14 = vunpack.c.h.bf16 %v2112_v41  ;;  %v1343_v5 = vld [vmem:[#allocation2 + $0xe8] sm:$0xff]  ;;  %v2117_v46 = vld [vmem:[%s2633_s27 + $0x70] sm:$0xff]  }
 0x1b0   : > { %v1373_v15 = vmul.f32 %v2773_v3, %v1334_v39  ;;  %v2062_v17 = vpack.c.bf16 %v1535_v40, %v1534_v30  ;;  %v1411_v19 = vadd.f32 %v2780_v9, %v1372_v8  ;;  %v1374_v22 = vmul.f32 %v2773_v3, %v1335_v38 }
 0x1b1   : > { %v1536_v18 = vmax.f32 %v1504_v7, 0.0  ;;  %v1537_v37 = vmax.f32 %v1505_v12, 0.0  ;;  %v1506_v21 = vadd.f32 %v1998_v10, %v1410_v13  ;;  %v2002_v25 = vunpack.c.l.bf16 %v2113_v11  ;;  %v1344_v10 = vld [vmem:[#allocation2 + $0xf0] sm:$0xff] }
 0x1b2   : > { %v1412_v24 = vadd.f32 %v2780_v9, %v1373_v15  ;;  %2125 = vst [vmem:[%s2638_s24 + $0x38] sm:$0xff] %v2062_v17   ;;  %v1507_v27 = vadd.f32 %v1999_v14, %v1411_v19  ;;  %v1413_v35 = vadd.f32 %v2780_v9, %v1374_v22  ;;  %v2003_v51 = vunpack.c.h.bf16 %v2113_v11  ;;  %v1345_v15 = vld [vmem:[#allocation2 + $0xf8] sm:$0xff] }
 0x1b3   : > { %v1375_v28 = vmul.f32 %v2773_v3, %v1336_v16  ;;  %v2067_v42 = vpack.c.bf16 %v1537_v37, %v1536_v18  ;;  %v1538_v36 = vmax.f32 %v1506_v21, 0.0  ;;  %v1376_v20 = vmul.f32 %v2773_v3, %v1337_v23  ;;  %v2118_v22 = vld [vmem:[%s2633_s27 + $0x78] sm:$0xff]  }
 0x1b4   : > { %v1508_v43 = vadd.f32 %v2002_v25, %v1412_v24  ;;  %v1539_v45 = vmax.f32 %v1507_v27, 0.0  ;;  %v1509_v52 = vadd.f32 %v2003_v51, %v1413_v35  ;;  %v2006_v50 = vunpack.c.l.bf16 %v2114_v26 }
 0x1b5   : > { %v1414_v34 = vadd.f32 %v2780_v9, %v1375_v28  ;;  %2126 = vst [vmem:[%s2638_s24 + $0x40] sm:$0xff] %v2067_v42   ;;  %v1415_v55 = vadd.f32 %v2780_v9, %v1376_v20  ;;  %v2007_v56 = vunpack.c.h.bf16 %v2114_v26  ;;  %v1377_v57 = vmul.f32 %v2773_v3, %v1338_v29 }
 0x1b6   : > { %v1540_v54 = vmax.f32 %v1508_v43, 0.0  ;;  %v2072_v59 = vpack.c.bf16 %v1539_v45, %v1538_v36  ;;  %v1541_v60 = vmax.f32 %v1509_v52, 0.0  ;;  %v1378_v49 = vmul.f32 %v2773_v3, %v1339_v44 }
 0x1b7   : > { %v1510_v33 = vadd.f32 %v2006_v50, %v1414_v34  ;;  %v1511_v63 = vadd.f32 %v2007_v56, %v1415_v55  ;;  %v1416_v0 = vadd.f32 %v2780_v9, %v1377_v57  ;;  %v2010_v31 = vunpack.c.l.bf16 %v2115_v53 }
 0x1b8   : > { %v2011_v47 = vunpack.c.h.bf16 %v2115_v53  ;;  %2127 = vst [vmem:[%s2638_s24 + $0x48] sm:$0xff] %v2072_v59   ;;  %v2077_v41 = vpack.c.bf16 %v1541_v60, %v1540_v54  ;;  %v1417_v32 = vadd.f32 %v2780_v9, %v1378_v49  ;;  %v1379_v4 = vmul.f32 %v2773_v3, %v1340_v58 }
 0x1b9   : > { %v1542_v2 = vmax.f32 %v1510_v33, 0.0  ;;  %v1543_v39 = vmax.f32 %v1511_v63, 0.0  ;;  %v1512_v48 = vadd.f32 %v2010_v31, %v1416_v0  ;;  %v1380_v30 = vmul.f32 %v2773_v3, %v1341_v61 }
 0x1ba   : > { %v2014_v6 = vunpack.c.l.bf16 %v2116_v62  ;;  %2128 = vst [vmem:[%s2638_s24 + $0x50] sm:$0xff] %v2077_v41   ;;  %v1513_v38 = vadd.f32 %v2011_v47, %v1417_v32  ;;  %v1418_v40 = vadd.f32 %v2780_v9, %v1379_v4  ;;  %v2015_v7 = vunpack.c.h.bf16 %v2116_v62 }
 0x1bb   : > { %v1381_v8 = vmul.f32 %v2773_v3, %v1342_v1  ;;  %v2082_v11 = vpack.c.bf16 %v1543_v39, %v1542_v2  ;;  %v1544_v12 = vmax.f32 %v1512_v48, 0.0  ;;  %v1419_v13 = vadd.f32 %v2780_v9, %v1380_v30 }
 0x1bc   : > { %v1382_v14 = vmul.f32 %v2773_v3, %v1343_v5  ;;  %v1545_v16 = vmax.f32 %v1513_v38, 0.0  ;;  %v1514_v17 = vadd.f32 %v2014_v6, %v1418_v40  ;;  %v2018_v19 = vunpack.c.l.bf16 %v2117_v46 }
 0x1bd   : > { %v1420_v18 = vadd.f32 %v2780_v9, %v1381_v8  ;;  %2129 = vst [vmem:[%s2638_s24 + $0x58] sm:$0xff] %v2082_v11   ;;  %v1515_v23 = vadd.f32 %v2015_v7, %v1419_v13  ;;  %v2019_v21 = vunpack.c.h.bf16 %v2117_v46  ;;  %v1383_v24 = vmul.f32 %v2773_v3, %v1344_v10 }
 0x1be   : > { %v1421_v37 = vadd.f32 %v2780_v9, %v1382_v14  ;;  %v2087_v25 = vpack.c.bf16 %v1545_v16, %v1544_v12  ;;  %v1546_v26 = vmax.f32 %v1514_v17, 0.0  ;;  %v1384_v35 = vmul.f32 %v2773_v3, %v1345_v15 }
 0x1bf   : > { %v1516_v27 = vadd.f32 %v2018_v19, %v1420_v18  ;;  %v1547_v51 = vmax.f32 %v1515_v23, 0.0  ;;  %v1422_v29 = vadd.f32 %v2780_v9, %v1383_v24  ;;  %v2022_v42 = vunpack.c.l.bf16 %v2118_v22 }
 0x1c0   : > { %v1517_v28 = vadd.f32 %v2019_v21, %v1421_v37  ;;  %2130 = vst [vmem:[%s2638_s24 + $0x60] sm:$0xff] %v2087_v25   ;;  %v1423_v43 = vadd.f32 %v2780_v9, %v1384_v35  ;;  %v2023_v20 = vunpack.c.h.bf16 %v2118_v22 }
 0x1c1   : > { %v1548_v36 = vmax.f32 %v1516_v27, 0.0  ;;  %v2092_v44 = vpack.c.bf16 %v1547_v51, %v1546_v26  ;;  %v1518_v52 = vadd.f32 %v2022_v42, %v1422_v29 }
 0x1c2   : > { %v1549_v45 = vmax.f32 %v1517_v28, 0.0  ;;  %v1519_v34 = vadd.f32 %v2023_v20, %v1423_v43 }
 0x1c3   : > { %2131 = vst [vmem:[%s2638_s24 + $0x68] sm:$0xff] %v2092_v44   ;;  %v1550_v53 = vmax.f32 %v1518_v52, 0.0 }
 0x1c4   : > { %v2097_v50 = vpack.c.bf16 %v1549_v45, %v1548_v36  ;;  %v1551_v3 = vmax.f32 %v1519_v34, 0.0 }
 0x1c6   : > { %2132 = vst [vmem:[%s2638_s24 + $0x70] sm:$0xff] %v2097_v50   ;;  %v2102_v54 = vpack.c.bf16 %v1551_v3, %v1550_v53 }
 0x1c8   : > { %2133 = vst [vmem:[%s2638_s24 + $0x78] sm:$0xff] %v2102_v54  }
 0x1c9 PF: > { %s2930_s15 = sld [smem:[#allocation12_spill]]  ;;  %s2931_s1 = sld [smem:[#allocation8_spill]] }
 0x1ca   : > { %s2932_s14 = sld [smem:[#allocation16_spill]]  ;;  %s2934_s16 = sld [smem:[#allocation10_spill]] }
 0x1cb   : > { %s2935_s17 = sld [smem:[#allocation11_spill]]  ;;  %s2936_s18 = sld [smem:[#allocation13_spill]] }
 0x1cc   : > { %s2937_s19 = sld [smem:[#allocation14_spill]]  ;;  %s2938_s20 = sld [smem:[#allocation15_spill]] }
 0x1cf   : > { %s28_s21 = sadd.s32 1, %s2930_s15   ;;  %s2933_s15 = sld [smem:[#allocation9_spill]] }
 0x1d0   : > { %p25_p4 = scmp.ge.s32.totalorder %s28_s21, 74  }
 0x1d2   :  { %27 = sbr.rel (!%p25_p4) target bundleno = 31 (0x1f), region = 141 }

// kernel: forward.26
= control target key start
LH: loop header
LB: loop body
LE: loop exit
PB: predicated region body
PF: predicated region fallthrough
CT: control target
= control target key end

     0   :  { %s959_s15 = smov 0   ;;  %s961_s16 = smov 0   ;;  %s1081_s0 = inlined_call_operand.vmem [shape: bf16[128,1152], index: 0, kind: input, shape index: {}]   ;;  %s1082_s1 = inlined_call_operand.vmem [shape: bf16[1152,128], index: 1, kind: input, shape index: {}]   ;;  %s1083_s2 = inlined_call_operand.vmem [shape: f32[1,128], index: 2, kind: input, shape index: {}]   ;;  %s1084_s3 = inlined_call_operand.vmem [shape: f32[1,128], index: 3, kind: input, shape index: {}]   ;;  %s1085_s4 = inlined_call_operand.vmem [shape: bf16[128,128], index: 4, kind: output, shape index: {}]  }
   0x1   :  { %s963_s17 = smov 0   ;;  %s965_s18 = smov 0  }
   0x2   :  { %s967_s19 = smov 0   ;;  %s969_s20 = smov 0  }
   0x3   :  { %s971_s21 = smov 0  }
   0x4 LB: > { %s23_s22 = sadd.s32 1, %s923_s19  ;;  %s26_s23 = sadd.s32 1, %s927_s20  ;;  %s931_s21 = sphi %s971_s21, %s14_s21   ;;  %s927_s20 = sphi %s969_s20, %s1091_s20   ;;  %s923_s19 = sphi %s967_s19, %s1090_s19   ;;  %s919_s18 = sphi %s965_s18, %s1089_s18   ;;  %s915_s17 = sphi %s963_s17, %s1088_s17   ;;  %s911_s16 = sphi %s961_s16, %s1087_s16   ;;  %s907_s15 = sphi %s959_s15, %s1086_s15  }
   0x5   : > { %p24_p0 = scmp.ge.s32.totalorder %s23_s22, 9  ;;  %p42_p1 = scmp.ne.s32.totalorder %s911_s16, %s907_s15 }
   0x6   : > { %p43_p2 = scmp.eq.s32.totalorder %s931_s21, 0  ;;  %s35_s27 = sadd.s32 1, %s911_s16 }
   0x7   : > { %s1093_s22 = smov (%p24_p0, %s23_s22), 0  ;;  %s1095_s23 = smov (!%p24_p0, %s26_s23), %s927_s20 }
   0x8   : > { %p44_p3 = por %p43_p2, %p42_p1  ;;  %p28_p4 = scmp.ge.s32.totalorder %s1095_s23, 2 }
   0x9   : > { %s31_s24 = ssub.s32 %s923_s19, %s1093_s22  ;;  %p687_p6 = scmp.ge.s32.totalorder %s931_s21, 18 }
   0xa   : > { %s1097_s23 = smov (%p28_p4, %s1095_s23), 0 }
   0xb   : > { %s30_s25 = ssub.s32 %s927_s20, %s1097_s23  ;;  %168 = sbr.rel (%p687_p6) target bundleno = 30 (0x1e), region = 24 }
   0xc   : > { %s32_s26 = sor.u32 %s31_s24, %s30_s25 }
   0xd   : > { %p33_p5 = scmp.eq.s32.totalorder %s32_s26, 0 }
   0xf   : > { %s1010_s28 = scalar_select %p33_p5, %s911_s16, %s35_s27  }
  0x12   : > { %171 = sbr.rel (!%p44_p3) target bundleno = 30 (0x1e), region = 28  ;;  %s173_s29 = sand.u32 (%p44_p3), 1, %s911_s16  }
  0x13   : > { %s807_s30 = smul.u32 (%p44_p3), 72, %s927_s20  ;;  %s688_s5 = sshll.u32 (%p44_p3), %s173_s29, 5 }
  0x14   : > { %s175_s11 = scalar_lea.vmem (%p44_p3), [#allocation3], %s688_s5 }
  0x15   : > { %s178_s6 = sadd.s32 (%p44_p3), %s923_s19, %s807_s30 }
  0x16   : > { %s691_s7 = sshll.u32 (%p44_p3), %s178_s6, 2 }
  0x17   : > { %s180_s10 = scalar_lea.vmem (%p44_p3), %s1081_s0, %s691_s7 }
  0x18   : > { %v196_v0 = vld [vmem:[%s180_s10] sm:$0xf] (%p44_p3)  ;;  %v198_v1 = vld [vmem:[%s180_s10 + $0x24] sm:$0xf] (%p44_p3)  ;;  %v200_v2 = vld [vmem:[%s180_s10 + $0x48] sm:$0xf] (%p44_p3) }
  0x19   : > { %197 = vst [vmem:[%s175_s11] sm:$0xf] %v196_v0  ;;  %199 = vst [vmem:[%s175_s11 + $0x4] sm:$0xf] %v198_v1  ;;  %v202_v3 = vld [vmem:[%s180_s10 + $0x6c] sm:$0xf] }
  0x1a   : > { %201 = vst [vmem:[%s175_s11 + $0x8] sm:$0xf] %v200_v2  ;;  %v204_v4 = vld [vmem:[%s180_s10 + $0x90] sm:$0xf]  ;;  %v206_v5 = vld [vmem:[%s180_s10 + $0xb4] sm:$0xf] }
  0x1b   : > { %203 = vst [vmem:[%s175_s11 + $0xc] sm:$0xf] %v202_v3  ;;  %205 = vst [vmem:[%s175_s11 + $0x10] sm:$0xf] %v204_v4  ;;  %v208_v6 = vld [vmem:[%s180_s10 + $0xd8] sm:$0xf] }
  0x1c   : > { %207 = vst [vmem:[%s175_s11 + $0x14] sm:$0xf] %v206_v5  ;;  %v210_v7 = vld [vmem:[%s180_s10 + $0xfc] sm:$0xf]  ;;  %209 = vst [vmem:[%s175_s11 + $0x18] sm:$0xf] %v208_v6 }
  0x1d   : > { %211 = vst [vmem:[%s175_s11 + $0x1c] sm:$0xf] %v210_v7 }
  0x1e PF: > { %p692_p7 = scmp.ge.s32.totalorder %s931_s21, 1  ;;  %p258_p8 = scmp.lt.s32.totalorder %s931_s21, 19 }
  0x20   : > { %p259_p9 = pnand %p692_p7, %p258_p8 }
  0x21   : > { %s265_s12 = sand.u32 (!%p259_p9), 1, %s907_s15   ;;  %s694_s13 = sshll.u32 (!%p259_p9), %s915_s17, 4 }
  0x22   : > { %262 = sbr.rel (%p259_p9) target bundleno = 319 (0x13f), region = 73  ;;  %s693_s14 = sshll.u32 (!%p259_p9), %s265_s12, 5 }
  0x23   : > { %p297_p10 = scmp.lt.s32.totalorder (!%p259_p9), %s694_s13, 143  ;;  %s696_s24 = sshll.u32 (!%p259_p9), %s919_s18, 3 }
  0x24   : > { %p303_p11 = scmp.lt.s32.totalorder (!%p259_p9), %s696_s24, 15  ;;  %s1034_s15 = scalar_lea.vmem (!%p259_p9), [#allocation3], %s693_s14 }
  0x25   : > { %p698_p12 = scmp.ne.s32.totalorder (!%p259_p9), %s915_s17, 0 }
  0x29   : > { %s1099_s13 = smov (!%p297_p10, %s694_s13), 143  ;;  %s1101_s24 = smov (!%p303_p11, %s696_s24), 15 }
  0x2a   : > { %s695_s25 = sshll.u32 %s1099_s13, 2  ;;  %s697_s30 = sshll.u32 %s1101_s24, 2  ;;  %v933_v8 = vmov (!%p698_p12), 0.0  }
  0x2b   : > { %s1027_s29 = scalar_lea.vmem %s1082_s1, %s695_s25  ;;  %s1032_s7 = scalar_lea.vmem %s1085_s4, %s697_s30  ;;  %313 = vst [vmem:[#allocation2] sm:$0xff] (!%p698_p12), %v933_v8  ;;  %314 = vst [vmem:[#allocation2 + $0x8] sm:$0xff] (!%p698_p12), %v933_v8 }
  0x2c   : > { %312 = sbr.rel (%p698_p12) target bundleno = 51 (0x33), region = 81  ;;  %315 = vst [vmem:[#allocation2 + $0x10] sm:$0xff] (!%p698_p12), %v933_v8  ;;  %316 = vst [vmem:[#allocation2 + $0x18] sm:$0xff] (!%p698_p12), %v933_v8 }
  0x2d   : > { %317 = vst [vmem:[#allocation2 + $0x20] sm:$0xff] (!%p698_p12), %v933_v8  ;;  %318 = vst [vmem:[#allocation2 + $0x28] sm:$0xff] (!%p698_p12), %v933_v8 }
  0x2e   : > { %319 = vst [vmem:[#allocation2 + $0x30] sm:$0xff] (!%p698_p12), %v933_v8  ;;  %320 = vst [vmem:[#allocation2 + $0x38] sm:$0xff] (!%p698_p12), %v933_v8 }
  0x33 PF: > { %v865_v9 = vld [vmem:[%s1027_s29] sm:$0xff]   ;;  %v866_v10 = vld [vmem:[%s1027_s29 + $0x8] sm:$0xff]   ;;  %v867_v11 = vld [vmem:[%s1027_s29 + $0x10] sm:$0xff]   ;;  %p711_p13 = scmp.ne.s32.totalorder %s915_s17, 8 }
  0x34   : > { %767 = vmatprep.subr.bf16.mxu0 %v865_v9  ;;  %791 = vmatprep.subr.bf16.mxu1 %v865_v9  ;;  %v868_v12 = vld [vmem:[%s1027_s29 + $0x18] sm:$0xff]   ;;  %v873_v13 = vld [vmem:[%s1034_s15] sm:$0xff]   ;;  %v874_v14 = vld [vmem:[%s1034_s15 + $0x10] sm:$0xff]  }
  0x35   : > { %768 = vmatpush3.bf16.msra.mxu0 %v865_v9  ;;  %799 = vmatpush3.bf16.msra.mxu1 %v865_v9  ;;  %v869_v15 = vld [vmem:[%s1027_s29 + $0x20] sm:$0xff]   ;;  %v870_v16 = vld [vmem:[%s1027_s29 + $0x28] sm:$0xff]   ;;  %v871_v17 = vld [vmem:[%s1027_s29 + $0x30] sm:$0xff]  }
  0x36   : > { %769 = vmatprep.subr.bf16.mxu0 %v866_v10  ;;  %792 = vmatprep.subr.bf16.mxu1 %v866_v10  ;;  %v872_v18 = vld [vmem:[%s1027_s29 + $0x38] sm:$0xff]   ;;  %v875_v19 = vld [vmem:[%s1034_s15 + $0x8] sm:$0xff]   ;;  %v323_v21 = vld [vmem:[#allocation2 + $0x10] sm:$0xff] }
  0x37   : > { %783 = vmatprep.mubr.bf16.mxu0 %v873_v13  ;;  %787 = vmatprep.mubr.bf16.mxu1 %v874_v14  ;;  %v876_v20 = vld [vmem:[%s1034_s15 + $0x18] sm:$0xff]   ;;  %v327_v22 = vld [vmem:[#allocation2 + $0x30] sm:$0xff]  ;;  %v321_v23 = vld [vmem:[#allocation2] sm:$0xff] }
  0x38   : > { %v325_v24 = vld [vmem:[#allocation2 + $0x20] sm:$0xff]  ;;  %v324_v27 = vld [vmem:[#allocation2 + $0x18] sm:$0xff]  ;;  %v322_v33 = vld [vmem:[#allocation2 + $0x8] sm:$0xff] }
  0x39   : > { %770 = vmatpush3.bf16.msra.mxu0 %v866_v10  ;;  %800 = vmatpush3.bf16.msra.mxu1 %v866_v10  ;;  %v328_v28 = vld [vmem:[#allocation2 + $0x38] sm:$0xff]  ;;  %v326_v34 = vld [vmem:[#allocation2 + $0x28] sm:$0xff]  ;;  %v712_v47 = vld [vmem:[%s1083_s2] ss:$0 sm:$0xff] (!%p711_p13) }
  0x3a   : > { %771 = vmatprep.subr.bf16.mxu0 %v867_v11  ;;  %793 = vmatprep.subr.bf16.mxu1 %v867_v11  ;;  %v713_v50 = vld [vmem:[%s1084_s3] ss:$0 sm:$0xff] (!%p711_p13) }
  0x3d   : > { %772 = vmatpush3.bf16.msra.mxu0 %v867_v11  ;;  %801 = vmatpush3.bf16.msra.mxu1 %v867_v11 }
  0x3e   : > { %773 = vmatprep.subr.bf16.mxu0 %v868_v12  ;;  %794 = vmatprep.subr.bf16.mxu1 %v868_v12 }
  0x41   : > { %774 = vmatpush3.bf16.msra.mxu0 %v868_v12  ;;  %802 = vmatpush3.bf16.msra.mxu1 %v868_v12 }
  0x42   : > { %775 = vmatprep.subr.bf16.mxu0 %v869_v15  ;;  %795 = vmatprep.subr.bf16.mxu1 %v869_v15 }
  0x45   : > { %776 = vmatpush3.bf16.msra.mxu0 %v869_v15  ;;  %803 = vmatpush3.bf16.msra.mxu1 %v869_v15 }
  0x46   : > { %777 = vmatprep.subr.bf16.mxu0 %v870_v16  ;;  %796 = vmatprep.subr.bf16.mxu1 %v870_v16 }
  0x49   : > { %778 = vmatpush3.bf16.msra.mxu0 %v870_v16  ;;  %804 = vmatpush3.bf16.msra.mxu1 %v870_v16 }
  0x4a   : > { %779 = vmatprep.subr.bf16.mxu0 %v871_v17  ;;  %797 = vmatprep.subr.bf16.mxu1 %v871_v17 }
  0x4d   : > { %780 = vmatpush3.bf16.msra.mxu0 %v871_v17  ;;  %805 = vmatpush3.bf16.msra.mxu1 %v871_v17 }
  0x4e   : > { %781 = vmatprep.subr.bf16.mxu0 %v872_v18  ;;  %798 = vmatprep.subr.bf16.mxu1 %v872_v18 }
  0x51   : > { %782 = vmatpush3.bf16.msra.mxu0 %v872_v18  ;;  %806 = vmatpush3.bf16.msra.mxu1 %v872_v18 }
  0x54   : > { %784 = vmatmul.mubr.bf16.vlgmr.msra.gmra.mrb[0].mxu0 %v875_v19  ;;  %788 = vmatmul.mubr.bf16.vlgmr.msra.gmra.mrb[0].mxu1 %v876_v20 }
 0x127   : > { %v785_v25 = vpop.f32.mrb[0].mxu0  ;;  %v789_v26 = vpop.f32.mrb[0].mxu1  ;;  %509 = sbr.rel (%p711_p13) target bundleno = 319 (0x13f), region = 85 }
 0x128   : > { %v492_v29 = vadd.f32 %v785_v25, %v323_v21  ;;  %v496_v30 = vadd.f32 %v789_v26, %v327_v22  ;;  %v459_v31 = vpop.f32.mrb[1].mxu0  ;;  %v475_v32 = vpop.f32.mrb[1].mxu1 }
 0x129   : > { %v490_v35 = vadd.f32 %v459_v31, %v321_v23  ;;  %v494_v36 = vadd.f32 %v475_v32, %v325_v24  ;;  %v786_v37 = vpop.f32.mrb[2].mxu0  ;;  %v790_v38 = vpop.f32.mrb[2].mxu1 }
 0x12a   : > { %500 = vst [vmem:[#allocation2 + $0x10] sm:$0xff] %v492_v29  ;;  %504 = vst [vmem:[#allocation2 + $0x30] sm:$0xff] %v496_v30  ;;  %v493_v39 = vadd.f32 %v786_v37, %v324_v27  ;;  %v497_v40 = vadd.f32 %v790_v38, %v328_v28  ;;  %v462_v41 = vpop.f32.mrb[3].mxu0  ;;  %v478_v42 = vpop.f32.mrb[3].mxu1 }
 0x12b   : > { %498 = vst [vmem:[#allocation2] sm:$0xff] %v490_v35  ;;  %502 = vst [vmem:[#allocation2 + $0x20] sm:$0xff] %v494_v36  ;;  %v491_v43 = vadd.f32 %v462_v41, %v322_v33  ;;  %v495_v44 = vadd.f32 %v478_v42, %v326_v34 }
 0x12c   : > { %501 = vst [vmem:[#allocation2 + $0x18] sm:$0xff] %v493_v39  ;;  %505 = vst [vmem:[#allocation2 + $0x38] sm:$0xff] %v497_v40 }
 0x12d   : > { %499 = vst [vmem:[#allocation2 + $0x8] sm:$0xff] %v491_v43  ;;  %503 = vst [vmem:[#allocation2 + $0x28] sm:$0xff] %v495_v44 }
 0x131   : > { %v512_v51 = vld [vmem:[#allocation2 + $0x10] sm:$0xff] }
 0x132   : > { %v510_v45 = vld [vmem:[#allocation2] sm:$0xff]  ;;  %v527_v53 = vmul.f32 %v712_v47, %v512_v51  ;;  %v516_v57 = vld [vmem:[#allocation2 + $0x30] sm:$0xff] }
 0x133   : > { %v525_v48 = vmul.f32 %v712_v47, %v510_v45  ;;  %v513_v52 = vld [vmem:[#allocation2 + $0x18] sm:$0xff]  ;;  %v514_v55 = vld [vmem:[#allocation2 + $0x20] sm:$0xff]  ;;  %v531_v1 = vmul.f32 %v712_v47, %v516_v57 }
 0x134   : > { %v511_v46 = vld [vmem:[#allocation2 + $0x8] sm:$0xff]  ;;  %v528_v54 = vmul.f32 %v712_v47, %v513_v52  ;;  %v529_v60 = vmul.f32 %v712_v47, %v514_v55  ;;  %v517_v62 = vld [vmem:[#allocation2 + $0x38] sm:$0xff]  ;;  %v542_v63 = vadd.f32 %v713_v50, %v527_v53 }
 0x135   : > { %v526_v49 = vmul.f32 %v712_v47, %v511_v46  ;;  %v515_v56 = vld [vmem:[#allocation2 + $0x28] sm:$0xff]  ;;  %v540_v58 = vadd.f32 %v713_v50, %v525_v48  ;;  %v532_v2 = vmul.f32 %v712_v47, %v517_v62  ;;  %v546_v9 = vadd.f32 %v713_v50, %v531_v1 }
 0x136   : > { %v530_v61 = vmul.f32 %v712_v47, %v515_v56  ;;  %v543_v0 = vadd.f32 %v713_v50, %v528_v54  ;;  %v544_v5 = vadd.f32 %v713_v50, %v529_v60  ;;  %v550_v7 = vmax.f32 %v542_v63, 0.0 }
 0x137   : > { %v541_v59 = vadd.f32 %v713_v50, %v526_v49  ;;  %v548_v3 = vmax.f32 %v540_v58, 0.0  ;;  %v547_v10 = vadd.f32 %v713_v50, %v532_v2  ;;  %v554_v15 = vmax.f32 %v546_v9, 0.0 }
 0x138   : > { %v545_v6 = vadd.f32 %v713_v50, %v530_v61  ;;  %v551_v8 = vmax.f32 %v543_v0, 0.0  ;;  %v552_v12 = vmax.f32 %v544_v5, 0.0 }
 0x139   : > { %v549_v4 = vmax.f32 %v541_v59, 0.0  ;;  %v555_v16 = vmax.f32 %v547_v10, 0.0 }
 0x13a   : > { %v553_v13 = vmax.f32 %v545_v6, 0.0  ;;  %v740_v14 = vpack.c.bf16 %v551_v8, %v550_v7 }
 0x13b   : > { %v735_v11 = vpack.c.bf16 %v549_v4, %v548_v3  ;;  %v750_v18 = vpack.c.bf16 %v555_v16, %v554_v15 }
 0x13c   : > { %v745_v17 = vpack.c.bf16 %v553_v13, %v552_v12  ;;  %752 = vst [vmem:[%s1032_s7 + $0x8] sm:$0xff] %v740_v14  }
 0x13d   : > { %736 = vst [vmem:[%s1032_s7] sm:$0xff] %v735_v11   ;;  %754 = vst [vmem:[%s1032_s7 + $0x18] sm:$0xff] %v750_v18  }
 0x13e   : > { %753 = vst [vmem:[%s1032_s7 + $0x10] sm:$0xff] %v745_v17  }
 0x13f PF: > { %s14_s21 = sadd.s32 1, %s931_s21   ;;  %s1086_s15 = smov %s911_s16 }
 0x140   : > { %p11_p0 = scmp.ge.s32.totalorder %s14_s21, 20   ;;  %s1087_s16 = smov %s1010_s28 }
 0x141   : > { %s1088_s17 = smov %s923_s19  ;;  %s1089_s18 = smov %s927_s20 }
 0x142   : > { %s1090_s19 = smov %s1093_s22  ;;  %s1091_s20 = smov %s1097_s23 }
 0x143   :  { %13 = sbr.rel (!%p11_p0) target bundleno = 4 (0x4), region = 123 }

// kernel: forward.25
= control target key start
LH: loop header
LB: loop body
LE: loop exit
PB: predicated region body
PF: predicated region fallthrough
CT: control target
= control target key end

     0   :  { %s810_s15 = smov 0   ;;  %s812_s16 = smov 0   ;;  %s886_s0 = inlined_call_operand.vmem [shape: bf16[128,128], index: 0, kind: input, shape index: {}]   ;;  %s887_s1 = inlined_call_operand.vmem [shape: bf16[128,128], index: 1, kind: input, shape index: {}]   ;;  %s888_s2 = inlined_call_operand.vmem [shape: f32[1,128], index: 2, kind: input, shape index: {}]   ;;  %s889_s3 = inlined_call_operand.vmem [shape: f32[1,128], index: 3, kind: input, shape index: {}]   ;;  %s890_s4 = inlined_call_operand.vmem [shape: bf16[128,128], index: 4, kind: output, shape index: {}]  }
   0x1   :  { %s814_s17 = smov 0  }
   0x2 LB: > { %s26_s18 = sadd.s32 1, %s779_s16  ;;  %p613_p0 = scmp.ge.s32.totalorder %s783_s17, 1  ;;  %s783_s17 = sphi %s814_s17, %s14_s17   ;;  %s779_s16 = sphi %s812_s16, %s892_s16   ;;  %s775_s15 = sphi %s810_s15, %s891_s15  }
   0x3   : > { %p28_p1 = scmp.ge.s32.totalorder %s26_s18, 2  ;;  %p191_p2 = scmp.lt.s32.totalorder %s783_s17, 3 }
   0x5   : > { %s894_s18 = smov (%p28_p1, %s26_s18), 0  ;;  %p192_p3 = pnand %p613_p0, %p191_p2 }
   0x6   : > { %v749_v0 = vld [vmem:[%s887_s1] sm:$0xff] (!%p192_p3)   ;;  %s614_s21 = sshll.u32 (!%p192_p3), %s775_s15, 3  ;;  %v750_v1 = vld [vmem:[%s887_s1 + $0x8] sm:$0xff] (!%p192_p3)   ;;  %v751_v2 = vld [vmem:[%s887_s1 + $0x10] sm:$0xff] (!%p192_p3)  }
   0x7   : > { %195 = sbr.rel (%p192_p3) target bundleno = 261 (0x105), region = 36  ;;  %p226_p4 = scmp.lt.s32.totalorder (!%p192_p3), %s614_s21, 15  ;;  %685 = vmatprep.subr.bf16.mxu0 (!%p192_p3), %v749_v0  ;;  %709 = vmatprep.subr.bf16.mxu1 (!%p192_p3), %v749_v0  ;;  %v752_v3 = vld [vmem:[%s887_s1 + $0x18] sm:$0xff] (!%p192_p3)   ;;  %v753_v6 = vld [vmem:[%s887_s1 + $0x20] sm:$0xff] (!%p192_p3)   ;;  %v754_v7 = vld [vmem:[%s887_s1 + $0x28] sm:$0xff] (!%p192_p3)  }
   0x8   : > { %686 = vmatpush3.bf16.msra.mxu0 (!%p192_p3), %v749_v0  ;;  %717 = vmatpush3.bf16.msra.mxu1 (!%p192_p3), %v749_v0  ;;  %v755_v8 = vld [vmem:[%s887_s1 + $0x30] sm:$0xff] (!%p192_p3)   ;;  %v756_v9 = vld [vmem:[%s887_s1 + $0x38] sm:$0xff] (!%p192_p3)   ;;  %v630_v12 = vld [vmem:[%s888_s2] ss:$0 sm:$0xff] (!%p192_p3) }
   0x9   : > { %687 = vmatprep.subr.bf16.mxu0 (!%p192_p3), %v750_v1  ;;  %710 = vmatprep.subr.bf16.mxu1 (!%p192_p3), %v750_v1  ;;  %v631_v19 = vld [vmem:[%s889_s3] ss:$0 sm:$0xff] (!%p192_p3) }
   0xc   : > { %688 = vmatpush3.bf16.msra.mxu0 (!%p192_p3), %v750_v1  ;;  %718 = vmatpush3.bf16.msra.mxu1 (!%p192_p3), %v750_v1 }
   0xd   : > { %689 = vmatprep.subr.bf16.mxu0 (!%p192_p3), %v751_v2  ;;  %711 = vmatprep.subr.bf16.mxu1 (!%p192_p3), %v751_v2 }
   0xe   : > { %s896_s21 = smov (!%p226_p4, %s614_s21), 15 }
   0xf   : > { %s615_s26 = sshll.u32 %s896_s21, 2 }
  0x10   : > { %s845_s29 = scalar_lea.vmem %s886_s0, %s615_s26  ;;  %690 = vmatpush3.bf16.msra.mxu0 %v751_v2  ;;  %719 = vmatpush3.bf16.msra.mxu1 %v751_v2  ;;  %s244_s24 = scalar_lea.vmem %s890_s4, %s615_s26 }
  0x11   : > { %v757_v4 = vld [vmem:[%s845_s29] sm:$0xff]   ;;  %v758_v5 = vld [vmem:[%s845_s29 + $0x10] sm:$0xff]   ;;  %691 = vmatprep.subr.bf16.mxu0 %v752_v3  ;;  %712 = vmatprep.subr.bf16.mxu1 %v752_v3  ;;  %v759_v10 = vld [vmem:[%s845_s29 + $0x8] sm:$0xff]  }
  0x12   : > { %701 = vmatprep.mubr.bf16.mxu0 %v757_v4  ;;  %705 = vmatprep.mubr.bf16.mxu1 %v758_v5  ;;  %v760_v11 = vld [vmem:[%s845_s29 + $0x18] sm:$0xff]  }
  0x14   : > { %692 = vmatpush3.bf16.msra.mxu0 %v752_v3  ;;  %720 = vmatpush3.bf16.msra.mxu1 %v752_v3 }
  0x15   : > { %693 = vmatprep.subr.bf16.mxu0 %v753_v6  ;;  %713 = vmatprep.subr.bf16.mxu1 %v753_v6 }
  0x18   : > { %694 = vmatpush3.bf16.msra.mxu0 %v753_v6  ;;  %721 = vmatpush3.bf16.msra.mxu1 %v753_v6 }
  0x19   : > { %695 = vmatprep.subr.bf16.mxu0 %v754_v7  ;;  %714 = vmatprep.subr.bf16.mxu1 %v754_v7 }
  0x1c   : > { %696 = vmatpush3.bf16.msra.mxu0 %v754_v7  ;;  %722 = vmatpush3.bf16.msra.mxu1 %v754_v7 }
  0x1d   : > { %697 = vmatprep.subr.bf16.mxu0 %v755_v8  ;;  %715 = vmatprep.subr.bf16.mxu1 %v755_v8 }
  0x20   : > { %698 = vmatpush3.bf16.msra.mxu0 %v755_v8  ;;  %723 = vmatpush3.bf16.msra.mxu1 %v755_v8 }
  0x21   : > { %699 = vmatprep.subr.bf16.mxu0 %v756_v9  ;;  %716 = vmatprep.subr.bf16.mxu1 %v756_v9 }
  0x24   : > { %700 = vmatpush3.bf16.msra.mxu0 %v756_v9  ;;  %724 = vmatpush3.bf16.msra.mxu1 %v756_v9 }
  0x27   : > { %702 = vmatmul.mubr.bf16.vlgmr.msra.gmra.mrb[0].mxu0 %v759_v10  ;;  %706 = vmatmul.mubr.bf16.vlgmr.msra.gmra.mrb[0].mxu1 %v760_v11 }
  0xfa   : > { %v703_v13 = vpop.f32.mrb[0].mxu0  ;;  %v707_v14 = vpop.f32.mrb[0].mxu1 }
  0xfb   : > { %v464_v15 = vmul.f32 %v703_v13, %v630_v12  ;;  %v468_v16 = vmul.f32 %v707_v14, %v630_v12  ;;  %v397_v17 = vpop.f32.mrb[1].mxu0  ;;  %v413_v18 = vpop.f32.mrb[1].mxu1 }
  0xfc   : > { %v462_v20 = vmul.f32 %v630_v12, %v397_v17  ;;  %v466_v21 = vmul.f32 %v630_v12, %v413_v18  ;;  %v704_v22 = vpop.f32.mrb[2].mxu0  ;;  %v708_v23 = vpop.f32.mrb[2].mxu1 }
  0xfd   : > { %v465_v24 = vmul.f32 %v704_v22, %v630_v12  ;;  %v469_v25 = vmul.f32 %v708_v23, %v630_v12  ;;  %v400_v26 = vpop.f32.mrb[3].mxu0  ;;  %v416_v27 = vpop.f32.mrb[3].mxu1  ;;  %v479_v30 = vadd.f32 %v631_v19, %v464_v15  ;;  %v483_v31 = vadd.f32 %v631_v19, %v468_v16 }
  0xfe   : > { %v463_v28 = vmul.f32 %v630_v12, %v400_v26  ;;  %v467_v29 = vmul.f32 %v630_v12, %v416_v27  ;;  %v477_v34 = vadd.f32 %v631_v19, %v462_v20  ;;  %v481_v35 = vadd.f32 %v631_v19, %v466_v21 }
  0xff   : > { %v480_v32 = vadd.f32 %v631_v19, %v465_v24  ;;  %v484_v33 = vadd.f32 %v631_v19, %v469_v25 }
 0x100   : > { %v478_v36 = vadd.f32 %v631_v19, %v463_v28  ;;  %v482_v37 = vadd.f32 %v631_v19, %v467_v29 }
 0x101   : > { %v658_v38 = vpack.c.bf16 %v480_v32, %v479_v30  ;;  %v668_v39 = vpack.c.bf16 %v484_v33, %v483_v31 }
 0x102   : > { %v653_v40 = vpack.c.bf16 %v478_v36, %v477_v34  ;;  %v663_v41 = vpack.c.bf16 %v482_v37, %v481_v35 }
 0x103   : > { %670 = vst [vmem:[%s244_s24 + $0x8] sm:$0xff] %v658_v38   ;;  %672 = vst [vmem:[%s244_s24 + $0x18] sm:$0xff] %v668_v39  }
 0x104   : > { %654 = vst [vmem:[%s244_s24] sm:$0xff] %v653_v40   ;;  %671 = vst [vmem:[%s244_s24 + $0x10] sm:$0xff] %v663_v41  }
 0x105 PF: > { %s14_s17 = sadd.s32 1, %s783_s17   ;;  %s891_s15 = smov %s779_s16 }
 0x106   : > { %p11_p5 = scmp.ge.s32.totalorder %s14_s17, 4   ;;  %s892_s16 = smov %s894_s18 }
 0x108   :  { %13 = sbr.rel (!%p11_p5) target bundleno = 2 (0x2), region = 77 }

// kernel: forward.27
= control target key start
LH: loop header
LB: loop body
LE: loop exit
PB: predicated region body
PF: predicated region fallthrough
CT: control target
= control target key end

     0   :  { %s1573_s0 = inlined_call_operand.vmem [shape: s32[8], index: 0, kind: input, shape index: {}]   ;;  %s1574_s2 = inlined_call_operand.vmem [shape: bf16[128,1152], index: 2, kind: input, shape index: {}]   ;;  %s1575_s3 = inlined_call_operand.vmem [shape: bf16[4,1152,128], index: 3, kind: input, shape index: {}]   ;;  %s1576_s4 = inlined_call_operand.vmem [shape: f32[4,128,1], index: 4, kind: input, shape index: {}]   ;;  %s1577_s5 = inlined_call_operand.vmem [shape: f32[1,128], index: 5, kind: input, shape index: {}]   ;;  %s1578_s6 = inlined_call_operand.vmem [shape: f32[1,128], index: 6, kind: input, shape index: {}]   ;;  %s1579_s7 = inlined_call_operand.vmem [shape: bf16[128,128], index: 7, kind: input, shape index: {}]   ;;  %s1580_s8 = inlined_call_operand.vmem [shape: bf16[128,128], index: 8, kind: output, shape index: {}]   ;;  %s1581_s1 = inlined_call_operand.vmem [shape: s32[2], index: 1, kind: input, shape index: {}]  }
   0x1   :  { %1589 = sst [smem:[#allocation17_spill]] %s1574_s2  ;;  %s13_s29 = sshll.u32 %s1573_s0, 4  ;;  %s14_s29 = int_to_ptr.vmem [resolvable:$true] %s13_s29 }
   0x2   :  { %s17_s10 = sshll.u32 %s1581_s1, 4  ;;  %s1246_s11 = scalar_lea.vmem %s14_s29, 16  ;;  %s18_s10 = int_to_ptr.vmem [resolvable:$true] %s17_s10 }
   0x3   :  { %p1247_p0 = scmp.ne.s32.totalorder %s14_s29, %s1246_s11  ;;  %p1251_p1 = scmp.lt.s32.totalorder %s14_s29, %s14_s29 }
   0x4   :  { %p1252_p2 = scmp.lt.s32.totalorder %s1246_s11, %s1246_s11 }
   0x6   :  { %p1253_p3 = por %p1252_p2, %p1251_p1 }
   0x8   :  { %p1254_p4 = pnand %p1253_p3, %p1247_p0 }
   0xa   :  { %1257 = shalt.err (!%p1254_p4)  }
   0xb   :  { %s1344_s12 = smov [#allocation4]   ;;  %s1258_s13 = scalar_lea.vmem %s18_s10, 16 }
   0xc   :  { %16 = dma.vmem_to_smem %s14_s29, 16, %s1344_s12, [#allocation3] }
   0xd   :  { %p1259_p5 = scmp.ne.s32.totalorder %s18_s10, %s1258_s13  ;;  %p1263_p6 = scmp.lt.s32.totalorder %s18_s10, %s18_s10 }
   0xe   :  { %p1264_p7 = scmp.lt.s32.totalorder %s1258_s13, %s1258_s13 }
  0x10   :  { %p1265_p8 = por %p1264_p7, %p1263_p6 }
  0x12   :  { %p1266_p9 = pnand %p1265_p8, %p1259_p5 }
  0x14   :  { %1269 = shalt.err (!%p1266_p9)  }
  0x15   :  { %s1345_s0 = smov [#allocation5]  }
  0x16   :  { %20 = dma.vmem_to_smem %s18_s10, 16, %s1345_s0, [#allocation3] }
  0x17   :  { %1306 = dma.done.wait [#allocation3], 32 }
  0x18   :  { %1307 = vsyncadd [#allocation3], 4294967264 }
  0x19   :  { %22 = sfence }
  0x1a   :  { %s1399_s1 = smov 0   ;;  %s1401_s14 = smov 0  }
  0x1b   :  { %s1403_s15 = smov 0   ;;  %s1405_s16 = smov 0  }
  0x1c   :  { %s1407_s17 = smov 0   ;;  %s1409_s18 = smov 0  }
  0x1d   :  { %s1411_s19 = smov 0   ;;  %s1413_s20 = smov 0  }
  0x1e   :  { %s1415_s21 = smov 0  }
  0x1f LB: > { %1590 = sst [smem:[#allocation8_spill]] %s1314_s14  ;;  %s40_s22 = sadd.s32 1, %s1330_s18  ;;  %s1342_s21 = sphi %s1415_s21, %s28_s21   ;;  %s1338_s20 = sphi %s1413_s20, %s1608_s20   ;;  %s1334_s19 = sphi %s1411_s19, %s1607_s19   ;;  %s1330_s18 = sphi %s1409_s18, %s1606_s18   ;;  %s1326_s17 = sphi %s1407_s17, %s1605_s17   ;;  %s1322_s16 = sphi %s1405_s16, %s1604_s16   ;;  %s1318_s15 = sphi %s1403_s15, %s1603_s15   ;;  %s1314_s14 = sphi %s1401_s14, %s1602_s14   ;;  %s1310_s1 = sphi %s1399_s1, %s1601_s1  }
  0x20   : > { %1591 = sst [smem:[#allocation9_spill]] %s1330_s18  ;;  %p41_p10 = scmp.ge.s32.totalorder %s40_s22, 4 }
  0x21   : > { %1592 = sst [smem:[#allocation10_spill]] %s1334_s19  ;;  %s43_s23 = sadd.s32 1, %s1334_s19 }
  0x22   : > { %1593 = sst [smem:[#allocation11_spill]] %s1338_s20  ;;  %p63_p11 = scmp.ne.s32.totalorder %s1314_s14, %s1310_s1 }
  0x23   : > { %1594 = sst [smem:[#allocation12_spill]] %s1342_s21  ;;  %s1610_s22 = smov (%p41_p10, %s40_s22), 0 }
  0x24   : > { %1595 = sst [smem:[#allocation13_spill]] %s1610_s22  ;;  %s1612_s23 = smov (!%p41_p10, %s43_s23), %s1334_s19 }
  0x25   : > { %p64_p12 = scmp.eq.s32.totalorder %s1342_s21, 0  ;;  %p45_p13 = scmp.ge.s32.totalorder %s1612_s23, 9 }
  0x26   : > { %s47_s24 = sadd.s32 1, %s1338_s20  ;;  %s56_s28 = sadd.s32 1, %s1314_s14 }
  0x27   : > { %p65_p0 = por %p64_p12, %p63_p11  ;;  %s1614_s23 = smov (%p45_p13, %s1612_s23), 0 }
  0x28   : > { %1596 = sst [smem:[#allocation14_spill]] %s1614_s23  ;;  %s1616_s24 = smov (!%p45_p13, %s47_s24), %s1338_s20 }
  0x29   : > { %p49_p1 = scmp.ge.s32.totalorder %s1616_s24, 2  ;;  %s52_s25 = ssub.s32 %s1334_s19, %s1614_s23 }
  0x2a   : > { %p1009_p3 = scmp.ge.s32.totalorder %s1342_s21, 72 }
  0x2b   : > { %s1618_s24 = smov (%p49_p1, %s1616_s24), 0 }
  0x2c   : > { %1597 = sst [smem:[#allocation15_spill]] %s1618_s24  ;;  %s51_s26 = ssub.s32 %s1338_s20, %s1618_s24 }
  0x2d   : > { %s53_s27 = sor.u32 %s52_s25, %s51_s26  ;;  %257 = sbr.rel (%p1009_p3) target bundleno = 67 (0x43), region = 24 }
  0x2e   : > { %p54_p2 = scmp.eq.s32.totalorder %s53_s27, 0 }
  0x30   : > { %s1464_s29 = scalar_select %p54_p2, %s1314_s14, %s56_s28  }
  0x32   : > { %1598 = sst [smem:[#allocation16_spill]] %s1464_s29 }
  0x34   : > { %260 = sbr.rel (!%p65_p0) target bundleno = 67 (0x43), region = 28  ;;  %s262_s30 = sand.u32 (%p65_p0), 1, %s1314_s14  }
  0x35   : > { %s1154_s9 = smul.u32 (%p65_p0), 72, %s1338_s20  ;;  %s1010_s10 = sshll.u32 (%p65_p0), %s262_s30, 5 }
  0x36   : > { %s1599_s2 = sld [smem:[#allocation17_spill]] (%p65_p0)  ;;  %s264_s26 = scalar_lea.vmem (%p65_p0), [#allocation6], %s1010_s10 }
  0x37   : > { %s267_s11 = sadd.s32 (%p65_p0), %s1334_s19, %s1154_s9 }
  0x38   : > { %s1013_s12 = sshll.u32 (%p65_p0), %s267_s11, 2 }
  0x3c   : > { %s269_s25 = scalar_lea.vmem %s1599_s2, %s1013_s12 }
  0x3d   : > { %v285_v0 = vld [vmem:[%s269_s25] sm:$0xf]  ;;  %v287_v1 = vld [vmem:[%s269_s25 + $0x24] sm:$0xf]  ;;  %v289_v2 = vld [vmem:[%s269_s25 + $0x48] sm:$0xf] }
  0x3e   : > { %286 = vst [vmem:[%s264_s26] sm:$0xf] %v285_v0  ;;  %288 = vst [vmem:[%s264_s26 + $0x4] sm:$0xf] %v287_v1  ;;  %v291_v3 = vld [vmem:[%s269_s25 + $0x6c] sm:$0xf] }
  0x3f   : > { %290 = vst [vmem:[%s264_s26 + $0x8] sm:$0xf] %v289_v2  ;;  %v293_v4 = vld [vmem:[%s269_s25 + $0x90] sm:$0xf]  ;;  %v295_v5 = vld [vmem:[%s269_s25 + $0xb4] sm:$0xf] }
  0x40   : > { %292 = vst [vmem:[%s264_s26 + $0xc] sm:$0xf] %v291_v3  ;;  %294 = vst [vmem:[%s264_s26 + $0x10] sm:$0xf] %v293_v4  ;;  %v297_v6 = vld [vmem:[%s269_s25 + $0xd8] sm:$0xf] }
  0x41   : > { %296 = vst [vmem:[%s264_s26 + $0x14] sm:$0xf] %v295_v5  ;;  %v299_v7 = vld [vmem:[%s269_s25 + $0xfc] sm:$0xf]  ;;  %298 = vst [vmem:[%s264_s26 + $0x18] sm:$0xf] %v297_v6 }
  0x42   : > { %300 = vst [vmem:[%s264_s26 + $0x1c] sm:$0xf] %v299_v7 }
  0x43 PF: > { %p1014_p4 = scmp.ge.s32.totalorder %s1342_s21, 1  ;;  %p385_p5 = scmp.lt.s32.totalorder %s1342_s21, 73 }
  0x45   : > { %p386_p6 = pnand %p1014_p4, %p385_p5 }
  0x46   : > { %s392_s27 = sand.u32 (!%p386_p6), 1, %s1310_s1   ;;  %s1016_s28 = sshll.u32 (!%p386_p6), %s1326_s17, 2 }
  0x47   : > { %389 = sbr.rel (%p386_p6) target bundleno = 375 (0x177), region = 81  ;;  %s1015_s30 = sshll.u32 (!%p386_p6), %s392_s27, 5 }
  0x48   : > { %s452_s9 = sadd.s32 (!%p386_p6), %s1318_s15, %s1016_s28  ;;  %s1017_s11 = sshll.u32 (!%p386_p6), %s1322_s16, 4 }
  0x49   : > { %s453_s10 = sld [smem:[#allocation4 + %s452_s9]] (!%p386_p6)  ;;  %p457_p7 = scmp.lt.s32.totalorder (!%p386_p6), %s1017_s11, 143 }
  0x4a   : > { %s469_s12 = sld [smem:[#allocation4 + %s452_s9]] (!%p386_p6)  ;;  %s1020_s13 = sshll.u32 (!%p386_p6), %s1326_s17, 3 }
  0x4b   : > { %p473_p8 = scmp.lt.s32.totalorder (!%p386_p6), %s1020_s13, 15  ;;  %p496_p9 = scmp.eq.s32.totalorder (!%p386_p6), %s1322_s16, 0 }
  0x4c   : > { %p497_p11 = scmp.eq.s32.totalorder (!%p386_p6), %s1318_s15, 0  ;;  %s1506_s2 = scalar_lea.vmem (!%p386_p6), [#allocation6], %s1015_s30 }
  0x4e   : > { %s1620_s11 = smov (!%p457_p7, %s1017_s11), 143  ;;  %s1622_s13 = smov (!%p473_p8, %s1020_s13), 15 }
  0x4f   : > { %p455_p10 = scmp.lt.s32.totalorder %s453_s10, 3  ;;  %s1024_s0 = sshll.u32 %s1622_s13, 2 }
  0x50   : > { %p471_p12 = scmp.lt.s32.totalorder %s469_s12, 3  ;;  %s1485_s27 = scalar_lea.vmem %s1579_s7, %s1024_s0 }
  0x51   : > { %s1624_s10 = smov (!%p455_p10, %s453_s10), 3  ;;  %s1490_s24 = scalar_lea.vmem %s1580_s8, %s1024_s0 }
  0x52   : > { %s1626_s12 = smov (!%p471_p12, %s469_s12), 3  ;;  %s1155_s1 = smul.u32 144, %s1624_s10 }
  0x53   : > { %s1021_s28 = sshll.u32 %s1626_s12, 4  ;;  %p498_p13 = pnand %p497_p11, %p496_p9 }
  0x54   : > { %s460_s23 = sadd.s32 %s1155_s1, %s1620_s11  ;;  %s476_s22 = sadd.s32 %s1021_s28, %s1622_s13  ;;  %v1346_v8 = vmov (!%p498_p13), 0.0  }
  0x55   : > { %s1018_s20 = sshll.u32 %s460_s23, 2  ;;  %s1022_s19 = sshll.u32 %s476_s22, 3  ;;  %502 = vst [vmem:[#allocation2] sm:$0xff] (!%p498_p13), %v1346_v8  ;;  %503 = vst [vmem:[#allocation2 + $0x8] sm:$0xff] (!%p498_p13), %v1346_v8 }
  0x56   : > { %s1495_s14 = scalar_lea.vmem %s1575_s3, %s1018_s20  ;;  %s1500_s25 = scalar_lea.vmem %s1576_s4, %s1022_s19  ;;  %504 = vst [vmem:[#allocation2 + $0x10] sm:$0xff] (!%p498_p13), %v1346_v8  ;;  %505 = vst [vmem:[#allocation2 + $0x18] sm:$0xff] (!%p498_p13), %v1346_v8 }
  0x57   : > { %501 = sbr.rel (%p498_p13) target bundleno = 94 (0x5e), region = 89  ;;  %506 = vst [vmem:[#allocation2 + $0x20] sm:$0xff] (!%p498_p13), %v1346_v8  ;;  %507 = vst [vmem:[#allocation2 + $0x28] sm:$0xff] (!%p498_p13), %v1346_v8 }
  0x58   : > { %508 = vst [vmem:[#allocation2 + $0x30] sm:$0xff] (!%p498_p13), %v1346_v8  ;;  %509 = vst [vmem:[#allocation2 + $0x38] sm:$0xff] (!%p498_p13), %v1346_v8 }
  0x5e PF: > { %s510_s18 = sld [smem:[#allocation5 + %s1326_s17]] }
  0x64   : > { %p1027_p0 = scmp.ge.s32.totalorder %s1318_s15, %s510_s18 }
  0x65   : > { %v1234_v9 = vld [vmem:[%s1495_s14] sm:$0xff] (!%p1027_p0)   ;;  %v1235_v10 = vld [vmem:[%s1495_s14 + $0x8] sm:$0xff] (!%p1027_p0)   ;;  %v1347_v11 = vmov (!%p1027_p0), 0   ;;  %v1236_v12 = vld [vmem:[%s1495_s14 + $0x10] sm:$0xff] (!%p1027_p0)  }
  0x66   : > { %514 = sbr.rel (%p1027_p0) target bundleno = 355 (0x163), region = 93  ;;  %1233 = vset.pattern.permute.xlu1 (!%p1027_p0), %v1347_v11  ;;  %1232 = vset.pattern.permute.xlu0 (!%p1027_p0), %v1347_v11  ;;  %v1237_v13 = vld [vmem:[%s1495_s14 + $0x18] sm:$0xff] (!%p1027_p0)   ;;  %v1242_v14 = vld [vmem:[%s1506_s2] sm:$0xff] (!%p1027_p0)   ;;  %v1243_v15 = vld [vmem:[%s1506_s2 + $0x10] sm:$0xff] (!%p1027_p0)  }
  0x67   : > { %1114 = vmatprep.subr.bf16.mxu0 (!%p1027_p0), %v1234_v9  ;;  %1138 = vmatprep.subr.bf16.mxu1 (!%p1027_p0), %v1234_v9  ;;  %v1238_v16 = vld [vmem:[%s1495_s14 + $0x20] sm:$0xff] (!%p1027_p0)   ;;  %v525_v17 = vld [vmem:[%s1500_s25 + $0x10] sm:$0xff] (!%p1027_p0)  ;;  %v526_v19 = vld [vmem:[%s1500_s25 + $0x18] sm:$0xff] (!%p1027_p0) }
  0x68   : > { %1115 = vmatpush3.bf16.msra.mxu0 (!%p1027_p0), %v1234_v9  ;;  %1146 = vmatpush3.bf16.msra.mxu1 (!%p1027_p0), %v1234_v9  ;;  %v523_v18 = vld [vmem:[%s1500_s25] sm:$0xff] (!%p1027_p0)  ;;  %v524_v20 = vld [vmem:[%s1500_s25 + $0x8] sm:$0xff] (!%p1027_p0)  ;;  %v1240_v24 = vld [vmem:[%s1495_s14 + $0x30] sm:$0xff] (!%p1027_p0)  }
  0x69   : > { %1116 = vmatprep.subr.bf16.mxu0 (!%p1027_p0), %v1235_v10  ;;  %1139 = vmatprep.subr.bf16.mxu1 (!%p1027_p0), %v1235_v10  ;;  %v1239_v21 = vld [vmem:[%s1495_s14 + $0x28] sm:$0xff] (!%p1027_p0)   ;;  %v527_v23 = vld [vmem:[%s1500_s25 + $0x20] sm:$0xff] (!%p1027_p0)  ;;  %v530_v25 = vld [vmem:[%s1500_s25 + $0x38] sm:$0xff] (!%p1027_p0) }
  0x6a   : > { %1130 = vmatprep.mubr.bf16.mxu0 (!%p1027_p0), %v1242_v14  ;;  %1134 = vmatprep.mubr.bf16.mxu1 (!%p1027_p0), %v1243_v15  ;;  %v528_v22 = vld [vmem:[%s1500_s25 + $0x28] sm:$0xff] (!%p1027_p0)  ;;  %v529_v26 = vld [vmem:[%s1500_s25 + $0x30] sm:$0xff] (!%p1027_p0)  ;;  %v1241_v27 = vld [vmem:[%s1495_s14 + $0x38] sm:$0xff] (!%p1027_p0)  }
  0x6b   : > { %704 = vperm.xlu1 (!%p1027_p0), %1233, %v525_v17   ;;  %694 = vperm.xlu0 (!%p1027_p0), %1232, %v523_v18   ;;  %v1244_v28 = vld [vmem:[%s1506_s2 + $0x8] sm:$0xff] (!%p1027_p0)   ;;  %v1245_v29 = vld [vmem:[%s1506_s2 + $0x18] sm:$0xff] (!%p1027_p0)   ;;  %v517_v38 = vld [vmem:[#allocation2 + $0x10] sm:$0xff] (!%p1027_p0) }
  0x6c   : > { %1117 = vmatpush3.bf16.msra.mxu0 (!%p1027_p0), %v1235_v10  ;;  %1147 = vmatpush3.bf16.msra.mxu1 (!%p1027_p0), %v1235_v10  ;;  %v521_v40 = vld [vmem:[#allocation2 + $0x30] sm:$0xff] (!%p1027_p0)  ;;  %v515_v44 = vld [vmem:[#allocation2] sm:$0xff] (!%p1027_p0)  ;;  %v518_v50 = vld [vmem:[#allocation2 + $0x18] sm:$0xff] (!%p1027_p0) }
  0x6d   : > { %1118 = vmatprep.subr.bf16.mxu0 %v1236_v12  ;;  %1140 = vmatprep.subr.bf16.mxu1 %v1236_v12  ;;  %v519_v46 = vld [vmem:[#allocation2 + $0x20] sm:$0xff]  ;;  %v522_v52 = vld [vmem:[#allocation2 + $0x38] sm:$0xff]  ;;  %v516_v58 = vld [vmem:[#allocation2 + $0x8] sm:$0xff] }
  0x6e   : > { %v520_v60 = vld [vmem:[#allocation2 + $0x28] sm:$0xff] }
  0x6f   : > { %709 = vperm.xlu1 %1233, %v526_v19   ;;  %699 = vperm.xlu0 %1232, %v524_v20  }
  0x70   : > { %1119 = vmatpush3.bf16.msra.mxu0 %v1236_v12  ;;  %1148 = vmatpush3.bf16.msra.mxu1 %v1236_v12 }
  0x71   : > { %1120 = vmatprep.subr.bf16.mxu0 %v1237_v13  ;;  %1141 = vmatprep.subr.bf16.mxu1 %v1237_v13 }
  0x73   : > { %719 = vperm.xlu1 %1233, %v528_v22   ;;  %714 = vperm.xlu0 %1232, %v527_v23  }
  0x74   : > { %1121 = vmatpush3.bf16.msra.mxu0 %v1237_v13  ;;  %1149 = vmatpush3.bf16.msra.mxu1 %v1237_v13 }
  0x75   : > { %1122 = vmatprep.subr.bf16.mxu0 %v1238_v16  ;;  %1142 = vmatprep.subr.bf16.mxu1 %v1238_v16 }
  0x77   : > { %729 = vperm.xlu1 %1233, %v530_v25   ;;  %724 = vperm.xlu0 %1232, %v529_v26  }
  0x78   : > { %1123 = vmatpush3.bf16.msra.mxu0 %v1238_v16  ;;  %1150 = vmatpush3.bf16.msra.mxu1 %v1238_v16 }
  0x79   : > { %1124 = vmatprep.subr.bf16.mxu0 %v1239_v21  ;;  %1143 = vmatprep.subr.bf16.mxu1 %v1239_v21 }
  0x7c   : > { %1125 = vmatpush3.bf16.msra.mxu0 %v1239_v21  ;;  %1151 = vmatpush3.bf16.msra.mxu1 %v1239_v21 }
  0x7d   : > { %1126 = vmatprep.subr.bf16.mxu0 %v1240_v24  ;;  %1144 = vmatprep.subr.bf16.mxu1 %v1240_v24 }
  0x80   : > { %1127 = vmatpush3.bf16.msra.mxu0 %v1240_v24  ;;  %1152 = vmatpush3.bf16.msra.mxu1 %v1240_v24 }
  0x81   : > { %1128 = vmatprep.subr.bf16.mxu0 %v1241_v27  ;;  %1145 = vmatprep.subr.bf16.mxu1 %v1241_v27 }
  0x84   : > { %1129 = vmatpush3.bf16.msra.mxu0 %v1241_v27  ;;  %1153 = vmatpush3.bf16.msra.mxu1 %v1241_v27 }
  0x87   : > { %1131 = vmatmul.mubr.bf16.vlgmr.msra.gmra.mrb[0].mxu0 %v1244_v28  ;;  %1135 = vmatmul.mubr.bf16.vlgmr.msra.gmra.mrb[0].mxu1 %v1245_v29 }
  0xea   : > { %v705_v30 = vpop.permute.xlu1 %704  ;;  %v695_v31 = vpop.permute.xlu0 %694 }
  0xee   : > { %v710_v32 = vpop.permute.xlu1 %709  ;;  %v700_v33 = vpop.permute.xlu0 %699 }
  0xf2   : > { %v720_v34 = vpop.permute.xlu1 %719  ;;  %v715_v35 = vpop.permute.xlu0 %714 }
  0xf6   : > { %v730_v36 = vpop.permute.xlu1 %729  ;;  %v725_v37 = vpop.permute.xlu0 %724 }
 0x15a   : > { %v1132_v39 = vpop.f32.mrb[0].mxu0  ;;  %v1136_v41 = vpop.f32.mrb[0].mxu1 }
 0x15b   : > { %v734_v42 = vmul.f32 %v1132_v39, %v705_v30  ;;  %v738_v43 = vmul.f32 %v1136_v41, %v725_v37  ;;  %v661_v45 = vpop.f32.mrb[1].mxu0  ;;  %v677_v47 = vpop.f32.mrb[1].mxu1 }
 0x15c   : > { %v732_v48 = vmul.f32 %v695_v31, %v661_v45  ;;  %v736_v49 = vmul.f32 %v715_v35, %v677_v47  ;;  %v1133_v51 = vpop.f32.mrb[2].mxu0  ;;  %v1137_v53 = vpop.f32.mrb[2].mxu1 }
 0x15d   : > { %v742_v54 = vadd.f32 %v734_v42, %v517_v38  ;;  %v746_v55 = vadd.f32 %v738_v43, %v521_v40  ;;  %v735_v56 = vmul.f32 %v1133_v51, %v710_v32  ;;  %v739_v57 = vmul.f32 %v1137_v53, %v730_v36  ;;  %v664_v59 = vpop.f32.mrb[3].mxu0  ;;  %v680_v61 = vpop.f32.mrb[3].mxu1 }
 0x15e   : > { %v740_v62 = vadd.f32 %v732_v48, %v515_v44  ;;  %v744_v63 = vadd.f32 %v736_v49, %v519_v46  ;;  %v733_v0 = vmul.f32 %v700_v33, %v664_v59  ;;  %v737_v1 = vmul.f32 %v720_v34, %v680_v61 }
 0x15f   : > { %750 = vst [vmem:[#allocation2 + $0x10] sm:$0xff] %v742_v54  ;;  %754 = vst [vmem:[#allocation2 + $0x30] sm:$0xff] %v746_v55  ;;  %v743_v2 = vadd.f32 %v735_v56, %v518_v50  ;;  %v747_v3 = vadd.f32 %v739_v57, %v522_v52 }
 0x160   : > { %748 = vst [vmem:[#allocation2] sm:$0xff] %v740_v62  ;;  %752 = vst [vmem:[#allocation2 + $0x20] sm:$0xff] %v744_v63  ;;  %v741_v4 = vadd.f32 %v733_v0, %v516_v58  ;;  %v745_v5 = vadd.f32 %v737_v1, %v520_v60 }
 0x161   : > { %751 = vst [vmem:[#allocation2 + $0x18] sm:$0xff] %v743_v2  ;;  %755 = vst [vmem:[#allocation2 + $0x38] sm:$0xff] %v747_v3 }
 0x162   : > { %749 = vst [vmem:[#allocation2 + $0x8] sm:$0xff] %v741_v4  ;;  %753 = vst [vmem:[#allocation2 + $0x28] sm:$0xff] %v745_v5 }
 0x163 PF: > { %p756_p1 = scmp.eq.s32.totalorder %s1322_s16, 8  ;;  %p757_p2 = scmp.eq.s32.totalorder %s1318_s15, 3 }
 0x165   : > { %p758_p3 = pnand %p757_p2, %p756_p1 }
 0x166   : > { %v1040_v8 = vld [vmem:[%s1577_s5] ss:$0 sm:$0xff] (!%p758_p3)  ;;  %v764_v13 = vld [vmem:[#allocation2 + $0x10] sm:$0xff] (!%p758_p3)  ;;  %v1096_v18 = vld [vmem:[%s1485_s27 + $0x8] sm:$0xff] (!%p758_p3)  }
 0x167   : > { %761 = sbr.rel (%p758_p3) target bundleno = 375 (0x177), region = 97  ;;  %v762_v6 = vld [vmem:[#allocation2] sm:$0xff] (!%p758_p3)  ;;  %v779_v17 = vmul.f32 (!%p758_p3), %v1040_v8, %v764_v13  ;;  %v1066_v23 = vunpack.c.l.bf16 (!%p758_p3), %v1096_v18  ;;  %v1097_v25 = vld [vmem:[%s1485_s27 + $0x10] sm:$0xff] (!%p758_p3)   ;;  %v1067_v27 = vunpack.c.h.bf16 (!%p758_p3), %v1096_v18  ;;  %v1098_v40 = vld [vmem:[%s1485_s27 + $0x18] sm:$0xff] (!%p758_p3)  }
 0x168   : > { %v777_v9 = vmul.f32 (!%p758_p3), %v1040_v8, %v762_v6  ;;  %v1041_v11 = vld [vmem:[%s1578_s6] ss:$0 sm:$0xff] (!%p758_p3)  ;;  %v765_v16 = vld [vmem:[#allocation2 + $0x18] sm:$0xff] (!%p758_p3)  ;;  %v768_v30 = vld [vmem:[#allocation2 + $0x30] sm:$0xff] (!%p758_p3)  ;;  %v1070_v34 = vunpack.c.l.bf16 (!%p758_p3), %v1097_v25  ;;  %v1071_v39 = vunpack.c.h.bf16 (!%p758_p3), %v1097_v25  ;;  %v1074_v52 = vunpack.c.l.bf16 (!%p758_p3), %v1098_v40 }
 0x169   : > { %v763_v7 = vld [vmem:[#allocation2 + $0x8] sm:$0xff] (!%p758_p3)  ;;  %v1061_v12 = vld [vmem:[%s1485_s27] sm:$0xff] (!%p758_p3)   ;;  %v780_v22 = vmul.f32 (!%p758_p3), %v1040_v8, %v765_v16  ;;  %v794_v26 = vadd.f32 (!%p758_p3), %v1041_v11, %v779_v17  ;;  %v769_v35 = vld [vmem:[#allocation2 + $0x38] sm:$0xff] (!%p758_p3)  ;;  %v783_v44 = vmul.f32 (!%p758_p3), %v1040_v8, %v768_v30  ;;  %v1075_v56 = vunpack.c.h.bf16 (!%p758_p3), %v1098_v40 }
 0x16a   : > { %v778_v10 = vmul.f32 (!%p758_p3), %v1040_v8, %v763_v7  ;;  %v1062_v14 = vunpack.c.l.bf16 (!%p758_p3), %v1061_v12  ;;  %v1063_v15 = vunpack.c.h.bf16 (!%p758_p3), %v1061_v12  ;;  %v766_v19 = vld [vmem:[#allocation2 + $0x20] sm:$0xff] (!%p758_p3)  ;;  %v792_v20 = vadd.f32 (!%p758_p3), %v1041_v11, %v777_v9  ;;  %v767_v24 = vld [vmem:[#allocation2 + $0x28] sm:$0xff] (!%p758_p3) }
 0x16b   : > { %v781_v28 = vmul.f32 (!%p758_p3), %v1040_v8, %v766_v19  ;;  %v782_v29 = vmul.f32 (!%p758_p3), %v1040_v8, %v767_v24  ;;  %v795_v33 = vadd.f32 (!%p758_p3), %v1041_v11, %v780_v22  ;;  %v818_v36 = vadd.f32 (!%p758_p3), %v1066_v23, %v794_v26 }
 0x16c   : > { %v793_v21 = vadd.f32 (!%p758_p3), %v1041_v11, %v778_v10  ;;  %v816_v31 = vadd.f32 (!%p758_p3), %v1062_v14, %v792_v20  ;;  %v784_v48 = vmul.f32 (!%p758_p3), %v1040_v8, %v769_v35  ;;  %v798_v51 = vadd.f32 (!%p758_p3), %v1041_v11, %v783_v44 }
 0x16d   : > { %v796_v37 = vadd.f32 (!%p758_p3), %v1041_v11, %v781_v28  ;;  %v797_v38 = vadd.f32 (!%p758_p3), %v1041_v11, %v782_v29  ;;  %v819_v43 = vadd.f32 (!%p758_p3), %v1067_v27, %v795_v33  ;;  %v826_v45 = vmax.f32 (!%p758_p3), %v818_v36, 0.0 }
 0x16e   : > { %v817_v32 = vadd.f32 %v1063_v15, %v793_v21  ;;  %v824_v41 = vmax.f32 %v816_v31, 0.0  ;;  %v799_v55 = vadd.f32 %v1041_v11, %v784_v48  ;;  %v822_v58 = vadd.f32 %v1074_v52, %v798_v51 }
 0x16f   : > { %v820_v46 = vadd.f32 %v1070_v34, %v796_v37  ;;  %v821_v47 = vadd.f32 %v1071_v39, %v797_v38  ;;  %v827_v50 = vmax.f32 %v819_v43, 0.0 }
 0x170   : > { %v825_v42 = vmax.f32 %v817_v32, 0.0  ;;  %v823_v60 = vadd.f32 %v1075_v56, %v799_v55  ;;  %v830_v61 = vmax.f32 %v822_v58, 0.0 }
 0x171   : > { %v828_v53 = vmax.f32 %v820_v46, 0.0  ;;  %v829_v54 = vmax.f32 %v821_v47, 0.0  ;;  %v1084_v57 = vpack.c.bf16 %v827_v50, %v826_v45 }
 0x172   : > { %v1079_v49 = vpack.c.bf16 %v825_v42, %v824_v41  ;;  %v831_v62 = vmax.f32 %v823_v60, 0.0 }
 0x173   : > { %v1089_v59 = vpack.c.bf16 %v829_v54, %v828_v53  ;;  %1099 = vst [vmem:[%s1490_s24 + $0x8] sm:$0xff] %v1084_v57  }
 0x174   : > { %1080 = vst [vmem:[%s1490_s24] sm:$0xff] %v1079_v49   ;;  %v1094_v63 = vpack.c.bf16 %v831_v62, %v830_v61 }
 0x175   : > { %1100 = vst [vmem:[%s1490_s24 + $0x10] sm:$0xff] %v1089_v59  }
 0x176   : > { %1101 = vst [vmem:[%s1490_s24 + $0x18] sm:$0xff] %v1094_v63  }
 0x177 PF: > { %s1600_s15 = sld [smem:[#allocation12_spill]]  ;;  %s1601_s1 = sld [smem:[#allocation8_spill]] }
 0x178   : > { %s1602_s14 = sld [smem:[#allocation16_spill]]  ;;  %s1604_s16 = sld [smem:[#allocation10_spill]] }
 0x179   : > { %s1605_s17 = sld [smem:[#allocation11_spill]]  ;;  %s1606_s18 = sld [smem:[#allocation13_spill]] }
 0x17a   : > { %s1607_s19 = sld [smem:[#allocation14_spill]]  ;;  %s1608_s20 = sld [smem:[#allocation15_spill]] }
 0x17d   : > { %s28_s21 = sadd.s32 1, %s1600_s15   ;;  %s1603_s15 = sld [smem:[#allocation9_spill]] }
 0x17e   : > { %p25_p4 = scmp.ge.s32.totalorder %s28_s21, 74  }
 0x180   :  { %27 = sbr.rel (!%p25_p4) target bundleno = 31 (0x1f), region = 141 }

// kernel: forward.31
= control target key start
LH: loop header
LB: loop body
LE: loop exit
PB: predicated region body
PF: predicated region fallthrough
CT: control target
= control target key end

     0   :  { %s815_s15 = smov 0   ;;  %s817_s16 = smov 0   ;;  %s942_s0 = inlined_call_operand.vmem [shape: bf16[32,1152], index: 0, kind: input, shape index: {}]   ;;  %s943_s1 = inlined_call_operand.vmem [shape: bf16[1152,256], index: 1, kind: input, shape index: {}]   ;;  %s944_s2 = inlined_call_operand.vmem [shape: f32[1,256], index: 2, kind: input, shape index: {}]   ;;  %s945_s3 = inlined_call_operand.vmem [shape: f32[1,256], index: 3, kind: input, shape index: {}]   ;;  %s946_s4 = inlined_call_operand.vmem [shape: bf16[32,256], index: 4, kind: output, shape index: {}]  }
   0x1   :  { %s819_s17 = smov 0   ;;  %s821_s18 = smov 0  }
   0x2   :  { %s823_s19 = smov 0   ;;  %s825_s20 = smov 0  }
   0x3   :  { %s827_s21 = smov 0  }
   0x4 LB: > { %s23_s22 = sadd.s32 1, %s778_s19  ;;  %s26_s23 = sadd.s32 1, %s782_s20  ;;  %s786_s21 = sphi %s827_s21, %s14_s21   ;;  %s782_s20 = sphi %s825_s20, %s952_s20   ;;  %s778_s19 = sphi %s823_s19, %s951_s19   ;;  %s774_s18 = sphi %s821_s18, %s950_s18   ;;  %s770_s17 = sphi %s819_s17, %s949_s17   ;;  %s766_s16 = sphi %s817_s16, %s948_s16   ;;  %s762_s15 = sphi %s815_s15, %s947_s15  }
   0x5   : > { %p24_p0 = scmp.ge.s32.totalorder %s23_s22, 9  ;;  %p42_p1 = scmp.ne.s32.totalorder %s766_s16, %s762_s15 }
   0x6   : > { %p43_p2 = scmp.eq.s32.totalorder %s786_s21, 0  ;;  %s35_s27 = sadd.s32 1, %s766_s16 }
   0x7   : > { %s954_s22 = smov (%p24_p0, %s23_s22), 0  ;;  %s956_s23 = smov (!%p24_p0, %s26_s23), %s782_s20 }
   0x8   : > { %p44_p3 = por %p43_p2, %p42_p1  ;;  %p28_p4 = scmp.ge.s32.totalorder %s956_s23, 2 }
   0x9   : > { %s31_s24 = ssub.s32 %s778_s19, %s954_s22  ;;  %p608_p6 = scmp.ge.s32.totalorder %s786_s21, 18 }
   0xa   : > { %s958_s23 = smov (%p28_p4, %s956_s23), 0 }
   0xb   : > { %s30_s25 = ssub.s32 %s782_s20, %s958_s23  ;;  %168 = sbr.rel (%p608_p6) target bundleno = 26 (0x1a), region = 24 }
   0xc   : > { %s32_s26 = sor.u32 %s31_s24, %s30_s25 }
   0xd   : > { %p33_p5 = scmp.eq.s32.totalorder %s32_s26, 0 }
   0xf   : > { %s866_s28 = scalar_select %p33_p5, %s766_s16, %s35_s27  }
  0x12   : > { %171 = sbr.rel (!%p44_p3) target bundleno = 26 (0x1a), region = 28  ;;  %s173_s29 = sand.u32 (%p44_p3), 1, %s766_s16  }
  0x13   : > { %s648_s30 = smul.u32 (%p44_p3), 18, %s782_s20  ;;  %s609_s5 = sshll.u32 (%p44_p3), %s173_s29, 3 }
  0x14   : > { %s175_s11 = scalar_lea.vmem (%p44_p3), [#allocation3], %s609_s5 }
  0x15   : > { %s178_s6 = sadd.s32 (%p44_p3), %s778_s19, %s648_s30 }
  0x16   : > { %s612_s7 = sshll.u32 (%p44_p3), %s178_s6, 2 }
  0x17   : > { %s180_s10 = scalar_lea.vmem (%p44_p3), %s942_s0, %s612_s7 }
  0x18   : > { %v196_v0 = vld [vmem:[%s180_s10] sm:$0xf] (%p44_p3)  ;;  %v198_v1 = vld [vmem:[%s180_s10 + $0x24] sm:$0xf] (%p44_p3) }
  0x19   : > { %197 = vst [vmem:[%s175_s11] sm:$0xf] %v196_v0  ;;  %199 = vst [vmem:[%s175_s11 + $0x4] sm:$0xf] %v198_v1 }
  0x1a PF: > { %p613_p7 = scmp.ge.s32.totalorder %s786_s21, 1  ;;  %p235_p8 = scmp.lt.s32.totalorder %s786_s21, 19 }
  0x1c   : > { %p236_p9 = pnand %p613_p7, %p235_p8 }
  0x1d   : > { %s242_s12 = sand.u32 (!%p236_p9), 1, %s762_s15   ;;  %s615_s13 = sshll.u32 (!%p236_p9), %s770_s17, 4 }
  0x1e   : > { %239 = sbr.rel (%p236_p9) target bundleno = 314 (0x13a), region = 73  ;;  %s879_s14 = sshll.u32 (!%p236_p9), %s242_s12, 3 }
  0x1f   : > { %p276_p10 = scmp.lt.s32.totalorder (!%p236_p9), %s615_s13, 143  ;;  %s618_s24 = sshll.u32 (!%p236_p9), %s774_s18, 1 }
  0x20   : > { %p283_p11 = scmp.lt.s32.totalorder (!%p236_p9), %s618_s24, 3  ;;  %s244_s7 = scalar_lea.vmem (!%p236_p9), [#allocation3], %s879_s14 }
  0x21   : > { %p621_p12 = scmp.ne.s32.totalorder (!%p236_p9), %s770_s17, 0 }
  0x25   : > { %s960_s13 = smov (!%p276_p10, %s615_s13), 143  ;;  %s962_s24 = smov (!%p283_p11, %s618_s24), 3 }
  0x26   : > { %s644_s25 = sshll.u32 %s960_s13, 3  ;;  %s645_s30 = sshll.u32 %s962_s24, 3  ;;  %v788_v2 = vmov (!%p621_p12), 0.0  }
  0x27   : > { %s885_s29 = scalar_lea.vmem %s943_s1, %s644_s25  ;;  %s890_s15 = scalar_lea.vmem %s946_s4, %s645_s30  ;;  %294 = vst [vmem:[#allocation2] sm:$0xff] (!%p621_p12), %v788_v2  ;;  %295 = vst [vmem:[#allocation2 + $0x8] sm:$0xff] (!%p621_p12), %v788_v2 }
  0x28   : > { %293 = sbr.rel (%p621_p12) target bundleno = 47 (0x2f), region = 81  ;;  %296 = vst [vmem:[#allocation2 + $0x10] sm:$0xff] (!%p621_p12), %v788_v2  ;;  %297 = vst [vmem:[#allocation2 + $0x18] sm:$0xff] (!%p621_p12), %v788_v2 }
  0x2f PF: > { %v707_v3 = vld [vmem:[%s885_s29 + $0x4] ss:$8 sps:$4 sm:$0xff]   ;;  %v709_v4 = vld [vmem:[%s885_s29] ss:$8 sps:$4 sm:$0xff]   ;;  %v789_v5 = vmov 0   ;;  %v300_v24 = vld [vmem:[#allocation2 + $0x10] sm:$0xff] }
  0x30   : > { %438 = vmatprep.mubr.bf16.mxu0 %v789_v5  ;;  %406 = vmatprep.subr.bf16.mxu0 %v707_v3  ;;  %v710_v6 = vld [vmem:[%s885_s29 + $0x14] ss:$8 sps:$4 sm:$0xff]   ;;  %v712_v7 = vld [vmem:[%s885_s29 + $0x10] ss:$8 sps:$4 sm:$0xff]   ;;  %v713_v8 = vld [vmem:[%s885_s29 + $0x24] ss:$8 sps:$4 sm:$0xff]  }
  0x31   : > { %407 = vmatpush1.bf16.msra.mxu0 %v709_v4  ;;  %v715_v9 = vld [vmem:[%s885_s29 + $0x20] ss:$8 sps:$4 sm:$0xff]   ;;  %v716_v10 = vld [vmem:[%s885_s29 + $0x34] ss:$8 sps:$4 sm:$0xff]   ;;  %v718_v11 = vld [vmem:[%s885_s29 + $0x30] ss:$8 sps:$4 sm:$0xff]  }
  0x32   : > { %408 = vmatprep.subr.bf16.mxu0 %v710_v6  ;;  %v719_v12 = vld [vmem:[%s885_s29 + $0x44] ss:$8 sps:$4 sm:$0xff]   ;;  %v721_v13 = vld [vmem:[%s885_s29 + $0x40] ss:$8 sps:$4 sm:$0xff]   ;;  %v722_v14 = vld [vmem:[%s885_s29 + $0x54] ss:$8 sps:$4 sm:$0xff]  }
  0x33   : > { %v724_v15 = vld [vmem:[%s885_s29 + $0x50] ss:$8 sps:$4 sm:$0xff]   ;;  %v725_v16 = vld [vmem:[%s885_s29 + $0x64] ss:$8 sps:$4 sm:$0xff]   ;;  %v727_v17 = vld [vmem:[%s885_s29 + $0x60] ss:$8 sps:$4 sm:$0xff]  }
  0x34   : > { %v728_v18 = vld [vmem:[%s885_s29 + $0x74] ss:$8 sps:$4 sm:$0xff]   ;;  %v730_v19 = vld [vmem:[%s885_s29 + $0x70] ss:$8 sps:$4 sm:$0xff]   ;;  %v731_v20 = vld [vmem:[%s244_s7] sm:$0xff]   ;;  %p639_p13 = scmp.ne.s32.totalorder %s770_s17, 8 }
  0x35   : > { %409 = vmatpush1.bf16.msra.mxu0 %v712_v7  ;;  %v298_v21 = vld [vmem:[#allocation2] sm:$0xff]  ;;  %v299_v22 = vld [vmem:[#allocation2 + $0x8] sm:$0xff]  ;;  %v301_v27 = vld [vmem:[#allocation2 + $0x18] sm:$0xff]  ;;  %v467_v33 = vlaneseq (!%p639_p13) }
  0x36   : > { %410 = vmatprep.subr.bf16.mxu0 %v713_v8  ;;  %v465_v35 = vld [vmem:[%s944_s2] sm:$0x3] (!%p639_p13) }
  0x37   : > { %v468_v34 = vshrl.u32 (!%p639_p13), %v467_v33, 7  ;;  %v481_v36 = vld [vmem:[%s945_s3] sm:$0x3] (!%p639_p13) }
  0x39   : > { %411 = vmatpush1.bf16.msra.mxu0 %v715_v9  ;;  %v469_v38 = vsub.s32 (!%p639_p13), 0, %v468_v34  ;;  %v473_v39 = vsub.s32 (!%p639_p13), 1, %v468_v34 }
  0x3a   : > { %412 = vmatprep.subr.bf16.mxu0 %v716_v10 }
  0x3b   : > { %v470_v43 = vrot.slane (!%p639_p13), %v465_v35, %v469_v38  ;;  %v474_v44 = vrot.slane (!%p639_p13), %v465_v35, %v473_v39  ;;  %v486_v45 = vrot.slane (!%p639_p13), %v481_v36, %v469_v38  ;;  %v490_v46 = vrot.slane (!%p639_p13), %v481_v36, %v473_v39 }
  0x3d   : > { %413 = vmatpush1.bf16.msra.mxu0 %v718_v11 }
  0x3e   : > { %414 = vmatprep.subr.bf16.mxu0 %v719_v12 }
  0x41   : > { %415 = vmatpush1.bf16.msra.mxu0 %v721_v13 }
  0x42   : > { %416 = vmatprep.subr.bf16.mxu0 %v722_v14 }
  0x45   : > { %417 = vmatpush1.bf16.msra.mxu0 %v724_v15 }
  0x46   : > { %418 = vmatprep.subr.bf16.mxu0 %v725_v16 }
  0x49   : > { %419 = vmatpush1.bf16.msra.mxu0 %v727_v17 }
  0x4a   : > { %420 = vmatprep.subr.bf16.mxu0 %v728_v18 }
  0x4d   : > { %421 = vmatpush1.bf16.msra.mxu0 %v730_v19 }
  0x50   : > { %439 = vmatmul.mubr.bf16.vlgmr.msra.gmra.mrb[0].mxu0 %v731_v20 }
 0x123   : > { %v440_v23 = vpop.f32.mrb[0].mxu0  ;;  %460 = sbr.rel (%p639_p13) target bundleno = 314 (0x13a), region = 85 }
 0x124   : > { %v449_v25 = vadd.f32 %v440_v23, %v298_v21  ;;  %v442_v26 = vpop.f32.mrb[1].mxu0 }
 0x125   : > { %v450_v28 = vadd.f32 %v442_v26, %v299_v22  ;;  %v444_v29 = vpop.f32.mrb[2].mxu0 }
 0x126   : > { %453 = vst [vmem:[#allocation2] sm:$0xff] %v449_v25  ;;  %v451_v30 = vadd.f32 %v444_v29, %v300_v24  ;;  %v446_v31 = vpop.f32.mrb[3].mxu0 }
 0x127   : > { %454 = vst [vmem:[#allocation2 + $0x8] sm:$0xff] %v450_v28  ;;  %v452_v32 = vadd.f32 %v446_v31, %v301_v27 }
 0x128   : > { %455 = vst [vmem:[#allocation2 + $0x10] sm:$0xff] %v451_v30 }
 0x129   : > { %456 = vst [vmem:[#allocation2 + $0x18] sm:$0xff] %v452_v32 }
 0x12d   : > { %v461_v37 = vld [vmem:[#allocation2] sm:$0xff] }
 0x12e   : > { %v462_v40 = vld [vmem:[#allocation2 + $0x8] sm:$0xff]  ;;  %v477_v47 = vmul.f32 %v470_v43, %v461_v37 }
 0x12f   : > { %v463_v41 = vld [vmem:[#allocation2 + $0x10] sm:$0xff]  ;;  %v478_v48 = vmul.f32 %v474_v44, %v462_v40 }
 0x130   : > { %v464_v42 = vld [vmem:[#allocation2 + $0x18] sm:$0xff]  ;;  %v479_v49 = vmul.f32 %v470_v43, %v463_v41  ;;  %v493_v51 = vadd.f32 %v486_v45, %v477_v47 }
 0x131   : > { %v480_v50 = vmul.f32 %v474_v44, %v464_v42  ;;  %v494_v52 = vadd.f32 %v490_v46, %v478_v48 }
 0x132   : > { %v495_v53 = vadd.f32 %v486_v45, %v479_v49  ;;  %v497_v55 = vmax.f32 %v493_v51, 0.0 }
 0x133   : > { %v496_v54 = vadd.f32 %v490_v46, %v480_v50  ;;  %v498_v56 = vmax.f32 %v494_v52, 0.0 }
 0x134   : > { %v499_v57 = vmax.f32 %v495_v53, 0.0 }
 0x135   : > { %v500_v58 = vmax.f32 %v496_v54, 0.0  ;;  %v646_v59 = vpack.c.bf16 %v498_v56, %v497_v55 }
 0x137   : > { %v647_v60 = vpack.c.bf16 %v500_v58, %v499_v57  ;;  %513 = vst [vmem:[%s890_s15] sm:$0xff] %v646_v59 }
 0x139   : > { %514 = vst [vmem:[%s890_s15 + $0x8] sm:$0xff] %v647_v60 }
 0x13a PF: > { %s14_s21 = sadd.s32 1, %s786_s21   ;;  %s947_s15 = smov %s766_s16 }
 0x13b   : > { %p11_p0 = scmp.ge.s32.totalorder %s14_s21, 20   ;;  %s948_s16 = smov %s866_s28 }
 0x13c   : > { %s949_s17 = smov %s778_s19  ;;  %s950_s18 = smov %s782_s20 }
 0x13d   : > { %s951_s19 = smov %s954_s22  ;;  %s952_s20 = smov %s958_s23 }
 0x13e   :  { %13 = sbr.rel (!%p11_p0) target bundleno = 4 (0x4), region = 123 }

// kernel: forward.32
= control target key start
LH: loop header
LB: loop body
LE: loop exit
PB: predicated region body
PF: predicated region fallthrough
CT: control target
= control target key end

     0   :  { %s1512_s0 = inlined_call_operand.vmem [shape: s32[8], index: 0, kind: input, shape index: {}]   ;;  %s1513_s2 = inlined_call_operand.vmem [shape: bf16[32,2304], index: 2, kind: input, shape index: {}]   ;;  %s1514_s3 = inlined_call_operand.vmem [shape: bf16[4,2304,256], index: 3, kind: input, shape index: {}]   ;;  %s1515_s4 = inlined_call_operand.vmem [shape: f32[4,32,1], index: 4, kind: input, shape index: {}]   ;;  %s1516_s5 = inlined_call_operand.vmem [shape: f32[1,256], index: 5, kind: input, shape index: {}]   ;;  %s1517_s6 = inlined_call_operand.vmem [shape: f32[1,256], index: 6, kind: input, shape index: {}]   ;;  %s1518_s7 = inlined_call_operand.vmem [shape: bf16[32,256], index: 7, kind: input, shape index: {}]   ;;  %s1519_s8 = inlined_call_operand.vmem [shape: bf16[32,256], index: 8, kind: output, shape index: {}]   ;;  %s1520_s1 = inlined_call_operand.vmem [shape: s32[2], index: 1, kind: input, shape index: {}]  }
   0x1   :  { %1528 = sst [smem:[#allocation17_spill]] %s1513_s2  ;;  %s13_s29 = sshll.u32 %s1512_s0, 4  ;;  %s14_s29 = int_to_ptr.vmem [resolvable:$true] %s13_s29 }
   0x2   :  { %s17_s10 = sshll.u32 %s1520_s1, 4  ;;  %s1172_s11 = scalar_lea.vmem %s14_s29, 16  ;;  %s18_s10 = int_to_ptr.vmem [resolvable:$true] %s17_s10 }
   0x3   :  { %p1173_p0 = scmp.ne.s32.totalorder %s14_s29, %s1172_s11  ;;  %p1177_p1 = scmp.lt.s32.totalorder %s14_s29, %s14_s29 }
   0x4   :  { %p1178_p2 = scmp.lt.s32.totalorder %s1172_s11, %s1172_s11 }
   0x6   :  { %p1179_p3 = por %p1178_p2, %p1177_p1 }
   0x8   :  { %p1180_p4 = pnand %p1179_p3, %p1173_p0 }
   0xa   :  { %1183 = shalt.err (!%p1180_p4)  }
   0xb   :  { %s1270_s12 = smov [#allocation4]   ;;  %s1184_s13 = scalar_lea.vmem %s18_s10, 16 }
   0xc   :  { %16 = dma.vmem_to_smem %s14_s29, 16, %s1270_s12, [#allocation3] }
   0xd   :  { %p1185_p5 = scmp.ne.s32.totalorder %s18_s10, %s1184_s13  ;;  %p1189_p6 = scmp.lt.s32.totalorder %s18_s10, %s18_s10 }
   0xe   :  { %p1190_p7 = scmp.lt.s32.totalorder %s1184_s13, %s1184_s13 }
  0x10   :  { %p1191_p8 = por %p1190_p7, %p1189_p6 }
  0x12   :  { %p1192_p9 = pnand %p1191_p8, %p1185_p5 }
  0x14   :  { %1195 = shalt.err (!%p1192_p9)  }
  0x15   :  { %s1271_s0 = smov [#allocation5]  }
  0x16   :  { %20 = dma.vmem_to_smem %s18_s10, 16, %s1271_s0, [#allocation3] }
  0x17   :  { %1232 = dma.done.wait [#allocation3], 32 }
  0x18   :  { %1233 = vsyncadd [#allocation3], 4294967264 }
  0x19   :  { %22 = sfence }
  0x1a   :  { %s1325_s1 = smov 0   ;;  %s1327_s14 = smov 0  }
  0x1b   :  { %s1329_s15 = smov 0   ;;  %s1331_s16 = smov 0  }
  0x1c   :  { %s1333_s17 = smov 0   ;;  %s1335_s18 = smov 0  }
  0x1d   :  { %s1337_s19 = smov 0   ;;  %s1339_s20 = smov 0  }
  0x1e   :  { %s1341_s21 = smov 0  }
  0x1f LB: > { %1529 = sst [smem:[#allocation8_spill]] %s1240_s14  ;;  %s40_s22 = sadd.s32 1, %s1256_s18  ;;  %s1268_s21 = sphi %s1341_s21, %s28_s21   ;;  %s1264_s20 = sphi %s1339_s20, %s1547_s20   ;;  %s1260_s19 = sphi %s1337_s19, %s1546_s19   ;;  %s1256_s18 = sphi %s1335_s18, %s1545_s18   ;;  %s1252_s17 = sphi %s1333_s17, %s1544_s17   ;;  %s1248_s16 = sphi %s1331_s16, %s1543_s16   ;;  %s1244_s15 = sphi %s1329_s15, %s1542_s15   ;;  %s1240_s14 = sphi %s1327_s14, %s1541_s14   ;;  %s1236_s1 = sphi %s1325_s1, %s1540_s1  }
  0x20   : > { %1530 = sst [smem:[#allocation9_spill]] %s1256_s18  ;;  %p41_p10 = scmp.ge.s32.totalorder %s40_s22, 4 }
  0x21   : > { %1531 = sst [smem:[#allocation10_spill]] %s1260_s19  ;;  %s43_s23 = sadd.s32 1, %s1260_s19 }
  0x22   : > { %1532 = sst [smem:[#allocation11_spill]] %s1264_s20  ;;  %p63_p11 = scmp.ne.s32.totalorder %s1240_s14, %s1236_s1 }
  0x23   : > { %1533 = sst [smem:[#allocation12_spill]] %s1268_s21  ;;  %s1549_s22 = smov (%p41_p10, %s40_s22), 0 }
  0x24   : > { %1534 = sst [smem:[#allocation13_spill]] %s1549_s22  ;;  %s1551_s23 = smov (!%p41_p10, %s43_s23), %s1260_s19 }
  0x25   : > { %p64_p12 = scmp.eq.s32.totalorder %s1268_s21, 0  ;;  %p45_p13 = scmp.ge.s32.totalorder %s1551_s23, 9 }
  0x26   : > { %s47_s24 = sadd.s32 1, %s1264_s20  ;;  %s56_s28 = sadd.s32 1, %s1240_s14 }
  0x27   : > { %p65_p0 = por %p64_p12, %p63_p11  ;;  %s1553_s23 = smov (%p45_p13, %s1551_s23), 0 }
  0x28   : > { %1535 = sst [smem:[#allocation14_spill]] %s1553_s23  ;;  %s1555_s24 = smov (!%p45_p13, %s47_s24), %s1264_s20 }
  0x29   : > { %p49_p1 = scmp.ge.s32.totalorder %s1555_s24, 2  ;;  %s52_s25 = ssub.s32 %s1260_s19, %s1553_s23 }
  0x2a   : > { %p977_p3 = scmp.ge.s32.totalorder %s1268_s21, 72 }
  0x2b   : > { %s1557_s24 = smov (%p49_p1, %s1555_s24), 0 }
  0x2c   : > { %1536 = sst [smem:[#allocation15_spill]] %s1557_s24  ;;  %s51_s26 = ssub.s32 %s1264_s20, %s1557_s24 }
  0x2d   : > { %s53_s27 = sor.u32 %s52_s25, %s51_s26  ;;  %257 = sbr.rel (%p977_p3) target bundleno = 63 (0x3f), region = 24 }
  0x2e   : > { %p54_p2 = scmp.eq.s32.totalorder %s53_s27, 0 }
  0x30   : > { %s1390_s29 = scalar_select %p54_p2, %s1240_s14, %s56_s28  }
  0x32   : > { %1537 = sst [smem:[#allocation16_spill]] %s1390_s29 }
  0x34   : > { %260 = sbr.rel (!%p65_p0) target bundleno = 63 (0x3f), region = 28  ;;  %s262_s30 = sand.u32 (%p65_p0), 1, %s1240_s14  }
  0x35   : > { %s980_s9 = sshll.u32 (%p65_p0), %s1260_s19, 1  ;;  %s978_s10 = sshll.u32 (%p65_p0), %s262_s30, 4 }
  0x36   : > { %s1042_s11 = smul.u32 (%p65_p0), 36, %s1264_s20  ;;  %s1538_s2 = sld [smem:[#allocation17_spill]] (%p65_p0) }
  0x37   : > { %s264_s26 = scalar_lea.vmem (%p65_p0), [#allocation6], %s978_s10 }
  0x38   : > { %s268_s12 = sadd.s32 (%p65_p0), %s1042_s11, %s980_s9 }
  0x39   : > { %s982_s13 = sshll.u32 (%p65_p0), %s268_s12, 2 }
  0x3c   : > { %s270_s25 = scalar_lea.vmem %s1538_s2, %s982_s13 }
  0x3d   : > { %v300_v0 = vld [vmem:[%s270_s25] sm:$0xff]  ;;  %v302_v1 = vld [vmem:[%s270_s25 + $0x48] sm:$0xff] }
  0x3e   : > { %301 = vst [vmem:[%s264_s26] sm:$0xff] %v300_v0  ;;  %303 = vst [vmem:[%s264_s26 + $0x8] sm:$0xff] %v302_v1 }
  0x3f PF: > { %p983_p4 = scmp.ge.s32.totalorder %s1268_s21, 1  ;;  %p357_p5 = scmp.lt.s32.totalorder %s1268_s21, 73 }
  0x41   : > { %p358_p6 = pnand %p983_p4, %p357_p5 }
  0x42   : > { %s364_s24 = sand.u32 (!%p358_p6), 1, %s1236_s1   ;;  %s985_s27 = sshll.u32 (!%p358_p6), %s1252_s17, 2 }
  0x43   : > { %361 = sbr.rel (%p358_p6) target bundleno = 406 (0x196), region = 78  ;;  %s1403_s28 = sshll.u32 (!%p358_p6), %s364_s24, 4 }
  0x44   : > { %s428_s30 = sadd.s32 (!%p358_p6), %s1244_s15, %s985_s27  ;;  %s986_s10 = sshll.u32 (!%p358_p6), %s1248_s16, 5 }
  0x45   : > { %s429_s9 = sld [smem:[#allocation4 + %s428_s30]] (!%p358_p6)  ;;  %p433_p7 = scmp.lt.s32.totalorder (!%p358_p6), %s986_s10, 287 }
  0x46   : > { %s446_s11 = sld [smem:[#allocation4 + %s428_s30]] (!%p358_p6)  ;;  %s990_s12 = sshll.u32 (!%p358_p6), %s1252_s17, 1 }
  0x47   : > { %p450_p8 = scmp.lt.s32.totalorder (!%p358_p6), %s990_s12, 3  ;;  %p474_p9 = scmp.eq.s32.totalorder (!%p358_p6), %s1248_s16, 0 }
  0x48   : > { %p475_p12 = scmp.eq.s32.totalorder (!%p358_p6), %s1244_s15, 0  ;;  %s366_s2 = scalar_lea.vmem (!%p358_p6), [#allocation6], %s1403_s28 }
  0x4a   : > { %s1559_s10 = smov (!%p433_p7, %s986_s10), 287  ;;  %s1561_s12 = smov (!%p450_p8, %s990_s12), 3 }
  0x4b   : > { %p431_p10 = scmp.lt.s32.totalorder %s429_s9, 3  ;;  %s987_s13 = sshll.u32 %s1559_s10, 1 }
  0x4c   : > { %p448_p11 = scmp.lt.s32.totalorder %s446_s11, 3  ;;  %s1038_s1 = sshll.u32 %s1561_s12, 3 }
  0x4d   : > { %s1563_s9 = smov (!%p431_p10, %s429_s9), 3  ;;  %s1412_s24 = scalar_lea.vmem %s1518_s7, %s1038_s1 }
  0x4e   : > { %s1565_s11 = smov (!%p448_p11, %s446_s11), 3  ;;  %s1043_s0 = smul.u32 576, %s1563_s9 }
  0x4f   : > { %s991_s27 = sshll.u32 %s1565_s11, 2  ;;  %s1417_s23 = scalar_lea.vmem %s1519_s8, %s1038_s1 }
  0x50   : > { %s437_s22 = sadd.s32 %s1043_s0, %s987_s13  ;;  %s453_s10 = sadd.s32 %s991_s27, %s1561_s12 }
  0x51   : > { %s988_s20 = sshll.u32 %s437_s22, 2  ;;  %s992_s19 = sshll.u32 %s453_s10, 3 }
  0x52   : > { %s1422_s14 = scalar_lea.vmem %s1514_s3, %s988_s20  ;;  %s1427_s25 = scalar_lea.vmem %s1515_s4, %s992_s19 }
  0x53   : > { %p476_p13 = pnand %p475_p12, %p474_p9 }
  0x54   : > { %v1272_v2 = vmov (!%p476_p13), 0.0  }
  0x55   : > { %479 = sbr.rel (%p476_p13) target bundleno = 92 (0x5c), region = 86  ;;  %480 = vst [vmem:[#allocation2] sm:$0xff] (!%p476_p13), %v1272_v2  ;;  %481 = vst [vmem:[#allocation2 + $0x8] sm:$0xff] (!%p476_p13), %v1272_v2 }
  0x56   : > { %482 = vst [vmem:[#allocation2 + $0x10] sm:$0xff] (!%p476_p13), %v1272_v2  ;;  %483 = vst [vmem:[#allocation2 + $0x18] sm:$0xff] (!%p476_p13), %v1272_v2 }
  0x5c PF: > { %s484_s18 = sld [smem:[#allocation5 + %s1252_s17]] }
  0x62   : > { %p999_p0 = scmp.ge.s32.totalorder %s1244_s15, %s484_s18 }
  0x63   : > { %v1121_v3 = vld [vmem:[%s1422_s14 + $0x4] ss:$8 sps:$4 sm:$0xff] (!%p999_p0)   ;;  %v1123_v4 = vld [vmem:[%s1422_s14] ss:$8 sps:$4 sm:$0xff] (!%p999_p0)   ;;  %v1273_v5 = vmov (!%p999_p0), 0   ;;  %v491_v48 = vld [vmem:[#allocation2 + $0x10] sm:$0xff] (!%p999_p0) }
  0x64   : > { %488 = sbr.rel (%p999_p0) target bundleno = 384 (0x180), region = 90  ;;  %1120 = vset.pattern.permute.xlu0 (!%p999_p0), %v1273_v5  ;;  %699 = vmatprep.subr.bf16.mxu0 (!%p999_p0), %v1121_v3  ;;  %v1124_v6 = vld [vmem:[%s1422_s14 + $0x14] ss:$8 sps:$4 sm:$0xff] (!%p999_p0)   ;;  %v1126_v7 = vld [vmem:[%s1422_s14 + $0x10] ss:$8 sps:$4 sm:$0xff] (!%p999_p0)   ;;  %v493_v18 = vld [vmem:[%s1427_s25] sm:$0xff] (!%p999_p0) }
  0x65   : > { %700 = vmatpush1.bf16.msra.mxu0 (!%p999_p0), %v1123_v4  ;;  %v1127_v8 = vld [vmem:[%s1422_s14 + $0x24] ss:$8 sps:$4 sm:$0xff] (!%p999_p0)   ;;  %v1129_v9 = vld [vmem:[%s1422_s14 + $0x20] ss:$8 sps:$4 sm:$0xff] (!%p999_p0)   ;;  %v1130_v10 = vld [vmem:[%s1422_s14 + $0x34] ss:$8 sps:$4 sm:$0xff] (!%p999_p0)   ;;  %744 = vperm.xlu0 (!%p999_p0), %1120, %v493_v18  }
  0x66   : > { %701 = vmatprep.subr.bf16.mxu0 (!%p999_p0), %v1124_v6  ;;  %v1132_v11 = vld [vmem:[%s1422_s14 + $0x30] ss:$8 sps:$4 sm:$0xff] (!%p999_p0)   ;;  %v1133_v12 = vld [vmem:[%s1422_s14 + $0x44] ss:$8 sps:$4 sm:$0xff] (!%p999_p0)   ;;  %v1135_v13 = vld [vmem:[%s1422_s14 + $0x40] ss:$8 sps:$4 sm:$0xff] (!%p999_p0)  }
  0x67   : > { %v1136_v14 = vld [vmem:[%s1422_s14 + $0x54] ss:$8 sps:$4 sm:$0xff] (!%p999_p0)   ;;  %v1138_v15 = vld [vmem:[%s1422_s14 + $0x50] ss:$8 sps:$4 sm:$0xff] (!%p999_p0)   ;;  %v1139_v16 = vld [vmem:[%s1422_s14 + $0x64] ss:$8 sps:$4 sm:$0xff] (!%p999_p0)  }
  0x68   : > { %v1171_v17 = vld [vmem:[%s366_s2 + $0x4] ss:$8 sps:$4 sm:$0xff] (!%p999_p0)   ;;  %v1141_v19 = vld [vmem:[%s1422_s14 + $0x60] ss:$8 sps:$4 sm:$0xff] (!%p999_p0)   ;;  %v1144_v22 = vld [vmem:[%s1422_s14 + $0x70] ss:$8 sps:$4 sm:$0xff] (!%p999_p0)  }
  0x69   : > { %702 = vmatpush1.bf16.msra.mxu0 (!%p999_p0), %v1126_v7  ;;  %v1142_v20 = vld [vmem:[%s1422_s14 + $0x74] ss:$8 sps:$4 sm:$0xff] (!%p999_p0)   ;;  %731 = vmatprep.mubr.bf16.mxu0 (!%p999_p0), %v1171_v17  ;;  %v494_v21 = vld [vmem:[%s1427_s25 + $0x8] sm:$0xff] (!%p999_p0)  ;;  %v1150_v26 = vld [vmem:[%s1422_s14 + $0x90] ss:$8 sps:$4 sm:$0xff] (!%p999_p0)  }
  0x6a   : > { %703 = vmatprep.subr.bf16.mxu0 (!%p999_p0), %v1127_v8  ;;  %749 = vperm.xlu0 (!%p999_p0), %1120, %v494_v21   ;;  %v1145_v23 = vld [vmem:[%s1422_s14 + $0x84] ss:$8 sps:$4 sm:$0xff] (!%p999_p0)   ;;  %v1147_v24 = vld [vmem:[%s1422_s14 + $0x80] ss:$8 sps:$4 sm:$0xff] (!%p999_p0)   ;;  %v1148_v25 = vld [vmem:[%s1422_s14 + $0x94] ss:$8 sps:$4 sm:$0xff] (!%p999_p0)  }
  0x6b   : > { %v1151_v27 = vld [vmem:[%s1422_s14 + $0xa4] ss:$8 sps:$4 sm:$0xff]   ;;  %v1153_v28 = vld [vmem:[%s1422_s14 + $0xa0] ss:$8 sps:$4 sm:$0xff]   ;;  %v1154_v29 = vld [vmem:[%s1422_s14 + $0xb4] ss:$8 sps:$4 sm:$0xff]  }
  0x6c   : > { %v1156_v30 = vld [vmem:[%s1422_s14 + $0xb0] ss:$8 sps:$4 sm:$0xff]   ;;  %v1157_v31 = vld [vmem:[%s1422_s14 + $0xc4] ss:$8 sps:$4 sm:$0xff]   ;;  %v1159_v32 = vld [vmem:[%s1422_s14 + $0xc0] ss:$8 sps:$4 sm:$0xff]  }
  0x6d   : > { %704 = vmatpush1.bf16.msra.mxu0 %v1129_v9  ;;  %v1160_v33 = vld [vmem:[%s1422_s14 + $0xd4] ss:$8 sps:$4 sm:$0xff]   ;;  %v1162_v34 = vld [vmem:[%s1422_s14 + $0xd0] ss:$8 sps:$4 sm:$0xff]   ;;  %v1163_v35 = vld [vmem:[%s1422_s14 + $0xe4] ss:$8 sps:$4 sm:$0xff]  }
  0x6e   : > { %705 = vmatprep.subr.bf16.mxu0 %v1130_v10  ;;  %v1165_v36 = vld [vmem:[%s1422_s14 + $0xe0] ss:$8 sps:$4 sm:$0xff]   ;;  %v1166_v37 = vld [vmem:[%s1422_s14 + $0xf4] ss:$8 sps:$4 sm:$0xff]   ;;  %v1168_v38 = vld [vmem:[%s1422_s14 + $0xf0] ss:$8 sps:$4 sm:$0xff]  }
  0x6f   : > { %v1169_v39 = vld [vmem:[%s366_s2] ss:$8 sps:$4 sm:$0xff]  }
  0x70   : > { %v489_v41 = vld [vmem:[#allocation2] sm:$0xff]  ;;  %v490_v44 = vld [vmem:[#allocation2 + $0x8] sm:$0xff]  ;;  %v492_v52 = vld [vmem:[#allocation2 + $0x18] sm:$0xff] }
  0x71   : > { %706 = vmatpush1.bf16.msra.mxu0 %v1132_v11 }
  0x72   : > { %707 = vmatprep.subr.bf16.mxu0 %v1133_v12 }
  0x75   : > { %708 = vmatpush1.bf16.msra.mxu0 %v1135_v13 }
  0x76   : > { %709 = vmatprep.subr.bf16.mxu0 %v1136_v14 }
  0x79   : > { %710 = vmatpush1.bf16.msra.mxu0 %v1138_v15 }
  0x7a   : > { %711 = vmatprep.subr.bf16.mxu0 %v1139_v16 }
  0x7d   : > { %712 = vmatpush1.bf16.msra.mxu0 %v1141_v19 }
  0x7e   : > { %713 = vmatprep.subr.bf16.mxu0 %v1142_v20 }
  0x81   : > { %714 = vmatpush1.bf16.msra.mxu0 %v1144_v22 }
  0x82   : > { %715 = vmatprep.subr.bf16.mxu0 %v1145_v23 }
  0x85   : > { %716 = vmatpush1.bf16.msra.mxu0 %v1147_v24 }
  0x86   : > { %717 = vmatprep.subr.bf16.mxu0 %v1148_v25 }
  0x89   : > { %718 = vmatpush1.bf16.msra.mxu0 %v1150_v26 }
  0x8a   : > { %719 = vmatprep.subr.bf16.mxu0 %v1151_v27 }
  0x8d   : > { %720 = vmatpush1.bf16.msra.mxu0 %v1153_v28 }
  0x8e   : > { %721 = vmatprep.subr.bf16.mxu0 %v1154_v29 }
  0x91   : > { %722 = vmatpush1.bf16.msra.mxu0 %v1156_v30 }
  0x92   : > { %723 = vmatprep.subr.bf16.mxu0 %v1157_v31 }
  0x95   : > { %724 = vmatpush1.bf16.msra.mxu0 %v1159_v32 }
  0x96   : > { %725 = vmatprep.subr.bf16.mxu0 %v1160_v33 }
  0x99   : > { %726 = vmatpush1.bf16.msra.mxu0 %v1162_v34 }
  0x9a   : > { %727 = vmatprep.subr.bf16.mxu0 %v1163_v35 }
  0x9d   : > { %728 = vmatpush1.bf16.msra.mxu0 %v1165_v36 }
  0x9e   : > { %729 = vmatprep.subr.bf16.mxu0 %v1166_v37 }
  0xa1   : > { %730 = vmatpush1.bf16.msra.mxu0 %v1168_v38 }
  0xa4   : > { %732 = vmatmul.mubr.bf16.vlgmr.msra.gmra.mrb[0].mxu0 %v1169_v39 }
  0xe4   : > { %v745_v40 = vpop.permute.xlu0 %744 }
  0xe9   : > { %v750_v46 = vpop.permute.xlu0 %749 }
 0x177   : > { %v733_v42 = vpop.f32.mrb[0].mxu0 }
 0x178   : > { %v752_v43 = vmul.f32 %v745_v40, %v733_v42  ;;  %v735_v45 = vpop.f32.mrb[1].mxu0 }
 0x179   : > { %v753_v47 = vmul.f32 %v745_v40, %v735_v45  ;;  %v737_v49 = vpop.f32.mrb[2].mxu0 }
 0x17a   : > { %v756_v50 = vadd.f32 %v752_v43, %v489_v41  ;;  %v754_v51 = vmul.f32 %v750_v46, %v737_v49  ;;  %v739_v53 = vpop.f32.mrb[3].mxu0 }
 0x17b   : > { %v757_v54 = vadd.f32 %v753_v47, %v490_v44  ;;  %v755_v55 = vmul.f32 %v750_v46, %v739_v53 }
 0x17c   : > { %760 = vst [vmem:[#allocation2] sm:$0xff] %v756_v50  ;;  %v758_v56 = vadd.f32 %v754_v51, %v491_v48 }
 0x17d   : > { %761 = vst [vmem:[#allocation2 + $0x8] sm:$0xff] %v757_v54  ;;  %v759_v57 = vadd.f32 %v755_v55, %v492_v52 }
 0x17e   : > { %762 = vst [vmem:[#allocation2 + $0x10] sm:$0xff] %v758_v56 }
 0x17f   : > { %763 = vst [vmem:[#allocation2 + $0x18] sm:$0xff] %v759_v57 }
 0x180 PF: > { %p764_p1 = scmp.eq.s32.totalorder %s1248_s16, 8  ;;  %p765_p2 = scmp.eq.s32.totalorder %s1244_s15, 3 }
 0x182   : > { %p766_p3 = pnand %p765_p2, %p764_p1 }
 0x183   : > { %v776_v58 = vlaneseq (!%p766_p3)  ;;  %v774_v60 = vld [vmem:[%s1516_s5] sm:$0x3] (!%p766_p3)  ;;  %v807_v2 = vld [vmem:[%s1412_s24 + $0x8] sm:$0xff] (!%p766_p3) }
 0x184   : > { %769 = sbr.rel (%p766_p3) target bundleno = 406 (0x196), region = 94  ;;  %v790_v61 = vld [vmem:[%s1517_s6] sm:$0x3] (!%p766_p3)  ;;  %v771_v3 = vld [vmem:[#allocation2 + $0x8] sm:$0xff] (!%p766_p3)  ;;  %v810_v12 = vunpack.c.l.bf16 (!%p766_p3), %v807_v2  ;;  %v811_v13 = vunpack.c.h.bf16 (!%p766_p3), %v807_v2 }
 0x185   : > { %v777_v59 = vshrl.u32 (!%p766_p3), %v776_v58, 7  ;;  %v770_v62 = vld [vmem:[#allocation2] sm:$0xff] (!%p766_p3)  ;;  %v772_v4 = vld [vmem:[#allocation2 + $0x10] sm:$0xff] (!%p766_p3) }
 0x186   : > { %v806_v1 = vld [vmem:[%s1412_s24] sm:$0xff] (!%p766_p3)  ;;  %v773_v5 = vld [vmem:[#allocation2 + $0x18] sm:$0xff] (!%p766_p3) }
 0x187   : > { %v778_v63 = vsub.s32 (!%p766_p3), 0, %v777_v59  ;;  %v782_v0 = vsub.s32 (!%p766_p3), 1, %v777_v59  ;;  %v808_v10 = vunpack.c.l.bf16 (!%p766_p3), %v806_v1  ;;  %v809_v11 = vunpack.c.h.bf16 (!%p766_p3), %v806_v1 }
 0x189   : > { %v779_v6 = vrot.slane (!%p766_p3), %v774_v60, %v778_v63  ;;  %v783_v7 = vrot.slane (!%p766_p3), %v774_v60, %v782_v0  ;;  %v795_v8 = vrot.slane (!%p766_p3), %v790_v61, %v778_v63  ;;  %v799_v9 = vrot.slane (!%p766_p3), %v790_v61, %v782_v0 }
 0x18b   : > { %v786_v14 = vmul.f32 %v779_v6, %v770_v62  ;;  %v787_v15 = vmul.f32 %v783_v7, %v771_v3  ;;  %v788_v16 = vmul.f32 %v779_v6, %v772_v4  ;;  %v789_v17 = vmul.f32 %v783_v7, %v773_v5 }
 0x18d   : > { %v802_v18 = vadd.f32 %v795_v8, %v786_v14  ;;  %v803_v19 = vadd.f32 %v799_v9, %v787_v15  ;;  %v804_v20 = vadd.f32 %v795_v8, %v788_v16  ;;  %v805_v21 = vadd.f32 %v799_v9, %v789_v17 }
 0x18f   : > { %v812_v22 = vadd.f32 %v808_v10, %v802_v18  ;;  %v813_v23 = vadd.f32 %v809_v11, %v803_v19  ;;  %v814_v24 = vadd.f32 %v810_v12, %v804_v20  ;;  %v815_v25 = vadd.f32 %v811_v13, %v805_v21 }
 0x191   : > { %v816_v26 = vmax.f32 %v812_v22, 0.0  ;;  %v817_v27 = vmax.f32 %v813_v23, 0.0  ;;  %v818_v28 = vmax.f32 %v814_v24, 0.0  ;;  %v819_v29 = vmax.f32 %v815_v25, 0.0 }
 0x193   : > { %v1040_v30 = vpack.c.bf16 %v817_v27, %v816_v26  ;;  %v1041_v31 = vpack.c.bf16 %v819_v29, %v818_v28 }
 0x195   : > { %832 = vst [vmem:[%s1417_s23] sm:$0xff] %v1040_v30  ;;  %833 = vst [vmem:[%s1417_s23 + $0x8] sm:$0xff] %v1041_v31 }
 0x196 PF: > { %s1539_s15 = sld [smem:[#allocation12_spill]]  ;;  %s1540_s1 = sld [smem:[#allocation8_spill]] }
 0x197   : > { %s1541_s14 = sld [smem:[#allocation16_spill]]  ;;  %s1543_s16 = sld [smem:[#allocation10_spill]] }
 0x198   : > { %s1544_s17 = sld [smem:[#allocation11_spill]]  ;;  %s1545_s18 = sld [smem:[#allocation13_spill]] }
 0x199   : > { %s1546_s19 = sld [smem:[#allocation14_spill]]  ;;  %s1547_s20 = sld [smem:[#allocation15_spill]] }
 0x19c   : > { %s28_s21 = sadd.s32 1, %s1539_s15   ;;  %s1542_s15 = sld [smem:[#allocation9_spill]] }
 0x19d   : > { %p25_p4 = scmp.ge.s32.totalorder %s28_s21, 74  }
 0x19f   :  { %27 = sbr.rel (!%p25_p4) target bundleno = 31 (0x1f), region = 138 }

// kernel: forward.30
= control target key start
LH: loop header
LB: loop body
LE: loop exit
PB: predicated region body
PF: predicated region fallthrough
CT: control target
= control target key end

     0   :  { %s692_s15 = smov 0   ;;  %s694_s16 = smov 0   ;;  %s783_s0 = inlined_call_operand.vmem [shape: bf16[32,128], index: 0, kind: input, shape index: {}]   ;;  %s784_s1 = inlined_call_operand.vmem [shape: bf16[128,256], index: 1, kind: input, shape index: {}]   ;;  %s785_s2 = inlined_call_operand.vmem [shape: f32[1,256], index: 2, kind: input, shape index: {}]   ;;  %s786_s3 = inlined_call_operand.vmem [shape: f32[1,256], index: 3, kind: input, shape index: {}]   ;;  %s787_s4 = inlined_call_operand.vmem [shape: bf16[32,256], index: 4, kind: output, shape index: {}]  }
   0x1   :  { %s696_s17 = smov 0  }
   0x2 LB: > { %s26_s18 = sadd.s32 1, %s660_s16  ;;  %p562_p0 = scmp.ge.s32.totalorder %s664_s17, 1  ;;  %s664_s17 = sphi %s696_s17, %s14_s17   ;;  %s660_s16 = sphi %s694_s16, %s789_s16   ;;  %s656_s15 = sphi %s692_s15, %s788_s15  }
   0x3   : > { %p28_p1 = scmp.ge.s32.totalorder %s26_s18, 2  ;;  %p192_p2 = scmp.lt.s32.totalorder %s664_s17, 3 }
   0x5   : > { %s791_s18 = smov (%p28_p1, %s26_s18), 0  ;;  %p193_p3 = pnand %p562_p0, %p192_p2 }
   0x6   : > { %v617_v0 = vld [vmem:[%s784_s1 + $0x4] ss:$8 sps:$4 sm:$0xff] (!%p193_p3)   ;;  %s563_s21 = sshll.u32 (!%p193_p3), %s656_s15, 1  ;;  %v619_v1 = vld [vmem:[%s784_s1] ss:$8 sps:$4 sm:$0xff] (!%p193_p3)   ;;  %v666_v2 = vmov (!%p193_p3), 0   ;;  %v428_v18 = vlaneseq (!%p193_p3) }
   0x7   : > { %196 = sbr.rel (%p193_p3) target bundleno = 261 (0x105), region = 36  ;;  %400 = vmatprep.mubr.bf16.mxu0 (!%p193_p3), %v666_v2  ;;  %p229_p4 = scmp.lt.s32.totalorder (!%p193_p3), %s563_s21, 3  ;;  %368 = vmatprep.subr.bf16.mxu0 (!%p193_p3), %v617_v0  ;;  %v620_v3 = vld [vmem:[%s784_s1 + $0x14] ss:$8 sps:$4 sm:$0xff] (!%p193_p3)   ;;  %v622_v4 = vld [vmem:[%s784_s1 + $0x10] ss:$8 sps:$4 sm:$0xff] (!%p193_p3)  }
   0x8   : > { %369 = vmatpush1.bf16.msra.mxu0 (!%p193_p3), %v619_v1  ;;  %v623_v5 = vld [vmem:[%s784_s1 + $0x24] ss:$8 sps:$4 sm:$0xff] (!%p193_p3)   ;;  %v625_v6 = vld [vmem:[%s784_s1 + $0x20] ss:$8 sps:$4 sm:$0xff] (!%p193_p3)   ;;  %v626_v7 = vld [vmem:[%s784_s1 + $0x34] ss:$8 sps:$4 sm:$0xff] (!%p193_p3)  }
   0x9   : > { %370 = vmatprep.subr.bf16.mxu0 (!%p193_p3), %v620_v3  ;;  %v628_v8 = vld [vmem:[%s784_s1 + $0x30] ss:$8 sps:$4 sm:$0xff] (!%p193_p3)   ;;  %v629_v9 = vld [vmem:[%s784_s1 + $0x44] ss:$8 sps:$4 sm:$0xff] (!%p193_p3)   ;;  %v631_v10 = vld [vmem:[%s784_s1 + $0x40] ss:$8 sps:$4 sm:$0xff] (!%p193_p3)  }
   0xa   : > { %v632_v11 = vld [vmem:[%s784_s1 + $0x54] ss:$8 sps:$4 sm:$0xff] (!%p193_p3)   ;;  %v634_v12 = vld [vmem:[%s784_s1 + $0x50] ss:$8 sps:$4 sm:$0xff] (!%p193_p3)   ;;  %v635_v13 = vld [vmem:[%s784_s1 + $0x64] ss:$8 sps:$4 sm:$0xff] (!%p193_p3)  }
   0xb   : > { %v637_v14 = vld [vmem:[%s784_s1 + $0x60] ss:$8 sps:$4 sm:$0xff] (!%p193_p3)   ;;  %v638_v15 = vld [vmem:[%s784_s1 + $0x74] ss:$8 sps:$4 sm:$0xff] (!%p193_p3)   ;;  %v640_v16 = vld [vmem:[%s784_s1 + $0x70] ss:$8 sps:$4 sm:$0xff] (!%p193_p3)  }
   0xc   : > { %371 = vmatpush1.bf16.msra.mxu0 (!%p193_p3), %v622_v4  ;;  %v429_v19 = vshrl.u32 (!%p193_p3), %v428_v18, 7  ;;  %v426_v21 = vld [vmem:[%s785_s2] sm:$0x3] (!%p193_p3) }
   0xd   : > { %372 = vmatprep.subr.bf16.mxu0 (!%p193_p3), %v623_v5  ;;  %v442_v23 = vld [vmem:[%s786_s3] sm:$0x3] (!%p193_p3) }
   0xe   : > { %s793_s21 = smov (!%p229_p4, %s563_s21), 3  ;;  %v430_v20 = vsub.s32 0, %v429_v19  ;;  %v434_v22 = vsub.s32 1, %v429_v19 }
   0xf   : > { %s564_s30 = sshll.u32 %s793_s21, 2 }
  0x10   : > { %s235_s11 = scalar_lea.vmem %s783_s0, %s564_s30  ;;  %373 = vmatpush1.bf16.msra.mxu0 %v625_v6  ;;  %v431_v24 = vrot.slane %v426_v21, %v430_v20  ;;  %v435_v25 = vrot.slane %v426_v21, %v434_v22  ;;  %v447_v26 = vrot.slane %v442_v23, %v430_v20  ;;  %v451_v28 = vrot.slane %v442_v23, %v434_v22 }
  0x11   : > { %374 = vmatprep.subr.bf16.mxu0 %v626_v7  ;;  %v641_v17 = vld [vmem:[%s235_s11] sm:$0xff]   ;;  %s589_s11 = sshll.u32 %s793_s21, 3 }
  0x12   : > { %s249_s15 = scalar_lea.vmem %s787_s4, %s589_s11 }
  0x14   : > { %375 = vmatpush1.bf16.msra.mxu0 %v628_v8 }
  0x15   : > { %376 = vmatprep.subr.bf16.mxu0 %v629_v9 }
  0x18   : > { %377 = vmatpush1.bf16.msra.mxu0 %v631_v10 }
  0x19   : > { %378 = vmatprep.subr.bf16.mxu0 %v632_v11 }
  0x1c   : > { %379 = vmatpush1.bf16.msra.mxu0 %v634_v12 }
  0x1d   : > { %380 = vmatprep.subr.bf16.mxu0 %v635_v13 }
  0x20   : > { %381 = vmatpush1.bf16.msra.mxu0 %v637_v14 }
  0x21   : > { %382 = vmatprep.subr.bf16.mxu0 %v638_v15 }
  0x24   : > { %383 = vmatpush1.bf16.msra.mxu0 %v640_v16 }
  0x27   : > { %401 = vmatmul.mubr.bf16.vlgmr.msra.gmra.mrb[0].mxu0 %v641_v17 }
  0xfa   : > { %v402_v27 = vpop.f32.mrb[0].mxu0 }
  0xfb   : > { %v438_v29 = vmul.f32 %v431_v24, %v402_v27  ;;  %v404_v30 = vpop.f32.mrb[1].mxu0 }
  0xfc   : > { %v439_v31 = vmul.f32 %v435_v25, %v404_v30  ;;  %v406_v32 = vpop.f32.mrb[2].mxu0 }
  0xfd   : > { %v454_v33 = vadd.f32 %v447_v26, %v438_v29  ;;  %v440_v34 = vmul.f32 %v431_v24, %v406_v32  ;;  %v408_v35 = vpop.f32.mrb[3].mxu0 }
  0xfe   : > { %v455_v36 = vadd.f32 %v451_v28, %v439_v31  ;;  %v441_v37 = vmul.f32 %v435_v25, %v408_v35 }
  0xff   : > { %v456_v38 = vadd.f32 %v447_v26, %v440_v34 }
 0x100   : > { %v590_v39 = vpack.c.bf16 %v455_v36, %v454_v33  ;;  %v457_v40 = vadd.f32 %v451_v28, %v441_v37 }
 0x102   : > { %470 = vst [vmem:[%s249_s15] sm:$0xff] %v590_v39  ;;  %v591_v41 = vpack.c.bf16 %v457_v40, %v456_v38 }
 0x104   : > { %471 = vst [vmem:[%s249_s15 + $0x8] sm:$0xff] %v591_v41 }
 0x105 PF: > { %s14_s17 = sadd.s32 1, %s664_s17   ;;  %s788_s15 = smov %s660_s16 }
 0x106   : > { %p11_p5 = scmp.ge.s32.totalorder %s14_s17, 4   ;;  %s789_s16 = smov %s791_s18 }
 0x108   :  { %13 = sbr.rel (!%p11_p5) target bundleno = 2 (0x2), region = 77 }

// kernel: forward.33
= control target key start
LH: loop header
LB: loop body
LE: loop exit
PB: predicated region body
PF: predicated region fallthrough
CT: control target
= control target key end

     0   :  { %s952_s15 = smov 0   ;;  %s954_s16 = smov 0   ;;  %s1097_s0 = inlined_call_operand.vmem [shape: bf16[32,2304], index: 0, kind: input, shape index: {}]   ;;  %s1098_s1 = inlined_call_operand.vmem [shape: bf16[2304,256], index: 1, kind: input, shape index: {}]   ;;  %s1099_s2 = inlined_call_operand.vmem [shape: f32[1,256], index: 2, kind: input, shape index: {}]   ;;  %s1100_s3 = inlined_call_operand.vmem [shape: f32[1,256], index: 3, kind: input, shape index: {}]   ;;  %s1101_s4 = inlined_call_operand.vmem [shape: bf16[32,256], index: 4, kind: output, shape index: {}]  }
   0x1   :  { %s956_s17 = smov 0   ;;  %s958_s18 = smov 0  }
   0x2   :  { %s960_s19 = smov 0   ;;  %s962_s20 = smov 0  }
   0x3   :  { %s964_s21 = smov 0  }
   0x4 LB: > { %s23_s22 = sadd.s32 1, %s916_s19  ;;  %s26_s23 = sadd.s32 1, %s920_s20  ;;  %s924_s21 = sphi %s964_s21, %s14_s21   ;;  %s920_s20 = sphi %s962_s20, %s1107_s20   ;;  %s916_s19 = sphi %s960_s19, %s1106_s19   ;;  %s912_s18 = sphi %s958_s18, %s1105_s18   ;;  %s908_s17 = sphi %s956_s17, %s1104_s17   ;;  %s904_s16 = sphi %s954_s16, %s1103_s16   ;;  %s900_s15 = sphi %s952_s15, %s1102_s15  }
   0x5   : > { %p24_p0 = scmp.ge.s32.totalorder %s23_s22, 9  ;;  %p42_p1 = scmp.ne.s32.totalorder %s904_s16, %s900_s15 }
   0x6   : > { %p43_p2 = scmp.eq.s32.totalorder %s924_s21, 0  ;;  %s35_s27 = sadd.s32 1, %s904_s16 }
   0x7   : > { %s1109_s22 = smov (%p24_p0, %s23_s22), 0  ;;  %s1111_s23 = smov (!%p24_p0, %s26_s23), %s920_s20 }
   0x8   : > { %p44_p3 = por %p43_p2, %p42_p1  ;;  %p28_p4 = scmp.ge.s32.totalorder %s1111_s23, 2 }
   0x9   : > { %s31_s24 = ssub.s32 %s916_s19, %s1109_s22  ;;  %p703_p6 = scmp.ge.s32.totalorder %s924_s21, 18 }
   0xa   : > { %s1113_s23 = smov (%p28_p4, %s1111_s23), 0 }
   0xb   : > { %s30_s25 = ssub.s32 %s920_s20, %s1113_s23  ;;  %168 = sbr.rel (%p703_p6) target bundleno = 27 (0x1b), region = 24 }
   0xc   : > { %s32_s26 = sor.u32 %s31_s24, %s30_s25 }
   0xd   : > { %p33_p5 = scmp.eq.s32.totalorder %s32_s26, 0 }
   0xf   : > { %s1003_s28 = scalar_select %p33_p5, %s904_s16, %s35_s27  }
  0x12   : > { %171 = sbr.rel (!%p44_p3) target bundleno = 27 (0x1b), region = 28  ;;  %s173_s29 = sand.u32 (%p44_p3), 1, %s904_s16  }
  0x13   : > { %s706_s30 = sshll.u32 (%p44_p3), %s916_s19, 1  ;;  %s704_s5 = sshll.u32 (%p44_p3), %s173_s29, 4 }
  0x14   : > { %s761_s6 = smul.u32 (%p44_p3), 36, %s920_s20  ;;  %s175_s12 = scalar_lea.vmem (%p44_p3), [#allocation3], %s704_s5 }
  0x16   : > { %s179_s7 = sadd.s32 (%p44_p3), %s761_s6, %s706_s30 }
  0x17   : > { %s708_s8 = sshll.u32 (%p44_p3), %s179_s7, 2 }
  0x18   : > { %s181_s11 = scalar_lea.vmem (%p44_p3), %s1097_s0, %s708_s8 }
  0x19   : > { %v211_v0 = vld [vmem:[%s181_s11] sm:$0xff]  ;;  %v213_v1 = vld [vmem:[%s181_s11 + $0x48] sm:$0xff] }
  0x1a   : > { %212 = vst [vmem:[%s175_s12] sm:$0xff] %v211_v0  ;;  %214 = vst [vmem:[%s175_s12 + $0x8] sm:$0xff] %v213_v1 }
  0x1b PF: > { %p709_p7 = scmp.ge.s32.totalorder %s924_s21, 1  ;;  %p229_p8 = scmp.lt.s32.totalorder %s924_s21, 19 }
  0x1d   : > { %p230_p9 = pnand %p709_p7, %p229_p8 }
  0x1e   : > { %s236_s13 = sand.u32 (!%p230_p9), 1, %s900_s15   ;;  %s711_s14 = sshll.u32 (!%p230_p9), %s908_s17, 5 }
  0x1f   : > { %233 = sbr.rel (%p230_p9) target bundleno = 347 (0x15b), region = 70  ;;  %s1016_s24 = sshll.u32 (!%p230_p9), %s236_s13, 4 }
  0x20   : > { %p271_p10 = scmp.lt.s32.totalorder (!%p230_p9), %s711_s14, 287  ;;  %s714_s25 = sshll.u32 (!%p230_p9), %s912_s18, 1 }
  0x21   : > { %p278_p11 = scmp.lt.s32.totalorder (!%p230_p9), %s714_s25, 3  ;;  %s238_s8 = scalar_lea.vmem (!%p230_p9), [#allocation3], %s1016_s24 }
  0x22   : > { %p717_p12 = scmp.ne.s32.totalorder (!%p230_p9), %s908_s17, 0 }
  0x26   : > { %s1115_s14 = smov (!%p271_p10, %s711_s14), 287  ;;  %s1117_s25 = smov (!%p278_p11, %s714_s25), 3 }
  0x27   : > { %s757_s26 = sshll.u32 %s1115_s14, 3  ;;  %s758_s5 = sshll.u32 %s1117_s25, 3  ;;  %v926_v2 = vmov (!%p717_p12), 0.0  }
  0x28   : > { %s1022_s30 = scalar_lea.vmem %s1098_s1, %s757_s26  ;;  %s1027_s15 = scalar_lea.vmem %s1101_s4, %s758_s5  ;;  %288 = vst [vmem:[#allocation2] sm:$0xff] (!%p717_p12), %v926_v2  ;;  %289 = vst [vmem:[#allocation2 + $0x8] sm:$0xff] (!%p717_p12), %v926_v2 }
  0x29   : > { %287 = sbr.rel (%p717_p12) target bundleno = 48 (0x30), region = 78  ;;  %290 = vst [vmem:[#allocation2 + $0x10] sm:$0xff] (!%p717_p12), %v926_v2  ;;  %291 = vst [vmem:[#allocation2 + $0x18] sm:$0xff] (!%p717_p12), %v926_v2 }
  0x30 PF: > { %v819_v3 = vld [vmem:[%s1022_s30 + $0x4] ss:$8 sps:$4 sm:$0xff]   ;;  %v821_v4 = vld [vmem:[%s1022_s30] ss:$8 sps:$4 sm:$0xff]   ;;  %v822_v5 = vld [vmem:[%s1022_s30 + $0x14] ss:$8 sps:$4 sm:$0xff]  }
  0x31   : > { %500 = vmatprep.subr.bf16.mxu0 %v819_v3  ;;  %v824_v6 = vld [vmem:[%s1022_s30 + $0x10] ss:$8 sps:$4 sm:$0xff]   ;;  %v825_v7 = vld [vmem:[%s1022_s30 + $0x24] ss:$8 sps:$4 sm:$0xff]   ;;  %v827_v8 = vld [vmem:[%s1022_s30 + $0x20] ss:$8 sps:$4 sm:$0xff]  }
  0x32   : > { %501 = vmatpush1.bf16.msra.mxu0 %v821_v4  ;;  %v828_v9 = vld [vmem:[%s1022_s30 + $0x34] ss:$8 sps:$4 sm:$0xff]   ;;  %v830_v10 = vld [vmem:[%s1022_s30 + $0x30] ss:$8 sps:$4 sm:$0xff]   ;;  %v831_v11 = vld [vmem:[%s1022_s30 + $0x44] ss:$8 sps:$4 sm:$0xff]  }
  0x33   : > { %502 = vmatprep.subr.bf16.mxu0 %v822_v5  ;;  %v833_v12 = vld [vmem:[%s1022_s30 + $0x40] ss:$8 sps:$4 sm:$0xff]   ;;  %v834_v13 = vld [vmem:[%s1022_s30 + $0x54] ss:$8 sps:$4 sm:$0xff]   ;;  %v836_v14 = vld [vmem:[%s1022_s30 + $0x50] ss:$8 sps:$4 sm:$0xff]  }
  0x34   : > { %v837_v15 = vld [vmem:[%s1022_s30 + $0x64] ss:$8 sps:$4 sm:$0xff]   ;;  %v839_v17 = vld [vmem:[%s1022_s30 + $0x60] ss:$8 sps:$4 sm:$0xff]   ;;  %v840_v18 = vld [vmem:[%s1022_s30 + $0x74] ss:$8 sps:$4 sm:$0xff]  }
  0x35   : > { %v869_v16 = vld [vmem:[%s238_s8 + $0x4] ss:$8 sps:$4 sm:$0xff]   ;;  %v842_v19 = vld [vmem:[%s1022_s30 + $0x70] ss:$8 sps:$4 sm:$0xff]   ;;  %v845_v21 = vld [vmem:[%s1022_s30 + $0x80] ss:$8 sps:$4 sm:$0xff]  }
  0x36   : > { %503 = vmatpush1.bf16.msra.mxu0 %v824_v6  ;;  %532 = vmatprep.mubr.bf16.mxu0 %v869_v16  ;;  %v843_v20 = vld [vmem:[%s1022_s30 + $0x84] ss:$8 sps:$4 sm:$0xff]   ;;  %v846_v22 = vld [vmem:[%s1022_s30 + $0x94] ss:$8 sps:$4 sm:$0xff]   ;;  %v848_v23 = vld [vmem:[%s1022_s30 + $0x90] ss:$8 sps:$4 sm:$0xff]  }
  0x37   : > { %504 = vmatprep.subr.bf16.mxu0 %v825_v7  ;;  %v849_v24 = vld [vmem:[%s1022_s30 + $0xa4] ss:$8 sps:$4 sm:$0xff]   ;;  %v851_v25 = vld [vmem:[%s1022_s30 + $0xa0] ss:$8 sps:$4 sm:$0xff]   ;;  %v852_v26 = vld [vmem:[%s1022_s30 + $0xb4] ss:$8 sps:$4 sm:$0xff]  }
  0x38   : > { %v854_v27 = vld [vmem:[%s1022_s30 + $0xb0] ss:$8 sps:$4 sm:$0xff]   ;;  %v855_v28 = vld [vmem:[%s1022_s30 + $0xc4] ss:$8 sps:$4 sm:$0xff]   ;;  %v857_v29 = vld [vmem:[%s1022_s30 + $0xc0] ss:$8 sps:$4 sm:$0xff]  }
  0x39   : > { %v858_v30 = vld [vmem:[%s1022_s30 + $0xd4] ss:$8 sps:$4 sm:$0xff]   ;;  %v860_v31 = vld [vmem:[%s1022_s30 + $0xd0] ss:$8 sps:$4 sm:$0xff]   ;;  %v861_v32 = vld [vmem:[%s1022_s30 + $0xe4] ss:$8 sps:$4 sm:$0xff]  }
  0x3a   : > { %505 = vmatpush1.bf16.msra.mxu0 %v827_v8  ;;  %v863_v33 = vld [vmem:[%s1022_s30 + $0xe0] ss:$8 sps:$4 sm:$0xff]   ;;  %v864_v34 = vld [vmem:[%s1022_s30 + $0xf4] ss:$8 sps:$4 sm:$0xff]   ;;  %v866_v35 = vld [vmem:[%s1022_s30 + $0xf0] ss:$8 sps:$4 sm:$0xff]  }
  0x3b   : > { %506 = vmatprep.subr.bf16.mxu0 %v828_v9  ;;  %v867_v36 = vld [vmem:[%s238_s8] ss:$8 sps:$4 sm:$0xff]   ;;  %p752_p13 = scmp.ne.s32.totalorder %s908_s17, 8 }
  0x3c   : > { %v292_v37 = vld [vmem:[#allocation2] sm:$0xff]  ;;  %v293_v38 = vld [vmem:[#allocation2 + $0x8] sm:$0xff]  ;;  %v294_v40 = vld [vmem:[#allocation2 + $0x10] sm:$0xff]  ;;  %v561_v49 = vlaneseq (!%p752_p13) }
  0x3d   : > { %v295_v43 = vld [vmem:[#allocation2 + $0x18] sm:$0xff]  ;;  %v559_v51 = vld [vmem:[%s1099_s2] sm:$0x3] (!%p752_p13) }
  0x3e   : > { %507 = vmatpush1.bf16.msra.mxu0 %v830_v10  ;;  %v562_v50 = vshrl.u32 (!%p752_p13), %v561_v49, 7  ;;  %v575_v52 = vld [vmem:[%s1100_s3] sm:$0x3] (!%p752_p13) }
  0x3f   : > { %508 = vmatprep.subr.bf16.mxu0 %v831_v11 }
  0x40   : > { %v563_v54 = vsub.s32 (!%p752_p13), 0, %v562_v50  ;;  %v567_v55 = vsub.s32 (!%p752_p13), 1, %v562_v50 }
  0x42   : > { %509 = vmatpush1.bf16.msra.mxu0 %v833_v12  ;;  %v564_v59 = vrot.slane (!%p752_p13), %v559_v51, %v563_v54  ;;  %v568_v60 = vrot.slane (!%p752_p13), %v559_v51, %v567_v55  ;;  %v580_v61 = vrot.slane (!%p752_p13), %v575_v52, %v563_v54  ;;  %v584_v62 = vrot.slane (!%p752_p13), %v575_v52, %v567_v55 }
  0x43   : > { %510 = vmatprep.subr.bf16.mxu0 %v834_v13 }
  0x46   : > { %511 = vmatpush1.bf16.msra.mxu0 %v836_v14 }
  0x47   : > { %512 = vmatprep.subr.bf16.mxu0 %v837_v15 }
  0x4a   : > { %513 = vmatpush1.bf16.msra.mxu0 %v839_v17 }
  0x4b   : > { %514 = vmatprep.subr.bf16.mxu0 %v840_v18 }
  0x4e   : > { %515 = vmatpush1.bf16.msra.mxu0 %v842_v19 }
  0x4f   : > { %516 = vmatprep.subr.bf16.mxu0 %v843_v20 }
  0x52   : > { %517 = vmatpush1.bf16.msra.mxu0 %v845_v21 }
  0x53   : > { %518 = vmatprep.subr.bf16.mxu0 %v846_v22 }
  0x56   : > { %519 = vmatpush1.bf16.msra.mxu0 %v848_v23 }
  0x57   : > { %520 = vmatprep.subr.bf16.mxu0 %v849_v24 }
  0x5a   : > { %521 = vmatpush1.bf16.msra.mxu0 %v851_v25 }
  0x5b   : > { %522 = vmatprep.subr.bf16.mxu0 %v852_v26 }
  0x5e   : > { %523 = vmatpush1.bf16.msra.mxu0 %v854_v27 }
  0x5f   : > { %524 = vmatprep.subr.bf16.mxu0 %v855_v28 }
  0x62   : > { %525 = vmatpush1.bf16.msra.mxu0 %v857_v29 }
  0x63   : > { %526 = vmatprep.subr.bf16.mxu0 %v858_v30 }
  0x66   : > { %527 = vmatpush1.bf16.msra.mxu0 %v860_v31 }
  0x67   : > { %528 = vmatprep.subr.bf16.mxu0 %v861_v32 }
  0x6a   : > { %529 = vmatpush1.bf16.msra.mxu0 %v863_v33 }
  0x6b   : > { %530 = vmatprep.subr.bf16.mxu0 %v864_v34 }
  0x6e   : > { %531 = vmatpush1.bf16.msra.mxu0 %v866_v35 }
  0x71   : > { %533 = vmatmul.mubr.bf16.vlgmr.msra.gmra.mrb[0].mxu0 %v867_v36 }
 0x144   : > { %v534_v39 = vpop.f32.mrb[0].mxu0  ;;  %554 = sbr.rel (%p752_p13) target bundleno = 347 (0x15b), region = 82 }
 0x145   : > { %v543_v41 = vadd.f32 %v534_v39, %v292_v37  ;;  %v536_v42 = vpop.f32.mrb[1].mxu0 }
 0x146   : > { %v544_v44 = vadd.f32 %v536_v42, %v293_v38  ;;  %v538_v45 = vpop.f32.mrb[2].mxu0 }
 0x147   : > { %547 = vst [vmem:[#allocation2] sm:$0xff] %v543_v41  ;;  %v545_v46 = vadd.f32 %v538_v45, %v294_v40  ;;  %v540_v47 = vpop.f32.mrb[3].mxu0 }
 0x148   : > { %548 = vst [vmem:[#allocation2 + $0x8] sm:$0xff] %v544_v44  ;;  %v546_v48 = vadd.f32 %v540_v47, %v295_v43 }
 0x149   : > { %549 = vst [vmem:[#allocation2 + $0x10] sm:$0xff] %v545_v46 }
 0x14a   : > { %550 = vst [vmem:[#allocation2 + $0x18] sm:$0xff] %v546_v48 }
 0x14e   : > { %v555_v53 = vld [vmem:[#allocation2] sm:$0xff] }
 0x14f   : > { %v556_v56 = vld [vmem:[#allocation2 + $0x8] sm:$0xff]  ;;  %v571_v63 = vmul.f32 %v564_v59, %v555_v53 }
 0x150   : > { %v557_v57 = vld [vmem:[#allocation2 + $0x10] sm:$0xff]  ;;  %v572_v0 = vmul.f32 %v568_v60, %v556_v56 }
 0x151   : > { %v558_v58 = vld [vmem:[#allocation2 + $0x18] sm:$0xff]  ;;  %v573_v1 = vmul.f32 %v564_v59, %v557_v57  ;;  %v587_v3 = vadd.f32 %v580_v61, %v571_v63 }
 0x152   : > { %v574_v2 = vmul.f32 %v568_v60, %v558_v58  ;;  %v588_v4 = vadd.f32 %v584_v62, %v572_v0 }
 0x153   : > { %v589_v5 = vadd.f32 %v580_v61, %v573_v1  ;;  %v591_v7 = vmax.f32 %v587_v3, 0.0 }
 0x154   : > { %v590_v6 = vadd.f32 %v584_v62, %v574_v2  ;;  %v592_v8 = vmax.f32 %v588_v4, 0.0 }
 0x155   : > { %v593_v9 = vmax.f32 %v589_v5, 0.0 }
 0x156   : > { %v594_v10 = vmax.f32 %v590_v6, 0.0  ;;  %v759_v11 = vpack.c.bf16 %v592_v8, %v591_v7 }
 0x158   : > { %v760_v12 = vpack.c.bf16 %v594_v10, %v593_v9  ;;  %607 = vst [vmem:[%s1027_s15] sm:$0xff] %v759_v11 }
 0x15a   : > { %608 = vst [vmem:[%s1027_s15 + $0x8] sm:$0xff] %v760_v12 }
 0x15b PF: > { %s14_s21 = sadd.s32 1, %s924_s21   ;;  %s1102_s15 = smov %s904_s16 }
 0x15c   : > { %p11_p0 = scmp.ge.s32.totalorder %s14_s21, 20   ;;  %s1103_s16 = smov %s1003_s28 }
 0x15d   : > { %s1104_s17 = smov %s916_s19  ;;  %s1105_s18 = smov %s920_s20 }
 0x15e   : > { %s1106_s19 = smov %s1109_s22  ;;  %s1107_s20 = smov %s1113_s23 }
 0x15f   :  { %13 = sbr.rel (!%p11_p0) target bundleno = 4 (0x4), region = 120 }

// kernel: forward.36
= control target key start
LH: loop header
LB: loop body
LE: loop exit
PB: predicated region body
PF: predicated region fallthrough
CT: control target
= control target key end

     0   :  { %s1294_s15 = smov 0   ;;  %s1296_s16 = smov 0   ;;  %s1452_s0 = inlined_call_operand.vmem [shape: bf16[16,2304], index: 0, kind: input, shape index: {}]   ;;  %s1453_s1 = inlined_call_operand.vmem [shape: bf16[2304,512], index: 1, kind: input, shape index: {}]   ;;  %s1454_s2 = inlined_call_operand.vmem [shape: f32[1,512], index: 2, kind: input, shape index: {}]   ;;  %s1455_s3 = inlined_call_operand.vmem [shape: f32[1,512], index: 3, kind: input, shape index: {}]   ;;  %s1456_s4 = inlined_call_operand.vmem [shape: bf16[16,512], index: 4, kind: output, shape index: {}]  }
   0x1   :  { %s1298_s17 = smov 0   ;;  %s1300_s18 = smov 0  }
   0x2   :  { %s1302_s19 = smov 0  }
   0x3 LB: > { %s23_s20 = sadd.s32 1, %s1262_s18  ;;  %p42_p1 = scmp.ne.s32.totalorder %s1254_s16, %s1250_s15  ;;  %s1266_s19 = sphi %s1302_s19, %s14_s19   ;;  %s1262_s18 = sphi %s1300_s18, %s1460_s18   ;;  %s1258_s17 = sphi %s1298_s17, %s1459_s17   ;;  %s1254_s16 = sphi %s1296_s16, %s1458_s16   ;;  %s1250_s15 = sphi %s1294_s15, %s1457_s15  }
   0x4   : > { %p24_p0 = scmp.ge.s32.totalorder %s23_s20, 9  ;;  %p43_p2 = scmp.eq.s32.totalorder %s1266_s19, 0 }
   0x5   : > { %s35_s22 = sadd.s32 1, %s1254_s16  ;;  %p997_p5 = scmp.ge.s32.totalorder %s1266_s19, 9 }
   0x6   : > { %s1462_s20 = smov (%p24_p0, %s23_s20), 0  ;;  %p44_p3 = por %p43_p2, %p42_p1 }
   0x7   : > { %s31_s21 = ssub.s32 %s1262_s18, %s1462_s20  ;;  %168 = sbr.rel (%p997_p5) target bundleno = 21 (0x15), region = 24 }
   0x8   : > { %p33_p4 = scmp.eq.s32.totalorder %s31_s21, 0 }
   0xa   : > { %s1329_s23 = scalar_select %p33_p4, %s1254_s16, %s35_s22  }
   0xe   : > { %171 = sbr.rel (!%p44_p3) target bundleno = 21 (0x15), region = 28  ;;  %s173_s24 = sand.u32 (%p44_p3), 1, %s1254_s16  }
   0xf   : > { %s1082_s25 = sshll.u32 (%p44_p3), %s1262_s18, 3  ;;  %s998_s26 = sshll.u32 (%p44_p3), %s173_s24, 4 }
  0x10   : > { %s181_s29 = scalar_lea.vmem (%p44_p3), %s1452_s0, %s1082_s25  ;;  %s175_s30 = scalar_lea.vmem (%p44_p3), [#allocation3], %s998_s26 }
  0x11   : > { %v211_v0 = vld [vmem:[%s181_s29] sm:$0xff] (%p44_p3)  ;;  %v213_v1 = vld [vmem:[%s181_s29 + $0x48] sm:$0xff] (%p44_p3) }
  0x12   : > { %212 = vst [vmem:[%s175_s30] sm:$0xff] (%p44_p3), %v211_v0  ;;  %214 = vst [vmem:[%s175_s30 + $0x8] sm:$0xff] (%p44_p3), %v213_v1 }
  0x15 PF: > { %p1001_p6 = scmp.ge.s32.totalorder %s1266_s19, 1  ;;  %p229_p7 = scmp.lt.s32.totalorder %s1266_s19, 10 }
  0x17   : > { %p230_p8 = pnand %p1001_p6, %p229_p7 }
  0x18   : > { %s236_s5 = sand.u32 (!%p230_p8), 1, %s1250_s15   ;;  %s1003_s6 = sshll.u32 (!%p230_p8), %s1258_s17, 5 }
  0x19   : > { %233 = sbr.rel (%p230_p8) target bundleno = 338 (0x152), region = 70  ;;  %s1341_s7 = sshll.u32 (!%p230_p8), %s236_s5, 4 }
  0x1a   : > { %p271_p9 = scmp.lt.s32.totalorder (!%p230_p8), %s1003_s6, 287  ;;  %s238_s12 = scalar_lea.vmem (!%p230_p8), [#allocation3], %s1341_s7 }
  0x1b   : > { %p1006_p10 = scmp.ne.s32.totalorder (!%p230_p8), %s1258_s17, 0 }
  0x20   : > { %s1464_s6 = smov (!%p271_p9, %s1003_s6), 287  ;;  %287 = sbr.rel (%p1006_p10) target bundleno = 39 (0x27), region = 78 }
  0x21   : > { %s1083_s8 = sshll.u32 %s1464_s6, 4  ;;  %v1268_v2 = vmov (!%p1006_p10), 0.0  }
  0x22   : > { %s1346_s11 = scalar_lea.vmem %s1453_s1, %s1083_s8  ;;  %288 = vst [vmem:[#allocation2] sm:$0xff] (!%p1006_p10), %v1268_v2  ;;  %289 = vst [vmem:[#allocation2 + $0x8] sm:$0xff] (!%p1006_p10), %v1268_v2 }
  0x23   : > { %290 = vst [vmem:[#allocation2 + $0x10] sm:$0xff] (!%p1006_p10), %v1268_v2  ;;  %291 = vst [vmem:[#allocation2 + $0x18] sm:$0xff] (!%p1006_p10), %v1268_v2 }
  0x24   : > { %292 = vst [vmem:[#allocation2 + $0x20] sm:$0xff] (!%p1006_p10), %v1268_v2  ;;  %293 = vst [vmem:[#allocation2 + $0x28] sm:$0xff] (!%p1006_p10), %v1268_v2 }
  0x25   : > { %294 = vst [vmem:[#allocation2 + $0x30] sm:$0xff] (!%p1006_p10), %v1268_v2  ;;  %295 = vst [vmem:[#allocation2 + $0x38] sm:$0xff] (!%p1006_p10), %v1268_v2 }
  0x27 PF: > { %v1129_v3 = vld [vmem:[%s1346_s11 + $0x4] ss:$16 sps:$4 sm:$0xff]   ;;  %v1131_v4 = vld [vmem:[%s1346_s11 + $0xc] ss:$16 sps:$4 sm:$0xff]   ;;  %v1133_v5 = vld [vmem:[%s1346_s11] ss:$16 sps:$4 sm:$0xff]  }
  0x28   : > { %700 = vmatprep.subr.bf16.mxu0 %v1129_v3  ;;  %v1134_v6 = vld [vmem:[%s1346_s11 + $0x8] ss:$16 sps:$4 sm:$0xff]   ;;  %743 = vmatprep.subr.bf16.mxu1 %v1131_v4  ;;  %v1135_v7 = vld [vmem:[%s1346_s11 + $0x24] ss:$16 sps:$4 sm:$0xff]   ;;  %v1137_v8 = vld [vmem:[%s1346_s11 + $0x2c] ss:$16 sps:$4 sm:$0xff]  }
  0x29   : > { %701 = vmatpush1.bf16.msra.mxu0 %v1133_v5  ;;  %744 = vmatpush1.bf16.msra.mxu1 %v1134_v6  ;;  %v1139_v9 = vld [vmem:[%s1346_s11 + $0x20] ss:$16 sps:$4 sm:$0xff]   ;;  %v1140_v10 = vld [vmem:[%s1346_s11 + $0x28] ss:$16 sps:$4 sm:$0xff]   ;;  %v1141_v11 = vld [vmem:[%s1346_s11 + $0x44] ss:$16 sps:$4 sm:$0xff]  }
  0x2a   : > { %702 = vmatprep.subr.bf16.mxu0 %v1135_v7  ;;  %745 = vmatprep.subr.bf16.mxu1 %v1137_v8  ;;  %v1143_v12 = vld [vmem:[%s1346_s11 + $0x4c] ss:$16 sps:$4 sm:$0xff]   ;;  %v1145_v13 = vld [vmem:[%s1346_s11 + $0x40] ss:$16 sps:$4 sm:$0xff]   ;;  %v1146_v14 = vld [vmem:[%s1346_s11 + $0x48] ss:$16 sps:$4 sm:$0xff]  }
  0x2b   : > { %v1147_v15 = vld [vmem:[%s1346_s11 + $0x64] ss:$16 sps:$4 sm:$0xff]   ;;  %v1149_v16 = vld [vmem:[%s1346_s11 + $0x6c] ss:$16 sps:$4 sm:$0xff]   ;;  %v1151_v17 = vld [vmem:[%s1346_s11 + $0x60] ss:$16 sps:$4 sm:$0xff]  }
  0x2c   : > { %v1152_v18 = vld [vmem:[%s1346_s11 + $0x68] ss:$16 sps:$4 sm:$0xff]   ;;  %v1153_v19 = vld [vmem:[%s1346_s11 + $0x84] ss:$16 sps:$4 sm:$0xff]   ;;  %v1155_v20 = vld [vmem:[%s1346_s11 + $0x8c] ss:$16 sps:$4 sm:$0xff]  }
  0x2d   : > { %703 = vmatpush1.bf16.msra.mxu0 %v1139_v9  ;;  %746 = vmatpush1.bf16.msra.mxu1 %v1140_v10  ;;  %v1157_v21 = vld [vmem:[%s1346_s11 + $0x80] ss:$16 sps:$4 sm:$0xff]   ;;  %v1158_v22 = vld [vmem:[%s1346_s11 + $0x88] ss:$16 sps:$4 sm:$0xff]   ;;  %v1159_v23 = vld [vmem:[%s1346_s11 + $0xa4] ss:$16 sps:$4 sm:$0xff]  }
  0x2e   : > { %704 = vmatprep.subr.bf16.mxu0 %v1141_v11  ;;  %747 = vmatprep.subr.bf16.mxu1 %v1143_v12  ;;  %v1161_v24 = vld [vmem:[%s1346_s11 + $0xac] ss:$16 sps:$4 sm:$0xff]   ;;  %v1163_v25 = vld [vmem:[%s1346_s11 + $0xa0] ss:$16 sps:$4 sm:$0xff]   ;;  %v1164_v26 = vld [vmem:[%s1346_s11 + $0xa8] ss:$16 sps:$4 sm:$0xff]  }
  0x2f   : > { %v1165_v27 = vld [vmem:[%s1346_s11 + $0xc4] ss:$16 sps:$4 sm:$0xff]   ;;  %v1167_v28 = vld [vmem:[%s1346_s11 + $0xcc] ss:$16 sps:$4 sm:$0xff]   ;;  %v1169_v29 = vld [vmem:[%s1346_s11 + $0xc0] ss:$16 sps:$4 sm:$0xff]  }
  0x30   : > { %v1170_v30 = vld [vmem:[%s1346_s11 + $0xc8] ss:$16 sps:$4 sm:$0xff]   ;;  %v1171_v31 = vld [vmem:[%s1346_s11 + $0xe4] ss:$16 sps:$4 sm:$0xff]   ;;  %v1173_v32 = vld [vmem:[%s1346_s11 + $0xec] ss:$16 sps:$4 sm:$0xff]  }
  0x31   : > { %705 = vmatpush1.bf16.msra.mxu0 %v1145_v13  ;;  %748 = vmatpush1.bf16.msra.mxu1 %v1146_v14  ;;  %v1175_v33 = vld [vmem:[%s1346_s11 + $0xe0] ss:$16 sps:$4 sm:$0xff]   ;;  %v1176_v34 = vld [vmem:[%s1346_s11 + $0xe8] ss:$16 sps:$4 sm:$0xff]   ;;  %v1177_v35 = vld [vmem:[%s1346_s11 + $0x104] ss:$16 sps:$4 sm:$0xff]  }
  0x32   : > { %706 = vmatprep.subr.bf16.mxu0 %v1147_v15  ;;  %749 = vmatprep.subr.bf16.mxu1 %v1149_v16  ;;  %v1179_v36 = vld [vmem:[%s1346_s11 + $0x10c] ss:$16 sps:$4 sm:$0xff]   ;;  %v1181_v37 = vld [vmem:[%s1346_s11 + $0x100] ss:$16 sps:$4 sm:$0xff]   ;;  %v1182_v38 = vld [vmem:[%s1346_s11 + $0x108] ss:$16 sps:$4 sm:$0xff]  }
  0x33   : > { %v1183_v39 = vld [vmem:[%s1346_s11 + $0x124] ss:$16 sps:$4 sm:$0xff]   ;;  %v1185_v40 = vld [vmem:[%s1346_s11 + $0x12c] ss:$16 sps:$4 sm:$0xff]   ;;  %v1187_v41 = vld [vmem:[%s1346_s11 + $0x120] ss:$16 sps:$4 sm:$0xff]  }
  0x34   : > { %v1188_v42 = vld [vmem:[%s1346_s11 + $0x128] ss:$16 sps:$4 sm:$0xff]   ;;  %v1189_v43 = vld [vmem:[%s1346_s11 + $0x144] ss:$16 sps:$4 sm:$0xff]   ;;  %v1191_v44 = vld [vmem:[%s1346_s11 + $0x14c] ss:$16 sps:$4 sm:$0xff]  }
  0x35   : > { %707 = vmatpush1.bf16.msra.mxu0 %v1151_v17  ;;  %750 = vmatpush1.bf16.msra.mxu1 %v1152_v18  ;;  %v1193_v45 = vld [vmem:[%s1346_s11 + $0x140] ss:$16 sps:$4 sm:$0xff]   ;;  %v1194_v46 = vld [vmem:[%s1346_s11 + $0x148] ss:$16 sps:$4 sm:$0xff]   ;;  %v1195_v47 = vld [vmem:[%s1346_s11 + $0x164] ss:$16 sps:$4 sm:$0xff]  }
  0x36   : > { %708 = vmatprep.subr.bf16.mxu0 %v1153_v19  ;;  %751 = vmatprep.subr.bf16.mxu1 %v1155_v20  ;;  %v1197_v48 = vld [vmem:[%s1346_s11 + $0x16c] ss:$16 sps:$4 sm:$0xff]   ;;  %v1199_v50 = vld [vmem:[%s1346_s11 + $0x160] ss:$16 sps:$4 sm:$0xff]   ;;  %v1200_v51 = vld [vmem:[%s1346_s11 + $0x168] ss:$16 sps:$4 sm:$0xff]  }
  0x37   : > { %v1227_v49 = vld [vmem:[%s238_s12 + $0x4] ss:$8 sps:$4 sm:$0xff]   ;;  %v1205_v54 = vld [vmem:[%s1346_s11 + $0x180] ss:$16 sps:$4 sm:$0xff]   ;;  %v1206_v55 = vld [vmem:[%s1346_s11 + $0x188] ss:$16 sps:$4 sm:$0xff]  }
  0x38   : > { %v1201_v52 = vld [vmem:[%s1346_s11 + $0x184] ss:$16 sps:$4 sm:$0xff]   ;;  %v1203_v53 = vld [vmem:[%s1346_s11 + $0x18c] ss:$16 sps:$4 sm:$0xff]   ;;  %732 = vmatprep.mubr.bf16.mxu0 %v1227_v49  ;;  %775 = vmatprep.mubr.bf16.mxu1 %v1227_v49  ;;  %v1211_v58 = vld [vmem:[%s1346_s11 + $0x1a0] ss:$16 sps:$4 sm:$0xff]  }
  0x39   : > { %709 = vmatpush1.bf16.msra.mxu0 %v1157_v21  ;;  %752 = vmatpush1.bf16.msra.mxu1 %v1158_v22  ;;  %v1207_v56 = vld [vmem:[%s1346_s11 + $0x1a4] ss:$16 sps:$4 sm:$0xff]   ;;  %v1209_v57 = vld [vmem:[%s1346_s11 + $0x1ac] ss:$16 sps:$4 sm:$0xff]   ;;  %v1212_v59 = vld [vmem:[%s1346_s11 + $0x1a8] ss:$16 sps:$4 sm:$0xff]  }
  0x3a   : > { %710 = vmatprep.subr.bf16.mxu0 %v1159_v23  ;;  %753 = vmatprep.subr.bf16.mxu1 %v1161_v24  ;;  %v1213_v60 = vld [vmem:[%s1346_s11 + $0x1c4] ss:$16 sps:$4 sm:$0xff]   ;;  %v1215_v61 = vld [vmem:[%s1346_s11 + $0x1cc] ss:$16 sps:$4 sm:$0xff]   ;;  %v1217_v62 = vld [vmem:[%s1346_s11 + $0x1c0] ss:$16 sps:$4 sm:$0xff]  }
  0x3b   : > { %v1218_v63 = vld [vmem:[%s1346_s11 + $0x1c8] ss:$16 sps:$4 sm:$0xff]   ;;  %v1219_v0 = vld [vmem:[%s1346_s11 + $0x1e4] ss:$16 sps:$4 sm:$0xff]   ;;  %v1221_v1 = vld [vmem:[%s1346_s11 + $0x1ec] ss:$16 sps:$4 sm:$0xff]  }
  0x3c   : > { %v1223_v2 = vld [vmem:[%s1346_s11 + $0x1e0] ss:$16 sps:$4 sm:$0xff]   ;;  %v1224_v3 = vld [vmem:[%s1346_s11 + $0x1e8] ss:$16 sps:$4 sm:$0xff]   ;;  %p1073_p11 = scmp.ne.s32.totalorder %s1258_s17, 8 }
  0x3d   : > { %711 = vmatpush1.bf16.msra.mxu0 %v1163_v25  ;;  %754 = vmatpush1.bf16.msra.mxu1 %v1164_v26  ;;  %v1225_v4 = vld [vmem:[%s238_s12] ss:$8 sps:$4 sm:$0xff]  }
  0x3e   : > { %712 = vmatprep.subr.bf16.mxu0 %v1165_v27  ;;  %755 = vmatprep.subr.bf16.mxu1 %v1167_v28  ;;  %v296_v5 = vld [vmem:[#allocation2] sm:$0xff]  ;;  %v298_v6 = vld [vmem:[#allocation2 + $0x10] sm:$0xff]  ;;  %v297_v7 = vld [vmem:[#allocation2 + $0x8] sm:$0xff] }
  0x3f   : > { %v299_v8 = vld [vmem:[#allocation2 + $0x18] sm:$0xff]  ;;  %v300_v11 = vld [vmem:[#allocation2 + $0x20] sm:$0xff]  ;;  %v302_v12 = vld [vmem:[#allocation2 + $0x30] sm:$0xff] }
  0x40   : > { %v301_v17 = vld [vmem:[#allocation2 + $0x28] sm:$0xff]  ;;  %v303_v18 = vld [vmem:[#allocation2 + $0x38] sm:$0xff] }
  0x41   : > { %713 = vmatpush1.bf16.msra.mxu0 %v1169_v29  ;;  %756 = vmatpush1.bf16.msra.mxu1 %v1170_v30  ;;  %v816_v29 = vlaneseq (!%p1073_p11) }
  0x42   : > { %714 = vmatprep.subr.bf16.mxu0 %v1171_v31  ;;  %757 = vmatprep.subr.bf16.mxu1 %v1173_v32  ;;  %v814_v31 = vld [vmem:[%s1454_s2] sm:$0xf] (!%p1073_p11) }
  0x43   : > { %v817_v30 = vshrl.u32 (!%p1073_p11), %v816_v29, 7  ;;  %v844_v32 = vld [vmem:[%s1455_s3] sm:$0xf] (!%p1073_p11) }
  0x45   : > { %715 = vmatpush1.bf16.msra.mxu0 %v1175_v33  ;;  %758 = vmatpush1.bf16.msra.mxu1 %v1176_v34 }
  0x46   : > { %716 = vmatprep.subr.bf16.mxu0 %v1177_v35  ;;  %759 = vmatprep.subr.bf16.mxu1 %v1179_v36  ;;  %v818_v35 = vsub.s32 (!%p1073_p11), 0, %v817_v30  ;;  %v822_v36 = vsub.s32 (!%p1073_p11), 1, %v817_v30 }
  0x49   : > { %717 = vmatpush1.bf16.msra.mxu0 %v1181_v37  ;;  %760 = vmatpush1.bf16.msra.mxu1 %v1182_v38  ;;  %v826_v37 = vsub.s32 (!%p1073_p11), 2, %v817_v30  ;;  %v830_v38 = vsub.s32 (!%p1073_p11), 3, %v817_v30 }
  0x4a   : > { %718 = vmatprep.subr.bf16.mxu0 %v1183_v39  ;;  %761 = vmatprep.subr.bf16.mxu1 %v1185_v40 }
  0x4b   : > { %v827_v49 = vrot.slane (!%p1073_p11), %v814_v31, %v826_v37 }
  0x4d   : > { %719 = vmatpush1.bf16.msra.mxu0 %v1187_v41  ;;  %762 = vmatpush1.bf16.msra.mxu1 %v1188_v42  ;;  %v819_v42 = vrot.slane (!%p1073_p11), %v814_v31, %v818_v35 }
  0x4e   : > { %720 = vmatprep.subr.bf16.mxu0 %v1189_v43  ;;  %763 = vmatprep.subr.bf16.mxu1 %v1191_v44  ;;  %v823_v43 = vrot.slane (!%p1073_p11), %v814_v31, %v822_v36  ;;  %v849_v44 = vrot.slane (!%p1073_p11), %v844_v32, %v818_v35 }
  0x51   : > { %721 = vmatpush1.bf16.msra.mxu0 %v1193_v45  ;;  %764 = vmatpush1.bf16.msra.mxu1 %v1194_v46  ;;  %v853_v45 = vrot.slane (!%p1073_p11), %v844_v32, %v822_v36 }
  0x52   : > { %722 = vmatprep.subr.bf16.mxu0 %v1195_v47  ;;  %765 = vmatprep.subr.bf16.mxu1 %v1197_v48 }
  0x55   : > { %723 = vmatpush1.bf16.msra.mxu0 %v1199_v50  ;;  %766 = vmatpush1.bf16.msra.mxu1 %v1200_v51  ;;  %v831_v50 = vrot.slane (!%p1073_p11), %v814_v31, %v830_v38  ;;  %v857_v51 = vrot.slane (!%p1073_p11), %v844_v32, %v826_v37 }
  0x56   : > { %724 = vmatprep.subr.bf16.mxu0 %v1201_v52  ;;  %767 = vmatprep.subr.bf16.mxu1 %v1203_v53  ;;  %v861_v52 = vrot.slane (!%p1073_p11), %v844_v32, %v830_v38 }
  0x59   : > { %725 = vmatpush1.bf16.msra.mxu0 %v1205_v54  ;;  %768 = vmatpush1.bf16.msra.mxu1 %v1206_v55 }
  0x5a   : > { %726 = vmatprep.subr.bf16.mxu0 %v1207_v56  ;;  %769 = vmatprep.subr.bf16.mxu1 %v1209_v57 }
  0x5d   : > { %727 = vmatpush1.bf16.msra.mxu0 %v1211_v58  ;;  %770 = vmatpush1.bf16.msra.mxu1 %v1212_v59 }
  0x5e   : > { %728 = vmatprep.subr.bf16.mxu0 %v1213_v60  ;;  %771 = vmatprep.subr.bf16.mxu1 %v1215_v61 }
  0x61   : > { %729 = vmatpush1.bf16.msra.mxu0 %v1217_v62  ;;  %772 = vmatpush1.bf16.msra.mxu1 %v1218_v63 }
  0x62   : > { %730 = vmatprep.subr.bf16.mxu0 %v1219_v0  ;;  %773 = vmatprep.subr.bf16.mxu1 %v1221_v1 }
  0x65   : > { %731 = vmatpush1.bf16.msra.mxu0 %v1223_v2  ;;  %774 = vmatpush1.bf16.msra.mxu1 %v1224_v3 }
  0x68   : > { %733 = vmatmul.mubr.bf16.vlgmr.msra.gmra.mrb[0].mxu0 %v1225_v4  ;;  %776 = vmatmul.mubr.bf16.vlgmr.msra.gmra.mrb[0].mxu1 %v1225_v4 }
 0x13b   : > { %v734_v9 = vpop.f32.mrb[0].mxu0  ;;  %v777_v10 = vpop.f32.mrb[0].mxu1  ;;  %805 = sbr.rel (%p1073_p11) target bundleno = 338 (0x152), region = 82 }
 0x13c   : > { %v786_v13 = vadd.f32 %v734_v9, %v296_v5  ;;  %v788_v14 = vadd.f32 %v777_v10, %v298_v6  ;;  %v736_v15 = vpop.f32.mrb[1].mxu0  ;;  %v779_v16 = vpop.f32.mrb[1].mxu1 }
 0x13d   : > { %v787_v19 = vadd.f32 %v736_v15, %v297_v7  ;;  %v789_v20 = vadd.f32 %v779_v16, %v299_v8  ;;  %v738_v21 = vpop.f32.mrb[2].mxu0  ;;  %v781_v22 = vpop.f32.mrb[2].mxu1 }
 0x13e   : > { %794 = vst [vmem:[#allocation2] sm:$0xff] %v786_v13  ;;  %796 = vst [vmem:[#allocation2 + $0x10] sm:$0xff] %v788_v14  ;;  %v790_v23 = vadd.f32 %v738_v21, %v300_v11  ;;  %v792_v24 = vadd.f32 %v781_v22, %v302_v12  ;;  %v740_v25 = vpop.f32.mrb[3].mxu0  ;;  %v783_v26 = vpop.f32.mrb[3].mxu1 }
 0x13f   : > { %795 = vst [vmem:[#allocation2 + $0x8] sm:$0xff] %v787_v19  ;;  %797 = vst [vmem:[#allocation2 + $0x18] sm:$0xff] %v789_v20  ;;  %v791_v27 = vadd.f32 %v740_v25, %v301_v17  ;;  %v793_v28 = vadd.f32 %v783_v26, %v303_v18 }
 0x140   : > { %798 = vst [vmem:[#allocation2 + $0x20] sm:$0xff] %v790_v23  ;;  %800 = vst [vmem:[#allocation2 + $0x30] sm:$0xff] %v792_v24 }
 0x141   : > { %799 = vst [vmem:[#allocation2 + $0x28] sm:$0xff] %v791_v27  ;;  %801 = vst [vmem:[#allocation2 + $0x38] sm:$0xff] %v793_v28 }
 0x145   : > { %v806_v33 = vld [vmem:[#allocation2] sm:$0xff]  ;;  %v808_v39 = vld [vmem:[#allocation2 + $0x10] sm:$0xff] }
 0x146   : > { %v807_v34 = vld [vmem:[#allocation2 + $0x8] sm:$0xff]  ;;  %v809_v46 = vld [vmem:[#allocation2 + $0x18] sm:$0xff]  ;;  %v836_v53 = vmul.f32 %v819_v42, %v806_v33  ;;  %v838_v57 = vmul.f32 %v827_v49, %v808_v39 }
 0x147   : > { %v810_v40 = vld [vmem:[#allocation2 + $0x20] sm:$0xff]  ;;  %v812_v47 = vld [vmem:[#allocation2 + $0x30] sm:$0xff]  ;;  %v837_v54 = vmul.f32 %v823_v43, %v807_v34  ;;  %v839_v58 = vmul.f32 %v831_v50, %v809_v46 }
 0x148   : > { %v811_v41 = vld [vmem:[#allocation2 + $0x28] sm:$0xff]  ;;  %v813_v48 = vld [vmem:[#allocation2 + $0x38] sm:$0xff]  ;;  %v840_v55 = vmul.f32 %v819_v42, %v810_v40  ;;  %v842_v59 = vmul.f32 %v827_v49, %v812_v47  ;;  %v866_v61 = vadd.f32 %v849_v44, %v836_v53  ;;  %v868_v1 = vadd.f32 %v857_v51, %v838_v57 }
 0x149   : > { %v841_v56 = vmul.f32 %v823_v43, %v811_v41  ;;  %v843_v60 = vmul.f32 %v831_v50, %v813_v48  ;;  %v867_v62 = vadd.f32 %v853_v45, %v837_v54  ;;  %v869_v2 = vadd.f32 %v861_v52, %v839_v58 }
 0x14a   : > { %v870_v63 = vadd.f32 %v849_v44, %v840_v55  ;;  %v872_v3 = vadd.f32 %v857_v51, %v842_v59  ;;  %v874_v5 = vmax.f32 %v866_v61, 0.0  ;;  %v876_v9 = vmax.f32 %v868_v1, 0.0 }
 0x14b   : > { %v871_v0 = vadd.f32 %v853_v45, %v841_v56  ;;  %v873_v4 = vadd.f32 %v861_v52, %v843_v60  ;;  %v875_v6 = vmax.f32 %v867_v62, 0.0  ;;  %v877_v10 = vmax.f32 %v869_v2, 0.0 }
 0x14c   : > { %v878_v7 = vmax.f32 %v870_v63, 0.0  ;;  %v880_v11 = vmax.f32 %v872_v3, 0.0 }
 0x14d   : > { %v879_v8 = vmax.f32 %v871_v0, 0.0  ;;  %v881_v12 = vmax.f32 %v873_v4, 0.0  ;;  %v1084_v13 = vpack.c.bf16 %v875_v6, %v874_v5  ;;  %v1085_v15 = vpack.c.bf16 %v877_v10, %v876_v9 }
 0x14f   : > { %v1086_v14 = vpack.c.bf16 %v879_v8, %v878_v7  ;;  %v1087_v16 = vpack.c.bf16 %v881_v12, %v880_v11  ;;  %906 = vst [vmem:[%s1456_s4] sm:$0xff] %v1084_v13  ;;  %907 = vst [vmem:[%s1456_s4 + $0x8] sm:$0xff] %v1085_v15 }
 0x151   : > { %908 = vst [vmem:[%s1456_s4 + $0x10] sm:$0xff] %v1086_v14  ;;  %909 = vst [vmem:[%s1456_s4 + $0x18] sm:$0xff] %v1087_v16 }
 0x152 PF: > { %s14_s19 = sadd.s32 1, %s1266_s19   ;;  %s1457_s15 = smov %s1254_s16 }
 0x153   : > { %p11_p12 = scmp.ge.s32.totalorder %s14_s19, 11   ;;  %s1458_s16 = smov %s1329_s23 }
 0x154   : > { %s1459_s17 = smov %s1262_s18  ;;  %s1460_s18 = smov %s1462_s20 }
 0x155   :  { %13 = sbr.rel (!%p11_p12) target bundleno = 3 (0x3), region = 120 }

// kernel: forward.35
= control target key start
LH: loop header
LB: loop body
LE: loop exit
PB: predicated region body
PF: predicated region fallthrough
CT: control target
= control target key end

     0   :  { %s1052_s1 = inlined_call_operand.vmem [shape: bf16[256,512], index: 1, kind: input, shape index: {}]   ;;  %s1053_s0 = inlined_call_operand.vmem [shape: bf16[16,256], index: 0, kind: input, shape index: {}]   ;;  %s1054_s2 = inlined_call_operand.vmem [shape: f32[1,512], index: 2, kind: input, shape index: {}]   ;;  %s1055_s3 = inlined_call_operand.vmem [shape: f32[1,512], index: 3, kind: input, shape index: {}]   ;;  %s1056_s4 = inlined_call_operand.vmem [shape: bf16[16,512], index: 4, kind: output, shape index: {}]  }
   0x1   :  { %v712_v0 = vld [vmem:[%s1052_s1 + $0x4] ss:$16 sps:$4 sm:$0xff]   ;;  %v714_v1 = vld [vmem:[%s1052_s1 + $0xc] ss:$16 sps:$4 sm:$0xff]   ;;  %v716_v2 = vld [vmem:[%s1052_s1] ss:$16 sps:$4 sm:$0xff]  }
   0x2   :  { %433 = vmatprep.subr.bf16.mxu0 %v712_v0  ;;  %v717_v3 = vld [vmem:[%s1052_s1 + $0x8] ss:$16 sps:$4 sm:$0xff]   ;;  %476 = vmatprep.subr.bf16.mxu1 %v714_v1  ;;  %v718_v4 = vld [vmem:[%s1052_s1 + $0x24] ss:$16 sps:$4 sm:$0xff]   ;;  %v720_v5 = vld [vmem:[%s1052_s1 + $0x2c] ss:$16 sps:$4 sm:$0xff]  }
   0x3   :  { %434 = vmatpush1.bf16.msra.mxu0 %v716_v2  ;;  %477 = vmatpush1.bf16.msra.mxu1 %v717_v3  ;;  %v722_v6 = vld [vmem:[%s1052_s1 + $0x20] ss:$16 sps:$4 sm:$0xff]   ;;  %v723_v7 = vld [vmem:[%s1052_s1 + $0x28] ss:$16 sps:$4 sm:$0xff]   ;;  %v724_v8 = vld [vmem:[%s1052_s1 + $0x44] ss:$16 sps:$4 sm:$0xff]   ;;  %v548_v2 = vlaneseq }
   0x4   :  { %435 = vmatprep.subr.bf16.mxu0 %v718_v4  ;;  %478 = vmatprep.subr.bf16.mxu1 %v720_v5  ;;  %v726_v9 = vld [vmem:[%s1052_s1 + $0x4c] ss:$16 sps:$4 sm:$0xff]   ;;  %v728_v10 = vld [vmem:[%s1052_s1 + $0x40] ss:$16 sps:$4 sm:$0xff]   ;;  %v729_v11 = vld [vmem:[%s1052_s1 + $0x48] ss:$16 sps:$4 sm:$0xff]  }
   0x5   :  { %v730_v12 = vld [vmem:[%s1052_s1 + $0x64] ss:$16 sps:$4 sm:$0xff]   ;;  %v732_v13 = vld [vmem:[%s1052_s1 + $0x6c] ss:$16 sps:$4 sm:$0xff]   ;;  %v734_v14 = vld [vmem:[%s1052_s1 + $0x60] ss:$16 sps:$4 sm:$0xff]  }
   0x6   :  { %v735_v15 = vld [vmem:[%s1052_s1 + $0x68] ss:$16 sps:$4 sm:$0xff]   ;;  %v736_v16 = vld [vmem:[%s1052_s1 + $0x84] ss:$16 sps:$4 sm:$0xff]   ;;  %v738_v17 = vld [vmem:[%s1052_s1 + $0x8c] ss:$16 sps:$4 sm:$0xff]  }
   0x7   :  { %436 = vmatpush1.bf16.msra.mxu0 %v722_v6  ;;  %479 = vmatpush1.bf16.msra.mxu1 %v723_v7  ;;  %v740_v18 = vld [vmem:[%s1052_s1 + $0x80] ss:$16 sps:$4 sm:$0xff]   ;;  %v741_v19 = vld [vmem:[%s1052_s1 + $0x88] ss:$16 sps:$4 sm:$0xff]   ;;  %v742_v20 = vld [vmem:[%s1052_s1 + $0xa4] ss:$16 sps:$4 sm:$0xff]  }
   0x8   :  { %437 = vmatprep.subr.bf16.mxu0 %v724_v8  ;;  %480 = vmatprep.subr.bf16.mxu1 %v726_v9  ;;  %v744_v21 = vld [vmem:[%s1052_s1 + $0xac] ss:$16 sps:$4 sm:$0xff]   ;;  %v746_v22 = vld [vmem:[%s1052_s1 + $0xa0] ss:$16 sps:$4 sm:$0xff]   ;;  %v747_v23 = vld [vmem:[%s1052_s1 + $0xa8] ss:$16 sps:$4 sm:$0xff]  }
   0x9   :  { %v748_v24 = vld [vmem:[%s1052_s1 + $0xc4] ss:$16 sps:$4 sm:$0xff]   ;;  %v750_v25 = vld [vmem:[%s1052_s1 + $0xcc] ss:$16 sps:$4 sm:$0xff]   ;;  %v752_v26 = vld [vmem:[%s1052_s1 + $0xc0] ss:$16 sps:$4 sm:$0xff]  }
   0xa   :  { %v753_v27 = vld [vmem:[%s1052_s1 + $0xc8] ss:$16 sps:$4 sm:$0xff]   ;;  %v754_v28 = vld [vmem:[%s1052_s1 + $0xe4] ss:$16 sps:$4 sm:$0xff]   ;;  %v756_v29 = vld [vmem:[%s1052_s1 + $0xec] ss:$16 sps:$4 sm:$0xff]  }
   0xb   :  { %438 = vmatpush1.bf16.msra.mxu0 %v728_v10  ;;  %481 = vmatpush1.bf16.msra.mxu1 %v729_v11  ;;  %v758_v30 = vld [vmem:[%s1052_s1 + $0xe0] ss:$16 sps:$4 sm:$0xff]   ;;  %v759_v31 = vld [vmem:[%s1052_s1 + $0xe8] ss:$16 sps:$4 sm:$0xff]   ;;  %v760_v32 = vld [vmem:[%s1052_s1 + $0x104] ss:$16 sps:$4 sm:$0xff]  }
   0xc   :  { %439 = vmatprep.subr.bf16.mxu0 %v730_v12  ;;  %482 = vmatprep.subr.bf16.mxu1 %v732_v13  ;;  %v762_v33 = vld [vmem:[%s1052_s1 + $0x10c] ss:$16 sps:$4 sm:$0xff]   ;;  %v764_v34 = vld [vmem:[%s1052_s1 + $0x100] ss:$16 sps:$4 sm:$0xff]   ;;  %v765_v35 = vld [vmem:[%s1052_s1 + $0x108] ss:$16 sps:$4 sm:$0xff]  }
   0xd   :  { %v766_v36 = vld [vmem:[%s1052_s1 + $0x124] ss:$16 sps:$4 sm:$0xff]   ;;  %v768_v37 = vld [vmem:[%s1052_s1 + $0x12c] ss:$16 sps:$4 sm:$0xff]   ;;  %v770_v38 = vld [vmem:[%s1052_s1 + $0x120] ss:$16 sps:$4 sm:$0xff]  }
   0xe   :  { %v771_v39 = vld [vmem:[%s1052_s1 + $0x128] ss:$16 sps:$4 sm:$0xff]   ;;  %v772_v40 = vld [vmem:[%s1052_s1 + $0x144] ss:$16 sps:$4 sm:$0xff]   ;;  %v774_v41 = vld [vmem:[%s1052_s1 + $0x14c] ss:$16 sps:$4 sm:$0xff]  }
   0xf   :  { %440 = vmatpush1.bf16.msra.mxu0 %v734_v14  ;;  %483 = vmatpush1.bf16.msra.mxu1 %v735_v15  ;;  %v776_v42 = vld [vmem:[%s1052_s1 + $0x140] ss:$16 sps:$4 sm:$0xff]   ;;  %v777_v43 = vld [vmem:[%s1052_s1 + $0x148] ss:$16 sps:$4 sm:$0xff]   ;;  %v778_v44 = vld [vmem:[%s1052_s1 + $0x164] ss:$16 sps:$4 sm:$0xff]  }
  0x10   :  { %441 = vmatprep.subr.bf16.mxu0 %v736_v16  ;;  %484 = vmatprep.subr.bf16.mxu1 %v738_v17  ;;  %v780_v45 = vld [vmem:[%s1052_s1 + $0x16c] ss:$16 sps:$4 sm:$0xff]   ;;  %v782_v47 = vld [vmem:[%s1052_s1 + $0x160] ss:$16 sps:$4 sm:$0xff]   ;;  %v783_v48 = vld [vmem:[%s1052_s1 + $0x168] ss:$16 sps:$4 sm:$0xff]  }
  0x11   :  { %v810_v46 = vld [vmem:[%s1053_s0 + $0x4] ss:$8 sps:$4 sm:$0xff]   ;;  %v788_v51 = vld [vmem:[%s1052_s1 + $0x180] ss:$16 sps:$4 sm:$0xff]   ;;  %v789_v52 = vld [vmem:[%s1052_s1 + $0x188] ss:$16 sps:$4 sm:$0xff]  }
  0x12   :  { %v784_v49 = vld [vmem:[%s1052_s1 + $0x184] ss:$16 sps:$4 sm:$0xff]   ;;  %v786_v50 = vld [vmem:[%s1052_s1 + $0x18c] ss:$16 sps:$4 sm:$0xff]   ;;  %465 = vmatprep.mubr.bf16.mxu0 %v810_v46  ;;  %508 = vmatprep.mubr.bf16.mxu1 %v810_v46  ;;  %v794_v55 = vld [vmem:[%s1052_s1 + $0x1a0] ss:$16 sps:$4 sm:$0xff]  }
  0x13   :  { %442 = vmatpush1.bf16.msra.mxu0 %v740_v18  ;;  %485 = vmatpush1.bf16.msra.mxu1 %v741_v19  ;;  %v790_v53 = vld [vmem:[%s1052_s1 + $0x1a4] ss:$16 sps:$4 sm:$0xff]   ;;  %v792_v54 = vld [vmem:[%s1052_s1 + $0x1ac] ss:$16 sps:$4 sm:$0xff]   ;;  %v795_v56 = vld [vmem:[%s1052_s1 + $0x1a8] ss:$16 sps:$4 sm:$0xff]  }
  0x14   :  { %443 = vmatprep.subr.bf16.mxu0 %v742_v20  ;;  %486 = vmatprep.subr.bf16.mxu1 %v744_v21  ;;  %v796_v57 = vld [vmem:[%s1052_s1 + $0x1c4] ss:$16 sps:$4 sm:$0xff]   ;;  %v798_v58 = vld [vmem:[%s1052_s1 + $0x1cc] ss:$16 sps:$4 sm:$0xff]   ;;  %v800_v59 = vld [vmem:[%s1052_s1 + $0x1c0] ss:$16 sps:$4 sm:$0xff]  }
  0x15   :  { %v801_v60 = vld [vmem:[%s1052_s1 + $0x1c8] ss:$16 sps:$4 sm:$0xff]   ;;  %v802_v61 = vld [vmem:[%s1052_s1 + $0x1e4] ss:$16 sps:$4 sm:$0xff]   ;;  %v804_v62 = vld [vmem:[%s1052_s1 + $0x1ec] ss:$16 sps:$4 sm:$0xff]  }
  0x16   :  { %v806_v63 = vld [vmem:[%s1052_s1 + $0x1e0] ss:$16 sps:$4 sm:$0xff]   ;;  %v807_v0 = vld [vmem:[%s1052_s1 + $0x1e8] ss:$16 sps:$4 sm:$0xff]   ;;  %v549_v3 = vshrl.u32 %v548_v2, 7 }
  0x17   :  { %444 = vmatpush1.bf16.msra.mxu0 %v746_v22  ;;  %487 = vmatpush1.bf16.msra.mxu1 %v747_v23  ;;  %v808_v1 = vld [vmem:[%s1053_s0] ss:$8 sps:$4 sm:$0xff]  }
  0x18   :  { %445 = vmatprep.subr.bf16.mxu0 %v748_v24  ;;  %488 = vmatprep.subr.bf16.mxu1 %v750_v25  ;;  %v550_v4 = vsub.s32 0, %v549_v3  ;;  %v558_v5 = vsub.s32 2, %v549_v3  ;;  %v546_v6 = vld [vmem:[%s1054_s2] sm:$0xf]  ;;  %v554_v7 = vsub.s32 1, %v549_v3  ;;  %v562_v8 = vsub.s32 3, %v549_v3 }
  0x19   :  { %v576_v9 = vld [vmem:[%s1055_s3] sm:$0xf] }
  0x1a   :  { %v551_v10 = vrot.slane %v546_v6, %v550_v4  ;;  %v559_v11 = vrot.slane %v546_v6, %v558_v5  ;;  %v555_v12 = vrot.slane %v546_v6, %v554_v7  ;;  %v563_v13 = vrot.slane %v546_v6, %v562_v8 }
  0x1b   :  { %446 = vmatpush1.bf16.msra.mxu0 %v752_v26  ;;  %489 = vmatpush1.bf16.msra.mxu1 %v753_v27  ;;  %v581_v14 = vrot.slane %v576_v9, %v550_v4  ;;  %v589_v15 = vrot.slane %v576_v9, %v558_v5  ;;  %v585_v18 = vrot.slane %v576_v9, %v554_v7 }
  0x1c   :  { %447 = vmatprep.subr.bf16.mxu0 %v754_v28  ;;  %490 = vmatprep.subr.bf16.mxu1 %v756_v29  ;;  %v593_v19 = vrot.slane %v576_v9, %v562_v8 }
  0x1f   :  { %448 = vmatpush1.bf16.msra.mxu0 %v758_v30  ;;  %491 = vmatpush1.bf16.msra.mxu1 %v759_v31 }
  0x20   :  { %449 = vmatprep.subr.bf16.mxu0 %v760_v32  ;;  %492 = vmatprep.subr.bf16.mxu1 %v762_v33 }
  0x23   :  { %450 = vmatpush1.bf16.msra.mxu0 %v764_v34  ;;  %493 = vmatpush1.bf16.msra.mxu1 %v765_v35 }
  0x24   :  { %451 = vmatprep.subr.bf16.mxu0 %v766_v36  ;;  %494 = vmatprep.subr.bf16.mxu1 %v768_v37 }
  0x27   :  { %452 = vmatpush1.bf16.msra.mxu0 %v770_v38  ;;  %495 = vmatpush1.bf16.msra.mxu1 %v771_v39 }
  0x28   :  { %453 = vmatprep.subr.bf16.mxu0 %v772_v40  ;;  %496 = vmatprep.subr.bf16.mxu1 %v774_v41 }
  0x2b   :  { %454 = vmatpush1.bf16.msra.mxu0 %v776_v42  ;;  %497 = vmatpush1.bf16.msra.mxu1 %v777_v43 }
  0x2c   :  { %455 = vmatprep.subr.bf16.mxu0 %v778_v44  ;;  %498 = vmatprep.subr.bf16.mxu1 %v780_v45 }
  0x2f   :  { %456 = vmatpush1.bf16.msra.mxu0 %v782_v47  ;;  %499 = vmatpush1.bf16.msra.mxu1 %v783_v48 }
  0x30   :  { %457 = vmatprep.subr.bf16.mxu0 %v784_v49  ;;  %500 = vmatprep.subr.bf16.mxu1 %v786_v50 }
  0x33   :  { %458 = vmatpush1.bf16.msra.mxu0 %v788_v51  ;;  %501 = vmatpush1.bf16.msra.mxu1 %v789_v52 }
  0x34   :  { %459 = vmatprep.subr.bf16.mxu0 %v790_v53  ;;  %502 = vmatprep.subr.bf16.mxu1 %v792_v54 }
  0x37   :  { %460 = vmatpush1.bf16.msra.mxu0 %v794_v55  ;;  %503 = vmatpush1.bf16.msra.mxu1 %v795_v56 }
  0x38   :  { %461 = vmatprep.subr.bf16.mxu0 %v796_v57  ;;  %504 = vmatprep.subr.bf16.mxu1 %v798_v58 }
  0x3b   :  { %462 = vmatpush1.bf16.msra.mxu0 %v800_v59  ;;  %505 = vmatpush1.bf16.msra.mxu1 %v801_v60 }
  0x3c   :  { %463 = vmatprep.subr.bf16.mxu0 %v802_v61  ;;  %506 = vmatprep.subr.bf16.mxu1 %v804_v62 }
  0x3f   :  { %464 = vmatpush1.bf16.msra.mxu0 %v806_v63  ;;  %507 = vmatpush1.bf16.msra.mxu1 %v807_v0 }
  0x42   :  { %466 = vmatmul.mubr.bf16.vlgmr.msra.gmra.mrb[0].mxu0 %v808_v1  ;;  %509 = vmatmul.mubr.bf16.vlgmr.msra.gmra.mrb[0].mxu1 %v808_v1 }
 0x115   :  { %v467_v16 = vpop.f32.mrb[0].mxu0  ;;  %v510_v17 = vpop.f32.mrb[0].mxu1 }
 0x116   :  { %v568_v20 = vmul.f32 %v551_v10, %v467_v16  ;;  %v570_v21 = vmul.f32 %v559_v11, %v510_v17  ;;  %v469_v22 = vpop.f32.mrb[1].mxu0  ;;  %v512_v23 = vpop.f32.mrb[1].mxu1 }
 0x117   :  { %v569_v24 = vmul.f32 %v555_v12, %v469_v22  ;;  %v571_v25 = vmul.f32 %v563_v13, %v512_v23  ;;  %v471_v26 = vpop.f32.mrb[2].mxu0  ;;  %v514_v27 = vpop.f32.mrb[2].mxu1 }
 0x118   :  { %v598_v28 = vadd.f32 %v581_v14, %v568_v20  ;;  %v600_v29 = vadd.f32 %v589_v15, %v570_v21  ;;  %v572_v30 = vmul.f32 %v551_v10, %v471_v26  ;;  %v574_v31 = vmul.f32 %v559_v11, %v514_v27  ;;  %v473_v32 = vpop.f32.mrb[3].mxu0  ;;  %v516_v33 = vpop.f32.mrb[3].mxu1 }
 0x119   :  { %v599_v34 = vadd.f32 %v585_v18, %v569_v24  ;;  %v601_v35 = vadd.f32 %v593_v19, %v571_v25  ;;  %v573_v36 = vmul.f32 %v555_v12, %v473_v32  ;;  %v575_v37 = vmul.f32 %v563_v13, %v516_v33 }
 0x11a   :  { %v602_v38 = vadd.f32 %v581_v14, %v572_v30  ;;  %v604_v39 = vadd.f32 %v589_v15, %v574_v31 }
 0x11b   :  { %v708_v40 = vpack.c.bf16 %v599_v34, %v598_v28  ;;  %v709_v41 = vpack.c.bf16 %v601_v35, %v600_v29  ;;  %v603_v42 = vadd.f32 %v585_v18, %v573_v36  ;;  %v605_v43 = vadd.f32 %v593_v19, %v575_v37 }
 0x11d   :  { %630 = vst [vmem:[%s1056_s4] sm:$0xff] %v708_v40  ;;  %631 = vst [vmem:[%s1056_s4 + $0x8] sm:$0xff] %v709_v41  ;;  %v710_v44 = vpack.c.bf16 %v603_v42, %v602_v38  ;;  %v711_v45 = vpack.c.bf16 %v605_v43, %v604_v39 }
 0x11f   :  { %632 = vst [vmem:[%s1056_s4 + $0x10] sm:$0xff] %v710_v44  ;;  %633 = vst [vmem:[%s1056_s4 + $0x18] sm:$0xff] %v711_v45 }

// kernel: forward.38
= control target key start
LH: loop header
LB: loop body
LE: loop exit
PB: predicated region body
PF: predicated region fallthrough
CT: control target
= control target key end

     0   :  { %s1294_s15 = smov 0   ;;  %s1296_s16 = smov 0   ;;  %s1452_s0 = inlined_call_operand.vmem [shape: bf16[16,4608], index: 0, kind: input, shape index: {}]   ;;  %s1453_s1 = inlined_call_operand.vmem [shape: bf16[4608,512], index: 1, kind: input, shape index: {}]   ;;  %s1454_s2 = inlined_call_operand.vmem [shape: f32[1,512], index: 2, kind: input, shape index: {}]   ;;  %s1455_s3 = inlined_call_operand.vmem [shape: f32[1,512], index: 3, kind: input, shape index: {}]   ;;  %s1456_s4 = inlined_call_operand.vmem [shape: bf16[16,512], index: 4, kind: output, shape index: {}]  }
   0x1   :  { %s1298_s17 = smov 0   ;;  %s1300_s18 = smov 0  }
   0x2   :  { %s1302_s19 = smov 0  }
   0x3 LB: > { %s23_s20 = sadd.s32 1, %s1262_s18  ;;  %p42_p1 = scmp.ne.s32.totalorder %s1254_s16, %s1250_s15  ;;  %s1266_s19 = sphi %s1302_s19, %s14_s19   ;;  %s1262_s18 = sphi %s1300_s18, %s1460_s18   ;;  %s1258_s17 = sphi %s1298_s17, %s1459_s17   ;;  %s1254_s16 = sphi %s1296_s16, %s1458_s16   ;;  %s1250_s15 = sphi %s1294_s15, %s1457_s15  }
   0x4   : > { %p24_p0 = scmp.ge.s32.totalorder %s23_s20, 18  ;;  %p43_p2 = scmp.eq.s32.totalorder %s1266_s19, 0 }
   0x5   : > { %s35_s22 = sadd.s32 1, %s1254_s16  ;;  %p997_p5 = scmp.ge.s32.totalorder %s1266_s19, 18 }
   0x6   : > { %s1462_s20 = smov (%p24_p0, %s23_s20), 0  ;;  %p44_p3 = por %p43_p2, %p42_p1 }
   0x7   : > { %s31_s21 = ssub.s32 %s1262_s18, %s1462_s20  ;;  %168 = sbr.rel (%p997_p5) target bundleno = 21 (0x15), region = 24 }
   0x8   : > { %p33_p4 = scmp.eq.s32.totalorder %s31_s21, 0 }
   0xa   : > { %s1329_s23 = scalar_select %p33_p4, %s1254_s16, %s35_s22  }
   0xe   : > { %171 = sbr.rel (!%p44_p3) target bundleno = 21 (0x15), region = 28  ;;  %s173_s24 = sand.u32 (%p44_p3), 1, %s1254_s16  }
   0xf   : > { %s1082_s25 = sshll.u32 (%p44_p3), %s1262_s18, 3  ;;  %s998_s26 = sshll.u32 (%p44_p3), %s173_s24, 4 }
  0x10   : > { %s181_s29 = scalar_lea.vmem (%p44_p3), %s1452_s0, %s1082_s25  ;;  %s175_s30 = scalar_lea.vmem (%p44_p3), [#allocation3], %s998_s26 }
  0x11   : > { %v211_v0 = vld [vmem:[%s181_s29] sm:$0xff] (%p44_p3)  ;;  %v213_v1 = vld [vmem:[%s181_s29 + $0x90] sm:$0xff] (%p44_p3) }
  0x12   : > { %212 = vst [vmem:[%s175_s30] sm:$0xff] (%p44_p3), %v211_v0  ;;  %214 = vst [vmem:[%s175_s30 + $0x8] sm:$0xff] (%p44_p3), %v213_v1 }
  0x15 PF: > { %p1001_p6 = scmp.ge.s32.totalorder %s1266_s19, 1  ;;  %p229_p7 = scmp.lt.s32.totalorder %s1266_s19, 19 }
  0x17   : > { %p230_p8 = pnand %p1001_p6, %p229_p7 }
  0x18   : > { %s236_s5 = sand.u32 (!%p230_p8), 1, %s1250_s15   ;;  %s1003_s6 = sshll.u32 (!%p230_p8), %s1258_s17, 5 }
  0x19   : > { %233 = sbr.rel (%p230_p8) target bundleno = 338 (0x152), region = 70  ;;  %s1341_s7 = sshll.u32 (!%p230_p8), %s236_s5, 4 }
  0x1a   : > { %p271_p9 = scmp.lt.s32.totalorder (!%p230_p8), %s1003_s6, 575  ;;  %s238_s12 = scalar_lea.vmem (!%p230_p8), [#allocation3], %s1341_s7 }
  0x1b   : > { %p1006_p10 = scmp.ne.s32.totalorder (!%p230_p8), %s1258_s17, 0 }
  0x20   : > { %s1464_s6 = smov (!%p271_p9, %s1003_s6), 575  ;;  %287 = sbr.rel (%p1006_p10) target bundleno = 39 (0x27), region = 78 }
  0x21   : > { %s1083_s8 = sshll.u32 %s1464_s6, 4  ;;  %v1268_v2 = vmov (!%p1006_p10), 0.0  }
  0x22   : > { %s1346_s11 = scalar_lea.vmem %s1453_s1, %s1083_s8  ;;  %288 = vst [vmem:[#allocation2] sm:$0xff] (!%p1006_p10), %v1268_v2  ;;  %289 = vst [vmem:[#allocation2 + $0x8] sm:$0xff] (!%p1006_p10), %v1268_v2 }
  0x23   : > { %290 = vst [vmem:[#allocation2 + $0x10] sm:$0xff] (!%p1006_p10), %v1268_v2  ;;  %291 = vst [vmem:[#allocation2 + $0x18] sm:$0xff] (!%p1006_p10), %v1268_v2 }
  0x24   : > { %292 = vst [vmem:[#allocation2 + $0x20] sm:$0xff] (!%p1006_p10), %v1268_v2  ;;  %293 = vst [vmem:[#allocation2 + $0x28] sm:$0xff] (!%p1006_p10), %v1268_v2 }
  0x25   : > { %294 = vst [vmem:[#allocation2 + $0x30] sm:$0xff] (!%p1006_p10), %v1268_v2  ;;  %295 = vst [vmem:[#allocation2 + $0x38] sm:$0xff] (!%p1006_p10), %v1268_v2 }
  0x27 PF: > { %v1129_v3 = vld [vmem:[%s1346_s11 + $0x4] ss:$16 sps:$4 sm:$0xff]   ;;  %v1131_v4 = vld [vmem:[%s1346_s11 + $0xc] ss:$16 sps:$4 sm:$0xff]   ;;  %v1133_v5 = vld [vmem:[%s1346_s11] ss:$16 sps:$4 sm:$0xff]  }
  0x28   : > { %700 = vmatprep.subr.bf16.mxu0 %v1129_v3  ;;  %v1134_v6 = vld [vmem:[%s1346_s11 + $0x8] ss:$16 sps:$4 sm:$0xff]   ;;  %743 = vmatprep.subr.bf16.mxu1 %v1131_v4  ;;  %v1135_v7 = vld [vmem:[%s1346_s11 + $0x24] ss:$16 sps:$4 sm:$0xff]   ;;  %v1137_v8 = vld [vmem:[%s1346_s11 + $0x2c] ss:$16 sps:$4 sm:$0xff]  }
  0x29   : > { %701 = vmatpush1.bf16.msra.mxu0 %v1133_v5  ;;  %744 = vmatpush1.bf16.msra.mxu1 %v1134_v6  ;;  %v1139_v9 = vld [vmem:[%s1346_s11 + $0x20] ss:$16 sps:$4 sm:$0xff]   ;;  %v1140_v10 = vld [vmem:[%s1346_s11 + $0x28] ss:$16 sps:$4 sm:$0xff]   ;;  %v1141_v11 = vld [vmem:[%s1346_s11 + $0x44] ss:$16 sps:$4 sm:$0xff]  }
  0x2a   : > { %702 = vmatprep.subr.bf16.mxu0 %v1135_v7  ;;  %745 = vmatprep.subr.bf16.mxu1 %v1137_v8  ;;  %v1143_v12 = vld [vmem:[%s1346_s11 + $0x4c] ss:$16 sps:$4 sm:$0xff]   ;;  %v1145_v13 = vld [vmem:[%s1346_s11 + $0x40] ss:$16 sps:$4 sm:$0xff]   ;;  %v1146_v14 = vld [vmem:[%s1346_s11 + $0x48] ss:$16 sps:$4 sm:$0xff]  }
  0x2b   : > { %v1147_v15 = vld [vmem:[%s1346_s11 + $0x64] ss:$16 sps:$4 sm:$0xff]   ;;  %v1149_v16 = vld [vmem:[%s1346_s11 + $0x6c] ss:$16 sps:$4 sm:$0xff]   ;;  %v1151_v17 = vld [vmem:[%s1346_s11 + $0x60] ss:$16 sps:$4 sm:$0xff]  }
  0x2c   : > { %v1152_v18 = vld [vmem:[%s1346_s11 + $0x68] ss:$16 sps:$4 sm:$0xff]   ;;  %v1153_v19 = vld [vmem:[%s1346_s11 + $0x84] ss:$16 sps:$4 sm:$0xff]   ;;  %v1155_v20 = vld [vmem:[%s1346_s11 + $0x8c] ss:$16 sps:$4 sm:$0xff]  }
  0x2d   : > { %703 = vmatpush1.bf16.msra.mxu0 %v1139_v9  ;;  %746 = vmatpush1.bf16.msra.mxu1 %v1140_v10  ;;  %v1157_v21 = vld [vmem:[%s1346_s11 + $0x80] ss:$16 sps:$4 sm:$0xff]   ;;  %v1158_v22 = vld [vmem:[%s1346_s11 + $0x88] ss:$16 sps:$4 sm:$0xff]   ;;  %v1159_v23 = vld [vmem:[%s1346_s11 + $0xa4] ss:$16 sps:$4 sm:$0xff]  }
  0x2e   : > { %704 = vmatprep.subr.bf16.mxu0 %v1141_v11  ;;  %747 = vmatprep.subr.bf16.mxu1 %v1143_v12  ;;  %v1161_v24 = vld [vmem:[%s1346_s11 + $0xac] ss:$16 sps:$4 sm:$0xff]   ;;  %v1163_v25 = vld [vmem:[%s1346_s11 + $0xa0] ss:$16 sps:$4 sm:$0xff]   ;;  %v1164_v26 = vld [vmem:[%s1346_s11 + $0xa8] ss:$16 sps:$4 sm:$0xff]  }
  0x2f   : > { %v1165_v27 = vld [vmem:[%s1346_s11 + $0xc4] ss:$16 sps:$4 sm:$0xff]   ;;  %v1167_v28 = vld [vmem:[%s1346_s11 + $0xcc] ss:$16 sps:$4 sm:$0xff]   ;;  %v1169_v29 = vld [vmem:[%s1346_s11 + $0xc0] ss:$16 sps:$4 sm:$0xff]  }
  0x30   : > { %v1170_v30 = vld [vmem:[%s1346_s11 + $0xc8] ss:$16 sps:$4 sm:$0xff]   ;;  %v1171_v31 = vld [vmem:[%s1346_s11 + $0xe4] ss:$16 sps:$4 sm:$0xff]   ;;  %v1173_v32 = vld [vmem:[%s1346_s11 + $0xec] ss:$16 sps:$4 sm:$0xff]  }
  0x31   : > { %705 = vmatpush1.bf16.msra.mxu0 %v1145_v13  ;;  %748 = vmatpush1.bf16.msra.mxu1 %v1146_v14  ;;  %v1175_v33 = vld [vmem:[%s1346_s11 + $0xe0] ss:$16 sps:$4 sm:$0xff]   ;;  %v1176_v34 = vld [vmem:[%s1346_s11 + $0xe8] ss:$16 sps:$4 sm:$0xff]   ;;  %v1177_v35 = vld [vmem:[%s1346_s11 + $0x104] ss:$16 sps:$4 sm:$0xff]  }
  0x32   : > { %706 = vmatprep.subr.bf16.mxu0 %v1147_v15  ;;  %749 = vmatprep.subr.bf16.mxu1 %v1149_v16  ;;  %v1179_v36 = vld [vmem:[%s1346_s11 + $0x10c] ss:$16 sps:$4 sm:$0xff]   ;;  %v1181_v37 = vld [vmem:[%s1346_s11 + $0x100] ss:$16 sps:$4 sm:$0xff]   ;;  %v1182_v38 = vld [vmem:[%s1346_s11 + $0x108] ss:$16 sps:$4 sm:$0xff]  }
  0x33   : > { %v1183_v39 = vld [vmem:[%s1346_s11 + $0x124] ss:$16 sps:$4 sm:$0xff]   ;;  %v1185_v40 = vld [vmem:[%s1346_s11 + $0x12c] ss:$16 sps:$4 sm:$0xff]   ;;  %v1187_v41 = vld [vmem:[%s1346_s11 + $0x120] ss:$16 sps:$4 sm:$0xff]  }
  0x34   : > { %v1188_v42 = vld [vmem:[%s1346_s11 + $0x128] ss:$16 sps:$4 sm:$0xff]   ;;  %v1189_v43 = vld [vmem:[%s1346_s11 + $0x144] ss:$16 sps:$4 sm:$0xff]   ;;  %v1191_v44 = vld [vmem:[%s1346_s11 + $0x14c] ss:$16 sps:$4 sm:$0xff]  }
  0x35   : > { %707 = vmatpush1.bf16.msra.mxu0 %v1151_v17  ;;  %750 = vmatpush1.bf16.msra.mxu1 %v1152_v18  ;;  %v1193_v45 = vld [vmem:[%s1346_s11 + $0x140] ss:$16 sps:$4 sm:$0xff]   ;;  %v1194_v46 = vld [vmem:[%s1346_s11 + $0x148] ss:$16 sps:$4 sm:$0xff]   ;;  %v1195_v47 = vld [vmem:[%s1346_s11 + $0x164] ss:$16 sps:$4 sm:$0xff]  }
  0x36   : > { %708 = vmatprep.subr.bf16.mxu0 %v1153_v19  ;;  %751 = vmatprep.subr.bf16.mxu1 %v1155_v20  ;;  %v1197_v48 = vld [vmem:[%s1346_s11 + $0x16c] ss:$16 sps:$4 sm:$0xff]   ;;  %v1199_v50 = vld [vmem:[%s1346_s11 + $0x160] ss:$16 sps:$4 sm:$0xff]   ;;  %v1200_v51 = vld [vmem:[%s1346_s11 + $0x168] ss:$16 sps:$4 sm:$0xff]  }
  0x37   : > { %v1227_v49 = vld [vmem:[%s238_s12 + $0x4] ss:$8 sps:$4 sm:$0xff]   ;;  %v1205_v54 = vld [vmem:[%s1346_s11 + $0x180] ss:$16 sps:$4 sm:$0xff]   ;;  %v1206_v55 = vld [vmem:[%s1346_s11 + $0x188] ss:$16 sps:$4 sm:$0xff]  }
  0x38   : > { %v1201_v52 = vld [vmem:[%s1346_s11 + $0x184] ss:$16 sps:$4 sm:$0xff]   ;;  %v1203_v53 = vld [vmem:[%s1346_s11 + $0x18c] ss:$16 sps:$4 sm:$0xff]   ;;  %732 = vmatprep.mubr.bf16.mxu0 %v1227_v49  ;;  %775 = vmatprep.mubr.bf16.mxu1 %v1227_v49  ;;  %v1211_v58 = vld [vmem:[%s1346_s11 + $0x1a0] ss:$16 sps:$4 sm:$0xff]  }
  0x39   : > { %709 = vmatpush1.bf16.msra.mxu0 %v1157_v21  ;;  %752 = vmatpush1.bf16.msra.mxu1 %v1158_v22  ;;  %v1207_v56 = vld [vmem:[%s1346_s11 + $0x1a4] ss:$16 sps:$4 sm:$0xff]   ;;  %v1209_v57 = vld [vmem:[%s1346_s11 + $0x1ac] ss:$16 sps:$4 sm:$0xff]   ;;  %v1212_v59 = vld [vmem:[%s1346_s11 + $0x1a8] ss:$16 sps:$4 sm:$0xff]  }
  0x3a   : > { %710 = vmatprep.subr.bf16.mxu0 %v1159_v23  ;;  %753 = vmatprep.subr.bf16.mxu1 %v1161_v24  ;;  %v1213_v60 = vld [vmem:[%s1346_s11 + $0x1c4] ss:$16 sps:$4 sm:$0xff]   ;;  %v1215_v61 = vld [vmem:[%s1346_s11 + $0x1cc] ss:$16 sps:$4 sm:$0xff]   ;;  %v1217_v62 = vld [vmem:[%s1346_s11 + $0x1c0] ss:$16 sps:$4 sm:$0xff]  }
  0x3b   : > { %v1218_v63 = vld [vmem:[%s1346_s11 + $0x1c8] ss:$16 sps:$4 sm:$0xff]   ;;  %v1219_v0 = vld [vmem:[%s1346_s11 + $0x1e4] ss:$16 sps:$4 sm:$0xff]   ;;  %v1221_v1 = vld [vmem:[%s1346_s11 + $0x1ec] ss:$16 sps:$4 sm:$0xff]  }
  0x3c   : > { %v1223_v2 = vld [vmem:[%s1346_s11 + $0x1e0] ss:$16 sps:$4 sm:$0xff]   ;;  %v1224_v3 = vld [vmem:[%s1346_s11 + $0x1e8] ss:$16 sps:$4 sm:$0xff]   ;;  %p1073_p11 = scmp.ne.s32.totalorder %s1258_s17, 17 }
  0x3d   : > { %711 = vmatpush1.bf16.msra.mxu0 %v1163_v25  ;;  %754 = vmatpush1.bf16.msra.mxu1 %v1164_v26  ;;  %v1225_v4 = vld [vmem:[%s238_s12] ss:$8 sps:$4 sm:$0xff]  }
  0x3e   : > { %712 = vmatprep.subr.bf16.mxu0 %v1165_v27  ;;  %755 = vmatprep.subr.bf16.mxu1 %v1167_v28  ;;  %v296_v5 = vld [vmem:[#allocation2] sm:$0xff]  ;;  %v298_v6 = vld [vmem:[#allocation2 + $0x10] sm:$0xff]  ;;  %v297_v7 = vld [vmem:[#allocation2 + $0x8] sm:$0xff] }
  0x3f   : > { %v299_v8 = vld [vmem:[#allocation2 + $0x18] sm:$0xff]  ;;  %v300_v11 = vld [vmem:[#allocation2 + $0x20] sm:$0xff]  ;;  %v302_v12 = vld [vmem:[#allocation2 + $0x30] sm:$0xff] }
  0x40   : > { %v301_v17 = vld [vmem:[#allocation2 + $0x28] sm:$0xff]  ;;  %v303_v18 = vld [vmem:[#allocation2 + $0x38] sm:$0xff] }
  0x41   : > { %713 = vmatpush1.bf16.msra.mxu0 %v1169_v29  ;;  %756 = vmatpush1.bf16.msra.mxu1 %v1170_v30  ;;  %v816_v29 = vlaneseq (!%p1073_p11) }
  0x42   : > { %714 = vmatprep.subr.bf16.mxu0 %v1171_v31  ;;  %757 = vmatprep.subr.bf16.mxu1 %v1173_v32  ;;  %v814_v31 = vld [vmem:[%s1454_s2] sm:$0xf] (!%p1073_p11) }
  0x43   : > { %v817_v30 = vshrl.u32 (!%p1073_p11), %v816_v29, 7  ;;  %v844_v32 = vld [vmem:[%s1455_s3] sm:$0xf] (!%p1073_p11) }
  0x45   : > { %715 = vmatpush1.bf16.msra.mxu0 %v1175_v33  ;;  %758 = vmatpush1.bf16.msra.mxu1 %v1176_v34 }
  0x46   : > { %716 = vmatprep.subr.bf16.mxu0 %v1177_v35  ;;  %759 = vmatprep.subr.bf16.mxu1 %v1179_v36  ;;  %v818_v35 = vsub.s32 (!%p1073_p11), 0, %v817_v30  ;;  %v822_v36 = vsub.s32 (!%p1073_p11), 1, %v817_v30 }
  0x49   : > { %717 = vmatpush1.bf16.msra.mxu0 %v1181_v37  ;;  %760 = vmatpush1.bf16.msra.mxu1 %v1182_v38  ;;  %v826_v37 = vsub.s32 (!%p1073_p11), 2, %v817_v30  ;;  %v830_v38 = vsub.s32 (!%p1073_p11), 3, %v817_v30 }
  0x4a   : > { %718 = vmatprep.subr.bf16.mxu0 %v1183_v39  ;;  %761 = vmatprep.subr.bf16.mxu1 %v1185_v40 }
  0x4b   : > { %v827_v49 = vrot.slane (!%p1073_p11), %v814_v31, %v826_v37 }
  0x4d   : > { %719 = vmatpush1.bf16.msra.mxu0 %v1187_v41  ;;  %762 = vmatpush1.bf16.msra.mxu1 %v1188_v42  ;;  %v819_v42 = vrot.slane (!%p1073_p11), %v814_v31, %v818_v35 }
  0x4e   : > { %720 = vmatprep.subr.bf16.mxu0 %v1189_v43  ;;  %763 = vmatprep.subr.bf16.mxu1 %v1191_v44  ;;  %v823_v43 = vrot.slane (!%p1073_p11), %v814_v31, %v822_v36  ;;  %v849_v44 = vrot.slane (!%p1073_p11), %v844_v32, %v818_v35 }
  0x51   : > { %721 = vmatpush1.bf16.msra.mxu0 %v1193_v45  ;;  %764 = vmatpush1.bf16.msra.mxu1 %v1194_v46  ;;  %v853_v45 = vrot.slane (!%p1073_p11), %v844_v32, %v822_v36 }
  0x52   : > { %722 = vmatprep.subr.bf16.mxu0 %v1195_v47  ;;  %765 = vmatprep.subr.bf16.mxu1 %v1197_v48 }
  0x55   : > { %723 = vmatpush1.bf16.msra.mxu0 %v1199_v50  ;;  %766 = vmatpush1.bf16.msra.mxu1 %v1200_v51  ;;  %v831_v50 = vrot.slane (!%p1073_p11), %v814_v31, %v830_v38  ;;  %v857_v51 = vrot.slane (!%p1073_p11), %v844_v32, %v826_v37 }
  0x56   : > { %724 = vmatprep.subr.bf16.mxu0 %v1201_v52  ;;  %767 = vmatprep.subr.bf16.mxu1 %v1203_v53  ;;  %v861_v52 = vrot.slane (!%p1073_p11), %v844_v32, %v830_v38 }
  0x59   : > { %725 = vmatpush1.bf16.msra.mxu0 %v1205_v54  ;;  %768 = vmatpush1.bf16.msra.mxu1 %v1206_v55 }
  0x5a   : > { %726 = vmatprep.subr.bf16.mxu0 %v1207_v56  ;;  %769 = vmatprep.subr.bf16.mxu1 %v1209_v57 }
  0x5d   : > { %727 = vmatpush1.bf16.msra.mxu0 %v1211_v58  ;;  %770 = vmatpush1.bf16.msra.mxu1 %v1212_v59 }
  0x5e   : > { %728 = vmatprep.subr.bf16.mxu0 %v1213_v60  ;;  %771 = vmatprep.subr.bf16.mxu1 %v1215_v61 }
  0x61   : > { %729 = vmatpush1.bf16.msra.mxu0 %v1217_v62  ;;  %772 = vmatpush1.bf16.msra.mxu1 %v1218_v63 }
  0x62   : > { %730 = vmatprep.subr.bf16.mxu0 %v1219_v0  ;;  %773 = vmatprep.subr.bf16.mxu1 %v1221_v1 }
  0x65   : > { %731 = vmatpush1.bf16.msra.mxu0 %v1223_v2  ;;  %774 = vmatpush1.bf16.msra.mxu1 %v1224_v3 }
  0x68   : > { %733 = vmatmul.mubr.bf16.vlgmr.msra.gmra.mrb[0].mxu0 %v1225_v4  ;;  %776 = vmatmul.mubr.bf16.vlgmr.msra.gmra.mrb[0].mxu1 %v1225_v4 }
 0x13b   : > { %v734_v9 = vpop.f32.mrb[0].mxu0  ;;  %v777_v10 = vpop.f32.mrb[0].mxu1  ;;  %805 = sbr.rel (%p1073_p11) target bundleno = 338 (0x152), region = 82 }
 0x13c   : > { %v786_v13 = vadd.f32 %v734_v9, %v296_v5  ;;  %v788_v14 = vadd.f32 %v777_v10, %v298_v6  ;;  %v736_v15 = vpop.f32.mrb[1].mxu0  ;;  %v779_v16 = vpop.f32.mrb[1].mxu1 }
 0x13d   : > { %v787_v19 = vadd.f32 %v736_v15, %v297_v7  ;;  %v789_v20 = vadd.f32 %v779_v16, %v299_v8  ;;  %v738_v21 = vpop.f32.mrb[2].mxu0  ;;  %v781_v22 = vpop.f32.mrb[2].mxu1 }
 0x13e   : > { %794 = vst [vmem:[#allocation2] sm:$0xff] %v786_v13  ;;  %796 = vst [vmem:[#allocation2 + $0x10] sm:$0xff] %v788_v14  ;;  %v790_v23 = vadd.f32 %v738_v21, %v300_v11  ;;  %v792_v24 = vadd.f32 %v781_v22, %v302_v12  ;;  %v740_v25 = vpop.f32.mrb[3].mxu0  ;;  %v783_v26 = vpop.f32.mrb[3].mxu1 }
 0x13f   : > { %795 = vst [vmem:[#allocation2 + $0x8] sm:$0xff] %v787_v19  ;;  %797 = vst [vmem:[#allocation2 + $0x18] sm:$0xff] %v789_v20  ;;  %v791_v27 = vadd.f32 %v740_v25, %v301_v17  ;;  %v793_v28 = vadd.f32 %v783_v26, %v303_v18 }
 0x140   : > { %798 = vst [vmem:[#allocation2 + $0x20] sm:$0xff] %v790_v23  ;;  %800 = vst [vmem:[#allocation2 + $0x30] sm:$0xff] %v792_v24 }
 0x141   : > { %799 = vst [vmem:[#allocation2 + $0x28] sm:$0xff] %v791_v27  ;;  %801 = vst [vmem:[#allocation2 + $0x38] sm:$0xff] %v793_v28 }
 0x145   : > { %v806_v33 = vld [vmem:[#allocation2] sm:$0xff]  ;;  %v808_v39 = vld [vmem:[#allocation2 + $0x10] sm:$0xff] }
 0x146   : > { %v807_v34 = vld [vmem:[#allocation2 + $0x8] sm:$0xff]  ;;  %v809_v46 = vld [vmem:[#allocation2 + $0x18] sm:$0xff]  ;;  %v836_v53 = vmul.f32 %v819_v42, %v806_v33  ;;  %v838_v57 = vmul.f32 %v827_v49, %v808_v39 }
 0x147   : > { %v810_v40 = vld [vmem:[#allocation2 + $0x20] sm:$0xff]  ;;  %v812_v47 = vld [vmem:[#allocation2 + $0x30] sm:$0xff]  ;;  %v837_v54 = vmul.f32 %v823_v43, %v807_v34  ;;  %v839_v58 = vmul.f32 %v831_v50, %v809_v46 }
 0x148   : > { %v811_v41 = vld [vmem:[#allocation2 + $0x28] sm:$0xff]  ;;  %v813_v48 = vld [vmem:[#allocation2 + $0x38] sm:$0xff]  ;;  %v840_v55 = vmul.f32 %v819_v42, %v810_v40  ;;  %v842_v59 = vmul.f32 %v827_v49, %v812_v47  ;;  %v866_v61 = vadd.f32 %v849_v44, %v836_v53  ;;  %v868_v1 = vadd.f32 %v857_v51, %v838_v57 }
 0x149   : > { %v841_v56 = vmul.f32 %v823_v43, %v811_v41  ;;  %v843_v60 = vmul.f32 %v831_v50, %v813_v48  ;;  %v867_v62 = vadd.f32 %v853_v45, %v837_v54  ;;  %v869_v2 = vadd.f32 %v861_v52, %v839_v58 }
 0x14a   : > { %v870_v63 = vadd.f32 %v849_v44, %v840_v55  ;;  %v872_v3 = vadd.f32 %v857_v51, %v842_v59  ;;  %v874_v5 = vmax.f32 %v866_v61, 0.0  ;;  %v876_v9 = vmax.f32 %v868_v1, 0.0 }
 0x14b   : > { %v871_v0 = vadd.f32 %v853_v45, %v841_v56  ;;  %v873_v4 = vadd.f32 %v861_v52, %v843_v60  ;;  %v875_v6 = vmax.f32 %v867_v62, 0.0  ;;  %v877_v10 = vmax.f32 %v869_v2, 0.0 }
 0x14c   : > { %v878_v7 = vmax.f32 %v870_v63, 0.0  ;;  %v880_v11 = vmax.f32 %v872_v3, 0.0 }
 0x14d   : > { %v879_v8 = vmax.f32 %v871_v0, 0.0  ;;  %v881_v12 = vmax.f32 %v873_v4, 0.0  ;;  %v1084_v13 = vpack.c.bf16 %v875_v6, %v874_v5  ;;  %v1085_v15 = vpack.c.bf16 %v877_v10, %v876_v9 }
 0x14f   : > { %v1086_v14 = vpack.c.bf16 %v879_v8, %v878_v7  ;;  %v1087_v16 = vpack.c.bf16 %v881_v12, %v880_v11  ;;  %906 = vst [vmem:[%s1456_s4] sm:$0xff] %v1084_v13  ;;  %907 = vst [vmem:[%s1456_s4 + $0x8] sm:$0xff] %v1085_v15 }
 0x151   : > { %908 = vst [vmem:[%s1456_s4 + $0x10] sm:$0xff] %v1086_v14  ;;  %909 = vst [vmem:[%s1456_s4 + $0x18] sm:$0xff] %v1087_v16 }
 0x152 PF: > { %s14_s19 = sadd.s32 1, %s1266_s19   ;;  %s1457_s15 = smov %s1254_s16 }
 0x153   : > { %p11_p12 = scmp.ge.s32.totalorder %s14_s19, 20   ;;  %s1458_s16 = smov %s1329_s23 }
 0x154   : > { %s1459_s17 = smov %s1262_s18  ;;  %s1460_s18 = smov %s1462_s20 }
 0x155   :  { %13 = sbr.rel (!%p11_p12) target bundleno = 3 (0x3), region = 120 }

// kernel: forward.37
= control target key start
LH: loop header
LB: loop body
LE: loop exit
PB: predicated region body
PF: predicated region fallthrough
CT: control target
= control target key end

     0   :  { %s1860_s0 = inlined_call_operand.vmem [shape: s32[4], index: 0, kind: input, shape index: {}]   ;;  %s1861_s1 = inlined_call_operand.<no memory space> [shape: s32[1], index: 1, kind: input, shape index: {}]   ;;  %s1862_s2 = inlined_call_operand.vmem [shape: bf16[16,4608], index: 2, kind: input, shape index: {}]   ;;  %s1863_s3 = inlined_call_operand.vmem [shape: bf16[4,4608,512], index: 3, kind: input, shape index: {}]   ;;  %s1864_s4 = inlined_call_operand.vmem [shape: f32[4,16,1], index: 4, kind: input, shape index: {}]   ;;  %s1865_s5 = inlined_call_operand.vmem [shape: f32[1,512], index: 5, kind: input, shape index: {}]   ;;  %s1866_s6 = inlined_call_operand.vmem [shape: f32[1,512], index: 6, kind: input, shape index: {}]   ;;  %s1867_s7 = inlined_call_operand.vmem [shape: bf16[16,512], index: 7, kind: input, shape index: {}]   ;;  %s1868_s8 = inlined_call_operand.vmem [shape: bf16[16,512], index: 8, kind: output, shape index: {}]  }
   0x1   :  { %1869 = sst [smem:[#allocation8_spill]] %s1862_s2  ;;  %s13_s29 = sshll.u32 %s1860_s0, 4  ;;  %s14_s29 = int_to_ptr.vmem [resolvable:$true] %s13_s29 }
   0x2   :  { %17 = sst [smem:[#allocation5]] %s1861_s1  ;;  %s1534_s10 = scalar_lea.vmem %s14_s29, 16 }
   0x3   :  { %p1535_p0 = scmp.ne.s32.totalorder %s14_s29, %s1534_s10  ;;  %p1539_p1 = scmp.lt.s32.totalorder %s14_s29, %s14_s29 }
   0x4   :  { %p1540_p2 = scmp.lt.s32.totalorder %s1534_s10, %s1534_s10 }
   0x6   :  { %p1541_p3 = por %p1540_p2, %p1539_p1 }
   0x8   :  { %p1542_p4 = pnand %p1541_p3, %p1535_p0 }
   0xa   :  { %1545 = shalt.err (!%p1542_p4)  }
   0xb   :  { %s1604_s11 = smov [#allocation4]  }
   0xc   :  { %16 = dma.vmem_to_smem %s14_s29, 16, %s1604_s11, [#allocation3] }
   0xd   :  { %1574 = dma.done.wait [#allocation3], 16 }
   0xe   :  { %1575 = vsyncadd [#allocation3], 4294967280 }
   0xf   :  { %19 = sfence }
  0x10   :  { %s1658_s12 = smov 0   ;;  %s1660_s0 = smov 0  }
  0x11   :  { %s1662_s13 = smov 0   ;;  %s1664_s1 = smov 0  }
  0x12   :  { %s1666_s14 = smov 0   ;;  %s1668_s15 = smov 0  }
  0x13   :  { %s1670_s16 = smov 0  }
  0x14 LB: > { %s37_s17 = sadd.s32 1, %s1594_s14  ;;  %s40_s18 = sadd.s32 1, %s1598_s15  ;;  %s1602_s16 = sphi %s1670_s16, %s25_s16   ;;  %s1598_s15 = sphi %s1668_s15, %s1876_s15   ;;  %s1594_s14 = sphi %s1666_s14, %s1875_s14   ;;  %s1590_s1 = sphi %s1664_s1, %s1874_s1   ;;  %s1586_s13 = sphi %s1662_s13, %s1873_s13   ;;  %s1582_s0 = sphi %s1660_s0, %s1872_s0   ;;  %s1578_s12 = sphi %s1658_s12, %s1871_s12  }
  0x15   : > { %p38_p5 = scmp.ge.s32.totalorder %s37_s17, 4  ;;  %p60_p6 = scmp.ne.s32.totalorder %s1582_s0, %s1578_s12 }
  0x16   : > { %p61_p7 = scmp.eq.s32.totalorder %s1602_s16, 0  ;;  %s53_s20 = sadd.s32 1, %s1582_s0 }
  0x17   : > { %s1878_s17 = smov (%p38_p5, %s37_s17), 0  ;;  %s1880_s18 = smov (!%p38_p5, %s40_s18), %s1598_s15 }
  0x18   : > { %p62_p8 = por %p61_p7, %p60_p6  ;;  %p42_p9 = scmp.ge.s32.totalorder %s1880_s18, 18 }
  0x19   : > { %p1282_p11 = scmp.ge.s32.totalorder %s1602_s16, 72 }
  0x1a   : > { %s1882_s18 = smov (%p42_p9, %s1880_s18), 0 }
  0x1b   : > { %s49_s19 = ssub.s32 %s1598_s15, %s1882_s18  ;;  %264 = sbr.rel (%p1282_p11) target bundleno = 45 (0x2d), region = 28 }
  0x1c   : > { %p51_p10 = scmp.eq.s32.totalorder %s49_s19, 0 }
  0x1e   : > { %s1707_s21 = scalar_select %p51_p10, %s1582_s0, %s53_s20  }
  0x22   : > { %267 = sbr.rel (!%p62_p8) target bundleno = 45 (0x2d), region = 32  ;;  %s269_s22 = sand.u32 (%p62_p8), 1, %s1582_s0  }
  0x23   : > { %s1368_s23 = sshll.u32 (%p62_p8), %s1598_s15, 3  ;;  %s1283_s24 = sshll.u32 (%p62_p8), %s269_s22, 4 }
  0x24   : > { %s1870_s2 = sld [smem:[#allocation8_spill]] (%p62_p8)  ;;  %s271_s28 = scalar_lea.vmem (%p62_p8), [#allocation6], %s1283_s24 }
  0x2a   : > { %s277_s27 = scalar_lea.vmem %s1870_s2, %s1368_s23 }
  0x2b   : > { %v307_v0 = vld [vmem:[%s277_s27] sm:$0xff]  ;;  %v309_v1 = vld [vmem:[%s277_s27 + $0x90] sm:$0xff] }
  0x2c   : > { %308 = vst [vmem:[%s271_s28] sm:$0xff] %v307_v0  ;;  %310 = vst [vmem:[%s271_s28 + $0x8] sm:$0xff] %v309_v1 }
  0x2d PF: > { %p1286_p12 = scmp.ge.s32.totalorder %s1602_s16, 1  ;;  %p354_p13 = scmp.lt.s32.totalorder %s1602_s16, 73 }
  0x2f   : > { %p355_p0 = pnand %p1286_p12, %p354_p13 }
  0x30   : > { %s361_s29 = sand.u32 (!%p355_p0), 1, %s1578_s12   ;;  %s426_s30 = sld [smem:[#allocation4 + %s1586_s13]] (!%p355_p0) }
  0x31   : > { %358 = sbr.rel (%p355_p0) target bundleno = 382 (0x17e), region = 78  ;;  %s1719_s9 = sshll.u32 (!%p355_p0), %s361_s29, 4 }
  0x32   : > { %s1288_s10 = sshll.u32 (!%p355_p0), %s1590_s1, 5  ;;  %s443_s11 = sld [smem:[#allocation4 + %s1586_s13]] (!%p355_p0) }
  0x33   : > { %p430_p1 = scmp.lt.s32.totalorder (!%p355_p0), %s1288_s10, 575  ;;  %p471_p2 = scmp.eq.s32.totalorder (!%p355_p0), %s1590_s1, 0 }
  0x34   : > { %p472_p3 = scmp.eq.s32.totalorder (!%p355_p0), %s1586_s13, 0  ;;  %s363_s2 = scalar_lea.vmem (!%p355_p0), [#allocation6], %s1719_s9 }
  0x36   : > { %p428_p4 = scmp.lt.s32.totalorder (!%p355_p0), %s426_s30, 3  ;;  %p473_p5 = pnand (!%p355_p0), %p472_p3, %p471_p2 }
  0x38   : > { %s1884_s10 = smov (!%p430_p1, %s1288_s10), 575  ;;  %s1886_s30 = smov (!%p428_p4, %s426_s30), 3 }
  0x39   : > { %s1289_s19 = sshll.u32 %s1884_s10, 2  ;;  %p445_p6 = scmp.lt.s32.totalorder %s443_s11, 3  ;;  %v1605_v2 = vmov (!%p473_p5), 0.0  }
  0x3a   : > { %s1374_s20 = smul.u32 2304, %s1886_s30  ;;  %477 = vst [vmem:[#allocation2] sm:$0xff] (!%p473_p5), %v1605_v2  ;;  %478 = vst [vmem:[#allocation2 + $0x8] sm:$0xff] (!%p473_p5), %v1605_v2 }
  0x3b   : > { %s1888_s11 = smov (!%p445_p6, %s443_s11), 3  ;;  %476 = sbr.rel (%p473_p5) target bundleno = 66 (0x42), region = 86 }
  0x3c   : > { %s434_s22 = sadd.s32 %s1374_s20, %s1289_s19  ;;  %s1369_s12 = sshll.u32 %s1888_s11, 4  ;;  %479 = vst [vmem:[#allocation2 + $0x10] sm:$0xff] (!%p473_p5), %v1605_v2  ;;  %480 = vst [vmem:[#allocation2 + $0x18] sm:$0xff] (!%p473_p5), %v1605_v2 }
  0x3d   : > { %s1290_s23 = sshll.u32 %s434_s22, 2  ;;  %s1733_s29 = scalar_lea.vmem %s1864_s4, %s1369_s12  ;;  %481 = vst [vmem:[#allocation2 + $0x20] sm:$0xff] (!%p473_p5), %v1605_v2  ;;  %482 = vst [vmem:[#allocation2 + $0x28] sm:$0xff] (!%p473_p5), %v1605_v2 }
  0x3e   : > { %s1728_s26 = scalar_lea.vmem %s1863_s3, %s1290_s23  ;;  %483 = vst [vmem:[#allocation2 + $0x30] sm:$0xff] (!%p473_p5), %v1605_v2  ;;  %484 = vst [vmem:[#allocation2 + $0x38] sm:$0xff] (!%p473_p5), %v1605_v2 }
  0x42 PF: > { %s485_s30 = sld [smem:[#allocation5]] }
  0x48   : > { %p1293_p7 = scmp.ge.s32.totalorder %s1586_s13, %s485_s30 }
  0x49   : > { %v1435_v3 = vld [vmem:[%s1728_s26 + $0x4] ss:$16 sps:$4 sm:$0xff] (!%p1293_p7)   ;;  %v1437_v4 = vld [vmem:[%s1728_s26 + $0xc] ss:$16 sps:$4 sm:$0xff] (!%p1293_p7)   ;;  %v1606_v5 = vmov (!%p1293_p7), 0  }
  0x4a   : > { %489 = sbr.rel (%p1293_p7) target bundleno = 359 (0x167), region = 90  ;;  %1434 = vset.pattern.permute.xlu0 (!%p1293_p7), %v1606_v5  ;;  %896 = vmatprep.subr.bf16.mxu0 (!%p1293_p7), %v1435_v3  ;;  %v1439_v6 = vld [vmem:[%s1728_s26] ss:$16 sps:$4 sm:$0xff] (!%p1293_p7)   ;;  %v1440_v7 = vld [vmem:[%s1728_s26 + $0x8] ss:$16 sps:$4 sm:$0xff] (!%p1293_p7)  }
  0x4b   : > { %939 = vmatprep.subr.bf16.mxu1 (!%p1293_p7), %v1437_v4  ;;  %v1441_v8 = vld [vmem:[%s1728_s26 + $0x24] ss:$16 sps:$4 sm:$0xff] (!%p1293_p7)   ;;  %897 = vmatpush1.bf16.msra.mxu0 (!%p1293_p7), %v1439_v6  ;;  %v1443_v9 = vld [vmem:[%s1728_s26 + $0x2c] ss:$16 sps:$4 sm:$0xff] (!%p1293_p7)   ;;  %v1445_v10 = vld [vmem:[%s1728_s26 + $0x20] ss:$16 sps:$4 sm:$0xff] (!%p1293_p7)  }
  0x4c   : > { %940 = vmatpush1.bf16.msra.mxu1 (!%p1293_p7), %v1440_v7  ;;  %898 = vmatprep.subr.bf16.mxu0 (!%p1293_p7), %v1441_v8  ;;  %v1446_v11 = vld [vmem:[%s1728_s26 + $0x28] ss:$16 sps:$4 sm:$0xff] (!%p1293_p7)   ;;  %v1447_v12 = vld [vmem:[%s1728_s26 + $0x44] ss:$16 sps:$4 sm:$0xff] (!%p1293_p7)   ;;  %v1449_v13 = vld [vmem:[%s1728_s26 + $0x4c] ss:$16 sps:$4 sm:$0xff] (!%p1293_p7)  }
  0x4d   : > { %941 = vmatprep.subr.bf16.mxu1 (!%p1293_p7), %v1443_v9  ;;  %v1451_v14 = vld [vmem:[%s1728_s26 + $0x40] ss:$16 sps:$4 sm:$0xff] (!%p1293_p7)   ;;  %v1452_v15 = vld [vmem:[%s1728_s26 + $0x48] ss:$16 sps:$4 sm:$0xff] (!%p1293_p7)   ;;  %v1453_v16 = vld [vmem:[%s1728_s26 + $0x64] ss:$16 sps:$4 sm:$0xff] (!%p1293_p7)  }
  0x4e   : > { %v1455_v17 = vld [vmem:[%s1728_s26 + $0x6c] ss:$16 sps:$4 sm:$0xff] (!%p1293_p7)   ;;  %v1457_v18 = vld [vmem:[%s1728_s26 + $0x60] ss:$16 sps:$4 sm:$0xff] (!%p1293_p7)   ;;  %v1458_v19 = vld [vmem:[%s1728_s26 + $0x68] ss:$16 sps:$4 sm:$0xff] (!%p1293_p7)  }
  0x4f   : > { %899 = vmatpush1.bf16.msra.mxu0 (!%p1293_p7), %v1445_v10  ;;  %v1459_v20 = vld [vmem:[%s1728_s26 + $0x84] ss:$16 sps:$4 sm:$0xff] (!%p1293_p7)   ;;  %v1461_v21 = vld [vmem:[%s1728_s26 + $0x8c] ss:$16 sps:$4 sm:$0xff] (!%p1293_p7)   ;;  %v1463_v22 = vld [vmem:[%s1728_s26 + $0x80] ss:$16 sps:$4 sm:$0xff] (!%p1293_p7)  }
  0x50   : > { %942 = vmatpush1.bf16.msra.mxu1 (!%p1293_p7), %v1446_v11  ;;  %900 = vmatprep.subr.bf16.mxu0 (!%p1293_p7), %v1447_v12  ;;  %v1464_v23 = vld [vmem:[%s1728_s26 + $0x88] ss:$16 sps:$4 sm:$0xff] (!%p1293_p7)   ;;  %v1465_v24 = vld [vmem:[%s1728_s26 + $0xa4] ss:$16 sps:$4 sm:$0xff] (!%p1293_p7)   ;;  %v1467_v25 = vld [vmem:[%s1728_s26 + $0xac] ss:$16 sps:$4 sm:$0xff] (!%p1293_p7)  }
  0x51   : > { %943 = vmatprep.subr.bf16.mxu1 %v1449_v13  ;;  %v1469_v26 = vld [vmem:[%s1728_s26 + $0xa0] ss:$16 sps:$4 sm:$0xff]   ;;  %v1470_v27 = vld [vmem:[%s1728_s26 + $0xa8] ss:$16 sps:$4 sm:$0xff]   ;;  %v1471_v28 = vld [vmem:[%s1728_s26 + $0xc4] ss:$16 sps:$4 sm:$0xff]  }
  0x52   : > { %v1473_v29 = vld [vmem:[%s1728_s26 + $0xcc] ss:$16 sps:$4 sm:$0xff]   ;;  %v1475_v30 = vld [vmem:[%s1728_s26 + $0xc0] ss:$16 sps:$4 sm:$0xff]   ;;  %v1476_v31 = vld [vmem:[%s1728_s26 + $0xc8] ss:$16 sps:$4 sm:$0xff]  }
  0x53   : > { %901 = vmatpush1.bf16.msra.mxu0 %v1451_v14  ;;  %v1477_v32 = vld [vmem:[%s1728_s26 + $0xe4] ss:$16 sps:$4 sm:$0xff]   ;;  %v1479_v33 = vld [vmem:[%s1728_s26 + $0xec] ss:$16 sps:$4 sm:$0xff]   ;;  %v1481_v34 = vld [vmem:[%s1728_s26 + $0xe0] ss:$16 sps:$4 sm:$0xff]  }
  0x54   : > { %944 = vmatpush1.bf16.msra.mxu1 %v1452_v15  ;;  %902 = vmatprep.subr.bf16.mxu0 %v1453_v16  ;;  %v1482_v35 = vld [vmem:[%s1728_s26 + $0xe8] ss:$16 sps:$4 sm:$0xff]   ;;  %v1483_v36 = vld [vmem:[%s1728_s26 + $0x104] ss:$16 sps:$4 sm:$0xff]   ;;  %v1485_v37 = vld [vmem:[%s1728_s26 + $0x10c] ss:$16 sps:$4 sm:$0xff]  }
  0x55   : > { %945 = vmatprep.subr.bf16.mxu1 %v1455_v17  ;;  %v1487_v38 = vld [vmem:[%s1728_s26 + $0x100] ss:$16 sps:$4 sm:$0xff]   ;;  %v1488_v39 = vld [vmem:[%s1728_s26 + $0x108] ss:$16 sps:$4 sm:$0xff]   ;;  %v1489_v40 = vld [vmem:[%s1728_s26 + $0x124] ss:$16 sps:$4 sm:$0xff]  }
  0x56   : > { %v1491_v41 = vld [vmem:[%s1728_s26 + $0x12c] ss:$16 sps:$4 sm:$0xff]   ;;  %v1493_v42 = vld [vmem:[%s1728_s26 + $0x120] ss:$16 sps:$4 sm:$0xff]   ;;  %v1494_v43 = vld [vmem:[%s1728_s26 + $0x128] ss:$16 sps:$4 sm:$0xff]  }
  0x57   : > { %903 = vmatpush1.bf16.msra.mxu0 %v1457_v18  ;;  %v1495_v44 = vld [vmem:[%s1728_s26 + $0x144] ss:$16 sps:$4 sm:$0xff]   ;;  %v1497_v45 = vld [vmem:[%s1728_s26 + $0x14c] ss:$16 sps:$4 sm:$0xff]   ;;  %v1499_v46 = vld [vmem:[%s1728_s26 + $0x140] ss:$16 sps:$4 sm:$0xff]  }
  0x58   : > { %946 = vmatpush1.bf16.msra.mxu1 %v1458_v19  ;;  %904 = vmatprep.subr.bf16.mxu0 %v1459_v20  ;;  %v1500_v47 = vld [vmem:[%s1728_s26 + $0x148] ss:$16 sps:$4 sm:$0xff]   ;;  %v1501_v48 = vld [vmem:[%s1728_s26 + $0x164] ss:$16 sps:$4 sm:$0xff]   ;;  %v1503_v49 = vld [vmem:[%s1728_s26 + $0x16c] ss:$16 sps:$4 sm:$0xff]  }
  0x59   : > { %947 = vmatprep.subr.bf16.mxu1 %v1461_v21  ;;  %v1533_v50 = vld [vmem:[%s363_s2 + $0x4] ss:$8 sps:$4 sm:$0xff]   ;;  %v1505_v51 = vld [vmem:[%s1728_s26 + $0x160] ss:$16 sps:$4 sm:$0xff]   ;;  %v1506_v52 = vld [vmem:[%s1728_s26 + $0x168] ss:$16 sps:$4 sm:$0xff]  }
  0x5a   : > { %v498_v53 = vld [vmem:[%s1733_s29] sm:$0xff]  ;;  %v1509_v55 = vld [vmem:[%s1728_s26 + $0x18c] ss:$16 sps:$4 sm:$0xff]   ;;  %928 = vmatprep.mubr.bf16.mxu0 %v1533_v50  ;;  %971 = vmatprep.mubr.bf16.mxu1 %v1533_v50  ;;  %v1512_v57 = vld [vmem:[%s1728_s26 + $0x188] ss:$16 sps:$4 sm:$0xff]  }
  0x5b   : > { %905 = vmatpush1.bf16.msra.mxu0 %v1463_v22  ;;  %v1507_v54 = vld [vmem:[%s1728_s26 + $0x184] ss:$16 sps:$4 sm:$0xff]   ;;  %984 = vperm.xlu0 %1434, %v498_v53   ;;  %v1511_v56 = vld [vmem:[%s1728_s26 + $0x180] ss:$16 sps:$4 sm:$0xff]   ;;  %v499_v58 = vld [vmem:[%s1733_s29 + $0x8] sm:$0xff] }
  0x5c   : > { %948 = vmatpush1.bf16.msra.mxu1 %v1464_v23  ;;  %906 = vmatprep.subr.bf16.mxu0 %v1465_v24  ;;  %v1513_v59 = vld [vmem:[%s1728_s26 + $0x1a4] ss:$16 sps:$4 sm:$0xff]   ;;  %v1515_v60 = vld [vmem:[%s1728_s26 + $0x1ac] ss:$16 sps:$4 sm:$0xff]   ;;  %v1517_v61 = vld [vmem:[%s1728_s26 + $0x1a0] ss:$16 sps:$4 sm:$0xff]  }
  0x5d   : > { %949 = vmatprep.subr.bf16.mxu1 %v1467_v25  ;;  %v1518_v62 = vld [vmem:[%s1728_s26 + $0x1a8] ss:$16 sps:$4 sm:$0xff]   ;;  %v1519_v63 = vld [vmem:[%s1728_s26 + $0x1c4] ss:$16 sps:$4 sm:$0xff]   ;;  %v1521_v0 = vld [vmem:[%s1728_s26 + $0x1cc] ss:$16 sps:$4 sm:$0xff]  }
  0x5e   : > { %v1523_v1 = vld [vmem:[%s1728_s26 + $0x1c0] ss:$16 sps:$4 sm:$0xff]   ;;  %v1524_v2 = vld [vmem:[%s1728_s26 + $0x1c8] ss:$16 sps:$4 sm:$0xff]   ;;  %v1525_v3 = vld [vmem:[%s1728_s26 + $0x1e4] ss:$16 sps:$4 sm:$0xff]  }
  0x5f   : > { %907 = vmatpush1.bf16.msra.mxu0 %v1469_v26  ;;  %989 = vperm.xlu0 %1434, %v499_v58   ;;  %v1527_v4 = vld [vmem:[%s1728_s26 + $0x1ec] ss:$16 sps:$4 sm:$0xff]   ;;  %v1529_v5 = vld [vmem:[%s1728_s26 + $0x1e0] ss:$16 sps:$4 sm:$0xff]   ;;  %v1530_v6 = vld [vmem:[%s1728_s26 + $0x1e8] ss:$16 sps:$4 sm:$0xff]  }
  0x60   : > { %950 = vmatpush1.bf16.msra.mxu1 %v1470_v27  ;;  %908 = vmatprep.subr.bf16.mxu0 %v1471_v28  ;;  %v1531_v7 = vld [vmem:[%s363_s2] ss:$8 sps:$4 sm:$0xff]  }
  0x61   : > { %951 = vmatprep.subr.bf16.mxu1 %v1473_v29  ;;  %v490_v10 = vld [vmem:[#allocation2] sm:$0xff]  ;;  %v492_v12 = vld [vmem:[#allocation2 + $0x10] sm:$0xff]  ;;  %v491_v16 = vld [vmem:[#allocation2 + $0x8] sm:$0xff] }
  0x62   : > { %v493_v18 = vld [vmem:[#allocation2 + $0x18] sm:$0xff]  ;;  %v494_v22 = vld [vmem:[#allocation2 + $0x20] sm:$0xff]  ;;  %v496_v24 = vld [vmem:[#allocation2 + $0x30] sm:$0xff] }
  0x63   : > { %909 = vmatpush1.bf16.msra.mxu0 %v1475_v30  ;;  %v495_v30 = vld [vmem:[#allocation2 + $0x28] sm:$0xff] }
  0x64   : > { %952 = vmatpush1.bf16.msra.mxu1 %v1476_v31  ;;  %910 = vmatprep.subr.bf16.mxu0 %v1477_v32  ;;  %v497_v32 = vld [vmem:[#allocation2 + $0x38] sm:$0xff] }
  0x65   : > { %953 = vmatprep.subr.bf16.mxu1 %v1479_v33 }
  0x67   : > { %911 = vmatpush1.bf16.msra.mxu0 %v1481_v34 }
  0x68   : > { %954 = vmatpush1.bf16.msra.mxu1 %v1482_v35  ;;  %912 = vmatprep.subr.bf16.mxu0 %v1483_v36 }
  0x69   : > { %955 = vmatprep.subr.bf16.mxu1 %v1485_v37 }
  0x6b   : > { %913 = vmatpush1.bf16.msra.mxu0 %v1487_v38 }
  0x6c   : > { %956 = vmatpush1.bf16.msra.mxu1 %v1488_v39  ;;  %914 = vmatprep.subr.bf16.mxu0 %v1489_v40 }
  0x6d   : > { %957 = vmatprep.subr.bf16.mxu1 %v1491_v41 }
  0x6f   : > { %915 = vmatpush1.bf16.msra.mxu0 %v1493_v42 }
  0x70   : > { %958 = vmatpush1.bf16.msra.mxu1 %v1494_v43  ;;  %916 = vmatprep.subr.bf16.mxu0 %v1495_v44 }
  0x71   : > { %959 = vmatprep.subr.bf16.mxu1 %v1497_v45 }
  0x73   : > { %917 = vmatpush1.bf16.msra.mxu0 %v1499_v46 }
  0x74   : > { %960 = vmatpush1.bf16.msra.mxu1 %v1500_v47  ;;  %918 = vmatprep.subr.bf16.mxu0 %v1501_v48 }
  0x75   : > { %961 = vmatprep.subr.bf16.mxu1 %v1503_v49 }
  0x77   : > { %919 = vmatpush1.bf16.msra.mxu0 %v1505_v51 }
  0x78   : > { %962 = vmatpush1.bf16.msra.mxu1 %v1506_v52  ;;  %920 = vmatprep.subr.bf16.mxu0 %v1507_v54 }
  0x79   : > { %963 = vmatprep.subr.bf16.mxu1 %v1509_v55 }
  0x7b   : > { %921 = vmatpush1.bf16.msra.mxu0 %v1511_v56 }
  0x7c   : > { %964 = vmatpush1.bf16.msra.mxu1 %v1512_v57  ;;  %922 = vmatprep.subr.bf16.mxu0 %v1513_v59 }
  0x7d   : > { %965 = vmatprep.subr.bf16.mxu1 %v1515_v60 }
  0x7f   : > { %923 = vmatpush1.bf16.msra.mxu0 %v1517_v61 }
  0x80   : > { %966 = vmatpush1.bf16.msra.mxu1 %v1518_v62  ;;  %924 = vmatprep.subr.bf16.mxu0 %v1519_v63 }
  0x81   : > { %967 = vmatprep.subr.bf16.mxu1 %v1521_v0 }
  0x83   : > { %925 = vmatpush1.bf16.msra.mxu0 %v1523_v1 }
  0x84   : > { %968 = vmatpush1.bf16.msra.mxu1 %v1524_v2  ;;  %926 = vmatprep.subr.bf16.mxu0 %v1525_v3 }
  0x85   : > { %969 = vmatprep.subr.bf16.mxu1 %v1527_v4 }
  0x87   : > { %927 = vmatpush1.bf16.msra.mxu0 %v1529_v5 }
  0x88   : > { %970 = vmatpush1.bf16.msra.mxu1 %v1530_v6 }
  0x8a   : > { %929 = vmatmul.mubr.bf16.vlgmr.msra.gmra.mrb[0].mxu0 %v1531_v7 }
  0x8b   : > { %972 = vmatmul.mubr.bf16.vlgmr.msra.gmra.mrb[0].mxu1 %v1531_v7 }
  0xda   : > { %v985_v8 = vpop.permute.xlu0 %984 }
  0xde   : > { %v990_v9 = vpop.permute.xlu0 %989 }
 0x15d   : > { %v930_v11 = vpop.f32.mrb[0].mxu0 }
 0x15e   : > { %v973_v13 = vpop.f32.mrb[0].mxu1  ;;  %v992_v14 = vmul.f32 %v985_v8, %v930_v11  ;;  %v932_v17 = vpop.f32.mrb[1].mxu0 }
 0x15f   : > { %v994_v15 = vmul.f32 %v985_v8, %v973_v13  ;;  %v975_v19 = vpop.f32.mrb[1].mxu1  ;;  %v993_v20 = vmul.f32 %v985_v8, %v932_v17  ;;  %v934_v23 = vpop.f32.mrb[2].mxu0 }
 0x160   : > { %v995_v21 = vmul.f32 %v985_v8, %v975_v19  ;;  %v977_v25 = vpop.f32.mrb[2].mxu1  ;;  %v1000_v26 = vadd.f32 %v992_v14, %v490_v10  ;;  %v996_v28 = vmul.f32 %v990_v9, %v934_v23  ;;  %v936_v31 = vpop.f32.mrb[3].mxu0 }
 0x161   : > { %v1002_v27 = vadd.f32 %v994_v15, %v492_v12  ;;  %v998_v29 = vmul.f32 %v990_v9, %v977_v25  ;;  %v979_v33 = vpop.f32.mrb[3].mxu1  ;;  %v1001_v34 = vadd.f32 %v993_v20, %v491_v16  ;;  %v997_v36 = vmul.f32 %v990_v9, %v936_v31 }
 0x162   : > { %v1003_v35 = vadd.f32 %v995_v21, %v493_v18  ;;  %v999_v37 = vmul.f32 %v990_v9, %v979_v33  ;;  %1008 = vst [vmem:[#allocation2] sm:$0xff] %v1000_v26  ;;  %v1004_v38 = vadd.f32 %v996_v28, %v494_v22 }
 0x163   : > { %1010 = vst [vmem:[#allocation2 + $0x10] sm:$0xff] %v1002_v27  ;;  %v1006_v39 = vadd.f32 %v998_v29, %v496_v24  ;;  %1009 = vst [vmem:[#allocation2 + $0x8] sm:$0xff] %v1001_v34  ;;  %v1005_v40 = vadd.f32 %v997_v36, %v495_v30 }
 0x164   : > { %1011 = vst [vmem:[#allocation2 + $0x18] sm:$0xff] %v1003_v35  ;;  %v1007_v41 = vadd.f32 %v999_v37, %v497_v32  ;;  %1012 = vst [vmem:[#allocation2 + $0x20] sm:$0xff] %v1004_v38 }
 0x165   : > { %1014 = vst [vmem:[#allocation2 + $0x30] sm:$0xff] %v1006_v39  ;;  %1013 = vst [vmem:[#allocation2 + $0x28] sm:$0xff] %v1005_v40 }
 0x166   : > { %1015 = vst [vmem:[#allocation2 + $0x38] sm:$0xff] %v1007_v41 }
 0x167 PF: > { %p1016_p8 = scmp.eq.s32.totalorder %s1590_s1, 17  ;;  %p1017_p9 = scmp.eq.s32.totalorder %s1586_s13, 3 }
 0x169   : > { %p1018_p10 = pnand %p1017_p9, %p1016_p8 }
 0x16a   : > { %v1032_v42 = vlaneseq (!%p1018_p10)  ;;  %v1090_v43 = vld [vmem:[%s1867_s7] sm:$0xff] (!%p1018_p10)  ;;  %v1091_v45 = vld [vmem:[%s1867_s7 + $0x8] sm:$0xff] (!%p1018_p10)  ;;  %v1092_v53 = vld [vmem:[%s1867_s7 + $0x10] sm:$0xff] (!%p1018_p10) }
 0x16b   : > { %1021 = sbr.rel (%p1018_p10) target bundleno = 382 (0x17e), region = 94  ;;  %v1022_v46 = vld [vmem:[#allocation2] sm:$0xff] (!%p1018_p10)  ;;  %v1094_v49 = vunpack.c.l.bf16 (!%p1018_p10), %v1090_v43  ;;  %v1095_v50 = vunpack.c.h.bf16 (!%p1018_p10), %v1090_v43  ;;  %v1096_v51 = vunpack.c.l.bf16 (!%p1018_p10), %v1091_v45  ;;  %v1097_v52 = vunpack.c.h.bf16 (!%p1018_p10), %v1091_v45  ;;  %v1023_v54 = vld [vmem:[#allocation2 + $0x8] sm:$0xff] (!%p1018_p10)  ;;  %v1093_v59 = vld [vmem:[%s1867_s7 + $0x18] sm:$0xff] (!%p1018_p10) }
 0x16c   : > { %v1033_v44 = vshrl.u32 (!%p1018_p10), %v1032_v42, 7  ;;  %v1030_v47 = vld [vmem:[%s1865_s5] sm:$0xf] (!%p1018_p10)  ;;  %v1024_v60 = vld [vmem:[#allocation2 + $0x10] sm:$0xff] (!%p1018_p10)  ;;  %v1027_v62 = vld [vmem:[#allocation2 + $0x28] sm:$0xff] (!%p1018_p10)  ;;  %v1098_v63 = vunpack.c.l.bf16 (!%p1018_p10), %v1092_v53  ;;  %v1099_v0 = vunpack.c.h.bf16 (!%p1018_p10), %v1092_v53  ;;  %v1100_v1 = vunpack.c.l.bf16 (!%p1018_p10), %v1093_v59 }
 0x16d   : > { %v1060_v48 = vld [vmem:[%s1866_s6] sm:$0xf] (!%p1018_p10)  ;;  %v1101_v2 = vunpack.c.h.bf16 (!%p1018_p10), %v1093_v59  ;;  %v1025_v7 = vld [vmem:[#allocation2 + $0x18] sm:$0xff] (!%p1018_p10)  ;;  %v1028_v8 = vld [vmem:[#allocation2 + $0x30] sm:$0xff] (!%p1018_p10) }
 0x16e   : > { %v1034_v55 = vsub.s32 (!%p1018_p10), 0, %v1033_v44  ;;  %v1038_v56 = vsub.s32 (!%p1018_p10), 1, %v1033_v44  ;;  %v1042_v57 = vsub.s32 (!%p1018_p10), 2, %v1033_v44  ;;  %v1046_v58 = vsub.s32 (!%p1018_p10), 3, %v1033_v44  ;;  %v1026_v61 = vld [vmem:[#allocation2 + $0x20] sm:$0xff] (!%p1018_p10)  ;;  %v1029_v9 = vld [vmem:[#allocation2 + $0x38] sm:$0xff] (!%p1018_p10) }
 0x170   : > { %v1035_v3 = vrot.slane (!%p1018_p10), %v1030_v47, %v1034_v55  ;;  %v1039_v4 = vrot.slane (!%p1018_p10), %v1030_v47, %v1038_v56  ;;  %v1065_v5 = vrot.slane (!%p1018_p10), %v1060_v48, %v1034_v55  ;;  %v1069_v6 = vrot.slane (!%p1018_p10), %v1060_v48, %v1038_v56 }
 0x171   : > { %v1043_v10 = vrot.slane (!%p1018_p10), %v1030_v47, %v1042_v57  ;;  %v1047_v11 = vrot.slane (!%p1018_p10), %v1030_v47, %v1046_v58  ;;  %v1073_v12 = vrot.slane (!%p1018_p10), %v1060_v48, %v1042_v57  ;;  %v1077_v13 = vrot.slane (!%p1018_p10), %v1060_v48, %v1046_v58 }
 0x172   : > { %v1052_v14 = vmul.f32 %v1035_v3, %v1022_v46  ;;  %v1053_v15 = vmul.f32 %v1039_v4, %v1023_v54  ;;  %v1056_v16 = vmul.f32 %v1035_v3, %v1026_v61  ;;  %v1057_v17 = vmul.f32 %v1039_v4, %v1027_v62 }
 0x173   : > { %v1054_v18 = vmul.f32 %v1043_v10, %v1024_v60  ;;  %v1055_v19 = vmul.f32 %v1047_v11, %v1025_v7  ;;  %v1058_v20 = vmul.f32 %v1043_v10, %v1028_v8  ;;  %v1059_v21 = vmul.f32 %v1047_v11, %v1029_v9 }
 0x174   : > { %v1082_v22 = vadd.f32 %v1065_v5, %v1052_v14  ;;  %v1083_v23 = vadd.f32 %v1069_v6, %v1053_v15  ;;  %v1086_v24 = vadd.f32 %v1065_v5, %v1056_v16  ;;  %v1087_v25 = vadd.f32 %v1069_v6, %v1057_v17 }
 0x175   : > { %v1084_v26 = vadd.f32 %v1073_v12, %v1054_v18  ;;  %v1085_v27 = vadd.f32 %v1077_v13, %v1055_v19  ;;  %v1088_v28 = vadd.f32 %v1073_v12, %v1058_v20  ;;  %v1089_v29 = vadd.f32 %v1077_v13, %v1059_v21 }
 0x176   : > { %v1102_v30 = vadd.f32 %v1094_v49, %v1082_v22  ;;  %v1103_v31 = vadd.f32 %v1095_v50, %v1083_v23  ;;  %v1106_v32 = vadd.f32 %v1098_v63, %v1086_v24  ;;  %v1107_v33 = vadd.f32 %v1099_v0, %v1087_v25 }
 0x177   : > { %v1104_v34 = vadd.f32 %v1096_v51, %v1084_v26  ;;  %v1105_v35 = vadd.f32 %v1097_v52, %v1085_v27  ;;  %v1108_v36 = vadd.f32 %v1100_v1, %v1088_v28  ;;  %v1109_v37 = vadd.f32 %v1101_v2, %v1089_v29 }
 0x178   : > { %v1110_v38 = vmax.f32 %v1102_v30, 0.0  ;;  %v1111_v39 = vmax.f32 %v1103_v31, 0.0  ;;  %v1114_v40 = vmax.f32 %v1106_v32, 0.0  ;;  %v1115_v41 = vmax.f32 %v1107_v33, 0.0 }
 0x179   : > { %v1112_v42 = vmax.f32 %v1104_v34, 0.0  ;;  %v1113_v43 = vmax.f32 %v1105_v35, 0.0  ;;  %v1116_v44 = vmax.f32 %v1108_v36, 0.0  ;;  %v1117_v45 = vmax.f32 %v1109_v37, 0.0 }
 0x17a   : > { %v1370_v46 = vpack.c.bf16 %v1111_v39, %v1110_v38  ;;  %v1372_v47 = vpack.c.bf16 %v1115_v41, %v1114_v40 }
 0x17b   : > { %v1371_v48 = vpack.c.bf16 %v1113_v43, %v1112_v42  ;;  %v1373_v53 = vpack.c.bf16 %v1117_v45, %v1116_v44 }
 0x17c   : > { %1142 = vst [vmem:[%s1868_s8] sm:$0xff] %v1370_v46  ;;  %1144 = vst [vmem:[%s1868_s8 + $0x10] sm:$0xff] %v1372_v47 }
 0x17d   : > { %1143 = vst [vmem:[%s1868_s8 + $0x8] sm:$0xff] %v1371_v48  ;;  %1145 = vst [vmem:[%s1868_s8 + $0x18] sm:$0xff] %v1373_v53 }
 0x17e PF: > { %s25_s16 = sadd.s32 1, %s1602_s16   ;;  %s1871_s12 = smov %s1582_s0 }
 0x17f   : > { %p22_p11 = scmp.ge.s32.totalorder %s25_s16, 74   ;;  %s1872_s0 = smov %s1707_s21 }
 0x180   : > { %s1873_s13 = smov %s1594_s14  ;;  %s1874_s1 = smov %s1598_s15 }
 0x181   : > { %s1875_s14 = smov %s1878_s17  ;;  %s1876_s15 = smov %s1882_s18 }
 0x182   :  { %24 = sbr.rel (!%p22_p11) target bundleno = 20 (0x14), region = 138 }

// kernel: forward.39
= control target key start
LH: loop header
LB: loop body
LE: loop exit
PB: predicated region body
PF: predicated region fallthrough
CT: control target
= control target key end

     0   :  { %s2042_s0 = inlined_call_operand.vmem [shape: s32[4], index: 0, kind: input, shape index: {}]   ;;  %s2043_s1 = inlined_call_operand.<no memory space> [shape: s32[1], index: 1, kind: input, shape index: {}]   ;;  %s2044_s2 = inlined_call_operand.vmem [shape: bf16[16,4608], index: 2, kind: input, shape index: {}]   ;;  %s2045_s3 = inlined_call_operand.hbm [shape: bf16[4,4608,512], index: 3, kind: input, shape index: {}]   ;;  %s2046_s4 = inlined_call_operand.vmem [shape: f32[4,16,1], index: 4, kind: input, shape index: {}]   ;;  %s2047_s5 = inlined_call_operand.vmem [shape: f32[1,512], index: 5, kind: input, shape index: {}]   ;;  %s2048_s6 = inlined_call_operand.vmem [shape: f32[1,512], index: 6, kind: input, shape index: {}]   ;;  %s2049_s7 = inlined_call_operand.vmem [shape: bf16[16,512], index: 7, kind: input, shape index: {}]   ;;  %s2050_s8 = inlined_call_operand.vmem [shape: bf16[16,512], index: 8, kind: output, shape index: {}]  }
   0x1   :  { %2055 = sst [smem:[#allocation17_spill]] %s2044_s2  ;;  %s13_s29 = sshll.u32 %s2042_s0, 4  ;;  %s14_s29 = int_to_ptr.vmem [resolvable:$true] %s13_s29 }
   0x2   :  { %17 = sst [smem:[#allocation5]] %s2043_s1  ;;  %s1570_s10 = scalar_lea.vmem %s14_s29, 16 }
   0x3   :  { %p1571_p0 = scmp.ne.s32.totalorder %s14_s29, %s1570_s10  ;;  %p1575_p1 = scmp.lt.s32.totalorder %s14_s29, %s14_s29 }
   0x4   :  { %p1576_p2 = scmp.lt.s32.totalorder %s1570_s10, %s1570_s10 }
   0x6   :  { %p1577_p3 = por %p1576_p2, %p1575_p1 }
   0x8   :  { %p1578_p4 = pnand %p1577_p3, %p1571_p0 }
   0xa   :  { %1581 = shalt.err (!%p1578_p4)  }
   0xb   :  { %s1696_s11 = smov [#allocation4]  }
   0xc   :  { %16 = dma.vmem_to_smem %s14_s29, 16, %s1696_s11, [#allocation3] }
   0xd   :  { %1650 = dma.done.wait [#allocation3], 16 }
   0xe   :  { %1651 = vsyncadd [#allocation3], 4294967280 }
   0xf   :  { %19 = sfence }
  0x10   :  { %20 = vsyncpa [#allocation8], 0 }
  0x11   :  { %22 = vsyncpa [#allocation8 + $0x1], 0  ;;  %s1753_s0 = smov 0   ;;  %s1755_s12 = smov 0  }
  0x12   :  { %s1757_s1 = smov 0   ;;  %s1759_s13 = smov 0  }
  0x13   :  { %s1761_s14 = smov 0   ;;  %s1763_s15 = smov 0  }
  0x14   :  { %s1765_s16 = smov 0   ;;  %s1767_s17 = smov 0  }
  0x15   :  { %s1769_s18 = smov 0   ;;  %s1771_s19 = smov 0  }
  0x16 LB: > { %2056 = sst [smem:[#allocation12_spill]] %s1674_s14  ;;  %s40_s20 = sadd.s32 1, %s1686_s17  ;;  %s1694_s19 = sphi %s1771_s19, %s28_s19   ;;  %s1690_s18 = sphi %s1769_s18, %s2074_s18   ;;  %s1686_s17 = sphi %s1767_s17, %s2068_s17   ;;  %s1682_s16 = sphi %s1765_s16, %s2073_s16   ;;  %s1678_s15 = sphi %s1763_s15, %s2067_s15   ;;  %s1674_s14 = sphi %s1761_s14, %s2066_s14   ;;  %s1670_s13 = sphi %s1759_s13, %s2065_s13   ;;  %s1666_s1 = sphi %s1757_s1, %s2072_s1   ;;  %s1662_s12 = sphi %s1755_s12, %s2071_s12   ;;  %s1658_s0 = sphi %s1753_s0, %s2070_s0  }
  0x17   : > { %2057 = sst [smem:[#allocation13_spill]] %s1686_s17  ;;  %p41_p5 = scmp.ge.s32.totalorder %s40_s20, 4 }
  0x18   : > { %s43_s21 = sadd.s32 1, %s1690_s18  ;;  %s1282_s22 = sadd.s32 4294967295, %s1694_s19  }
  0x19   : > { %p63_p6 = scmp.ne.s32.totalorder %s1674_s14, %s1670_s13  ;;  %s2076_s20 = smov (%p41_p5, %s40_s20), 0 }
  0x1a   : > { %2058 = sst [smem:[#allocation14_spill]] %s2076_s20  ;;  %s2078_s21 = smov (!%p41_p5, %s43_s21), %s1690_s18 }
  0x1b   : > { %p64_p7 = scmp.eq.s32.totalorder %s1694_s19, 0  ;;  %s81_s23 = sld [smem:[#allocation4 + %s1686_s17]] }
  0x1c   : > { %p45_p8 = scmp.ge.s32.totalorder %s2078_s21, 18  ;;  %s84_s24 = sld [smem:[#allocation4 + %s2076_s20]] }
  0x1d   : > { %s56_s25 = sadd.s32 1, %s1674_s14  ;;  %p1815_p9 = por %p64_p7, %p63_p6 }
  0x1e   : > { %s2080_s21 = smov (%p45_p8, %s2078_s21), 0  ;;  %p97_p10 = scmp.ne.s32.totalorder %s1666_s1, %s1662_s12 }
  0x1f   : > { %2060 = sst [smem:[#allocation15_spill]] %s2080_s21  ;;  %p103_p11 = scmp.ne.s32.totalorder %s1662_s12, %s1658_s0 }
  0x20   : > { %s52_s27 = ssub.s32 %s1690_s18, %s2080_s21  ;;  %p104_p12 = scmp.eq.s32.totalorder %s1282_s22, 0 }
  0x21   : > { %p54_p13 = scmp.eq.s32.totalorder %s52_s27, 0  ;;  %p1827_p0 = por %p97_p10, %p64_p7 }
  0x22   : > { %s85_s29 = ssub.s32 %s81_s23, %s84_s24  ;;  %p1831_p1 = por %p104_p12, %p103_p11 }
  0x23   : > { %s1836_s9 = scalar_select %p54_p13, %s1674_s14, %s56_s25  }
  0x24   : > { %s87_s10 = sor.u32 %s85_s29, %s52_s27  ;;  %s90_s11 = sadd.s32 1, %s1666_s1 }
  0x25   : > { %2063 = sst [smem:[#allocation16_spill]] %s1836_s9  ;;  %p88_p2 = scmp.eq.s32.totalorder %s87_s10, 0 }
  0x26   : > { %p1285_p3 = scmp.ge.s32.totalorder %s1694_s19, 72 }
  0x27   : > { %s1840_s20 = scalar_select %p88_p2, %s1666_s1, %s90_s11  }
  0x28   : > { %267 = sbr.rel (%p1285_p3) target bundleno = 95 (0x5f), region = 28 }
  0x2f   : > { %270 = sbr.rel (!%p1815_p9) target bundleno = 58 (0x3a), region = 32  ;;  %s272_s0 = sand.u32 (%p1815_p9), 1, %s1674_s14  }
  0x30   : > { %s1373_s22 = sshll.u32 (%p1815_p9), %s1690_s18, 3  ;;  %s1286_s23 = sshll.u32 (%p1815_p9), %s272_s0, 4 }
  0x31   : > { %s2064_s2 = sld [smem:[#allocation17_spill]] (%p1815_p9)  ;;  %s274_s27 = scalar_lea.vmem (%p1815_p9), [#allocation6], %s1286_s23 }
  0x37   : > { %s280_s25 = scalar_lea.vmem %s2064_s2, %s1373_s22 }
  0x38   : > { %v310_v0 = vld [vmem:[%s280_s25] sm:$0xff]  ;;  %v312_v1 = vld [vmem:[%s280_s25 + $0x90] sm:$0xff] }
  0x39   : > { %311 = vst [vmem:[%s274_s27] sm:$0xff] %v310_v0  ;;  %313 = vst [vmem:[%s274_s27 + $0x8] sm:$0xff] %v312_v1 }
  0x3a PF: > { %s320_s26 = sand.u32 1, %s1666_s1   ;;  %s1374_s0 = sshll.u32 %s1690_s18, 7 }
  0x3b   : > { %s1381_s29 = scalar_select %p1827_p0, [#allocation4], [#allocation9] }
  0x3c   : > { %s1382_s10 = scalar_select %p1827_p0, %s1686_s17, 0 }
  0x3d   : > { %s1289_s11 = sshll.u32 %s320_s26, 9  ;;  %s1864_s17 = scalar_lea.sflag [#allocation8], %s320_s26 }
  0x3e   : > { %s327_s21 = sld [smem:[%s1381_s29 + %s1382_s10]]  ;;  %s324_s22 = scalar_lea.vmem [#allocation7], %s1289_s11 }
  0x3f   : > { %s337_s24 = sshll.u32 %s324_s22, 4  ;;  %s1857_s24 = int_to_ptr.vmem [resolvable:$true] %s337_s24 }
  0x44   : > { %s1380_s23 = smul.u32 2304, %s327_s21  ;;  %s1586_s21 = scalar_lea.hbm %s2045_s3, 589824 }
  0x46   : > { %s334_s25 = sadd.s32 %s1380_s23, %s1374_s0 }
  0x47   : > { %s1292_s27 = sshll.u32 %s334_s25, 6 }
  0x48   : > { %s1862_s14 = scalar_lea.hbm %s2045_s3, %s1292_s27 }
  0x49   : > { %s1582_s29 = scalar_lea.hbm %s1862_s14, 8192  ;;  %p1587_p7 = scmp.lt.u32.totalorder %s1862_s14, %s2045_s3 }
  0x4a   : > { %p1583_p4 = scmp.ne.s32.totalorder %s1862_s14, %s1582_s29  ;;  %p1588_p8 = scmp.lt.u32.totalorder %s1586_s21, %s1582_s29 }
  0x4b   : > { %p1590_p10 = scmp.lt.u32.totalorder %s1582_s29, %s1862_s14 }
  0x4c   : > { %p1584_p5 = pnand %p1583_p4, %p1827_p0  ;;  %p1589_p9 = por %p1588_p8, %p1587_p7 }
  0x4e   : > { %p1585_p6 = pneg %p1584_p5  ;;  %p1591_p11 = por %p1590_p10, %p1589_p9 }
  0x50   : > { %p1592_p12 = pnand %p1591_p11, %p1585_p6 }
  0x52   : > { %1595 = shalt.err (!%p1592_p12)
}
  0x53   : > { %s1596_s2 = scalar_lea.vmem %s1857_s24, 8192  ;;  %s1697_s9 = smov [#allocation7]  }
  0x54   : > { %p1597_p13 = scmp.ne.s32.totalorder %s1857_s24, %s1596_s2  ;;  %s1600_s26 = sshll.u32 %s1697_s9, 4  ;;  %s1601_s26 = int_to_ptr.vmem [resolvable:$false] %s1600_s26 }
  0x55   : > { %s1602_s23 = scalar_lea.vmem %s1601_s26, 16384  ;;  %p1603_p4 = scmp.lt.s32.totalorder %s1857_s24, %s1601_s26 }
  0x56   : > { %p1598_p2 = pnand %p1597_p13, %p1827_p0  ;;  %p1604_p5 = scmp.lt.s32.totalorder %s1602_s23, %s1596_s2 }
  0x58   : > { %p1599_p3 = pneg %p1598_p2  ;;  %p1605_p7 = por %p1604_p5, %p1603_p4 }
  0x5a   : > { %p1606_p8 = pnand %p1605_p7, %p1599_p3 }
  0x5c   : > { %1609 = shalt.err (!%p1606_p8)
}
  0x5d   : > { %s1698_s25 = smov 256   ;;  %s1699_s27 = smov 16  }
  0x5e   : > { %1383 = dma.hbm_to_vmem [thread:$0]  (%p1827_p0), %s1862_s14, 8192, %s1857_s24, %s1864_s17, %s1698_s25, %s1698_s25, %s1699_s27  }
  0x5f PF: > { %p1293_p6 = scmp.ge.s32.totalorder %s1694_s19, 1  ;;  %p364_p9 = scmp.lt.s32.totalorder %s1694_s19, 73 }
  0x61   : > { %p365_p10 = pnand %p1293_p6, %p364_p9 }
  0x62   : > { %s371_s29 = sand.u32 (!%p365_p10), 1, %s1670_s13   ;;  %s377_s10 = sand.u32 (!%p365_p10), 1, %s1662_s12  }
  0x63   : > { %368 = sbr.rel (%p365_p10) target bundleno = 435 (0x1b3), region = 78  ;;  %s1892_s11 = sshll.u32 (!%p365_p10), %s371_s29, 4 }
  0x64   : > { %s1295_s21 = sshll.u32 (!%p365_p10), %s377_s10, 9  ;;  %s373_s0 = scalar_lea.vmem (!%p365_p10), [#allocation6], %s1892_s11 }
  0x65   : > { %s378_s22 = scalar_lea.sflag (!%p365_p10), [#allocation8], %s377_s10  ;;  %s1895_s28 = scalar_lea.vmem (!%p365_p10), [#allocation7], %s1295_s21 }
  0x6a   : > { %1653 = dma.done.wait (%p1831_p1), %s378_s22, 8192  }
  0x6b   : > { %1655 = vsyncadd (%p1831_p1), %s378_s22, 4294959104  ;;  %p469_p0 = scmp.eq.s32.totalorder %s1682_s16, 0  ;;  %p470_p11 = scmp.eq.s32.totalorder %s1678_s15, 0 }
  0x6c   : > { %s441_s13 = sld [smem:[#allocation4 + %s1678_s15]] }
  0x6d   : > { %p471_p12 = pnand %p470_p11, %p469_p0 }
  0x6e   : > { %v1700_v2 = vmov (!%p471_p12), 0.0  }
  0x6f   : > { %475 = vst [vmem:[#allocation2] sm:$0xff] (!%p471_p12), %v1700_v2  ;;  %476 = vst [vmem:[#allocation2 + $0x8] sm:$0xff] (!%p471_p12), %v1700_v2 }
  0x70   : > { %474 = sbr.rel (%p471_p12) target bundleno = 119 (0x77), region = 90  ;;  %477 = vst [vmem:[#allocation2 + $0x10] sm:$0xff] (!%p471_p12), %v1700_v2  ;;  %478 = vst [vmem:[#allocation2 + $0x18] sm:$0xff] (!%p471_p12), %v1700_v2 }
  0x71   : > { %479 = vst [vmem:[#allocation2 + $0x20] sm:$0xff] (!%p471_p12), %v1700_v2  ;;  %480 = vst [vmem:[#allocation2 + $0x28] sm:$0xff] (!%p471_p12), %v1700_v2 }
  0x72   : > { %p443_p13 = scmp.lt.s32.totalorder %s441_s13, 3  ;;  %481 = vst [vmem:[#allocation2 + $0x30] sm:$0xff] (!%p471_p12), %v1700_v2  ;;  %482 = vst [vmem:[#allocation2 + $0x38] sm:$0xff] (!%p471_p12), %v1700_v2 }
  0x74   : > { %s2082_s13 = smov (!%p443_p13, %s441_s13), 3 }
  0x75   : > { %s1375_s14 = sshll.u32 %s2082_s13, 4 }
  0x76   : > { %s1907_s2 = scalar_lea.vmem %s2046_s4, %s1375_s14 }
  0x77 PF: > { %s483_s30 = sld [smem:[#allocation5]] }
  0x7d   : > { %p1298_p1 = scmp.ge.s32.totalorder %s1678_s15, %s483_s30 }
  0x7e   : > { %v1471_v3 = vld [vmem:[%s1895_s28 + $0x4] ss:$16 sps:$4 sm:$0xff] (!%p1298_p1)   ;;  %v1473_v4 = vld [vmem:[%s1895_s28 + $0xc] ss:$16 sps:$4 sm:$0xff] (!%p1298_p1)   ;;  %v1701_v5 = vmov (!%p1298_p1), 0  }
  0x7f   : > { %487 = sbr.rel (%p1298_p1) target bundleno = 412 (0x19c), region = 94  ;;  %1470 = vset.pattern.permute.xlu0 (!%p1298_p1), %v1701_v5  ;;  %894 = vmatprep.subr.bf16.mxu0 (!%p1298_p1), %v1471_v3  ;;  %v1475_v6 = vld [vmem:[%s1895_s28] ss:$16 sps:$4 sm:$0xff] (!%p1298_p1)   ;;  %v1476_v7 = vld [vmem:[%s1895_s28 + $0x8] ss:$16 sps:$4 sm:$0xff] (!%p1298_p1)  }
  0x80   : > { %937 = vmatprep.subr.bf16.mxu1 (!%p1298_p1), %v1473_v4  ;;  %v1477_v8 = vld [vmem:[%s1895_s28 + $0x24] ss:$16 sps:$4 sm:$0xff] (!%p1298_p1)   ;;  %895 = vmatpush1.bf16.msra.mxu0 (!%p1298_p1), %v1475_v6  ;;  %v1479_v9 = vld [vmem:[%s1895_s28 + $0x2c] ss:$16 sps:$4 sm:$0xff] (!%p1298_p1)   ;;  %v1481_v10 = vld [vmem:[%s1895_s28 + $0x20] ss:$16 sps:$4 sm:$0xff] (!%p1298_p1)  }
  0x81   : > { %938 = vmatpush1.bf16.msra.mxu1 (!%p1298_p1), %v1476_v7  ;;  %896 = vmatprep.subr.bf16.mxu0 (!%p1298_p1), %v1477_v8  ;;  %v1482_v11 = vld [vmem:[%s1895_s28 + $0x28] ss:$16 sps:$4 sm:$0xff] (!%p1298_p1)   ;;  %v1483_v12 = vld [vmem:[%s1895_s28 + $0x44] ss:$16 sps:$4 sm:$0xff] (!%p1298_p1)   ;;  %v1485_v13 = vld [vmem:[%s1895_s28 + $0x4c] ss:$16 sps:$4 sm:$0xff] (!%p1298_p1)  }
  0x82   : > { %939 = vmatprep.subr.bf16.mxu1 (!%p1298_p1), %v1479_v9  ;;  %v1487_v14 = vld [vmem:[%s1895_s28 + $0x40] ss:$16 sps:$4 sm:$0xff] (!%p1298_p1)   ;;  %v1488_v15 = vld [vmem:[%s1895_s28 + $0x48] ss:$16 sps:$4 sm:$0xff] (!%p1298_p1)   ;;  %v1489_v16 = vld [vmem:[%s1895_s28 + $0x64] ss:$16 sps:$4 sm:$0xff] (!%p1298_p1)  }
  0x83   : > { %v1491_v17 = vld [vmem:[%s1895_s28 + $0x6c] ss:$16 sps:$4 sm:$0xff] (!%p1298_p1)   ;;  %v1493_v18 = vld [vmem:[%s1895_s28 + $0x60] ss:$16 sps:$4 sm:$0xff] (!%p1298_p1)   ;;  %v1494_v19 = vld [vmem:[%s1895_s28 + $0x68] ss:$16 sps:$4 sm:$0xff] (!%p1298_p1)  }
  0x84   : > { %897 = vmatpush1.bf16.msra.mxu0 (!%p1298_p1), %v1481_v10  ;;  %v1495_v20 = vld [vmem:[%s1895_s28 + $0x84] ss:$16 sps:$4 sm:$0xff] (!%p1298_p1)   ;;  %v1497_v21 = vld [vmem:[%s1895_s28 + $0x8c] ss:$16 sps:$4 sm:$0xff] (!%p1298_p1)   ;;  %v1499_v22 = vld [vmem:[%s1895_s28 + $0x80] ss:$16 sps:$4 sm:$0xff] (!%p1298_p1)  }
  0x85   : > { %940 = vmatpush1.bf16.msra.mxu1 (!%p1298_p1), %v1482_v11  ;;  %898 = vmatprep.subr.bf16.mxu0 (!%p1298_p1), %v1483_v12  ;;  %v1500_v23 = vld [vmem:[%s1895_s28 + $0x88] ss:$16 sps:$4 sm:$0xff] (!%p1298_p1)   ;;  %v1501_v24 = vld [vmem:[%s1895_s28 + $0xa4] ss:$16 sps:$4 sm:$0xff] (!%p1298_p1)   ;;  %v1503_v25 = vld [vmem:[%s1895_s28 + $0xac] ss:$16 sps:$4 sm:$0xff] (!%p1298_p1)  }
  0x86   : > { %941 = vmatprep.subr.bf16.mxu1 %v1485_v13  ;;  %v1505_v26 = vld [vmem:[%s1895_s28 + $0xa0] ss:$16 sps:$4 sm:$0xff]   ;;  %v1506_v27 = vld [vmem:[%s1895_s28 + $0xa8] ss:$16 sps:$4 sm:$0xff]   ;;  %v1507_v28 = vld [vmem:[%s1895_s28 + $0xc4] ss:$16 sps:$4 sm:$0xff]  }
  0x87   : > { %v1509_v29 = vld [vmem:[%s1895_s28 + $0xcc] ss:$16 sps:$4 sm:$0xff]   ;;  %v1511_v30 = vld [vmem:[%s1895_s28 + $0xc0] ss:$16 sps:$4 sm:$0xff]   ;;  %v1512_v31 = vld [vmem:[%s1895_s28 + $0xc8] ss:$16 sps:$4 sm:$0xff]  }
  0x88   : > { %899 = vmatpush1.bf16.msra.mxu0 %v1487_v14  ;;  %v1513_v32 = vld [vmem:[%s1895_s28 + $0xe4] ss:$16 sps:$4 sm:$0xff]   ;;  %v1515_v33 = vld [vmem:[%s1895_s28 + $0xec] ss:$16 sps:$4 sm:$0xff]   ;;  %v1517_v34 = vld [vmem:[%s1895_s28 + $0xe0] ss:$16 sps:$4 sm:$0xff]  }
  0x89   : > { %942 = vmatpush1.bf16.msra.mxu1 %v1488_v15  ;;  %900 = vmatprep.subr.bf16.mxu0 %v1489_v16  ;;  %v1518_v35 = vld [vmem:[%s1895_s28 + $0xe8] ss:$16 sps:$4 sm:$0xff]   ;;  %v1519_v36 = vld [vmem:[%s1895_s28 + $0x104] ss:$16 sps:$4 sm:$0xff]   ;;  %v1521_v37 = vld [vmem:[%s1895_s28 + $0x10c] ss:$16 sps:$4 sm:$0xff]  }
  0x8a   : > { %943 = vmatprep.subr.bf16.mxu1 %v1491_v17  ;;  %v1523_v38 = vld [vmem:[%s1895_s28 + $0x100] ss:$16 sps:$4 sm:$0xff]   ;;  %v1524_v39 = vld [vmem:[%s1895_s28 + $0x108] ss:$16 sps:$4 sm:$0xff]   ;;  %v1525_v40 = vld [vmem:[%s1895_s28 + $0x124] ss:$16 sps:$4 sm:$0xff]  }
  0x8b   : > { %v1527_v41 = vld [vmem:[%s1895_s28 + $0x12c] ss:$16 sps:$4 sm:$0xff]   ;;  %v1529_v42 = vld [vmem:[%s1895_s28 + $0x120] ss:$16 sps:$4 sm:$0xff]   ;;  %v1530_v43 = vld [vmem:[%s1895_s28 + $0x128] ss:$16 sps:$4 sm:$0xff]  }
  0x8c   : > { %901 = vmatpush1.bf16.msra.mxu0 %v1493_v18  ;;  %v1531_v44 = vld [vmem:[%s1895_s28 + $0x144] ss:$16 sps:$4 sm:$0xff]   ;;  %v1533_v45 = vld [vmem:[%s1895_s28 + $0x14c] ss:$16 sps:$4 sm:$0xff]   ;;  %v1535_v46 = vld [vmem:[%s1895_s28 + $0x140] ss:$16 sps:$4 sm:$0xff]  }
  0x8d   : > { %944 = vmatpush1.bf16.msra.mxu1 %v1494_v19  ;;  %902 = vmatprep.subr.bf16.mxu0 %v1495_v20  ;;  %v1536_v47 = vld [vmem:[%s1895_s28 + $0x148] ss:$16 sps:$4 sm:$0xff]   ;;  %v1537_v48 = vld [vmem:[%s1895_s28 + $0x164] ss:$16 sps:$4 sm:$0xff]   ;;  %v1539_v49 = vld [vmem:[%s1895_s28 + $0x16c] ss:$16 sps:$4 sm:$0xff]  }
  0x8e   : > { %945 = vmatprep.subr.bf16.mxu1 %v1497_v21  ;;  %v1569_v50 = vld [vmem:[%s373_s0 + $0x4] ss:$8 sps:$4 sm:$0xff]   ;;  %v1541_v51 = vld [vmem:[%s1895_s28 + $0x160] ss:$16 sps:$4 sm:$0xff]   ;;  %v1542_v52 = vld [vmem:[%s1895_s28 + $0x168] ss:$16 sps:$4 sm:$0xff]  }
  0x8f   : > { %v496_v53 = vld [vmem:[%s1907_s2] sm:$0xff]  ;;  %v1545_v55 = vld [vmem:[%s1895_s28 + $0x18c] ss:$16 sps:$4 sm:$0xff]   ;;  %926 = vmatprep.mubr.bf16.mxu0 %v1569_v50  ;;  %969 = vmatprep.mubr.bf16.mxu1 %v1569_v50  ;;  %v1548_v57 = vld [vmem:[%s1895_s28 + $0x188] ss:$16 sps:$4 sm:$0xff]  }
  0x90   : > { %903 = vmatpush1.bf16.msra.mxu0 %v1499_v22  ;;  %v1543_v54 = vld [vmem:[%s1895_s28 + $0x184] ss:$16 sps:$4 sm:$0xff]   ;;  %982 = vperm.xlu0 %1470, %v496_v53   ;;  %v1547_v56 = vld [vmem:[%s1895_s28 + $0x180] ss:$16 sps:$4 sm:$0xff]   ;;  %v497_v58 = vld [vmem:[%s1907_s2 + $0x8] sm:$0xff] }
  0x91   : > { %946 = vmatpush1.bf16.msra.mxu1 %v1500_v23  ;;  %904 = vmatprep.subr.bf16.mxu0 %v1501_v24  ;;  %v1549_v59 = vld [vmem:[%s1895_s28 + $0x1a4] ss:$16 sps:$4 sm:$0xff]   ;;  %v1551_v60 = vld [vmem:[%s1895_s28 + $0x1ac] ss:$16 sps:$4 sm:$0xff]   ;;  %v1553_v61 = vld [vmem:[%s1895_s28 + $0x1a0] ss:$16 sps:$4 sm:$0xff]  }
  0x92   : > { %947 = vmatprep.subr.bf16.mxu1 %v1503_v25  ;;  %v1554_v62 = vld [vmem:[%s1895_s28 + $0x1a8] ss:$16 sps:$4 sm:$0xff]   ;;  %v1555_v63 = vld [vmem:[%s1895_s28 + $0x1c4] ss:$16 sps:$4 sm:$0xff]   ;;  %v1557_v0 = vld [vmem:[%s1895_s28 + $0x1cc] ss:$16 sps:$4 sm:$0xff]  }
  0x93   : > { %v1559_v1 = vld [vmem:[%s1895_s28 + $0x1c0] ss:$16 sps:$4 sm:$0xff]   ;;  %v1560_v2 = vld [vmem:[%s1895_s28 + $0x1c8] ss:$16 sps:$4 sm:$0xff]   ;;  %v1561_v3 = vld [vmem:[%s1895_s28 + $0x1e4] ss:$16 sps:$4 sm:$0xff]  }
  0x94   : > { %905 = vmatpush1.bf16.msra.mxu0 %v1505_v26  ;;  %987 = vperm.xlu0 %1470, %v497_v58   ;;  %v1563_v4 = vld [vmem:[%s1895_s28 + $0x1ec] ss:$16 sps:$4 sm:$0xff]   ;;  %v1565_v5 = vld [vmem:[%s1895_s28 + $0x1e0] ss:$16 sps:$4 sm:$0xff]   ;;  %v1566_v6 = vld [vmem:[%s1895_s28 + $0x1e8] ss:$16 sps:$4 sm:$0xff]  }
  0x95   : > { %948 = vmatpush1.bf16.msra.mxu1 %v1506_v27  ;;  %906 = vmatprep.subr.bf16.mxu0 %v1507_v28  ;;  %v1567_v7 = vld [vmem:[%s373_s0] ss:$8 sps:$4 sm:$0xff]  }
  0x96   : > { %949 = vmatprep.subr.bf16.mxu1 %v1509_v29  ;;  %v488_v10 = vld [vmem:[#allocation2] sm:$0xff]  ;;  %v490_v12 = vld [vmem:[#allocation2 + $0x10] sm:$0xff]  ;;  %v489_v16 = vld [vmem:[#allocation2 + $0x8] sm:$0xff] }
  0x97   : > { %v491_v18 = vld [vmem:[#allocation2 + $0x18] sm:$0xff]  ;;  %v492_v22 = vld [vmem:[#allocation2 + $0x20] sm:$0xff]  ;;  %v494_v24 = vld [vmem:[#allocation2 + $0x30] sm:$0xff] }
  0x98   : > { %907 = vmatpush1.bf16.msra.mxu0 %v1511_v30  ;;  %v493_v30 = vld [vmem:[#allocation2 + $0x28] sm:$0xff] }
  0x99   : > { %950 = vmatpush1.bf16.msra.mxu1 %v1512_v31  ;;  %908 = vmatprep.subr.bf16.mxu0 %v1513_v32  ;;  %v495_v32 = vld [vmem:[#allocation2 + $0x38] sm:$0xff] }
  0x9a   : > { %951 = vmatprep.subr.bf16.mxu1 %v1515_v33 }
  0x9c   : > { %909 = vmatpush1.bf16.msra.mxu0 %v1517_v34 }
  0x9d   : > { %952 = vmatpush1.bf16.msra.mxu1 %v1518_v35  ;;  %910 = vmatprep.subr.bf16.mxu0 %v1519_v36 }
  0x9e   : > { %953 = vmatprep.subr.bf16.mxu1 %v1521_v37 }
  0xa0   : > { %911 = vmatpush1.bf16.msra.mxu0 %v1523_v38 }
  0xa1   : > { %954 = vmatpush1.bf16.msra.mxu1 %v1524_v39  ;;  %912 = vmatprep.subr.bf16.mxu0 %v1525_v40 }
  0xa2   : > { %955 = vmatprep.subr.bf16.mxu1 %v1527_v41 }
  0xa4   : > { %913 = vmatpush1.bf16.msra.mxu0 %v1529_v42 }
  0xa5   : > { %956 = vmatpush1.bf16.msra.mxu1 %v1530_v43  ;;  %914 = vmatprep.subr.bf16.mxu0 %v1531_v44 }
  0xa6   : > { %957 = vmatprep.subr.bf16.mxu1 %v1533_v45 }
  0xa8   : > { %915 = vmatpush1.bf16.msra.mxu0 %v1535_v46 }
  0xa9   : > { %958 = vmatpush1.bf16.msra.mxu1 %v1536_v47  ;;  %916 = vmatprep.subr.bf16.mxu0 %v1537_v48 }
  0xaa   : > { %959 = vmatprep.subr.bf16.mxu1 %v1539_v49 }
  0xac   : > { %917 = vmatpush1.bf16.msra.mxu0 %v1541_v51 }
  0xad   : > { %960 = vmatpush1.bf16.msra.mxu1 %v1542_v52  ;;  %918 = vmatprep.subr.bf16.mxu0 %v1543_v54 }
  0xae   : > { %961 = vmatprep.subr.bf16.mxu1 %v1545_v55 }
  0xb0   : > { %919 = vmatpush1.bf16.msra.mxu0 %v1547_v56 }
  0xb1   : > { %962 = vmatpush1.bf16.msra.mxu1 %v1548_v57  ;;  %920 = vmatprep.subr.bf16.mxu0 %v1549_v59 }
  0xb2   : > { %963 = vmatprep.subr.bf16.mxu1 %v1551_v60 }
  0xb4   : > { %921 = vmatpush1.bf16.msra.mxu0 %v1553_v61 }
  0xb5   : > { %964 = vmatpush1.bf16.msra.mxu1 %v1554_v62  ;;  %922 = vmatprep.subr.bf16.mxu0 %v1555_v63 }
  0xb6   : > { %965 = vmatprep.subr.bf16.mxu1 %v1557_v0 }
  0xb8   : > { %923 = vmatpush1.bf16.msra.mxu0 %v1559_v1 }
  0xb9   : > { %966 = vmatpush1.bf16.msra.mxu1 %v1560_v2  ;;  %924 = vmatprep.subr.bf16.mxu0 %v1561_v3 }
  0xba   : > { %967 = vmatprep.subr.bf16.mxu1 %v1563_v4 }
  0xbc   : > { %925 = vmatpush1.bf16.msra.mxu0 %v1565_v5 }
  0xbd   : > { %968 = vmatpush1.bf16.msra.mxu1 %v1566_v6 }
  0xbf   : > { %927 = vmatmul.mubr.bf16.vlgmr.msra.gmra.mrb[0].mxu0 %v1567_v7 }
  0xc0   : > { %970 = vmatmul.mubr.bf16.vlgmr.msra.gmra.mrb[0].mxu1 %v1567_v7 }
 0x10f   : > { %v983_v8 = vpop.permute.xlu0 %982 }
 0x113   : > { %v988_v9 = vpop.permute.xlu0 %987 }
 0x192   : > { %v928_v11 = vpop.f32.mrb[0].mxu0 }
 0x193   : > { %v971_v13 = vpop.f32.mrb[0].mxu1  ;;  %v990_v14 = vmul.f32 %v983_v8, %v928_v11  ;;  %v930_v17 = vpop.f32.mrb[1].mxu0 }
 0x194   : > { %v992_v15 = vmul.f32 %v983_v8, %v971_v13  ;;  %v973_v19 = vpop.f32.mrb[1].mxu1  ;;  %v991_v20 = vmul.f32 %v983_v8, %v930_v17  ;;  %v932_v23 = vpop.f32.mrb[2].mxu0 }
 0x195   : > { %v993_v21 = vmul.f32 %v983_v8, %v973_v19  ;;  %v975_v25 = vpop.f32.mrb[2].mxu1  ;;  %v998_v26 = vadd.f32 %v990_v14, %v488_v10  ;;  %v994_v28 = vmul.f32 %v988_v9, %v932_v23  ;;  %v934_v31 = vpop.f32.mrb[3].mxu0 }
 0x196   : > { %v1000_v27 = vadd.f32 %v992_v15, %v490_v12  ;;  %v996_v29 = vmul.f32 %v988_v9, %v975_v25  ;;  %v977_v33 = vpop.f32.mrb[3].mxu1  ;;  %v999_v34 = vadd.f32 %v991_v20, %v489_v16  ;;  %v995_v36 = vmul.f32 %v988_v9, %v934_v31 }
 0x197   : > { %v1001_v35 = vadd.f32 %v993_v21, %v491_v18  ;;  %v997_v37 = vmul.f32 %v988_v9, %v977_v33  ;;  %1006 = vst [vmem:[#allocation2] sm:$0xff] %v998_v26  ;;  %v1002_v38 = vadd.f32 %v994_v28, %v492_v22 }
 0x198   : > { %1008 = vst [vmem:[#allocation2 + $0x10] sm:$0xff] %v1000_v27  ;;  %v1004_v39 = vadd.f32 %v996_v29, %v494_v24  ;;  %1007 = vst [vmem:[#allocation2 + $0x8] sm:$0xff] %v999_v34  ;;  %v1003_v40 = vadd.f32 %v995_v36, %v493_v30 }
 0x199   : > { %1009 = vst [vmem:[#allocation2 + $0x18] sm:$0xff] %v1001_v35  ;;  %v1005_v41 = vadd.f32 %v997_v37, %v495_v32  ;;  %1010 = vst [vmem:[#allocation2 + $0x20] sm:$0xff] %v1002_v38 }
 0x19a   : > { %1012 = vst [vmem:[#allocation2 + $0x30] sm:$0xff] %v1004_v39  ;;  %1011 = vst [vmem:[#allocation2 + $0x28] sm:$0xff] %v1003_v40 }
 0x19b   : > { %1013 = vst [vmem:[#allocation2 + $0x38] sm:$0xff] %v1005_v41 }
 0x19c PF: > { %p1014_p2 = scmp.eq.s32.totalorder %s1682_s16, 17  ;;  %p1015_p3 = scmp.eq.s32.totalorder %s1678_s15, 3 }
 0x19e   : > { %p1016_p4 = pnand %p1015_p3, %p1014_p2 }
 0x19f   : > { %v1030_v42 = vlaneseq (!%p1016_p4)  ;;  %v1088_v43 = vld [vmem:[%s2049_s7] sm:$0xff] (!%p1016_p4)  ;;  %v1089_v45 = vld [vmem:[%s2049_s7 + $0x8] sm:$0xff] (!%p1016_p4)  ;;  %v1090_v53 = vld [vmem:[%s2049_s7 + $0x10] sm:$0xff] (!%p1016_p4) }
 0x1a0   : > { %1019 = sbr.rel (%p1016_p4) target bundleno = 435 (0x1b3), region = 98  ;;  %v1020_v46 = vld [vmem:[#allocation2] sm:$0xff] (!%p1016_p4)  ;;  %v1092_v49 = vunpack.c.l.bf16 (!%p1016_p4), %v1088_v43  ;;  %v1093_v50 = vunpack.c.h.bf16 (!%p1016_p4), %v1088_v43  ;;  %v1094_v51 = vunpack.c.l.bf16 (!%p1016_p4), %v1089_v45  ;;  %v1095_v52 = vunpack.c.h.bf16 (!%p1016_p4), %v1089_v45  ;;  %v1021_v54 = vld [vmem:[#allocation2 + $0x8] sm:$0xff] (!%p1016_p4)  ;;  %v1091_v59 = vld [vmem:[%s2049_s7 + $0x18] sm:$0xff] (!%p1016_p4) }
 0x1a1   : > { %v1031_v44 = vshrl.u32 (!%p1016_p4), %v1030_v42, 7  ;;  %v1028_v47 = vld [vmem:[%s2047_s5] sm:$0xf] (!%p1016_p4)  ;;  %v1022_v60 = vld [vmem:[#allocation2 + $0x10] sm:$0xff] (!%p1016_p4)  ;;  %v1025_v62 = vld [vmem:[#allocation2 + $0x28] sm:$0xff] (!%p1016_p4)  ;;  %v1096_v63 = vunpack.c.l.bf16 (!%p1016_p4), %v1090_v53  ;;  %v1097_v0 = vunpack.c.h.bf16 (!%p1016_p4), %v1090_v53  ;;  %v1098_v1 = vunpack.c.l.bf16 (!%p1016_p4), %v1091_v59 }
 0x1a2   : > { %v1058_v48 = vld [vmem:[%s2048_s6] sm:$0xf] (!%p1016_p4)  ;;  %v1099_v2 = vunpack.c.h.bf16 (!%p1016_p4), %v1091_v59  ;;  %v1023_v7 = vld [vmem:[#allocation2 + $0x18] sm:$0xff] (!%p1016_p4)  ;;  %v1026_v8 = vld [vmem:[#allocation2 + $0x30] sm:$0xff] (!%p1016_p4) }
 0x1a3   : > { %v1032_v55 = vsub.s32 (!%p1016_p4), 0, %v1031_v44  ;;  %v1036_v56 = vsub.s32 (!%p1016_p4), 1, %v1031_v44  ;;  %v1040_v57 = vsub.s32 (!%p1016_p4), 2, %v1031_v44  ;;  %v1044_v58 = vsub.s32 (!%p1016_p4), 3, %v1031_v44  ;;  %v1024_v61 = vld [vmem:[#allocation2 + $0x20] sm:$0xff] (!%p1016_p4)  ;;  %v1027_v9 = vld [vmem:[#allocation2 + $0x38] sm:$0xff] (!%p1016_p4) }
 0x1a5   : > { %v1033_v3 = vrot.slane (!%p1016_p4), %v1028_v47, %v1032_v55  ;;  %v1037_v4 = vrot.slane (!%p1016_p4), %v1028_v47, %v1036_v56  ;;  %v1063_v5 = vrot.slane (!%p1016_p4), %v1058_v48, %v1032_v55  ;;  %v1067_v6 = vrot.slane (!%p1016_p4), %v1058_v48, %v1036_v56 }
 0x1a6   : > { %v1041_v10 = vrot.slane (!%p1016_p4), %v1028_v47, %v1040_v57  ;;  %v1045_v11 = vrot.slane (!%p1016_p4), %v1028_v47, %v1044_v58  ;;  %v1071_v12 = vrot.slane (!%p1016_p4), %v1058_v48, %v1040_v57  ;;  %v1075_v13 = vrot.slane (!%p1016_p4), %v1058_v48, %v1044_v58 }
 0x1a7   : > { %v1050_v14 = vmul.f32 %v1033_v3, %v1020_v46  ;;  %v1051_v15 = vmul.f32 %v1037_v4, %v1021_v54  ;;  %v1054_v16 = vmul.f32 %v1033_v3, %v1024_v61  ;;  %v1055_v17 = vmul.f32 %v1037_v4, %v1025_v62 }
 0x1a8   : > { %v1052_v18 = vmul.f32 %v1041_v10, %v1022_v60  ;;  %v1053_v19 = vmul.f32 %v1045_v11, %v1023_v7  ;;  %v1056_v20 = vmul.f32 %v1041_v10, %v1026_v8  ;;  %v1057_v21 = vmul.f32 %v1045_v11, %v1027_v9 }
 0x1a9   : > { %v1080_v22 = vadd.f32 %v1063_v5, %v1050_v14  ;;  %v1081_v23 = vadd.f32 %v1067_v6, %v1051_v15  ;;  %v1084_v24 = vadd.f32 %v1063_v5, %v1054_v16  ;;  %v1085_v25 = vadd.f32 %v1067_v6, %v1055_v17 }
 0x1aa   : > { %v1082_v26 = vadd.f32 %v1071_v12, %v1052_v18  ;;  %v1083_v27 = vadd.f32 %v1075_v13, %v1053_v19  ;;  %v1086_v28 = vadd.f32 %v1071_v12, %v1056_v20  ;;  %v1087_v29 = vadd.f32 %v1075_v13, %v1057_v21 }
 0x1ab   : > { %v1100_v30 = vadd.f32 %v1092_v49, %v1080_v22  ;;  %v1101_v31 = vadd.f32 %v1093_v50, %v1081_v23  ;;  %v1104_v32 = vadd.f32 %v1096_v63, %v1084_v24  ;;  %v1105_v33 = vadd.f32 %v1097_v0, %v1085_v25 }
 0x1ac   : > { %v1102_v34 = vadd.f32 %v1094_v51, %v1082_v26  ;;  %v1103_v35 = vadd.f32 %v1095_v52, %v1083_v27  ;;  %v1106_v36 = vadd.f32 %v1098_v1, %v1086_v28  ;;  %v1107_v37 = vadd.f32 %v1099_v2, %v1087_v29 }
 0x1ad   : > { %v1108_v38 = vmax.f32 %v1100_v30, 0.0  ;;  %v1109_v39 = vmax.f32 %v1101_v31, 0.0  ;;  %v1112_v40 = vmax.f32 %v1104_v32, 0.0  ;;  %v1113_v41 = vmax.f32 %v1105_v33, 0.0 }
 0x1ae   : > { %v1110_v42 = vmax.f32 %v1102_v34, 0.0  ;;  %v1111_v43 = vmax.f32 %v1103_v35, 0.0  ;;  %v1114_v44 = vmax.f32 %v1106_v36, 0.0  ;;  %v1115_v45 = vmax.f32 %v1107_v37, 0.0 }
 0x1af   : > { %v1376_v46 = vpack.c.bf16 %v1109_v39, %v1108_v38  ;;  %v1378_v47 = vpack.c.bf16 %v1113_v41, %v1112_v40 }
 0x1b0   : > { %v1377_v48 = vpack.c.bf16 %v1111_v43, %v1110_v42  ;;  %v1379_v53 = vpack.c.bf16 %v1115_v45, %v1114_v44 }
 0x1b1   : > { %1140 = vst [vmem:[%s2050_s8] sm:$0xff] %v1376_v46  ;;  %1142 = vst [vmem:[%s2050_s8 + $0x10] sm:$0xff] %v1378_v47 }
 0x1b2   : > { %1141 = vst [vmem:[%s2050_s8 + $0x8] sm:$0xff] %v1377_v48  ;;  %1143 = vst [vmem:[%s2050_s8 + $0x18] sm:$0xff] %v1379_v53 }
 0x1b3 PF: > { %s28_s19 = sadd.s32 1, %s1694_s19   ;;  %s2065_s13 = sld [smem:[#allocation12_spill]] }
 0x1b4   : > { %p25_p5 = scmp.ge.s32.totalorder %s28_s19, 74   ;;  %s2066_s14 = sld [smem:[#allocation16_spill]] }
 0x1b5   : > { %s2067_s15 = sld [smem:[#allocation13_spill]]  ;;  %s2068_s17 = sld [smem:[#allocation14_spill]] }
 0x1b6   : > { %s2069_s9 = sld [smem:[#allocation15_spill]]  ;;  %s2070_s0 = smov %s1662_s12 }
 0x1b7   : > { %s2071_s12 = smov %s1666_s1  ;;  %s2072_s1 = smov %s1840_s20 }
 0x1b8   : > { %s2073_s16 = smov %s1690_s18  ;;  %27 = sbr.rel (!%p25_p5) target bundleno = 22 (0x16), region = 148 }
 0x1bc   : > { %s2074_s18 = smov %s2069_s9 }
 0x1bf   :  { %1168 = vsyncpa [#allocation8], 1 }
 0x1c0   :  { %1170 = vsyncpa [#allocation8 + $0x1], 1 }

</bundles_post_ra>
